<compile_context>
chip_gen: v5e
topology: v5e:2x2
jax: 0.10.0
libtpu: 0.0.40
codegen_flags: <defaults>
</compile_context>

<pallas_src>
import functools

import numpy as np
import jax
import jax.numpy as jnp
from jax.experimental import pallas as pl
from jax.experimental.pallas import tpu as pltpu

# ---------------------------------------------------------------------------
# Layout constants for the phase-decomposed, flattened activation layout.
#   Activations live as 2-D [rows = b*49 + u*7 + v, cols = channels] arrays,
#   where (u, v) is a 7x7 "full grid" per batch (extra rows hold garbage that
#   never reaches a valid output).
# ---------------------------------------------------------------------------
G1 = 7                                   # full-grid side (28 / 4)
RPB = G1 * G1                            # rows per batch image (49)
OFF1 = (0, 1, 7, 8)                      # stage-1 shift offsets  a*7 + c, a,c in {0,1}
OFF2 = (0, 1, 2, 7, 8, 9, 14, 15, 16)    # stage-2 shift offsets  a*7 + c, a,c in {0,1,2}


# ------------------------------ Pallas kernel -------------------------------

def _lenet_kernel(xq_ref, w1_ref, b1_ref, w2_ref, b2_ref,
                  wf1_ref, bf1_ref, wf2_ref, bf2_ref, wf3_ref, bf3_ref,
                  out_ref,
                  p1_scr, p2_scr, bank1, bank2, bankfc, *, batch):
    f32 = jnp.float32
    bf16 = jnp.bfloat16
    M = batch * RPB                       # 98 for B=2

    # Zero-init scratches whose padding rows / columns are read (keeps garbage finite).
    p1_scr[...] = jnp.zeros(p1_scr.shape, f32)
    p2_scr[...] = jnp.zeros(p2_scr.shape, f32)
    bank2[...] = jnp.zeros(bank2.shape, bf16)

    # ---- Stage 1: conv1 (1->6, 5x5, valid) + ReLU + 2x2 maxpool -------------
    # bank1[:, 16t + plane] = xq[row + OFF1[t], plane]   (in-VMEM im2col)
    for t, off in enumerate(OFF1):
        bank1[:, 16 * t:16 * t + 16] = xq_ref[off:off + M, :].astype(bf16)
    bk1 = bank1[...]
    b1 = b1_ref[...]
    for g in range(4):                    # g = pool1-output sub-phase (r2, s2)
        acc = None
        for j in range(4):                # j = pre-pool phase (p', q') -> max-reduced
            c = jnp.dot(bk1, w1_ref[4 * g + j], preferred_element_type=f32)  # [M, 6]
            acc = c if acc is None else jnp.maximum(acc, c)
        p1_scr[0:M, 6 * g:6 * g + 6] = jnp.maximum(acc + b1, 0.0)

    # ---- Stage 2: conv2 (6->16, 5x5, valid) + ReLU + 2x2 maxpool ------------
    # bank2 column blocks (32 wide, 24 used) = shifted copies of the 4 p1 phase planes.
    for t, off in enumerate(OFF2):
        bank2[:, 32 * t:32 * t + 24] = p1_scr[off:off + M, :].astype(bf16)
    bk2 = bank2[...]
    b2 = b2_ref[...]
    acc = None
    for j in range(4):                    # pre-pool phase -> max-reduced
        c = jnp.dot(bk2, w2_ref[j], preferred_element_type=f32)              # [M, 16]
        acc = c if acc is None else jnp.maximum(acc, c)
    p2_scr[0:M, :] = jnp.maximum(acc + b2, 0.0)

    # ---- FC stack: fc1(+ReLU), fc2(+ReLU), fc3 ------------------------------
    # fc1 gathers the 16 valid spatial positions per image via shifted slices; the
    # flatten (NCHW order) is folded into the fc1 weight permutation done outside.
    for p in range(16):
        u = (p // 4) * G1 + (p % 4)
        bankfc[:, 16 * p:16 * p + 16] = p2_scr[u:u + M, :].astype(bf16)
    h = jnp.dot(bankfc[...], wf1_ref[...], preferred_element_type=f32)       # [M, 120]
    h = jnp.maximum(h + bf1_ref[...], 0.0)
    h = jnp.dot(h.astype(bf16), wf2_ref[...], preferred_element_type=f32)    # [M, 84]
    h = jnp.maximum(h + bf2_ref[...], 0.0)
    y = jnp.dot(h.astype(bf16), wf3_ref[...], preferred_element_type=f32)    # [M, 10]
    y = y + bf3_ref[...]
    # Valid logits live at row b*49 of the full-grid slab.
    for b in range(batch):
        out_ref[b:b + 1, :] = y[RPB * b:RPB * b + 1, :]


# --------------------- weight / selector packing (boundary) -----------------

def _build_selectors():
    """0/1 selection tensors mapping conv taps onto the in-kernel bank layout."""
    S1 = np.zeros((16, 64, 25), np.float32)
    for g in range(4):                    # g = 2*r2 + s2 (pool1 output sub-phase)
        r2, s2 = divmod(g, 2)
        for j in range(4):                # j = 2*p' + q' (pre-pool phase)
            pp, qq = divmod(j, 2)
            for ki in range(5):
                a, r4 = divmod(2 * r2 + pp + ki, 4)
                for kj in range(5):
                    c, s4 = divmod(2 * s2 + qq + kj, 4)
                    t = OFF1.index(a * 7 + c)
                    S1[4 * g + j, 16 * t + 4 * r4 + s4, 5 * ki + kj] = 1.0

    S2 = np.zeros((4, 288, 150), np.float32)
    for j in range(4):                    # j = 2*p' + q' (pre-pool phase)
        pp, qq = divmod(j, 2)
        for ci in range(6):
            for ki in range(5):
                a, r2 = divmod(pp + ki, 2)
                for kj in range(5):
                    c, s2 = divmod(qq + kj, 2)
                    t = OFF2.index(a * 7 + c)
                    g = 2 * r2 + s2
                    S2[j, 32 * t + 6 * g + ci, 6 * (5 * ki + kj) + ci] = 1.0
    return S1, S2


def pack_params(params):
    """One-time repack of PyTorch-layout weights into the kernel's bank layout (bf16)."""
    S1, S2 = _build_selectors()
    w1m = params["conv1_w"].reshape(6, 25).T                                # [25, 6]
    w1big = jnp.einsum("gok,kc->goc", jnp.asarray(S1), w1m).astype(jnp.bfloat16)   # [16,64,6]
    w2m = params["conv2_w"].transpose(2, 3, 1, 0).reshape(150, 16)          # [(ki,kj,ci),co]
    w2big = jnp.einsum("pok,kc->poc", jnp.asarray(S2), w2m).astype(jnp.bfloat16)   # [4,288,16]
    # fc1: permute columns so the NCHW flatten order matches the (position, channel) bank.
    wf1 = params["fc1_w"].T.reshape(16, 16, 120).transpose(1, 0, 2).reshape(256, 120)
    return {
        "w1big": w1big,
        "b1": params["conv1_b"].reshape(1, 6).astype(jnp.float32),
        "w2big": w2big,
        "b2": params["conv2_b"].reshape(1, 16).astype(jnp.float32),
        "wf1": wf1.astype(jnp.bfloat16),
        "bf1": params["fc1_b"].reshape(1, 120).astype(jnp.float32),
        "wf2": params["fc2_w"].T.astype(jnp.bfloat16),
        "bf2": params["fc2_b"].reshape(1, 84).astype(jnp.float32),
        "wf3": params["fc3_w"].T.astype(jnp.bfloat16),
        "bf3": params["fc3_b"].reshape(1, 10).astype(jnp.float32),
    }


# ------------------------------ forward pass --------------------------------

def _lenet_forward(packed, x):
    B = x.shape[0]
    M = B * RPB

    # Input repack (model boundary): mod-4 phase decomposition of the 28x28 image,
    # flattened to [B*49, 16] with columns = (r4, s4) phase planes.
    xs = x.reshape(B, 28, 28).reshape(B, 7, 4, 7, 4)
    xs = xs.transpose(0, 1, 3, 2, 4).reshape(M, 16)
    xq = jnp.pad(xs, ((0, max(OFF1)), (0, 0))).astype(jnp.float32)          # [M+8, 16]

    def vspec(shape):
        n = len(shape)
        return pl.BlockSpec(shape, lambda *_: (0,) * n)

    operands = (xq, packed["w1big"], packed["b1"], packed["w2big"], packed["b2"],
                packed["wf1"], packed["bf1"], packed["wf2"], packed["bf2"],
                packed["wf3"], packed["bf3"])

    return pl.pallas_call(
        functools.partial(_lenet_kernel, batch=B),
        out_shape=jax.ShapeDtypeStruct((B, 10), jnp.float32),
        in_specs=[vspec(a.shape) for a in operands],
        out_specs=vspec((B, 10)),
        scratch_shapes=[
            pltpu.VMEM((M + 16, 24), jnp.float32),     # pool1 output (4 phase planes x 6 ch)
            pltpu.VMEM((M + 24, 16), jnp.float32),     # pool2 output (16 ch)
            pltpu.VMEM((M, 64), jnp.bfloat16),         # conv1 im2col bank
            pltpu.VMEM((M, 288), jnp.bfloat16),        # conv2 im2col bank
            pltpu.VMEM((M, 256), jnp.bfloat16),        # fc1 gather bank
        ],
    )(*operands)


lenet_forward = jax.jit(_lenet_forward)


def init_params(key):
    ks = jax.random.split(key, 10)
    s = 0.1
    return {
        "conv1_w": s * jax.random.normal(ks[0], (6, 1, 5, 5), jnp.float32),
        "conv1_b": s * jax.random.normal(ks[1], (6,), jnp.float32),
        "conv2_w": s * jax.random.normal(ks[2], (16, 6, 5, 5), jnp.float32),
        "conv2_b": s * jax.random.normal(ks[3], (16,), jnp.float32),
        "fc1_w": s * jax.random.normal(ks[4], (120, 16 * 4 * 4), jnp.float32),
        "fc1_b": s * jax.random.normal(ks[5], (120,), jnp.float32),
        "fc2_w": s * jax.random.normal(ks[6], (84, 120), jnp.float32),
        "fc2_b": s * jax.random.normal(ks[7], (84,), jnp.float32),
        "fc3_w": s * jax.random.normal(ks[8], (10, 84), jnp.float32),
        "fc3_b": s * jax.random.normal(ks[9], (10,), jnp.float32),
    }


# --------------------------- pure-JAX reference ------------------------------

def lenet_reference(params, x):
    dn = ("NCHW", "OIHW", "NCHW")

    def conv(x, w, b):
        y = jax.lax.conv_general_dilated(x, w, (1, 1), "VALID", dimension_numbers=dn)
        return y + b.reshape(1, -1, 1, 1)

    def pool(x):
        return jax.lax.reduce_window(x, -jnp.inf, jax.lax.max,
                                     (1, 1, 2, 2), (1, 1, 2, 2), "VALID")

    x = pool(jax.nn.relu(conv(x, params["conv1_w"], params["conv1_b"])))
    x = pool(jax.nn.relu(conv(x, params["conv2_w"], params["conv2_b"])))
    x = x.reshape(x.shape[0], -1)
    x = jax.nn.relu(x @ params["fc1_w"].T + params["fc1_b"])
    x = jax.nn.relu(x @ params["fc2_w"].T + params["fc2_b"])
    return x @ params["fc3_w"].T + params["fc3_b"]


if __name__ == "__main__":
    key = jax.random.PRNGKey(0)
    pkey, xkey = jax.random.split(key)
    params = init_params(pkey)

    # LeNet's fc1 (16*4*4) fixes the input to 1 channel, 28x28.
    x = jax.random.normal(xkey, (2, 1, 28, 28), jnp.float32)

    packed = pack_params(params)
    out = jax.block_until_ready(lenet_forward(packed, x))
    assert out.shape == (2, 10), out.shape

    ref = jax.block_until_ready(lenet_reference(params, x))
    # bf16 MXU operands with f32 accumulation: comfortably within 2e-2 of the f32 reference.
    assert jnp.allclose(out, ref, atol=2e-2, rtol=2e-2), (out, ref)

    print("KERNEL_OK")
</pallas_src>

<mosaic_0001>
module attributes {stable_mosaic.version = 11 : i64} {
  func.func @_lenet_kernel(%arg0: memref<106x16xf32, #tpu.memory_space<vmem>>, %arg1: memref<16x64x6xbf16, #tpu.memory_space<vmem>>, %arg2: memref<1x6xf32, #tpu.memory_space<vmem>>, %arg3: memref<4x288x16xbf16, #tpu.memory_space<vmem>>, %arg4: memref<1x16xf32, #tpu.memory_space<vmem>>, %arg5: memref<256x120xbf16, #tpu.memory_space<vmem>>, %arg6: memref<1x120xf32, #tpu.memory_space<vmem>>, %arg7: memref<120x84xbf16, #tpu.memory_space<vmem>>, %arg8: memref<1x84xf32, #tpu.memory_space<vmem>>, %arg9: memref<84x10xbf16, #tpu.memory_space<vmem>>, %arg10: memref<1x10xf32, #tpu.memory_space<vmem>>, %arg11: memref<2x10xf32, #tpu.memory_space<vmem>>, %arg12: memref<114x24xf32, #tpu.memory_space<vmem>>, %arg13: memref<122x16xf32, #tpu.memory_space<vmem>>, %arg14: memref<98x64xbf16, #tpu.memory_space<vmem>>, %arg15: memref<98x288xbf16, #tpu.memory_space<vmem>>, %arg16: memref<98x256xbf16, #tpu.memory_space<vmem>>) attributes {dimension_semantics = [], scalar_prefetch = 0 : i64, scratch_operands = 5 : i64, tpu.core_type = #tpu.core_type<tc>} {
    %cst = arith.constant 0.000000e+00 : f32
    %0 = vector.broadcast %cst : f32 to vector<114x24xf32>
    %c0 = arith.constant 0 : index
    %c0_0 = arith.constant 0 : index
    %1 = vector.load %arg12[%c0, %c0_0] : memref<114x24xf32, #tpu.memory_space<vmem>>, vector<114x24xf32>
    tpu.vector_store %arg12[%c0, %c0_0], %0 {strides = array<i32>} : memref<114x24xf32, #tpu.memory_space<vmem>>, vector<114x24xf32>,
    %cst_1 = arith.constant 0.000000e+00 : f32
    %2 = vector.broadcast %cst_1 : f32 to vector<122x16xf32>
    %c0_2 = arith.constant 0 : index
    %c0_3 = arith.constant 0 : index
    %3 = vector.load %arg13[%c0_2, %c0_3] : memref<122x16xf32, #tpu.memory_space<vmem>>, vector<122x16xf32>
    tpu.vector_store %arg13[%c0_2, %c0_3], %2 {strides = array<i32>} : memref<122x16xf32, #tpu.memory_space<vmem>>, vector<122x16xf32>,
    %cst_4 = arith.constant 0.000000e+00 : bf16
    %4 = vector.broadcast %cst_4 : bf16 to vector<98x288xbf16>
    %c0_5 = arith.constant 0 : index
    %c0_6 = arith.constant 0 : index
    %5 = vector.load %arg15[%c0_5, %c0_6] : memref<98x288xbf16, #tpu.memory_space<vmem>>, vector<98x288xbf16>
    tpu.vector_store %arg15[%c0_5, %c0_6], %4 {strides = array<i32>} : memref<98x288xbf16, #tpu.memory_space<vmem>>, vector<98x288xbf16>,
    %c0_7 = arith.constant 0 : index
    %c0_8 = arith.constant 0 : index
    %6 = vector.load %arg0[%c0_7, %c0_8] : memref<106x16xf32, #tpu.memory_space<vmem>>, vector<98x16xf32>
    %7 = arith.truncf %6 : vector<98x16xf32> to vector<98x16xbf16>
    %c0_9 = arith.constant 0 : index
    %c0_10 = arith.constant 0 : index
    %8 = vector.load %arg14[%c0_9, %c0_10] : memref<98x64xbf16, #tpu.memory_space<vmem>>, vector<98x16xbf16>
    tpu.vector_store %arg14[%c0_9, %c0_10], %7 {strides = array<i32>} : memref<98x64xbf16, #tpu.memory_space<vmem>>, vector<98x16xbf16>,
    %c1 = arith.constant 1 : index
    %c0_11 = arith.constant 0 : index
    %9 = vector.load %arg0[%c1, %c0_11] : memref<106x16xf32, #tpu.memory_space<vmem>>, vector<98x16xf32>
    %10 = arith.truncf %9 : vector<98x16xf32> to vector<98x16xbf16>
    %c0_12 = arith.constant 0 : index
    %c16 = arith.constant 16 : index
    %11 = vector.load %arg14[%c0_12, %c16] : memref<98x64xbf16, #tpu.memory_space<vmem>>, vector<98x16xbf16>
    tpu.vector_store %arg14[%c0_12, %c16], %10 {strides = array<i32>} : memref<98x64xbf16, #tpu.memory_space<vmem>>, vector<98x16xbf16>,
    %c7 = arith.constant 7 : index
    %c0_13 = arith.constant 0 : index
    %12 = vector.load %arg0[%c7, %c0_13] : memref<106x16xf32, #tpu.memory_space<vmem>>, vector<98x16xf32>
    %13 = arith.truncf %12 : vector<98x16xf32> to vector<98x16xbf16>
    %c0_14 = arith.constant 0 : index
    %c32 = arith.constant 32 : index
    %14 = vector.load %arg14[%c0_14, %c32] : memref<98x64xbf16, #tpu.memory_space<vmem>>, vector<98x16xbf16>
    tpu.vector_store %arg14[%c0_14, %c32], %13 {strides = array<i32>} : memref<98x64xbf16, #tpu.memory_space<vmem>>, vector<98x16xbf16>,
    %c8 = arith.constant 8 : index
    %c0_15 = arith.constant 0 : index
    %15 = vector.load %arg0[%c8, %c0_15] : memref<106x16xf32, #tpu.memory_space<vmem>>, vector<98x16xf32>
    %16 = arith.truncf %15 : vector<98x16xf32> to vector<98x16xbf16>
    %c0_16 = arith.constant 0 : index
    %c48 = arith.constant 48 : index
    %17 = vector.load %arg14[%c0_16, %c48] : memref<98x64xbf16, #tpu.memory_space<vmem>>, vector<98x16xbf16>
    tpu.vector_store %arg14[%c0_16, %c48], %16 {strides = array<i32>} : memref<98x64xbf16, #tpu.memory_space<vmem>>, vector<98x16xbf16>,
    %c0_17 = arith.constant 0 : index
    %c0_18 = arith.constant 0 : index
    %18 = vector.load %arg14[%c0_17, %c0_18] : memref<98x64xbf16, #tpu.memory_space<vmem>>, vector<98x64xbf16>
    %c0_19 = arith.constant 0 : index
    %c0_20 = arith.constant 0 : index
    %19 = vector.load %arg2[%c0_19, %c0_20] : memref<1x6xf32, #tpu.memory_space<vmem>>, vector<1x6xf32>
    %c0_21 = arith.constant 0 : index
    %c0_22 = arith.constant 0 : index
    %c0_23 = arith.constant 0 : index
    %20 = vector.load %arg1[%c0_21, %c0_22, %c0_23] : memref<16x64x6xbf16, #tpu.memory_space<vmem>>, vector<1x64x6xbf16>
    %21 = vector.shape_cast %20 : vector<1x64x6xbf16> to vector<64x6xbf16>
    %cst_24 = arith.constant dense<0.000000e+00> : vector<98x6xf32>
    %22 = tpu.matmul %18, %21, %cst_24 {dimension_numbers = #tpu.dot_dimension_numbers<[1], [0], [0], [1], [0, 0, 1, 1], [], []>} : vector<98x64xbf16>, vector<64x6xbf16>, vector<98x6xf32> -> vector<98x6xf32>
    %c1_25 = arith.constant 1 : index
    %c0_26 = arith.constant 0 : index
    %c0_27 = arith.constant 0 : index
    %23 = vector.load %arg1[%c1_25, %c0_26, %c0_27] : memref<16x64x6xbf16, #tpu.memory_space<vmem>>, vector<1x64x6xbf16>
    %24 = vector.shape_cast %23 : vector<1x64x6xbf16> to vector<64x6xbf16>
    %cst_28 = arith.constant dense<0.000000e+00> : vector<98x6xf32>
    %25 = tpu.matmul %18, %24, %cst_28 {dimension_numbers = #tpu.dot_dimension_numbers<[1], [0], [0], [1], [0, 0, 1, 1], [], []>} : vector<98x64xbf16>, vector<64x6xbf16>, vector<98x6xf32> -> vector<98x6xf32>
    %26 = arith.maximumf %22, %25 : vector<98x6xf32>
    %c2 = arith.constant 2 : index
    %c0_29 = arith.constant 0 : index
    %c0_30 = arith.constant 0 : index
    %27 = vector.load %arg1[%c2, %c0_29, %c0_30] : memref<16x64x6xbf16, #tpu.memory_space<vmem>>, vector<1x64x6xbf16>
    %28 = vector.shape_cast %27 : vector<1x64x6xbf16> to vector<64x6xbf16>
    %cst_31 = arith.constant dense<0.000000e+00> : vector<98x6xf32>
    %29 = tpu.matmul %18, %28, %cst_31 {dimension_numbers = #tpu.dot_dimension_numbers<[1], [0], [0], [1], [0, 0, 1, 1], [], []>} : vector<98x64xbf16>, vector<64x6xbf16>, vector<98x6xf32> -> vector<98x6xf32>
    %30 = arith.maximumf %26, %29 : vector<98x6xf32>
    %c3 = arith.constant 3 : index
    %c0_32 = arith.constant 0 : index
    %c0_33 = arith.constant 0 : index
    %31 = vector.load %arg1[%c3, %c0_32, %c0_33] : memref<16x64x6xbf16, #tpu.memory_space<vmem>>, vector<1x64x6xbf16>
    %32 = vector.shape_cast %31 : vector<1x64x6xbf16> to vector<64x6xbf16>
    %cst_34 = arith.constant dense<0.000000e+00> : vector<98x6xf32>
    %33 = tpu.matmul %18, %32, %cst_34 {dimension_numbers = #tpu.dot_dimension_numbers<[1], [0], [0], [1], [0, 0, 1, 1], [], []>} : vector<98x64xbf16>, vector<64x6xbf16>, vector<98x6xf32> -> vector<98x6xf32>
    %34 = arith.maximumf %30, %33 : vector<98x6xf32>
    %35 = vector.broadcast %19 : vector<1x6xf32> to vector<98x6xf32>
    %36 = arith.addf %34, %35 : vector<98x6xf32>
    %cst_35 = arith.constant 0.000000e+00 : f32
    %37 = vector.broadcast %cst_35 : f32 to vector<98x6xf32>
    %38 = arith.maximumf %36, %37 : vector<98x6xf32>
    %c0_36 = arith.constant 0 : index
    %c0_37 = arith.constant 0 : index
    %39 = vector.load %arg12[%c0_36, %c0_37] : memref<114x24xf32, #tpu.memory_space<vmem>>, vector<98x6xf32>
    tpu.vector_store %arg12[%c0_36, %c0_37], %38 {strides = array<i32>} : memref<114x24xf32, #tpu.memory_space<vmem>>, vector<98x6xf32>,
    %c4 = arith.constant 4 : index
    %c0_38 = arith.constant 0 : index
    %c0_39 = arith.constant 0 : index
    %40 = vector.load %arg1[%c4, %c0_38, %c0_39] : memref<16x64x6xbf16, #tpu.memory_space<vmem>>, vector<1x64x6xbf16>
    %41 = vector.shape_cast %40 : vector<1x64x6xbf16> to vector<64x6xbf16>
    %cst_40 = arith.constant dense<0.000000e+00> : vector<98x6xf32>
    %42 = tpu.matmul %18, %41, %cst_40 {dimension_numbers = #tpu.dot_dimension_numbers<[1], [0], [0], [1], [0, 0, 1, 1], [], []>} : vector<98x64xbf16>, vector<64x6xbf16>, vector<98x6xf32> -> vector<98x6xf32>
    %c5 = arith.constant 5 : index
    %c0_41 = arith.constant 0 : index
    %c0_42 = arith.constant 0 : index
    %43 = vector.load %arg1[%c5, %c0_41, %c0_42] : memref<16x64x6xbf16, #tpu.memory_space<vmem>>, vector<1x64x6xbf16>
    %44 = vector.shape_cast %43 : vector<1x64x6xbf16> to vector<64x6xbf16>
    %cst_43 = arith.constant dense<0.000000e+00> : vector<98x6xf32>
    %45 = tpu.matmul %18, %44, %cst_43 {dimension_numbers = #tpu.dot_dimension_numbers<[1], [0], [0], [1], [0, 0, 1, 1], [], []>} : vector<98x64xbf16>, vector<64x6xbf16>, vector<98x6xf32> -> vector<98x6xf32>
    %46 = arith.maximumf %42, %45 : vector<98x6xf32>
    %c6 = arith.constant 6 : index
    %c0_44 = arith.constant 0 : index
    %c0_45 = arith.constant 0 : index
    %47 = vector.load %arg1[%c6, %c0_44, %c0_45] : memref<16x64x6xbf16, #tpu.memory_space<vmem>>, vector<1x64x6xbf16>
    %48 = vector.shape_cast %47 : vector<1x64x6xbf16> to vector<64x6xbf16>
    %cst_46 = arith.constant dense<0.000000e+00> : vector<98x6xf32>
    %49 = tpu.matmul %18, %48, %cst_46 {dimension_numbers = #tpu.dot_dimension_numbers<[1], [0], [0], [1], [0, 0, 1, 1], [], []>} : vector<98x64xbf16>, vector<64x6xbf16>, vector<98x6xf32> -> vector<98x6xf32>
    %50 = arith.maximumf %46, %49 : vector<98x6xf32>
    %c7_47 = arith.constant 7 : index
    %c0_48 = arith.constant 0 : index
    %c0_49 = arith.constant 0 : index
    %51 = vector.load %arg1[%c7_47, %c0_48, %c0_49] : memref<16x64x6xbf16, #tpu.memory_space<vmem>>, vector<1x64x6xbf16>
    %52 = vector.shape_cast %51 : vector<1x64x6xbf16> to vector<64x6xbf16>
    %cst_50 = arith.constant dense<0.000000e+00> : vector<98x6xf32>
    %53 = tpu.matmul %18, %52, %cst_50 {dimension_numbers = #tpu.dot_dimension_numbers<[1], [0], [0], [1], [0, 0, 1, 1], [], []>} : vector<98x64xbf16>, vector<64x6xbf16>, vector<98x6xf32> -> vector<98x6xf32>
    %54 = arith.maximumf %50, %53 : vector<98x6xf32>
    %55 = vector.broadcast %19 : vector<1x6xf32> to vector<98x6xf32>
    %56 = arith.addf %54, %55 : vector<98x6xf32>
    %cst_51 = arith.constant 0.000000e+00 : f32
    %57 = vector.broadcast %cst_51 : f32 to vector<98x6xf32>
    %58 = arith.maximumf %56, %57 : vector<98x6xf32>
    %c0_52 = arith.constant 0 : index
    %c6_53 = arith.constant 6 : index
    %59 = vector.load %arg12[%c0_52, %c6_53] : memref<114x24xf32, #tpu.memory_space<vmem>>, vector<98x6xf32>
    tpu.vector_store %arg12[%c0_52, %c6_53], %58 {strides = array<i32>} : memref<114x24xf32, #tpu.memory_space<vmem>>, vector<98x6xf32>,
    %c8_54 = arith.constant 8 : index
    %c0_55 = arith.constant 0 : index
    %c0_56 = arith.constant 0 : index
    %60 = vector.load %arg1[%c8_54, %c0_55, %c0_56] : memref<16x64x6xbf16, #tpu.memory_space<vmem>>, vector<1x64x6xbf16>
    %61 = vector.shape_cast %60 : vector<1x64x6xbf16> to vector<64x6xbf16>
    %cst_57 = arith.constant dense<0.000000e+00> : vector<98x6xf32>
    %62 = tpu.matmul %18, %61, %cst_57 {dimension_numbers = #tpu.dot_dimension_numbers<[1], [0], [0], [1], [0, 0, 1, 1], [], []>} : vector<98x64xbf16>, vector<64x6xbf16>, vector<98x6xf32> -> vector<98x6xf32>
    %c9 = arith.constant 9 : index
    %c0_58 = arith.constant 0 : index
    %c0_59 = arith.constant 0 : index
    %63 = vector.load %arg1[%c9, %c0_58, %c0_59] : memref<16x64x6xbf16, #tpu.memory_space<vmem>>, vector<1x64x6xbf16>
    %64 = vector.shape_cast %63 : vector<1x64x6xbf16> to vector<64x6xbf16>
    %cst_60 = arith.constant dense<0.000000e+00> : vector<98x6xf32>
    %65 = tpu.matmul %18, %64, %cst_60 {dimension_numbers = #tpu.dot_dimension_numbers<[1], [0], [0], [1], [0, 0, 1, 1], [], []>} : vector<98x64xbf16>, vector<64x6xbf16>, vector<98x6xf32> -> vector<98x6xf32>
    %66 = arith.maximumf %62, %65 : vector<98x6xf32>
    %c10 = arith.constant 10 : index
    %c0_61 = arith.constant 0 : index
    %c0_62 = arith.constant 0 : index
    %67 = vector.load %arg1[%c10, %c0_61, %c0_62] : memref<16x64x6xbf16, #tpu.memory_space<vmem>>, vector<1x64x6xbf16>
    %68 = vector.shape_cast %67 : vector<1x64x6xbf16> to vector<64x6xbf16>
    %cst_63 = arith.constant dense<0.000000e+00> : vector<98x6xf32>
    %69 = tpu.matmul %18, %68, %cst_63 {dimension_numbers = #tpu.dot_dimension_numbers<[1], [0], [0], [1], [0, 0, 1, 1], [], []>} : vector<98x64xbf16>, vector<64x6xbf16>, vector<98x6xf32> -> vector<98x6xf32>
    %70 = arith.maximumf %66, %69 : vector<98x6xf32>
    %c11 = arith.constant 11 : index
    %c0_64 = arith.constant 0 : index
    %c0_65 = arith.constant 0 : index
    %71 = vector.load %arg1[%c11, %c0_64, %c0_65] : memref<16x64x6xbf16, #tpu.memory_space<vmem>>, vector<1x64x6xbf16>
    %72 = vector.shape_cast %71 : vector<1x64x6xbf16> to vector<64x6xbf16>
    %cst_66 = arith.constant dense<0.000000e+00> : vector<98x6xf32>
    %73 = tpu.matmul %18, %72, %cst_66 {dimension_numbers = #tpu.dot_dimension_numbers<[1], [0], [0], [1], [0, 0, 1, 1], [], []>} : vector<98x64xbf16>, vector<64x6xbf16>, vector<98x6xf32> -> vector<98x6xf32>
    %74 = arith.maximumf %70, %73 : vector<98x6xf32>
    %75 = vector.broadcast %19 : vector<1x6xf32> to vector<98x6xf32>
    %76 = arith.addf %74, %75 : vector<98x6xf32>
    %cst_67 = arith.constant 0.000000e+00 : f32
    %77 = vector.broadcast %cst_67 : f32 to vector<98x6xf32>
    %78 = arith.maximumf %76, %77 : vector<98x6xf32>
    %c0_68 = arith.constant 0 : index
    %c12 = arith.constant 12 : index
    %79 = vector.load %arg12[%c0_68, %c12] : memref<114x24xf32, #tpu.memory_space<vmem>>, vector<98x6xf32>
    tpu.vector_store %arg12[%c0_68, %c12], %78 {strides = array<i32>} : memref<114x24xf32, #tpu.memory_space<vmem>>, vector<98x6xf32>,
    %c12_69 = arith.constant 12 : index
    %c0_70 = arith.constant 0 : index
    %c0_71 = arith.constant 0 : index
    %80 = vector.load %arg1[%c12_69, %c0_70, %c0_71] : memref<16x64x6xbf16, #tpu.memory_space<vmem>>, vector<1x64x6xbf16>
    %81 = vector.shape_cast %80 : vector<1x64x6xbf16> to vector<64x6xbf16>
    %cst_72 = arith.constant dense<0.000000e+00> : vector<98x6xf32>
    %82 = tpu.matmul %18, %81, %cst_72 {dimension_numbers = #tpu.dot_dimension_numbers<[1], [0], [0], [1], [0, 0, 1, 1], [], []>} : vector<98x64xbf16>, vector<64x6xbf16>, vector<98x6xf32> -> vector<98x6xf32>
    %c13 = arith.constant 13 : index
    %c0_73 = arith.constant 0 : index
    %c0_74 = arith.constant 0 : index
    %83 = vector.load %arg1[%c13, %c0_73, %c0_74] : memref<16x64x6xbf16, #tpu.memory_space<vmem>>, vector<1x64x6xbf16>
    %84 = vector.shape_cast %83 : vector<1x64x6xbf16> to vector<64x6xbf16>
    %cst_75 = arith.constant dense<0.000000e+00> : vector<98x6xf32>
    %85 = tpu.matmul %18, %84, %cst_75 {dimension_numbers = #tpu.dot_dimension_numbers<[1], [0], [0], [1], [0, 0, 1, 1], [], []>} : vector<98x64xbf16>, vector<64x6xbf16>, vector<98x6xf32> -> vector<98x6xf32>
    %86 = arith.maximumf %82, %85 : vector<98x6xf32>
    %c14 = arith.constant 14 : index
    %c0_76 = arith.constant 0 : index
    %c0_77 = arith.constant 0 : index
    %87 = vector.load %arg1[%c14, %c0_76, %c0_77] : memref<16x64x6xbf16, #tpu.memory_space<vmem>>, vector<1x64x6xbf16>
    %88 = vector.shape_cast %87 : vector<1x64x6xbf16> to vector<64x6xbf16>
    %cst_78 = arith.constant dense<0.000000e+00> : vector<98x6xf32>
    %89 = tpu.matmul %18, %88, %cst_78 {dimension_numbers = #tpu.dot_dimension_numbers<[1], [0], [0], [1], [0, 0, 1, 1], [], []>} : vector<98x64xbf16>, vector<64x6xbf16>, vector<98x6xf32> -> vector<98x6xf32>
    %90 = arith.maximumf %86, %89 : vector<98x6xf32>
    %c15 = arith.constant 15 : index
    %c0_79 = arith.constant 0 : index
    %c0_80 = arith.constant 0 : index
    %91 = vector.load %arg1[%c15, %c0_79, %c0_80] : memref<16x64x6xbf16, #tpu.memory_space<vmem>>, vector<1x64x6xbf16>
    %92 = vector.shape_cast %91 : vector<1x64x6xbf16> to vector<64x6xbf16>
    %cst_81 = arith.constant dense<0.000000e+00> : vector<98x6xf32>
    %93 = tpu.matmul %18, %92, %cst_81 {dimension_numbers = #tpu.dot_dimension_numbers<[1], [0], [0], [1], [0, 0, 1, 1], [], []>} : vector<98x64xbf16>, vector<64x6xbf16>, vector<98x6xf32> -> vector<98x6xf32>
    %94 = arith.maximumf %90, %93 : vector<98x6xf32>
    %95 = vector.broadcast %19 : vector<1x6xf32> to vector<98x6xf32>
    %96 = arith.addf %94, %95 : vector<98x6xf32>
    %cst_82 = arith.constant 0.000000e+00 : f32
    %97 = vector.broadcast %cst_82 : f32 to vector<98x6xf32>
    %98 = arith.maximumf %96, %97 : vector<98x6xf32>
    %c0_83 = arith.constant 0 : index
    %c18 = arith.constant 18 : index
    %99 = vector.load %arg12[%c0_83, %c18] : memref<114x24xf32, #tpu.memory_space<vmem>>, vector<98x6xf32>
    tpu.vector_store %arg12[%c0_83, %c18], %98 {strides = array<i32>} : memref<114x24xf32, #tpu.memory_space<vmem>>, vector<98x6xf32>,
    %c0_84 = arith.constant 0 : index
    %c0_85 = arith.constant 0 : index
    %100 = vector.load %arg12[%c0_84, %c0_85] : memref<114x24xf32, #tpu.memory_space<vmem>>, vector<98x24xf32>
    %101 = arith.truncf %100 : vector<98x24xf32> to vector<98x24xbf16>
    %c0_86 = arith.constant 0 : index
    %c0_87 = arith.constant 0 : index
    %102 = vector.load %arg15[%c0_86, %c0_87] : memref<98x288xbf16, #tpu.memory_space<vmem>>, vector<98x24xbf16>
    tpu.vector_store %arg15[%c0_86, %c0_87], %101 {strides = array<i32>} : memref<98x288xbf16, #tpu.memory_space<vmem>>, vector<98x24xbf16>,
    %c1_88 = arith.constant 1 : index
    %c0_89 = arith.constant 0 : index
    %103 = vector.load %arg12[%c1_88, %c0_89] : memref<114x24xf32, #tpu.memory_space<vmem>>, vector<98x24xf32>
    %104 = arith.truncf %103 : vector<98x24xf32> to vector<98x24xbf16>
    %c0_90 = arith.constant 0 : index
    %c32_91 = arith.constant 32 : index
    %105 = vector.load %arg15[%c0_90, %c32_91] : memref<98x288xbf16, #tpu.memory_space<vmem>>, vector<98x24xbf16>
    tpu.vector_store %arg15[%c0_90, %c32_91], %104 {strides = array<i32>} : memref<98x288xbf16, #tpu.memory_space<vmem>>, vector<98x24xbf16>,
    %c2_92 = arith.constant 2 : index
    %c0_93 = arith.constant 0 : index
    %106 = vector.load %arg12[%c2_92, %c0_93] : memref<114x24xf32, #tpu.memory_space<vmem>>, vector<98x24xf32>
    %107 = arith.truncf %106 : vector<98x24xf32> to vector<98x24xbf16>
    %c0_94 = arith.constant 0 : index
    %c64 = arith.constant 64 : index
    %108 = vector.load %arg15[%c0_94, %c64] : memref<98x288xbf16, #tpu.memory_space<vmem>>, vector<98x24xbf16>
    tpu.vector_store %arg15[%c0_94, %c64], %107 {strides = array<i32>} : memref<98x288xbf16, #tpu.memory_space<vmem>>, vector<98x24xbf16>,
    %c7_95 = arith.constant 7 : index
    %c0_96 = arith.constant 0 : index
    %109 = vector.load %arg12[%c7_95, %c0_96] : memref<114x24xf32, #tpu.memory_space<vmem>>, vector<98x24xf32>
    %110 = arith.truncf %109 : vector<98x24xf32> to vector<98x24xbf16>
    %c0_97 = arith.constant 0 : index
    %c96 = arith.constant 96 : index
    %111 = vector.load %arg15[%c0_97, %c96] : memref<98x288xbf16, #tpu.memory_space<vmem>>, vector<98x24xbf16>
    tpu.vector_store %arg15[%c0_97, %c96], %110 {strides = array<i32>} : memref<98x288xbf16, #tpu.memory_space<vmem>>, vector<98x24xbf16>,
    %c8_98 = arith.constant 8 : index
    %c0_99 = arith.constant 0 : index
    %112 = vector.load %arg12[%c8_98, %c0_99] : memref<114x24xf32, #tpu.memory_space<vmem>>, vector<98x24xf32>
    %113 = arith.truncf %112 : vector<98x24xf32> to vector<98x24xbf16>
    %c0_100 = arith.constant 0 : index
    %c128 = arith.constant 128 : index
    %114 = vector.load %arg15[%c0_100, %c128] : memref<98x288xbf16, #tpu.memory_space<vmem>>, vector<98x24xbf16>
    tpu.vector_store %arg15[%c0_100, %c128], %113 {strides = array<i32>} : memref<98x288xbf16, #tpu.memory_space<vmem>>, vector<98x24xbf16>,
    %c9_101 = arith.constant 9 : index
    %c0_102 = arith.constant 0 : index
    %115 = vector.load %arg12[%c9_101, %c0_102] : memref<114x24xf32, #tpu.memory_space<vmem>>, vector<98x24xf32>
    %116 = arith.truncf %115 : vector<98x24xf32> to vector<98x24xbf16>
    %c0_103 = arith.constant 0 : index
    %c160 = arith.constant 160 : index
    %117 = vector.load %arg15[%c0_103, %c160] : memref<98x288xbf16, #tpu.memory_space<vmem>>, vector<98x24xbf16>
    tpu.vector_store %arg15[%c0_103, %c160], %116 {strides = array<i32>} : memref<98x288xbf16, #tpu.memory_space<vmem>>, vector<98x24xbf16>,
    %c14_104 = arith.constant 14 : index
    %c0_105 = arith.constant 0 : index
    %118 = vector.load %arg12[%c14_104, %c0_105] : memref<114x24xf32, #tpu.memory_space<vmem>>, vector<98x24xf32>
    %119 = arith.truncf %118 : vector<98x24xf32> to vector<98x24xbf16>
    %c0_106 = arith.constant 0 : index
    %c192 = arith.constant 192 : index
    %120 = vector.load %arg15[%c0_106, %c192] : memref<98x288xbf16, #tpu.memory_space<vmem>>, vector<98x24xbf16>
    tpu.vector_store %arg15[%c0_106, %c192], %119 {strides = array<i32>} : memref<98x288xbf16, #tpu.memory_space<vmem>>, vector<98x24xbf16>,
    %c15_107 = arith.constant 15 : index
    %c0_108 = arith.constant 0 : index
    %121 = vector.load %arg12[%c15_107, %c0_108] : memref<114x24xf32, #tpu.memory_space<vmem>>, vector<98x24xf32>
    %122 = arith.truncf %121 : vector<98x24xf32> to vector<98x24xbf16>
    %c0_109 = arith.constant 0 : index
    %c224 = arith.constant 224 : index
    %123 = vector.load %arg15[%c0_109, %c224] : memref<98x288xbf16, #tpu.memory_space<vmem>>, vector<98x24xbf16>
    tpu.vector_store %arg15[%c0_109, %c224], %122 {strides = array<i32>} : memref<98x288xbf16, #tpu.memory_space<vmem>>, vector<98x24xbf16>,
    %c16_110 = arith.constant 16 : index
    %c0_111 = arith.constant 0 : index
    %124 = vector.load %arg12[%c16_110, %c0_111] : memref<114x24xf32, #tpu.memory_space<vmem>>, vector<98x24xf32>
    %125 = arith.truncf %124 : vector<98x24xf32> to vector<98x24xbf16>
    %c0_112 = arith.constant 0 : index
    %c256 = arith.constant 256 : index
    %126 = vector.load %arg15[%c0_112, %c256] : memref<98x288xbf16, #tpu.memory_space<vmem>>, vector<98x24xbf16>
    tpu.vector_store %arg15[%c0_112, %c256], %125 {strides = array<i32>} : memref<98x288xbf16, #tpu.memory_space<vmem>>, vector<98x24xbf16>,
    %c0_113 = arith.constant 0 : index
    %c0_114 = arith.constant 0 : index
    %127 = vector.load %arg15[%c0_113, %c0_114] : memref<98x288xbf16, #tpu.memory_space<vmem>>, vector<98x288xbf16>
    %c0_115 = arith.constant 0 : index
    %c0_116 = arith.constant 0 : index
    %128 = vector.load %arg4[%c0_115, %c0_116] : memref<1x16xf32, #tpu.memory_space<vmem>>, vector<1x16xf32>
    %c0_117 = arith.constant 0 : index
    %c0_118 = arith.constant 0 : index
    %c0_119 = arith.constant 0 : index
    %129 = vector.load %arg3[%c0_117, %c0_118, %c0_119] : memref<4x288x16xbf16, #tpu.memory_space<vmem>>, vector<1x288x16xbf16>
    %130 = vector.shape_cast %129 : vector<1x288x16xbf16> to vector<288x16xbf16>
    %cst_120 = arith.constant dense<0.000000e+00> : vector<98x16xf32>
    %131 = tpu.matmul %127, %130, %cst_120 {dimension_numbers = #tpu.dot_dimension_numbers<[1], [0], [0], [1], [0, 0, 1, 1], [], []>} : vector<98x288xbf16>, vector<288x16xbf16>, vector<98x16xf32> -> vector<98x16xf32>
    %c1_121 = arith.constant 1 : index
    %c0_122 = arith.constant 0 : index
    %c0_123 = arith.constant 0 : index
    %132 = vector.load %arg3[%c1_121, %c0_122, %c0_123] : memref<4x288x16xbf16, #tpu.memory_space<vmem>>, vector<1x288x16xbf16>
    %133 = vector.shape_cast %132 : vector<1x288x16xbf16> to vector<288x16xbf16>
    %cst_124 = arith.constant dense<0.000000e+00> : vector<98x16xf32>
    %134 = tpu.matmul %127, %133, %cst_124 {dimension_numbers = #tpu.dot_dimension_numbers<[1], [0], [0], [1], [0, 0, 1, 1], [], []>} : vector<98x288xbf16>, vector<288x16xbf16>, vector<98x16xf32> -> vector<98x16xf32>
    %135 = arith.maximumf %131, %134 : vector<98x16xf32>
    %c2_125 = arith.constant 2 : index
    %c0_126 = arith.constant 0 : index
    %c0_127 = arith.constant 0 : index
    %136 = vector.load %arg3[%c2_125, %c0_126, %c0_127] : memref<4x288x16xbf16, #tpu.memory_space<vmem>>, vector<1x288x16xbf16>
    %137 = vector.shape_cast %136 : vector<1x288x16xbf16> to vector<288x16xbf16>
    %cst_128 = arith.constant dense<0.000000e+00> : vector<98x16xf32>
    %138 = tpu.matmul %127, %137, %cst_128 {dimension_numbers = #tpu.dot_dimension_numbers<[1], [0], [0], [1], [0, 0, 1, 1], [], []>} : vector<98x288xbf16>, vector<288x16xbf16>, vector<98x16xf32> -> vector<98x16xf32>
    %139 = arith.maximumf %135, %138 : vector<98x16xf32>
    %c3_129 = arith.constant 3 : index
    %c0_130 = arith.constant 0 : index
    %c0_131 = arith.constant 0 : index
    %140 = vector.load %arg3[%c3_129, %c0_130, %c0_131] : memref<4x288x16xbf16, #tpu.memory_space<vmem>>, vector<1x288x16xbf16>
    %141 = vector.shape_cast %140 : vector<1x288x16xbf16> to vector<288x16xbf16>
    %cst_132 = arith.constant dense<0.000000e+00> : vector<98x16xf32>
    %142 = tpu.matmul %127, %141, %cst_132 {dimension_numbers = #tpu.dot_dimension_numbers<[1], [0], [0], [1], [0, 0, 1, 1], [], []>} : vector<98x288xbf16>, vector<288x16xbf16>, vector<98x16xf32> -> vector<98x16xf32>
    %143 = arith.maximumf %139, %142 : vector<98x16xf32>
    %144 = vector.broadcast %128 : vector<1x16xf32> to vector<98x16xf32>
    %145 = arith.addf %143, %144 : vector<98x16xf32>
    %cst_133 = arith.constant 0.000000e+00 : f32
    %146 = vector.broadcast %cst_133 : f32 to vector<98x16xf32>
    %147 = arith.maximumf %145, %146 : vector<98x16xf32>
    %c0_134 = arith.constant 0 : index
    %c0_135 = arith.constant 0 : index
    %148 = vector.load %arg13[%c0_134, %c0_135] : memref<122x16xf32, #tpu.memory_space<vmem>>, vector<98x16xf32>
    tpu.vector_store %arg13[%c0_134, %c0_135], %147 {strides = array<i32>} : memref<122x16xf32, #tpu.memory_space<vmem>>, vector<98x16xf32>,
    %c0_136 = arith.constant 0 : index
    %c0_137 = arith.constant 0 : index
    %149 = vector.load %arg13[%c0_136, %c0_137] : memref<122x16xf32, #tpu.memory_space<vmem>>, vector<98x16xf32>
    %150 = arith.truncf %149 : vector<98x16xf32> to vector<98x16xbf16>
    %c0_138 = arith.constant 0 : index
    %c0_139 = arith.constant 0 : index
    %151 = vector.load %arg16[%c0_138, %c0_139] : memref<98x256xbf16, #tpu.memory_space<vmem>>, vector<98x16xbf16>
    tpu.vector_store %arg16[%c0_138, %c0_139], %150 {strides = array<i32>} : memref<98x256xbf16, #tpu.memory_space<vmem>>, vector<98x16xbf16>,
    %c1_140 = arith.constant 1 : index
    %c0_141 = arith.constant 0 : index
    %152 = vector.load %arg13[%c1_140, %c0_141] : memref<122x16xf32, #tpu.memory_space<vmem>>, vector<98x16xf32>
    %153 = arith.truncf %152 : vector<98x16xf32> to vector<98x16xbf16>
    %c0_142 = arith.constant 0 : index
    %c16_143 = arith.constant 16 : index
    %154 = vector.load %arg16[%c0_142, %c16_143] : memref<98x256xbf16, #tpu.memory_space<vmem>>, vector<98x16xbf16>
    tpu.vector_store %arg16[%c0_142, %c16_143], %153 {strides = array<i32>} : memref<98x256xbf16, #tpu.memory_space<vmem>>, vector<98x16xbf16>,
    %c2_144 = arith.constant 2 : index
    %c0_145 = arith.constant 0 : index
    %155 = vector.load %arg13[%c2_144, %c0_145] : memref<122x16xf32, #tpu.memory_space<vmem>>, vector<98x16xf32>
    %156 = arith.truncf %155 : vector<98x16xf32> to vector<98x16xbf16>
    %c0_146 = arith.constant 0 : index
    %c32_147 = arith.constant 32 : index
    %157 = vector.load %arg16[%c0_146, %c32_147] : memref<98x256xbf16, #tpu.memory_space<vmem>>, vector<98x16xbf16>
    tpu.vector_store %arg16[%c0_146, %c32_147], %156 {strides = array<i32>} : memref<98x256xbf16, #tpu.memory_space<vmem>>, vector<98x16xbf16>,
    %c3_148 = arith.constant 3 : index
    %c0_149 = arith.constant 0 : index
    %158 = vector.load %arg13[%c3_148, %c0_149] : memref<122x16xf32, #tpu.memory_space<vmem>>, vector<98x16xf32>
    %159 = arith.truncf %158 : vector<98x16xf32> to vector<98x16xbf16>
    %c0_150 = arith.constant 0 : index
    %c48_151 = arith.constant 48 : index
    %160 = vector.load %arg16[%c0_150, %c48_151] : memref<98x256xbf16, #tpu.memory_space<vmem>>, vector<98x16xbf16>
    tpu.vector_store %arg16[%c0_150, %c48_151], %159 {strides = array<i32>} : memref<98x256xbf16, #tpu.memory_space<vmem>>, vector<98x16xbf16>,
    %c7_152 = arith.constant 7 : index
    %c0_153 = arith.constant 0 : index
    %161 = vector.load %arg13[%c7_152, %c0_153] : memref<122x16xf32, #tpu.memory_space<vmem>>, vector<98x16xf32>
    %162 = arith.truncf %161 : vector<98x16xf32> to vector<98x16xbf16>
    %c0_154 = arith.constant 0 : index
    %c64_155 = arith.constant 64 : index
    %163 = vector.load %arg16[%c0_154, %c64_155] : memref<98x256xbf16, #tpu.memory_space<vmem>>, vector<98x16xbf16>
    tpu.vector_store %arg16[%c0_154, %c64_155], %162 {strides = array<i32>} : memref<98x256xbf16, #tpu.memory_space<vmem>>, vector<98x16xbf16>,
    %c8_156 = arith.constant 8 : index
    %c0_157 = arith.constant 0 : index
    %164 = vector.load %arg13[%c8_156, %c0_157] : memref<122x16xf32, #tpu.memory_space<vmem>>, vector<98x16xf32>
    %165 = arith.truncf %164 : vector<98x16xf32> to vector<98x16xbf16>
    %c0_158 = arith.constant 0 : index
    %c80 = arith.constant 80 : index
    %166 = vector.load %arg16[%c0_158, %c80] : memref<98x256xbf16, #tpu.memory_space<vmem>>, vector<98x16xbf16>
    tpu.vector_store %arg16[%c0_158, %c80], %165 {strides = array<i32>} : memref<98x256xbf16, #tpu.memory_space<vmem>>, vector<98x16xbf16>,
    %c9_159 = arith.constant 9 : index
    %c0_160 = arith.constant 0 : index
    %167 = vector.load %arg13[%c9_159, %c0_160] : memref<122x16xf32, #tpu.memory_space<vmem>>, vector<98x16xf32>
    %168 = arith.truncf %167 : vector<98x16xf32> to vector<98x16xbf16>
    %c0_161 = arith.constant 0 : index
    %c96_162 = arith.constant 96 : index
    %169 = vector.load %arg16[%c0_161, %c96_162] : memref<98x256xbf16, #tpu.memory_space<vmem>>, vector<98x16xbf16>
    tpu.vector_store %arg16[%c0_161, %c96_162], %168 {strides = array<i32>} : memref<98x256xbf16, #tpu.memory_space<vmem>>, vector<98x16xbf16>,
    %c10_163 = arith.constant 10 : index
    %c0_164 = arith.constant 0 : index
    %170 = vector.load %arg13[%c10_163, %c0_164] : memref<122x16xf32, #tpu.memory_space<vmem>>, vector<98x16xf32>
    %171 = arith.truncf %170 : vector<98x16xf32> to vector<98x16xbf16>
    %c0_165 = arith.constant 0 : index
    %c112 = arith.constant 112 : index
    %172 = vector.load %arg16[%c0_165, %c112] : memref<98x256xbf16, #tpu.memory_space<vmem>>, vector<98x16xbf16>
    tpu.vector_store %arg16[%c0_165, %c112], %171 {strides = array<i32>} : memref<98x256xbf16, #tpu.memory_space<vmem>>, vector<98x16xbf16>,
    %c14_166 = arith.constant 14 : index
    %c0_167 = arith.constant 0 : index
    %173 = vector.load %arg13[%c14_166, %c0_167] : memref<122x16xf32, #tpu.memory_space<vmem>>, vector<98x16xf32>
    %174 = arith.truncf %173 : vector<98x16xf32> to vector<98x16xbf16>
    %c0_168 = arith.constant 0 : index
    %c128_169 = arith.constant 128 : index
    %175 = vector.load %arg16[%c0_168, %c128_169] : memref<98x256xbf16, #tpu.memory_space<vmem>>, vector<98x16xbf16>
    tpu.vector_store %arg16[%c0_168, %c128_169], %174 {strides = array<i32>} : memref<98x256xbf16, #tpu.memory_space<vmem>>, vector<98x16xbf16>,
    %c15_170 = arith.constant 15 : index
    %c0_171 = arith.constant 0 : index
    %176 = vector.load %arg13[%c15_170, %c0_171] : memref<122x16xf32, #tpu.memory_space<vmem>>, vector<98x16xf32>
    %177 = arith.truncf %176 : vector<98x16xf32> to vector<98x16xbf16>
    %c0_172 = arith.constant 0 : index
    %c144 = arith.constant 144 : index
    %178 = vector.load %arg16[%c0_172, %c144] : memref<98x256xbf16, #tpu.memory_space<vmem>>, vector<98x16xbf16>
    tpu.vector_store %arg16[%c0_172, %c144], %177 {strides = array<i32>} : memref<98x256xbf16, #tpu.memory_space<vmem>>, vector<98x16xbf16>,
    %c16_173 = arith.constant 16 : index
    %c0_174 = arith.constant 0 : index
    %179 = vector.load %arg13[%c16_173, %c0_174] : memref<122x16xf32, #tpu.memory_space<vmem>>, vector<98x16xf32>
    %180 = arith.truncf %179 : vector<98x16xf32> to vector<98x16xbf16>
    %c0_175 = arith.constant 0 : index
    %c160_176 = arith.constant 160 : index
    %181 = vector.load %arg16[%c0_175, %c160_176] : memref<98x256xbf16, #tpu.memory_space<vmem>>, vector<98x16xbf16>
    tpu.vector_store %arg16[%c0_175, %c160_176], %180 {strides = array<i32>} : memref<98x256xbf16, #tpu.memory_space<vmem>>, vector<98x16xbf16>,
    %c17 = arith.constant 17 : index
    %c0_177 = arith.constant 0 : index
    %182 = vector.load %arg13[%c17, %c0_177] : memref<122x16xf32, #tpu.memory_space<vmem>>, vector<98x16xf32>
    %183 = arith.truncf %182 : vector<98x16xf32> to vector<98x16xbf16>
    %c0_178 = arith.constant 0 : index
    %c176 = arith.constant 176 : index
    %184 = vector.load %arg16[%c0_178, %c176] : memref<98x256xbf16, #tpu.memory_space<vmem>>, vector<98x16xbf16>
    tpu.vector_store %arg16[%c0_178, %c176], %183 {strides = array<i32>} : memref<98x256xbf16, #tpu.memory_space<vmem>>, vector<98x16xbf16>,
    %c21 = arith.constant 21 : index
    %c0_179 = arith.constant 0 : index
    %185 = vector.load %arg13[%c21, %c0_179] : memref<122x16xf32, #tpu.memory_space<vmem>>, vector<98x16xf32>
    %186 = arith.truncf %185 : vector<98x16xf32> to vector<98x16xbf16>
    %c0_180 = arith.constant 0 : index
    %c192_181 = arith.constant 192 : index
    %187 = vector.load %arg16[%c0_180, %c192_181] : memref<98x256xbf16, #tpu.memory_space<vmem>>, vector<98x16xbf16>
    tpu.vector_store %arg16[%c0_180, %c192_181], %186 {strides = array<i32>} : memref<98x256xbf16, #tpu.memory_space<vmem>>, vector<98x16xbf16>,
    %c22 = arith.constant 22 : index
    %c0_182 = arith.constant 0 : index
    %188 = vector.load %arg13[%c22, %c0_182] : memref<122x16xf32, #tpu.memory_space<vmem>>, vector<98x16xf32>
    %189 = arith.truncf %188 : vector<98x16xf32> to vector<98x16xbf16>
    %c0_183 = arith.constant 0 : index
    %c208 = arith.constant 208 : index
    %190 = vector.load %arg16[%c0_183, %c208] : memref<98x256xbf16, #tpu.memory_space<vmem>>, vector<98x16xbf16>
    tpu.vector_store %arg16[%c0_183, %c208], %189 {strides = array<i32>} : memref<98x256xbf16, #tpu.memory_space<vmem>>, vector<98x16xbf16>,
    %c23 = arith.constant 23 : index
    %c0_184 = arith.constant 0 : index
    %191 = vector.load %arg13[%c23, %c0_184] : memref<122x16xf32, #tpu.memory_space<vmem>>, vector<98x16xf32>
    %192 = arith.truncf %191 : vector<98x16xf32> to vector<98x16xbf16>
    %c0_185 = arith.constant 0 : index
    %c224_186 = arith.constant 224 : index
    %193 = vector.load %arg16[%c0_185, %c224_186] : memref<98x256xbf16, #tpu.memory_space<vmem>>, vector<98x16xbf16>
    tpu.vector_store %arg16[%c0_185, %c224_186], %192 {strides = array<i32>} : memref<98x256xbf16, #tpu.memory_space<vmem>>, vector<98x16xbf16>,
    %c24 = arith.constant 24 : index
    %c0_187 = arith.constant 0 : index
    %194 = vector.load %arg13[%c24, %c0_187] : memref<122x16xf32, #tpu.memory_space<vmem>>, vector<98x16xf32>
    %195 = arith.truncf %194 : vector<98x16xf32> to vector<98x16xbf16>
    %c0_188 = arith.constant 0 : index
    %c240 = arith.constant 240 : index
    %196 = vector.load %arg16[%c0_188, %c240] : memref<98x256xbf16, #tpu.memory_space<vmem>>, vector<98x16xbf16>
    tpu.vector_store %arg16[%c0_188, %c240], %195 {strides = array<i32>} : memref<98x256xbf16, #tpu.memory_space<vmem>>, vector<98x16xbf16>,
    %c0_189 = arith.constant 0 : index
    %c0_190 = arith.constant 0 : index
    %197 = vector.load %arg16[%c0_189, %c0_190] : memref<98x256xbf16, #tpu.memory_space<vmem>>, vector<98x256xbf16>
    %c0_191 = arith.constant 0 : index
    %c0_192 = arith.constant 0 : index
    %198 = vector.load %arg5[%c0_191, %c0_192] : memref<256x120xbf16, #tpu.memory_space<vmem>>, vector<256x120xbf16>
    %cst_193 = arith.constant dense<0.000000e+00> : vector<98x120xf32>
    %199 = tpu.matmul %197, %198, %cst_193 {dimension_numbers = #tpu.dot_dimension_numbers<[1], [0], [0], [1], [0, 0, 1, 1], [], []>} : vector<98x256xbf16>, vector<256x120xbf16>, vector<98x120xf32> -> vector<98x120xf32>
    %c0_194 = arith.constant 0 : index
    %c0_195 = arith.constant 0 : index
    %200 = vector.load %arg6[%c0_194, %c0_195] : memref<1x120xf32, #tpu.memory_space<vmem>>, vector<1x120xf32>
    %201 = vector.broadcast %200 : vector<1x120xf32> to vector<98x120xf32>
    %202 = arith.addf %199, %201 : vector<98x120xf32>
    %cst_196 = arith.constant 0.000000e+00 : f32
    %203 = vector.broadcast %cst_196 : f32 to vector<98x120xf32>
    %204 = arith.maximumf %202, %203 : vector<98x120xf32>
    %205 = arith.truncf %204 : vector<98x120xf32> to vector<98x120xbf16>
    %c0_197 = arith.constant 0 : index
    %c0_198 = arith.constant 0 : index
    %206 = vector.load %arg7[%c0_197, %c0_198] : memref<120x84xbf16, #tpu.memory_space<vmem>>, vector<120x84xbf16>
    %cst_199 = arith.constant dense<0.000000e+00> : vector<98x84xf32>
    %207 = tpu.matmul %205, %206, %cst_199 {dimension_numbers = #tpu.dot_dimension_numbers<[1], [0], [0], [1], [0, 0, 1, 1], [], []>} : vector<98x120xbf16>, vector<120x84xbf16>, vector<98x84xf32> -> vector<98x84xf32>
    %c0_200 = arith.constant 0 : index
    %c0_201 = arith.constant 0 : index
    %208 = vector.load %arg8[%c0_200, %c0_201] : memref<1x84xf32, #tpu.memory_space<vmem>>, vector<1x84xf32>
    %209 = vector.broadcast %208 : vector<1x84xf32> to vector<98x84xf32>
    %210 = arith.addf %207, %209 : vector<98x84xf32>
    %cst_202 = arith.constant 0.000000e+00 : f32
    %211 = vector.broadcast %cst_202 : f32 to vector<98x84xf32>
    %212 = arith.maximumf %210, %211 : vector<98x84xf32>
    %213 = arith.truncf %212 : vector<98x84xf32> to vector<98x84xbf16>
    %c0_203 = arith.constant 0 : index
    %c0_204 = arith.constant 0 : index
    %214 = vector.load %arg9[%c0_203, %c0_204] : memref<84x10xbf16, #tpu.memory_space<vmem>>, vector<84x10xbf16>
    %cst_205 = arith.constant dense<0.000000e+00> : vector<98x10xf32>
    %215 = tpu.matmul %213, %214, %cst_205 {dimension_numbers = #tpu.dot_dimension_numbers<[1], [0], [0], [1], [0, 0, 1, 1], [], []>} : vector<98x84xbf16>, vector<84x10xbf16>, vector<98x10xf32> -> vector<98x10xf32>
    %c0_206 = arith.constant 0 : index
    %c0_207 = arith.constant 0 : index
    %216 = vector.load %arg10[%c0_206, %c0_207] : memref<1x10xf32, #tpu.memory_space<vmem>>, vector<1x10xf32>
    %217 = vector.broadcast %216 : vector<1x10xf32> to vector<98x10xf32>
    %218 = arith.addf %215, %217 : vector<98x10xf32>
    %219 = vector.extract_strided_slice %218 {offsets = [0, 0], sizes = [1, 10], strides = [1, 1]} : vector<98x10xf32> to vector<1x10xf32>
    %c0_208 = arith.constant 0 : index
    %c0_209 = arith.constant 0 : index
    %220 = vector.load %arg11[%c0_208, %c0_209] : memref<2x10xf32, #tpu.memory_space<vmem>>, vector<1x10xf32>
    tpu.vector_store %arg11[%c0_208, %c0_209], %219 {strides = array<i32>} : memref<2x10xf32, #tpu.memory_space<vmem>>, vector<1x10xf32>,
    %221 = vector.extract_strided_slice %218 {offsets = [49, 0], sizes = [1, 10], strides = [1, 1]} : vector<98x10xf32> to vector<1x10xf32>
    %c1_210 = arith.constant 1 : index
    %c0_211 = arith.constant 0 : index
    %222 = vector.load %arg11[%c1_210, %c0_211] : memref<2x10xf32, #tpu.memory_space<vmem>>, vector<1x10xf32>
    tpu.vector_store %arg11[%c1_210, %c0_211], %221 {strides = array<i32>} : memref<2x10xf32, #tpu.memory_space<vmem>>, vector<1x10xf32>,
    return
  }
}

</mosaic_0001>

<bundles_post_ra>
// kernel: _lenet_forward.1
= control target key start
LH: loop header
LB: loop body
LE: loop exit
PB: predicated region body
PF: predicated region fallthrough
CT: control target
= control target key end

     0   :  { %s7566_s23 = smov 16   ;;  %s7567_s24 = smov 32   ;;  %s10269_s0 = inlined_call_operand.vmem [shape: f32[106,16], index: 0, kind: input, shape index: {}]   ;;  %s10270_s1 = inlined_call_operand.vmem [shape: bf16[16,64,6], index: 1, kind: input, shape index: {}]   ;;  %s10271_s2 = inlined_call_operand.vmem [shape: f32[1,6], index: 2, kind: input, shape index: {}]   ;;  %s10272_s3 = inlined_call_operand.vmem [shape: bf16[4,288,16], index: 3, kind: input, shape index: {}]   ;;  %s10273_s4 = inlined_call_operand.vmem [shape: f32[1,16], index: 4, kind: input, shape index: {}]   ;;  %s10274_s5 = inlined_call_operand.vmem [shape: bf16[256,120], index: 5, kind: input, shape index: {}]   ;;  %s10275_s6 = inlined_call_operand.vmem [shape: f32[1,120], index: 6, kind: input, shape index: {}]   ;;  %s10276_s7 = inlined_call_operand.vmem [shape: bf16[120,84], index: 7, kind: input, shape index: {}]   ;;  %s10277_s8 = inlined_call_operand.vmem [shape: f32[1,84], index: 8, kind: input, shape index: {}]   ;;  %s10278_s9 = inlined_call_operand.vmem [shape: bf16[84,10], index: 9, kind: input, shape index: {}]   ;;  %s10279_s10 = inlined_call_operand.vmem [shape: f32[1,10], index: 10, kind: input, shape index: {}]   ;;  %s10280_s11 = inlined_call_operand.hbm [shape: f32[2,10], index: 11, kind: output, shape index: {}]  }
   0x1   :  { %v144_v0 = vld [vmem:[%s10269_s0 + $0x1] sm:$0xff]  ;;  %v145_v6 = vld [vmem:[%s10269_s0 + $0x9] sm:$0xff]  ;;  %s7568_s29 = smov 48  }
   0x2   :  { %v237_v1 = vld [vmem:[%s10269_s0 + $0x7] sm:$0xff]  ;;  %v157_v2 = vpack.c.bf16 %v144_v0, %v144_v0  ;;  %v238_v7 = vld [vmem:[%s10269_s0 + $0xf] sm:$0xff] }
   0x3   :  { %v250_v3 = vpack.c.bf16 %v237_v1, %v237_v1  ;;  %v330_v4 = vld [vmem:[%s10269_s0 + $0x8] sm:$0xff]  ;;  %v331_v8 = vld [vmem:[%s10269_s0 + $0x10] sm:$0xff] }
   0x4   :  { %183 = vrot.lane.b32.xlu0 %v157_v2, %s7566_s23  ;;  %v7650_v5 = vpack.c.bf16 %v330_v4, %v330_v4 }
   0x5   :  { %276 = vrot.lane.b32.xlu1 %v250_v3, %s7567_s24 }
   0x6   :  { %369 = vrot.lane.b32.xlu2 %v7650_v5, %s7568_s29 }
   0x7   :  { %16 = vsyncpa [#allocation8], 0  ;;  %v158_v9 = vpack.c.bf16 %v145_v6, %v145_v6  ;;  %v251_v10 = vpack.c.bf16 %v238_v7, %v238_v7  ;;  %v7663_v11 = vpack.c.bf16 %v331_v8, %v331_v8  ;;  %v146_v12 = vld [vmem:[%s10269_s0 + $0x11] sm:$0xff]  ;;  %v147_v13 = vld [vmem:[%s10269_s0 + $0x19] sm:$0xff]  ;;  %vm129_vm0 = vcmask 125952   ;;  %s7570_s28 = smov 64  }
   0x8   :  { %v239_v14 = vld [vmem:[%s10269_s0 + $0x17] sm:$0xff]  ;;  %v159_v15 = vpack.c.bf16 %v146_v12, %v146_v12  ;;  %v160_v16 = vpack.c.bf16 %v147_v13, %v147_v13  ;;  %v240_v18 = vld [vmem:[%s10269_s0 + $0x1f] sm:$0xff]  ;;  %v149_v25 = vld [vmem:[%s10269_s0 + $0x29] sm:$0xff]  ;;  %131 = vst.msk [vmem:[#allocation4 + $0x4] sm:$0xf] %vm129_vm0, %v7650_v5  ;;  %vm222_vm1 = vcmask 257152  }
   0x9   :  { %v252_v17 = vpack.c.bf16 %v239_v14, %v239_v14  ;;  %v332_v19 = vld [vmem:[%s10269_s0 + $0x18] sm:$0xff]  ;;  %v333_v20 = vld [vmem:[%s10269_s0 + $0x20] sm:$0xff]  ;;  %v253_v21 = vpack.c.bf16 %v240_v18, %v240_v18  ;;  %v162_v28 = vpack.c.bf16 %v149_v25, %v149_v25  ;;  %v242_v30 = vld [vmem:[%s10269_s0 + $0x2f] sm:$0xff]  ;;  %132 = vst.msk [vmem:[#allocation4 + $0x8] sm:$0xf] %vm129_vm0, %v7663_v11  ;;  %vm315_vm2 = vcmask 388352  }
   0xa   :  { %v7690_v22 = vpack.c.bf16 %v332_v19, %v332_v19  ;;  %v7692_v23 = vpack.c.bf16 %v333_v20, %v333_v20  ;;  %v148_v24 = vld [vmem:[%s10269_s0 + $0x21] sm:$0xff]  ;;  %v335_v32 = vld [vmem:[%s10269_s0 + $0x30] sm:$0xff]  ;;  %v255_v33 = vpack.c.bf16 %v242_v30, %v242_v30  ;;  %v151_v37 = vld [vmem:[%s10269_s0 + $0x39] sm:$0xff]  ;;  %vm408_vm3 = vcmask 519552   ;;  %s7572_s25 = smov 6   ;;  %s7577_s16 = smov 80  }
   0xb   :  { %v241_v26 = vld [vmem:[%s10269_s0 + $0x27] sm:$0xff]  ;;  %v161_v27 = vpack.c.bf16 %v148_v24, %v148_v24  ;;  %v7722_v35 = vpack.c.bf16 %v335_v32, %v335_v32  ;;  %v150_v36 = vld [vmem:[%s10269_s0 + $0x31] sm:$0xff]  ;;  %v164_v40 = vpack.c.bf16 %v151_v37, %v151_v37  ;;  %v244_v42 = vld [vmem:[%s10269_s0 + $0x3f] sm:$0xff]  ;;  %vm502_vm4 = vcmask 523264   ;;  %s7578_s21 = smov [#allocation7]  }
   0xc   :  { %185 = vrot.lane.b32.xlu0 %v158_v9, %s7566_s23  ;;  %v254_v29 = vpack.c.bf16 %v241_v26, %v241_v26  ;;  %v334_v31 = vld [vmem:[%s10269_s0 + $0x28] sm:$0xff]  ;;  %v243_v38 = vld [vmem:[%s10269_s0 + $0x37] sm:$0xff]  ;;  %v163_v39 = vpack.c.bf16 %v150_v36, %v150_v36  ;;  %v337_v44 = vld [vmem:[%s10269_s0 + $0x40] sm:$0xff]  ;;  %v257_v45 = vpack.c.bf16 %v244_v42, %v244_v42  ;;  %133 = vst.msk [vmem:[#allocation4 + $0xc] sm:$0xf] %vm129_vm0, %v7690_v22  ;;  %vm142_vm5 = vcmask 122880  }
   0xd   :  { %278 = vrot.lane.b32.xlu1 %v251_v10, %s7567_s24  ;;  %v7720_v34 = vpack.c.bf16 %v334_v31, %v334_v31  ;;  %v256_v41 = vpack.c.bf16 %v243_v38, %v243_v38  ;;  %v336_v43 = vld [vmem:[%s10269_s0 + $0x38] sm:$0xff]  ;;  %v7750_v47 = vpack.c.bf16 %v337_v44, %v337_v44  ;;  %v152_v48 = vld [vmem:[%s10269_s0 + $0x41] sm:$0xff]  ;;  %v153_v49 = vld [vmem:[%s10269_s0 + $0x49] sm:$0xff]  ;;  %134 = vst.msk [vmem:[#allocation4 + $0x10] sm:$0xf] %vm129_vm0, %v7692_v23  ;;  %vm235_vm6 = vcmask 254080  }
   0xe   :  { %371 = vrot.lane.b32.xlu2 %v7663_v11, %s7568_s29  ;;  %v349_v46 = vpack.c.bf16 %v336_v43, %v336_v43  ;;  %v245_v50 = vld [vmem:[%s10269_s0 + $0x47] sm:$0xff]  ;;  %v165_v51 = vpack.c.bf16 %v152_v48, %v152_v48  ;;  %v166_v52 = vpack.c.bf16 %v153_v49, %v153_v49  ;;  %v246_v54 = vld [vmem:[%s10269_s0 + $0x4f] sm:$0xff]  ;;  %v155_v61 = vld [vmem:[%s10269_s0 + $0x59] sm:$0xff]  ;;  %136 = vst.msk [vmem:[#allocation4 + $0x18] sm:$0xf] %vm129_vm0, %v7722_v35  ;;  %vm328_vm7 = vcmask 385280  }
   0xf   :  { %v258_v53 = vpack.c.bf16 %v245_v50, %v245_v50  ;;  %v338_v55 = vld [vmem:[%s10269_s0 + $0x48] sm:$0xff]  ;;  %v339_v56 = vld [vmem:[%s10269_s0 + $0x50] sm:$0xff]  ;;  %v259_v57 = vpack.c.bf16 %v246_v54, %v246_v54  ;;  %v168_v0 = vpack.c.bf16 %v155_v61, %v155_v61  ;;  %v103_v2 = vld [vmem:[%s10269_s0] sm:$0xff]  ;;  %135 = vst.msk [vmem:[#allocation4 + $0x14] sm:$0xf] %vm129_vm0, %v7720_v34  ;;  %vm421_vm8 = vcmask 516480  }
  0x10   :  { %v351_v58 = vpack.c.bf16 %v338_v55, %v338_v55  ;;  %v352_v59 = vpack.c.bf16 %v339_v56, %v339_v56  ;;  %v154_v60 = vld [vmem:[%s10269_s0 + $0x51] sm:$0xff]  ;;  %v116_v3 = vpack.c.bf16 %v103_v2, %v103_v2  ;;  %v248_v4 = vld [vmem:[%s10269_s0 + $0x5f] sm:$0xff]  ;;  %137 = vst.msk [vmem:[#allocation4 + $0x1c] sm:$0xf] %vm129_vm0, %v349_v46  ;;  %v7328_v24 = vld [vmem:[%s10270_s1 + $0x8] sm:$0xff]  ;;  %vm40_vm9 = vcmask 195584  }
  0x11   :  { %v247_v62 = vld [vmem:[%s10269_s0 + $0x57] sm:$0xff]  ;;  %v167_v63 = vpack.c.bf16 %v154_v60, %v154_v60  ;;  %v341_v7 = vld [vmem:[%s10269_s0 + $0x60] sm:$0xff]  ;;  %v261_v8 = vpack.c.bf16 %v248_v4, %v248_v4  ;;  %138 = vst.msk [vmem:[#allocation4 + $0x20] sm:$0xf] %vm129_vm0, %v7750_v47  ;;  %v7332_v25 = vld [vmem:[%s10270_s1 + $0x28] sm:$0xff]  ;;  %vm863_vm10 = vcmask 48128  }
  0x12   :  { %v260_v1 = vpack.c.bf16 %v247_v62, %v247_v62  ;;  %v340_v6 = vld [vmem:[%s10269_s0 + $0x58] sm:$0xff]  ;;  %130 = vst.msk [vmem:[#allocation4] sm:$0xf] %vm129_vm0, %v116_v3  ;;  %v354_v10 = vpack.c.bf16 %v341_v7, %v341_v7  ;;  %v156_v14 = vld [vmem:[%s10269_s0 + $0x61] sm:$0x3]  ;;  %v7337_v18 = vld [vmem:[%s10270_s1 + $0x50] sm:$0xff] }
  0x13   :  { %v353_v9 = vpack.c.bf16 %v340_v6, %v340_v6  ;;  %v7330_v12 = vld [vmem:[%s10270_s1 + $0x18] sm:$0xff]  ;;  %v7341_v19 = vld [vmem:[%s10270_s1 + $0x70] sm:$0xff]  ;;  %139 = vst.msk [vmem:[#allocation4 + $0x24] sm:$0xf] %vm129_vm0, %v351_v58  ;;  %v169_v20 = vpack.c.bf16 %v156_v14, %v156_v14  ;;  %v7336_v26 = vld [vmem:[%s10270_s1 + $0x48] sm:$0xff]  ;;  %vm876_vm11 = vcmask 41984  }
  0x14   :  { %187 = vrot.lane.b32.xlu0 %v159_v15, %s7566_s23  ;;  %v7334_v13 = vld [vmem:[%s10270_s1 + $0x38] sm:$0xff]  ;;  %v249_v15 = vld [vmem:[%s10269_s0 + $0x67] sm:$0x3]  ;;  %528 = vmatpush.bf16.msra.mxu0 %v7330_v12  ;;  %140 = vst.msk [vmem:[#allocation4 + $0x28] sm:$0xf] %vm129_vm0, %v352_v59  ;;  %v7353_v50 = vld [vmem:[%s10270_s1 + $0xd0] sm:$0xff] }
  0x15   :  { %189 = vrot.lane.b32.xlu1 %v160_v16, %s7566_s23  ;;  %v7338_v5 = vld [vmem:[%s10270_s1 + $0x58] sm:$0xff]  ;;  %604 = vmatpush.bf16.msra.mxu1 %v7334_v13  ;;  %v7329_v16 = vld [vmem:[%s10270_s1 + $0x10] sm:$0xff]  ;;  %141 = vst.msk [vmem:[#allocation4 + $0x2c] sm:$0xf] %vm129_vm0, %v353_v9  ;;  %v7331_v30 = vld [vmem:[%s10270_s1 + $0x20] sm:$0xff]  ;;  %vm55_vm12 = vcmask 189440  }
  0x16   :  { %280 = vrot.lane.b32.xlu2 %v252_v17, %s7567_s24  ;;  %v7342_v11 = vld [vmem:[%s10270_s1 + $0x78] sm:$0xff]  ;;  %693 = vmatpush.bf16.msra.mxu2 %v7338_v5  ;;  %v7333_v17 = vld [vmem:[%s10270_s1 + $0x30] sm:$0xff]  ;;  %v7335_v31 = vld [vmem:[%s10270_s1 + $0x40] sm:$0xff]  ;;  %vm101_vm13 = vcmask 253952   ;;  %vm2225_vm14 = vcmask 188416   ;;  %vm2318_vm15 = vcmask 450816  }
  0x17   :  { %782 = vmatpush.bf16.msra.mxu3 %v7342_v11  ;;  %v7339_v32 = vld [vmem:[%s10270_s1 + $0x60] sm:$0xff]  ;;  %v7346_v36 = vld [vmem:[%s10270_s1 + $0x98] sm:$0xff]  ;;  %v7348_v12 = vld [vmem:[%s10270_s1 + $0xa8] sm:$0xff]  ;;  %s6128_s22 = sshll.u32 %s7578_s21, 4  ;;  %s6129_s22 = int_to_ptr.vmem [resolvable:$true] %s6128_s22 }
  0x18   :  { %529 = vmatpush.bf16.msra.mxu0 %v7329_v16  ;;  %v7350_v37 = vld [vmem:[%s10270_s1 + $0xb8] sm:$0xff] }
  0x19   :  { %605 = vmatpush.bf16.msra.mxu1 %v7333_v17 }
  0x1a   :  { %694 = vmatpush.bf16.msra.mxu2 %v7337_v18 }
  0x1b   :  { %783 = vmatpush.bf16.msra.mxu3 %v7341_v19 }
  0x1c   :  { %282 = vrot.lane.b32.xlu0 %v253_v21, %s7567_s24  ;;  %v262_v21 = vpack.c.bf16 %v249_v15, %v249_v15  ;;  %530 = vmatpush.bf16.msra.mxu0 %v7328_v24 }
  0x1d   :  { %373 = vrot.lane.b32.xlu1 %v7690_v22, %s7568_s29  ;;  %606 = vmatpush.bf16.msra.mxu1 %v7332_v25  ;;  %v7351_v25 = vld [vmem:[%s10270_s1 + $0xc0] sm:$0xff] }
  0x1e   :  { %375 = vrot.lane.b32.xlu2 %v7692_v23, %s7568_s29  ;;  %v342_v23 = vld [vmem:[%s10269_s0 + $0x68] sm:$0x3]  ;;  %695 = vmatpush.bf16.msra.mxu2 %v7336_v26  ;;  %v7355_v26 = vld [vmem:[%s10270_s1 + $0xe0] sm:$0xff] }
  0x21   :  { %607 = vmatpush.bf16.msra.mxu1 %v7331_v30 }
  0x22   :  { %696 = vmatpush.bf16.msra.mxu2 %v7335_v31 }
  0x24   :  { %191 = vrot.lane.b32.xlu0 %v161_v27, %s7566_s23  ;;  %v355_v27 = vpack.c.bf16 %v342_v23, %v342_v23 }
  0x25   :  { %193 = vrot.lane.b32.xlu1 %v162_v28, %s7566_s23  ;;  %v7340_v28 = vld [vmem:[%s10270_s1 + $0x68] sm:$0xff]  ;;  %991 = vmatpush.bf16.msrb.mxu1 %v7350_v37 }
  0x26   :  { %284 = vrot.lane.b32.xlu2 %v254_v29, %s7567_s24  ;;  %v7327_v29 = vld [vmem:[%s10270_s1] sm:$0xff]  ;;  %784 = vmatpush.bf16.msra.mxu3 %v7340_v28 }
  0x27   :  { %531 = vmatpush.bf16.msra.mxu0 %v7327_v29  ;;  %v7347_v28 = vld [vmem:[%s10270_s1 + $0xa0] sm:$0xff] }
  0x2a   :  { %785 = vmatpush.bf16.msra.mxu3 %v7339_v32 }
  0x2b   :  { %915 = vmatpush.bf16.msrb.mxu0 %v7346_v36 }
  0x2c   :  { %286 = vrot.lane.b32.xlu0 %v255_v33, %s7567_s24 }
  0x2d   :  { %377 = vrot.lane.b32.xlu1 %v7720_v34, %s7568_s29  ;;  %v7354_v34 = vld [vmem:[%s10270_s1 + $0xd8] sm:$0xff] }
  0x2e   :  { %379 = vrot.lane.b32.xlu2 %v7722_v35, %s7568_s29  ;;  %v7358_v35 = vld [vmem:[%s10270_s1 + $0xf8] sm:$0xff]  ;;  %1080 = vmatpush.bf16.msrb.mxu2 %v7354_v34 }
  0x2f   :  { %1169 = vmatpush.bf16.msrb.mxu3 %v7358_v35 }
  0x32   :  { %1081 = vmatpush.bf16.msrb.mxu2 %v7353_v50 }
  0x34   :  { %195 = vrot.lane.b32.xlu0 %v163_v39, %s7566_s23 }
  0x35   :  { %197 = vrot.lane.b32.xlu1 %v164_v40, %s7566_s23 }
  0x36   :  { %288 = vrot.lane.b32.xlu2 %v256_v41, %s7567_s24 }
  0x3c   :  { %290 = vrot.lane.b32.xlu0 %v257_v45, %s7567_s24 }
  0x3d   :  { %381 = vrot.lane.b32.xlu1 %v349_v46, %s7568_s29 }
  0x3e   :  { %383 = vrot.lane.b32.xlu2 %v7750_v47, %s7568_s29 }
  0x44   :  { %199 = vrot.lane.b32.xlu0 %v165_v51, %s7566_s23  ;;  %v7357_v51 = vld [vmem:[%s10270_s1 + $0xf0] sm:$0xff] }
  0x45   :  { %201 = vrot.lane.b32.xlu1 %v166_v52, %s7566_s23  ;;  %v7345_v52 = vld [vmem:[%s10270_s1 + $0x90] sm:$0xff]  ;;  %1170 = vmatpush.bf16.msrb.mxu3 %v7357_v51  ;;  %v10281_v51 = vmov 0.0  }
  0x46   :  { %292 = vrot.lane.b32.xlu2 %v258_v53, %s7567_s24  ;;  %v7349_v53 = vld [vmem:[%s10270_s1 + $0xb0] sm:$0xff]  ;;  %916 = vmatpush.bf16.msrb.mxu0 %v7345_v52  ;;  %53 = vst.msk [vmem:[#allocation2 + $0x60] sm:$0xff] %vm40_vm9, %v10281_v51 }
  0x47   :  { %992 = vmatpush.bf16.msrb.mxu1 %v7349_v53  ;;  %54 = vst.msk [vmem:[#allocation2 + $0x68] sm:$0xff] %vm40_vm9, %v10281_v51  ;;  %v7369_v52 = vld [vmem:[%s10270_s1 + $0x150] sm:$0xff] }
  0x48   :  { %41 = vst.msk [vmem:[#allocation2] sm:$0xff] %vm40_vm9, %v10281_v51  ;;  %v7373_v53 = vld [vmem:[%s10270_s1 + $0x170] sm:$0xff] }
  0x49   :  { %42 = vst.msk [vmem:[#allocation2 + $0x8] sm:$0xff] %vm40_vm9, %v10281_v51 }
  0x4a   :  { %43 = vst.msk [vmem:[#allocation2 + $0x10] sm:$0xff] %vm40_vm9, %v10281_v51 }
  0x4b   :  { %993 = vmatpush.bf16.msrb.mxu1 %v7348_v12  ;;  %44 = vst.msk [vmem:[#allocation2 + $0x18] sm:$0xff] %vm40_vm9, %v10281_v51 }
  0x4c   :  { %294 = vrot.lane.b32.xlu0 %v259_v57, %s7567_s24  ;;  %45 = vst.msk [vmem:[#allocation2 + $0x20] sm:$0xff] %vm40_vm9, %v10281_v51 }
  0x4d   :  { %385 = vrot.lane.b32.xlu1 %v351_v58, %s7568_s29  ;;  %46 = vst.msk [vmem:[#allocation2 + $0x28] sm:$0xff] %vm40_vm9, %v10281_v51 }
  0x4e   :  { %387 = vrot.lane.b32.xlu2 %v352_v59, %s7568_s29  ;;  %47 = vst.msk [vmem:[#allocation2 + $0x30] sm:$0xff] %vm40_vm9, %v10281_v51 }
  0x4f   :  { %994 = vmatpush.bf16.msrb.mxu1 %v7347_v28  ;;  %48 = vst.msk [vmem:[#allocation2 + $0x38] sm:$0xff] %vm40_vm9, %v10281_v51 }
  0x50   :  { %49 = vst.msk [vmem:[#allocation2 + $0x40] sm:$0xff] %vm40_vm9, %v10281_v51 }
  0x51   :  { %50 = vst.msk [vmem:[#allocation2 + $0x48] sm:$0xff] %vm40_vm9, %v10281_v51 }
  0x52   :  { %51 = vst.msk [vmem:[#allocation2 + $0x50] sm:$0xff] %vm40_vm9, %v10281_v51 }
  0x53   :  { %52 = vst.msk [vmem:[#allocation2 + $0x58] sm:$0xff] %vm40_vm9, %v10281_v51  ;;  %vm2411_vm9 = vcmask 713216  }
  0x54   :  { %203 = vrot.lane.b32.xlu0 %v167_v63, %s7566_s23  ;;  %56 = vst.msk [vmem:[#allocation2 + $0x70] sm:$0x3] %vm55_vm12, %v10281_v51  ;;  %vm76_vm12 = vcmask 257024  }
  0x55   :  { %205 = vrot.lane.b32.xlu1 %v168_v0, %s7566_s23 }
  0x56   :  { %296 = vrot.lane.b32.xlu2 %v260_v1, %s7567_s24 }
  0x5c   :  { %298 = vrot.lane.b32.xlu0 %v261_v8, %s7567_s24  ;;  %v7352_v8 = vld [vmem:[%s10270_s1 + $0xc8] sm:$0xff] }
  0x5d   :  { %389 = vrot.lane.b32.xlu1 %v353_v9, %s7568_s29  ;;  %v7356_v9 = vld [vmem:[%s10270_s1 + $0xe8] sm:$0xff]  ;;  %1082 = vmatpush.bf16.msrb.mxu2 %v7352_v8 }
  0x5e   :  { %391 = vrot.lane.b32.xlu2 %v354_v10, %s7568_s29  ;;  %v7344_v10 = vld [vmem:[%s10270_s1 + $0x88] sm:$0xff]  ;;  %1171 = vmatpush.bf16.msrb.mxu3 %v7356_v9 }
  0x5f   :  { %917 = vmatpush.bf16.msrb.mxu0 %v7344_v10  ;;  %v7368_v8 = vld [vmem:[%s10270_s1 + $0x148] sm:$0xff] }
  0x60   :  { %v370_v22 = vpop.permute.xlu2 %369  ;;  %v7372_v9 = vld [vmem:[%s10270_s1 + $0x168] sm:$0xff] }
  0x61   :  { %1083 = vmatpush.bf16.msrb.mxu2 %v7351_v25 }
  0x62   :  { %1172 = vmatpush.bf16.msrb.mxu3 %v7355_v26 }
  0x64   :  { %207 = vrot.lane.b32.xlu0 %v169_v20, %s7566_s23  ;;  %v115_v20 = vld [vmem:[%s10269_s0 + $0x60] sm:$0x3]  ;;  %s7571_s0 = smov 96  }
  0x65   :  { %300 = vrot.lane.b32.xlu1 %v262_v21, %s7567_s24  ;;  %v128_v21 = vpack.c.bf16 %v115_v20, %v115_v20  ;;  %v7364_v20 = vld [vmem:[%s10270_s1 + $0x128] sm:$0xff] }
  0x66   :  { %393 = vrot.lane.b32.xlu2 %v355_v27, %s7568_s29  ;;  %v7343_v27 = vld [vmem:[%s10270_s1 + $0x80] sm:$0xff] }
  0x67   :  { %143 = vst.msk [vmem:[#allocation4 + $0x30] sm:$0x1] %vm142_vm5, %v128_v21  ;;  %918 = vmatpush.bf16.msrb.mxu0 %v7343_v27 }
  0x68   :  { %v372_v33 = vpop.permute.xlu2 %371 }
  0x70   :  { %v281_v38 = vpop.permute.xlu2 %280 }
  0x76   :  { %v184_v39 = vpop.permute.xlu0 %183 }
  0x77   :  { %v277_v40 = vpop.permute.xlu1 %276  ;;  %223 = vst.msk [vmem:[#allocation4] sm:$0xf] %vm222_vm1, %v184_v39 }
  0x78   :  { %316 = vst.msk [vmem:[#allocation4] sm:$0xf] %vm315_vm2, %v277_v40  ;;  %v376_v41 = vpop.permute.xlu2 %375 }
  0x79   :  { %409 = vst.msk [vmem:[#allocation4] sm:$0xf] %vm408_vm3, %v370_v22 }
  0x7e   :  { %v186_v42 = vpop.permute.xlu0 %185 }
  0x7f   :  { %v279_v43 = vpop.permute.xlu1 %278  ;;  %224 = vst.msk [vmem:[#allocation4 + $0x4] sm:$0xf] %vm222_vm1, %v186_v42 }
  0x80   :  { %317 = vst.msk [vmem:[#allocation4 + $0x4] sm:$0xf] %vm315_vm2, %v279_v43  ;;  %v285_v46 = vpop.permute.xlu2 %284  ;;  %v6141_v47 = vld [vmem:[#allocation4] sm:$0xf] }
  0x81   :  { %410 = vst.msk [vmem:[#allocation4 + $0x4] sm:$0xf] %vm408_vm3, %v372_v33  ;;  %v7370_v43 = vld [vmem:[%s10270_s1 + $0x158] sm:$0xff] }
  0x86   :  { %v188_v44 = vpop.permute.xlu0 %187 }
  0x87   :  { %v190_v45 = vpop.permute.xlu1 %189  ;;  %225 = vst.msk [vmem:[#allocation4 + $0x8] sm:$0xf] %vm222_vm1, %v188_v44  ;;  %v7374_v44 = vld [vmem:[%s10270_s1 + $0x178] sm:$0xff] }
  0x88   :  { %v7321_v48 = vld [vmem:[#allocation4] sm:$0xf0]  ;;  %318 = vst.msk [vmem:[#allocation4 + $0x8] sm:$0xf] %vm315_vm2, %v281_v38  ;;  %v380_v56 = vpop.permute.xlu2 %379 }
  0x89   :  { %v7906_v49 = vor.u32 %v7321_v48, %v6141_v47  ;;  %226 = vst.msk [vmem:[#allocation4 + $0xc] sm:$0xf] %vm222_vm1, %v190_v45  ;;  %v7362_v45 = vld [vmem:[%s10270_s1 + $0x118] sm:$0xff] }
  0x8b   :  { %6179 = vmatmul.msk.bf16.vlgmr.msra.gmra.mxu0 %vm502_vm4, %v7906_v49  ;;  %6210 = vmatmul.msk.bf16.vlgmr.msra.gmra.mxu1 %vm502_vm4, %v7906_v49 }
  0x8c   :  { %6241 = vmatmul.msk.bf16.vlgmr.msra.gmra.mxu2 %vm502_vm4, %v7906_v49  ;;  %6272 = vmatmul.msk.bf16.vlgmr.msra.gmra.mxu3 %vm502_vm4, %v7906_v49 }
  0x8d   :  { %1516 = vmatpush.bf16.msra.mxu2 %v7370_v43  ;;  %1605 = vmatpush.bf16.msra.mxu3 %v7374_v44 }
  0x8e   :  { %v283_v54 = vpop.permute.xlu0 %282  ;;  %1351 = vmatpush.bf16.msra.mxu0 %v7362_v45 }
  0x8f   :  { %v374_v55 = vpop.permute.xlu1 %373  ;;  %319 = vst.msk [vmem:[#allocation4 + $0xc] sm:$0xf] %vm315_vm2, %v283_v54  ;;  %v7361_v54 = vld [vmem:[%s10270_s1 + $0x110] sm:$0xff] }
  0x90   :  { %412 = vst.msk [vmem:[#allocation4 + $0xc] sm:$0xf] %vm408_vm3, %v376_v41  ;;  %v289_v62 = vpop.permute.xlu2 %288 }
  0x91   :  { %411 = vst.msk [vmem:[#allocation4 + $0x8] sm:$0xf] %vm408_vm3, %v374_v55  ;;  %v7365_v55 = vld [vmem:[%s10270_s1 + $0x130] sm:$0xff]  ;;  %1517 = vmatpush.bf16.msra.mxu2 %v7369_v52  ;;  %1606 = vmatpush.bf16.msra.mxu3 %v7373_v53  ;;  %v7367_v53 = vld [vmem:[%s10270_s1 + $0x140] sm:$0xff] }
  0x92   :  { %1352 = vmatpush.bf16.msra.mxu0 %v7361_v54  ;;  %v7371_v54 = vld [vmem:[%s10270_s1 + $0x160] sm:$0xff] }
  0x95   :  { %1518 = vmatpush.bf16.msra.mxu2 %v7368_v8  ;;  %1607 = vmatpush.bf16.msra.mxu3 %v7372_v9 }
  0x96   :  { %v192_v57 = vpop.permute.xlu0 %191 }
  0x97   :  { %v194_v58 = vpop.permute.xlu1 %193  ;;  %v7322_v59 = vld [vmem:[#allocation4 + $0x8] sm:$0xf0]  ;;  %227 = vst.msk [vmem:[#allocation4 + $0x10] sm:$0xf] %vm222_vm1, %v192_v57 }
  0x98   :  { %v6145_v60 = vld [vmem:[#allocation4 + $0x8] sm:$0xf]  ;;  %320 = vst.msk [vmem:[#allocation4 + $0x10] sm:$0xf] %vm315_vm2, %v285_v46  ;;  %v384_v1 = vpop.permute.xlu2 %383  ;;  %v7366_v46 = vld [vmem:[%s10270_s1 + $0x138] sm:$0xff] }
  0x99   :  { %v7934_v61 = vor.u32 %v7322_v59, %v6145_v60  ;;  %228 = vst.msk [vmem:[#allocation4 + $0x14] sm:$0xf] %vm222_vm1, %v194_v58  ;;  %1427 = vmatpush.bf16.msra.mxu1 %v7366_v46  ;;  %1519 = vmatpush.bf16.msra.mxu2 %v7367_v53 }
  0x9a   :  { %1608 = vmatpush.bf16.msra.mxu3 %v7371_v54 }
  0x9b   :  { %6180 = vmatmul.msk.bf16.gmra.mxu0 %vm502_vm4, %v7934_v61  ;;  %6211 = vmatmul.msk.bf16.gmra.mxu1 %vm502_vm4, %v7934_v61 }
  0x9c   :  { %6242 = vmatmul.msk.bf16.gmra.mxu2 %vm502_vm4, %v7934_v61  ;;  %6273 = vmatmul.msk.bf16.gmra.mxu3 %vm502_vm4, %v7934_v61 }
  0x9d   :  { %1428 = vmatpush.bf16.msra.mxu1 %v7365_v55  ;;  %v7359_v55 = vld [vmem:[%s10270_s1 + $0x100] sm:$0xff] }
  0x9e   :  { %v287_v63 = vpop.permute.xlu0 %286 }
  0x9f   :  { %v378_v0 = vpop.permute.xlu1 %377  ;;  %321 = vst.msk [vmem:[#allocation4 + $0x14] sm:$0xf] %vm315_vm2, %v287_v63  ;;  %v8118_v63 = vld [vmem:[%s10271_s2] ss:$0 sm:$0xff] }
  0xa0   :  { %414 = vst.msk [vmem:[#allocation4 + $0x14] sm:$0xf] %vm408_vm3, %v380_v56  ;;  %v293_v11 = vpop.permute.xlu2 %292 }
  0xa1   :  { %413 = vst.msk [vmem:[#allocation4 + $0x10] sm:$0xf] %vm408_vm3, %v378_v0  ;;  %1429 = vmatpush.bf16.msra.mxu1 %v7364_v20 }
  0xa6   :  { %v196_v2 = vpop.permute.xlu0 %195 }
  0xa7   :  { %v198_v3 = vpop.permute.xlu1 %197  ;;  %v7323_v4 = vld [vmem:[#allocation4 + $0x10] sm:$0xf0]  ;;  %229 = vst.msk [vmem:[#allocation4 + $0x18] sm:$0xf] %vm222_vm1, %v196_v2 }
  0xa8   :  { %v6149_v6 = vld [vmem:[#allocation4 + $0x10] sm:$0xf]  ;;  %322 = vst.msk [vmem:[#allocation4 + $0x18] sm:$0xf] %vm315_vm2, %v289_v62  ;;  %v388_v19 = vpop.permute.xlu2 %387 }
  0xa9   :  { %v7950_v7 = vor.u32 %v7323_v4, %v6149_v6  ;;  %230 = vst.msk [vmem:[#allocation4 + $0x1c] sm:$0xf] %vm222_vm1, %v198_v3 }
  0xab   :  { %6181 = vmatmul.msk.bf16.gmra.mxu0 %vm502_vm4, %v7950_v7  ;;  %6212 = vmatmul.msk.bf16.gmra.mxu1 %vm502_vm4, %v7950_v7 }
  0xac   :  { %6243 = vmatmul.msk.bf16.gmra.mxu2 %vm502_vm4, %v7950_v7  ;;  %6274 = vmatmul.msk.bf16.gmra.mxu3 %vm502_vm4, %v7950_v7 }
  0xae   :  { %v291_v13 = vpop.permute.xlu0 %290 }
  0xaf   :  { %v382_v5 = vpop.permute.xlu1 %381  ;;  %323 = vst.msk [vmem:[#allocation4 + $0x1c] sm:$0xf] %vm315_vm2, %v291_v13 }
  0xb0   :  { %416 = vst.msk [vmem:[#allocation4 + $0x1c] sm:$0xf] %vm408_vm3, %v384_v1  ;;  %v297_v24 = vpop.permute.xlu2 %296 }
  0xb1   :  { %415 = vst.msk [vmem:[#allocation4 + $0x18] sm:$0xf] %vm408_vm3, %v382_v5 }
  0xb6   :  { %v200_v14 = vpop.permute.xlu0 %199 }
  0xb7   :  { %v202_v15 = vpop.permute.xlu1 %201  ;;  %v7324_v16 = vld [vmem:[#allocation4 + $0x18] sm:$0xf0]  ;;  %231 = vst.msk [vmem:[#allocation4 + $0x20] sm:$0xf] %vm222_vm1, %v200_v14 }
  0xb8   :  { %v6153_v17 = vld [vmem:[#allocation4 + $0x18] sm:$0xf]  ;;  %324 = vst.msk [vmem:[#allocation4 + $0x20] sm:$0xf] %vm315_vm2, %v293_v11  ;;  %v392_v34 = vpop.permute.xlu2 %391 }
  0xb9   :  { %v7978_v18 = vor.u32 %v7324_v16, %v6153_v17  ;;  %232 = vst.msk [vmem:[#allocation4 + $0x24] sm:$0xf] %vm222_vm1, %v202_v15 }
  0xbb   :  { %6182 = vmatmul.msk.bf16.gmra.mxu0 %vm502_vm4, %v7978_v18  ;;  %6213 = vmatmul.msk.bf16.gmra.mxu1 %vm502_vm4, %v7978_v18 }
  0xbc   :  { %6244 = vmatmul.msk.bf16.gmra.mxu2 %vm502_vm4, %v7978_v18  ;;  %6275 = vmatmul.msk.bf16.gmra.mxu3 %vm502_vm4, %v7978_v18 }
  0xbe   :  { %v295_v22 = vpop.permute.xlu0 %294 }
  0xbf   :  { %v386_v23 = vpop.permute.xlu1 %385  ;;  %325 = vst.msk [vmem:[#allocation4 + $0x24] sm:$0xf] %vm315_vm2, %v295_v22 }
  0xc0   :  { %418 = vst.msk [vmem:[#allocation4 + $0x24] sm:$0xf] %vm408_vm3, %v388_v19  ;;  %v394_v37 = vpop.permute.xlu2 %393  ;;  %v7360_v19 = vld [vmem:[%s10270_s1 + $0x108] sm:$0xff] }
  0xc1   :  { %417 = vst.msk [vmem:[#allocation4 + $0x20] sm:$0xf] %vm408_vm3, %v386_v23  ;;  %1353 = vmatpush.bf16.msra.mxu0 %v7360_v19 }
  0xc5   :  { %1354 = vmatpush.bf16.msra.mxu0 %v7359_v55 }
  0xc6   :  { %v204_v29 = vpop.permute.xlu0 %203 }
  0xc7   :  { %v206_v30 = vpop.permute.xlu1 %205  ;;  %v7325_v31 = vld [vmem:[#allocation4 + $0x20] sm:$0xf0]  ;;  %233 = vst.msk [vmem:[#allocation4 + $0x28] sm:$0xf] %vm222_vm1, %v204_v29 }
  0xc8   :  { %v6157_v32 = vld [vmem:[#allocation4 + $0x20] sm:$0xf]  ;;  %326 = vst.msk [vmem:[#allocation4 + $0x28] sm:$0xf] %vm315_vm2, %v297_v24 }
  0xc9   :  { %v8010_v33 = vor.u32 %v7325_v31, %v6157_v32  ;;  %234 = vst.msk [vmem:[#allocation4 + $0x2c] sm:$0xf] %vm222_vm1, %v206_v30 }
  0xcb   :  { %6183 = vmatmul.msk.bf16.gmra.mxu0 %vm502_vm4, %v8010_v33  ;;  %6214 = vmatmul.msk.bf16.gmra.mxu1 %vm502_vm4, %v8010_v33 }
  0xcc   :  { %6245 = vmatmul.msk.bf16.gmra.mxu2 %vm502_vm4, %v8010_v33  ;;  %6276 = vmatmul.msk.bf16.gmra.mxu3 %vm502_vm4, %v8010_v33 }
  0xce   :  { %v299_v35 = vpop.permute.xlu0 %298 }
  0xcf   :  { %v390_v36 = vpop.permute.xlu1 %389  ;;  %327 = vst.msk [vmem:[#allocation4 + $0x2c] sm:$0xf] %vm315_vm2, %v299_v35 }
  0xd0   :  { %420 = vst.msk [vmem:[#allocation4 + $0x2c] sm:$0xf] %vm408_vm3, %v392_v34 }
  0xd1   :  { %419 = vst.msk [vmem:[#allocation4 + $0x28] sm:$0xf] %vm408_vm3, %v390_v36 }
  0xd6   :  { %v208_v38 = vpop.permute.xlu0 %207 }
  0xd7   :  { %v301_v39 = vpop.permute.xlu1 %300  ;;  %v7326_v40 = vld [vmem:[#allocation4 + $0x28] sm:$0xf0]  ;;  %236 = vst.msk [vmem:[#allocation4 + $0x30] sm:$0x1] %vm235_vm6, %v208_v38 }
  0xd8   :  { %v6161_v41 = vld [vmem:[#allocation4 + $0x28] sm:$0xf]  ;;  %329 = vst.msk [vmem:[#allocation4 + $0x30] sm:$0x1] %vm328_vm7, %v301_v39 }
  0xd9   :  { %v8026_v42 = vor.u32 %v7326_v40, %v6161_v41  ;;  %422 = vst.msk [vmem:[#allocation4 + $0x30] sm:$0x1] %vm421_vm8, %v394_v37 }
  0xdb   :  { %6184 = vmatmul.msk.bf16.gmra.mxu0 %vm502_vm4, %v8026_v42  ;;  %6215 = vmatmul.msk.bf16.gmra.mxu1 %vm502_vm4, %v8026_v42 }
  0xdc   :  { %6246 = vmatmul.msk.bf16.gmra.mxu2 %vm502_vm4, %v8026_v42  ;;  %6277 = vmatmul.msk.bf16.gmra.mxu3 %vm502_vm4, %v8026_v42 }
  0xe0   :  { %v435_v47 = vld [vmem:[#allocation4 + $0x30] sm:$0x1] }
  0xe1   :  { %v470_v48 = vunpack.c.l.b16 %v435_v47 }
  0xe3   :  { %v8049_v50 = vpack.c.b16 %v470_v48, %v470_v48 }
  0xeb   :  { %6185 = vmatmul.msk.bf16.gmra.mxu0 %vm502_vm4, %v8049_v50  ;;  %6216 = vmatmul.msk.bf16.gmra.mxu1 %vm502_vm4, %v8049_v50 }
  0xec   :  { %6247 = vmatmul.msk.bf16.gmra.mxu2 %vm502_vm4, %v8049_v50  ;;  %6278 = vmatmul.msk.bf16.gmra.mxu3 %vm502_vm4, %v8049_v50 }
  0xfb   :  { %6303 = vmatmul.msk.bf16.vlgmr.msrb.gmra.mxu0 %vm502_vm4, %v7906_v49  ;;  %6334 = vmatmul.msk.bf16.vlgmr.msrb.gmra.mxu1 %vm502_vm4, %v7906_v49 }
  0xfc   :  { %6365 = vmatmul.msk.bf16.vlgmr.msrb.gmra.mxu2 %vm502_vm4, %v7906_v49  ;;  %6396 = vmatmul.msk.bf16.vlgmr.msrb.gmra.mxu3 %vm502_vm4, %v7906_v49 }
 0x108   :  { %v533_v56 = vpop.f32.mrf.mxu0  ;;  %v609_v57 = vpop.f32.mrf.mxu1 }
 0x109   :  { %v643_v58 = vmax.f32 %v533_v56, %v609_v57 }
 0x10b   :  { %6304 = vmatmul.msk.bf16.gmra.mxu0 %vm502_vm4, %v7934_v61  ;;  %6335 = vmatmul.msk.bf16.gmra.mxu1 %vm502_vm4, %v7934_v61 }
 0x10c   :  { %6366 = vmatmul.msk.bf16.gmra.mxu2 %vm502_vm4, %v7934_v61  ;;  %6397 = vmatmul.msk.bf16.gmra.mxu3 %vm502_vm4, %v7934_v61 }
 0x10f   :  { %v698_v59 = vpop.f32.mrf.mxu2  ;;  %v787_v60 = vpop.f32.mrf.mxu3 }
 0x110   :  { %v732_v62 = vmax.f32 %v643_v58, %v698_v59  ;;  %v535_v0 = vpop.f32.mrf.mxu0  ;;  %v611_v1 = vpop.f32.mrf.mxu1  ;;  %v7363_v58 = vld [vmem:[%s10270_s1 + $0x120] sm:$0xff] }
 0x111   :  { %v644_v6 = vmax.f32 %v535_v0, %v611_v1  ;;  %1430 = vmatpush.bf16.msra.mxu1 %v7363_v58 }
 0x112   :  { %v821_v2 = vmax.f32 %v732_v62, %v787_v60 }
 0x114   :  { %v837_v3 = vadd.f32 %v8118_v63, %v821_v2 }
 0x116   :  { %v850_v4 = vmax.f32 %v837_v3, 0.0 }
 0x117   :  { %v700_v10 = vpop.f32.mrf.mxu2  ;;  %v789_v12 = vpop.f32.mrf.mxu3 }
 0x118   :  { %v733_v13 = vmax.f32 %v644_v6, %v700_v10  ;;  %v538_v5 = vpop.f32.mrf.mxu0  ;;  %v614_v11 = vpop.f32.mrf.mxu1  ;;  %864 = vst.msk [vmem:[#allocation2] sm:$0xff] %vm863_vm10, %v850_v4 }
 0x119   :  { %v645_v17 = vmax.f32 %v538_v5, %v614_v11 }
 0x11a   :  { %v822_v14 = vmax.f32 %v733_v13, %v789_v12 }
 0x11b   :  { %6305 = vmatmul.msk.bf16.gmra.mxu0 %vm502_vm4, %v7950_v7  ;;  %6336 = vmatmul.msk.bf16.gmra.mxu1 %vm502_vm4, %v7950_v7 }
 0x11c   :  { %v838_v15 = vadd.f32 %v8118_v63, %v822_v14  ;;  %6367 = vmatmul.msk.bf16.gmra.mxu2 %vm502_vm4, %v7950_v7  ;;  %6398 = vmatmul.msk.bf16.gmra.mxu3 %vm502_vm4, %v7950_v7 }
 0x11e   :  { %v851_v16 = vmax.f32 %v838_v15, 0.0 }
 0x11f   :  { %v703_v21 = vpop.f32.mrf.mxu2  ;;  %v792_v22 = vpop.f32.mrf.mxu3 }
 0x120   :  { %v734_v23 = vmax.f32 %v645_v17, %v703_v21  ;;  %v540_v24 = vpop.f32.mrf.mxu0  ;;  %v616_v25 = vpop.f32.mrf.mxu1  ;;  %865 = vst.msk [vmem:[#allocation2 + $0x8] sm:$0xff] %vm863_vm10, %v851_v16 }
 0x121   :  { %v646_v29 = vmax.f32 %v540_v24, %v616_v25  ;;  %v7386_v24 = vld [vmem:[%s10270_s1 + $0x1d8] sm:$0xff] }
 0x122   :  { %v823_v26 = vmax.f32 %v734_v23, %v792_v22  ;;  %v7390_v25 = vld [vmem:[%s10270_s1 + $0x1f8] sm:$0xff]  ;;  %1952 = vmatpush.bf16.msrb.mxu2 %v7386_v24 }
 0x123   :  { %2041 = vmatpush.bf16.msrb.mxu3 %v7390_v25 }
 0x124   :  { %v839_v27 = vadd.f32 %v8118_v63, %v823_v26 }
 0x126   :  { %v852_v28 = vmax.f32 %v839_v27, 0.0 }
 0x127   :  { %v705_v30 = vpop.f32.mrf.mxu2  ;;  %v794_v31 = vpop.f32.mrf.mxu3 }
 0x128   :  { %v735_v32 = vmax.f32 %v646_v29, %v705_v30  ;;  %v543_v34 = vpop.f32.mrf.mxu0  ;;  %v619_v35 = vpop.f32.mrf.mxu1  ;;  %866 = vst.msk [vmem:[#allocation2 + $0x10] sm:$0xff] %vm863_vm10, %v852_v28 }
 0x129   :  { %v647_v39 = vmax.f32 %v543_v34, %v619_v35  ;;  %v2647_v34 = vld [vmem:[#allocation2 + $0x66] sm:$0xff] }
 0x12a   :  { %v824_v36 = vmax.f32 %v735_v32, %v794_v31 }
 0x12b   :  { %6306 = vmatmul.msk.bf16.gmra.mxu0 %vm502_vm4, %v7978_v18  ;;  %6337 = vmatmul.msk.bf16.gmra.mxu1 %vm502_vm4, %v7978_v18 }
 0x12c   :  { %v840_v37 = vadd.f32 %v8118_v63, %v824_v36  ;;  %6368 = vmatmul.msk.bf16.gmra.mxu2 %vm502_vm4, %v7978_v18  ;;  %6399 = vmatmul.msk.bf16.gmra.mxu3 %vm502_vm4, %v7978_v18 }
 0x12e   :  { %v853_v38 = vmax.f32 %v840_v37, 0.0  ;;  %v7378_v37 = vld [vmem:[%s10270_s1 + $0x198] sm:$0xff] }
 0x12f   :  { %v708_v40 = vpop.f32.mrf.mxu2  ;;  %v797_v41 = vpop.f32.mrf.mxu3  ;;  %1787 = vmatpush.bf16.msrb.mxu0 %v7378_v37 }
 0x130   :  { %v736_v43 = vmax.f32 %v647_v39, %v708_v40  ;;  %v545_v44 = vpop.f32.mrf.mxu0  ;;  %v621_v45 = vpop.f32.mrf.mxu1  ;;  %867 = vst.msk [vmem:[#allocation2 + $0x18] sm:$0xff] %vm863_vm10, %v853_v38  ;;  %v7382_v38 = vld [vmem:[%s10270_s1 + $0x1b8] sm:$0xff]  ;;  %v2660_v39 = vpack.c.bf16 %v2647_v34, %v2647_v34 }
 0x131   :  { %v648_v52 = vmax.f32 %v545_v44, %v621_v45  ;;  %1863 = vmatpush.bf16.msrb.mxu1 %v7382_v38 }
 0x132   :  { %v825_v46 = vmax.f32 %v736_v43, %v797_v41  ;;  %2697 = vrot.lane.b32.xlu0 %v2660_v39, %s7570_s28 }
 0x134   :  { %v841_v47 = vadd.f32 %v8118_v63, %v825_v46 }
 0x136   :  { %v854_v48 = vmax.f32 %v841_v47, 0.0 }
 0x137   :  { %v710_v56 = vpop.f32.mrf.mxu2  ;;  %v799_v57 = vpop.f32.mrf.mxu3 }
 0x138   :  { %v737_v59 = vmax.f32 %v648_v52, %v710_v56  ;;  %v548_v60 = vpop.f32.mrf.mxu0  ;;  %v624_v62 = vpop.f32.mrf.mxu1  ;;  %868 = vst.msk [vmem:[#allocation2 + $0x20] sm:$0xff] %vm863_vm10, %v854_v48  ;;  %v2557_v48 = vld [vmem:[#allocation2 + $0x69] sm:$0x3]  ;;  %v2648_v52 = vld [vmem:[#allocation2 + $0x6e] sm:$0x3] }
 0x139   :  { %v649_v3 = vmax.f32 %v548_v60, %v624_v62  ;;  %v2570_v55 = vpack.c.bf16 %v2557_v48, %v2557_v48  ;;  %v2661_v56 = vpack.c.bf16 %v2648_v52, %v2648_v52  ;;  %v7384_v52 = vld [vmem:[%s10270_s1 + $0x1c8] sm:$0xff] }
 0x13a   :  { %v826_v0 = vmax.f32 %v737_v59, %v799_v57 }
 0x13b   :  { %6307 = vmatmul.msk.bf16.gmra.mxu0 %vm502_vm4, %v8010_v33  ;;  %6338 = vmatmul.msk.bf16.gmra.mxu1 %vm502_vm4, %v8010_v33 }
 0x13c   :  { %v842_v1 = vadd.f32 %v8118_v63, %v826_v0  ;;  %6369 = vmatmul.msk.bf16.gmra.mxu2 %vm502_vm4, %v8010_v33  ;;  %6400 = vmatmul.msk.bf16.gmra.mxu3 %vm502_vm4, %v8010_v33 }
 0x13d   :  { %2608 = vrot.lane.b32.xlu1 %v2570_v55, %s7567_s24  ;;  %2699 = vrot.lane.b32.xlu0 %v2661_v56, %s7570_s28 }
 0x13e   :  { %v855_v2 = vmax.f32 %v842_v1, 0.0 }
 0x13f   :  { %v713_v4 = vpop.f32.mrf.mxu2  ;;  %v802_v6 = vpop.f32.mrf.mxu3 }
 0x140   :  { %v738_v8 = vmax.f32 %v649_v3, %v713_v4  ;;  %v550_v9 = vpop.f32.mrf.mxu0  ;;  %v626_v10 = vpop.f32.mrf.mxu1  ;;  %869 = vst.msk [vmem:[#allocation2 + $0x28] sm:$0xff] %vm863_vm10, %v855_v2  ;;  %v2738_v2 = vld [vmem:[#allocation2 + $0x67] sm:$0xff] }
 0x141   :  { %v650_v11 = vmax.f32 %v550_v9, %v626_v10  ;;  %v2425_v3 = vld [vmem:[#allocation2 + $0x67] sm:$0x3] }
 0x142   :  { %v827_v12 = vmax.f32 %v738_v8, %v802_v6  ;;  %v2751_v8 = vpack.c.bf16 %v2738_v2, %v2738_v2  ;;  %v2438_v9 = vpack.c.bf16 %v2425_v3, %v2425_v3 }
 0x144   :  { %v843_v13 = vadd.f32 %v8118_v63, %v827_v12  ;;  %2788 = vrot.lane.b32.xlu2 %v2751_v8, %s7571_s0 }
 0x145   :  { %2476 = vrot.lane.b32.xlu1 %v2438_v9, %s7571_s0 }
 0x146   :  { %v856_v5 = vmax.f32 %v843_v13, 0.0 }
 0x147   :  { %v715_v14 = vpop.f32.mrf.mxu2  ;;  %v804_v15 = vpop.f32.mrf.mxu3 }
 0x148   :  { %v739_v16 = vmax.f32 %v650_v11, %v715_v14  ;;  %v553_v17 = vpop.f32.mrf.mxu0  ;;  %v629_v19 = vpop.f32.mrf.mxu1  ;;  %870 = vst.msk [vmem:[#allocation2 + $0x30] sm:$0xff] %vm863_vm10, %v856_v5 }
 0x149   :  { %v651_v23 = vmax.f32 %v553_v17, %v629_v19  ;;  %v7389_v17 = vld [vmem:[%s10270_s1 + $0x1f0] sm:$0xff] }
 0x14a   :  { %v828_v20 = vmax.f32 %v739_v16, %v804_v15  ;;  %v7385_v16 = vld [vmem:[%s10270_s1 + $0x1d0] sm:$0xff]  ;;  %2042 = vmatpush.bf16.msrb.mxu3 %v7389_v17 }
 0x14b   :  { %6308 = vmatmul.msk.bf16.gmra.mxu0 %vm502_vm4, %v8026_v42  ;;  %6339 = vmatmul.msk.bf16.gmra.mxu1 %vm502_vm4, %v8026_v42  ;;  %v7377_v19 = vld [vmem:[%s10270_s1 + $0x190] sm:$0xff] }
 0x14c   :  { %v844_v21 = vadd.f32 %v8118_v63, %v828_v20  ;;  %6370 = vmatmul.msk.bf16.gmra.mxu2 %vm502_vm4, %v8026_v42  ;;  %6401 = vmatmul.msk.bf16.gmra.mxu3 %vm502_vm4, %v8026_v42  ;;  %v7381_v20 = vld [vmem:[%s10270_s1 + $0x1b0] sm:$0xff] }
 0x14d   :  { %1953 = vmatpush.bf16.msrb.mxu2 %v7385_v16  ;;  %1788 = vmatpush.bf16.msrb.mxu0 %v7377_v19 }
 0x14e   :  { %v857_v22 = vmax.f32 %v844_v21, 0.0  ;;  %v2332_v21 = vld [vmem:[#allocation2 + $0x62] sm:$0x3]  ;;  %1864 = vmatpush.bf16.msrb.mxu1 %v7381_v20 }
 0x14f   :  { %v718_v26 = vpop.f32.mrf.mxu2  ;;  %v807_v27 = vpop.f32.mrf.mxu3  ;;  %v2345_v24 = vpack.c.bf16 %v2332_v21, %v2332_v21 }
 0x150   :  { %v740_v28 = vmax.f32 %v651_v23, %v718_v26  ;;  %v555_v29 = vpop.f32.mrf.mxu0  ;;  %v631_v30 = vpop.f32.mrf.mxu1  ;;  %871 = vst.msk [vmem:[#allocation2 + $0x38] sm:$0xff] %vm863_vm10, %v857_v22 }
 0x151   :  { %v652_v36 = vmax.f32 %v555_v29, %v631_v30  ;;  %2383 = vrot.lane.b32.xlu2 %v2345_v24, %s7570_s28  ;;  %1954 = vmatpush.bf16.msrb.mxu2 %v7384_v52 }
 0x152   :  { %v829_v31 = vmax.f32 %v740_v28, %v807_v27 }
 0x154   :  { %v845_v32 = vadd.f32 %v8118_v63, %v829_v31 }
 0x156   :  { %v858_v35 = vmax.f32 %v845_v32, 0.0 }
 0x157   :  { %v720_v40 = vpop.f32.mrf.mxu2  ;;  %v809_v41 = vpop.f32.mrf.mxu3 }
 0x158   :  { %v741_v43 = vmax.f32 %v652_v36, %v720_v40  ;;  %v558_v44 = vpop.f32.mrf.mxu0  ;;  %v634_v45 = vpop.f32.mrf.mxu1  ;;  %872 = vst.msk [vmem:[#allocation2 + $0x40] sm:$0xff] %vm863_vm10, %v858_v35 }
 0x159   :  { %v653_v54 = vmax.f32 %v558_v44, %v634_v45 }
 0x15a   :  { %v830_v46 = vmax.f32 %v741_v43, %v809_v41 }
 0x15b   :  { %6309 = vmatmul.msk.bf16.gmra.mxu0 %vm502_vm4, %v8049_v50  ;;  %6340 = vmatmul.msk.bf16.gmra.mxu1 %vm502_vm4, %v8049_v50 }
 0x15c   :  { %v846_v47 = vadd.f32 %v8118_v63, %v830_v46  ;;  %6371 = vmatmul.msk.bf16.gmra.mxu2 %vm502_vm4, %v8049_v50  ;;  %6402 = vmatmul.msk.bf16.gmra.mxu3 %vm502_vm4, %v8049_v50 }
 0x15e   :  { %v859_v53 = vmax.f32 %v846_v47, 0.0 }
 0x15f   :  { %v723_v57 = vpop.f32.mrf.mxu2  ;;  %v812_v58 = vpop.f32.mrf.mxu3 }
 0x160   :  { %v742_v59 = vmax.f32 %v653_v54, %v723_v57  ;;  %v560_v60 = vpop.f32.mrf.mxu0  ;;  %v636_v62 = vpop.f32.mrf.mxu1  ;;  %873 = vst.msk [vmem:[#allocation2 + $0x48] sm:$0xff] %vm863_vm10, %v859_v53  ;;  %v7388_v53 = vld [vmem:[%s10270_s1 + $0x1e8] sm:$0xff] }
 0x161   :  { %v654_v6 = vmax.f32 %v560_v60, %v636_v62  ;;  %2043 = vmatpush.bf16.msrb.mxu3 %v7388_v53  ;;  %v7376_v62 = vld [vmem:[%s10270_s1 + $0x188] sm:$0xff] }
 0x162   :  { %v831_v0 = vmax.f32 %v742_v59, %v812_v58  ;;  %1789 = vmatpush.bf16.msrb.mxu0 %v7376_v62 }
 0x164   :  { %v847_v1 = vadd.f32 %v8118_v63, %v831_v0  ;;  %v7380_v0 = vld [vmem:[%s10270_s1 + $0x1a8] sm:$0xff] }
 0x165   :  { %1865 = vmatpush.bf16.msrb.mxu1 %v7380_v0 }
 0x166   :  { %v860_v4 = vmax.f32 %v847_v1, 0.0 }
 0x167   :  { %v725_v10 = vpop.f32.mrf.mxu2  ;;  %v814_v12 = vpop.f32.mrf.mxu3 }
 0x168   :  { %v743_v13 = vmax.f32 %v654_v6, %v725_v10  ;;  %v563_v5 = vpop.f32.mrf.mxu0  ;;  %v639_v11 = vpop.f32.mrf.mxu1  ;;  %874 = vst.msk [vmem:[#allocation2 + $0x50] sm:$0xff] %vm863_vm10, %v860_v4 }
 0x169   :  { %v655_v23 = vmax.f32 %v563_v5, %v639_v11 }
 0x16a   :  { %v832_v14 = vmax.f32 %v743_v13, %v814_v12 }
 0x16b   :  { %6427 = vmatmul.msk.bf16.vlgmr.msra.gmra.mxu0 %vm502_vm4, %v7906_v49  ;;  %6458 = vmatmul.msk.bf16.vlgmr.msra.gmra.mxu1 %vm502_vm4, %v7906_v49 }
 0x16c   :  { %v848_v15 = vadd.f32 %v8118_v63, %v832_v14  ;;  %6489 = vmatmul.msk.bf16.vlgmr.msra.gmra.mxu2 %vm502_vm4, %v7906_v49  ;;  %6520 = vmatmul.msk.bf16.vlgmr.msra.gmra.mxu3 %vm502_vm4, %v7906_v49 }
 0x16e   :  { %v861_v22 = vmax.f32 %v848_v15, 0.0 }
 0x16f   :  { %v728_v25 = vpop.f32.mrf.mxu2  ;;  %v817_v26 = vpop.f32.mrf.mxu3 }
 0x170   :  { %v744_v27 = vmax.f32 %v655_v23, %v728_v25  ;;  %v565_v28 = vpop.f32.mrf.mxu0  ;;  %v641_v29 = vpop.f32.mrf.mxu1  ;;  %875 = vst.msk [vmem:[#allocation2 + $0x58] sm:$0xff] %vm863_vm10, %v861_v22  ;;  %vm1299_vm10 = vcmask 97328  }
 0x172   :  { %v833_v30 = vmax.f32 %v744_v27, %v817_v26 }
 0x174   :  { %v849_v31 = vadd.f32 %v8118_v63, %v833_v30 }
 0x176   :  { %v862_v32 = vmax.f32 %v849_v31, 0.0 }
 0x177   :  { %v730_v34 = vpop.f32.mrf.mxu2  ;;  %v819_v35 = vpop.f32.mrf.mxu3 }
 0x178   :  { %v920_v36 = vpop.f32.mrf.mxu0  ;;  %v996_v37 = vpop.f32.mrf.mxu1  ;;  %877 = vst.msk [vmem:[#allocation2 + $0x60] sm:$0x3] %vm876_vm11, %v862_v32  ;;  %v7383_v32 = vld [vmem:[%s10270_s1 + $0x1c0] sm:$0xff]  ;;  %vm1735_vm11 = vcmask 146528  }
 0x179   :  { %v1030_v38 = vmax.f32 %v920_v36, %v996_v37  ;;  %v7387_v34 = vld [vmem:[%s10270_s1 + $0x1e0] sm:$0xff]  ;;  %1955 = vmatpush.bf16.msrb.mxu2 %v7383_v32 }
 0x17a   :  { %v7375_v35 = vld [vmem:[%s10270_s1 + $0x180] sm:$0xff]  ;;  %2044 = vmatpush.bf16.msrb.mxu3 %v7387_v34 }
 0x17b   :  { %6428 = vmatmul.msk.bf16.gmra.mxu0 %vm502_vm4, %v7934_v61  ;;  %6459 = vmatmul.msk.bf16.gmra.mxu1 %vm502_vm4, %v7934_v61 }
 0x17c   :  { %6490 = vmatmul.msk.bf16.gmra.mxu2 %vm502_vm4, %v7934_v61  ;;  %6521 = vmatmul.msk.bf16.gmra.mxu3 %vm502_vm4, %v7934_v61 }
 0x17d   :  { %1790 = vmatpush.bf16.msrb.mxu0 %v7375_v35 }
 0x17f   :  { %v1085_v39 = vpop.f32.mrf.mxu2  ;;  %v1174_v40 = vpop.f32.mrf.mxu3 }
 0x180   :  { %v1119_v41 = vmax.f32 %v1030_v38, %v1085_v39  ;;  %v922_v43 = vpop.f32.mrf.mxu0  ;;  %v998_v44 = vpop.f32.mrf.mxu1  ;;  %v7379_v38 = vld [vmem:[%s10270_s1 + $0x1a0] sm:$0xff]  ;;  %s7574_s1 = smov 12  }
 0x181   :  { %v1031_v48 = vmax.f32 %v922_v43, %v998_v44  ;;  %1866 = vmatpush.bf16.msrb.mxu1 %v7379_v38 }
 0x182   :  { %v1208_v45 = vmax.f32 %v1119_v41, %v1174_v40 }
 0x184   :  { %v1221_v46 = vadd.f32 %v8118_v63, %v1208_v45 }
 0x186   :  { %v1234_v47 = vmax.f32 %v1221_v46, 0.0 }
 0x187   :  { %v1087_v54 = vpop.f32.mrf.mxu2  ;;  %v1176_v55 = vpop.f32.mrf.mxu3 }
 0x188   :  { %v1120_v56 = vmax.f32 %v1031_v48, %v1087_v54  ;;  %1260 = vrot.lane.b32.xlu0 %v1234_v47, %s7572_s25  ;;  %v925_v57 = vpop.f32.mrf.mxu0  ;;  %v1001_v58 = vpop.f32.mrf.mxu1 }
 0x189   :  { %v1032_v1 = vmax.f32 %v925_v57, %v1001_v58 }
 0x18a   :  { %v1209_v59 = vmax.f32 %v1120_v56, %v1176_v55 }
 0x18b   :  { %6429 = vmatmul.msk.bf16.gmra.mxu0 %vm502_vm4, %v7950_v7  ;;  %6460 = vmatmul.msk.bf16.gmra.mxu1 %vm502_vm4, %v7950_v7 }
 0x18c   :  { %v1222_v60 = vadd.f32 %v8118_v63, %v1209_v59  ;;  %6491 = vmatmul.msk.bf16.gmra.mxu2 %vm502_vm4, %v7950_v7  ;;  %6522 = vmatmul.msk.bf16.gmra.mxu3 %vm502_vm4, %v7950_v7 }
 0x18e   :  { %v1235_v2 = vmax.f32 %v1222_v60, 0.0 }
 0x18f   :  { %v1090_v3 = vpop.f32.mrf.mxu2  ;;  %v1179_v4 = vpop.f32.mrf.mxu3 }
 0x190   :  { %v1121_v6 = vmax.f32 %v1032_v1, %v1090_v3  ;;  %1262 = vrot.lane.b32.xlu1 %v1235_v2, %s7572_s25  ;;  %v927_v8 = vpop.f32.mrf.mxu0  ;;  %v1003_v9 = vpop.f32.mrf.mxu1 }
 0x191   :  { %v1033_v5 = vmax.f32 %v927_v8, %v1003_v9 }
 0x192   :  { %v1210_v10 = vmax.f32 %v1121_v6, %v1179_v4 }
 0x194   :  { %v1223_v12 = vadd.f32 %v8118_v63, %v1210_v10 }
 0x196   :  { %v1236_v13 = vmax.f32 %v1223_v12, 0.0 }
 0x197   :  { %v1092_v11 = vpop.f32.mrf.mxu2  ;;  %v1181_v14 = vpop.f32.mrf.mxu3 }
 0x198   :  { %v1122_v15 = vmax.f32 %v1033_v5, %v1092_v11  ;;  %1264 = vrot.lane.b32.xlu2 %v1236_v13, %s7572_s25  ;;  %v930_v16 = vpop.f32.mrf.mxu0  ;;  %v1006_v17 = vpop.f32.mrf.mxu1 }
 0x199   :  { %v1034_v21 = vmax.f32 %v930_v16, %v1006_v17 }
 0x19a   :  { %v1211_v19 = vmax.f32 %v1122_v15, %v1181_v14 }
 0x19b   :  { %6430 = vmatmul.msk.bf16.gmra.mxu0 %vm502_vm4, %v7978_v18  ;;  %6461 = vmatmul.msk.bf16.gmra.mxu1 %vm502_vm4, %v7978_v18 }
 0x19c   :  { %v1224_v20 = vadd.f32 %v8118_v63, %v1211_v19  ;;  %6492 = vmatmul.msk.bf16.gmra.mxu2 %vm502_vm4, %v7978_v18  ;;  %6523 = vmatmul.msk.bf16.gmra.mxu3 %vm502_vm4, %v7978_v18 }
 0x19e   :  { %v1237_v22 = vmax.f32 %v1224_v20, 0.0 }
 0x19f   :  { %v1095_v23 = vpop.f32.mrf.mxu2  ;;  %v1184_v24 = vpop.f32.mrf.mxu3 }
 0x1a0   :  { %v1123_v25 = vmax.f32 %v1034_v21, %v1095_v23  ;;  %1266 = vrot.lane.b32.xlu0 %v1237_v22, %s7572_s25  ;;  %v932_v26 = vpop.f32.mrf.mxu0  ;;  %v1008_v27 = vpop.f32.mrf.mxu1 }
 0x1a1   :  { %v1035_v31 = vmax.f32 %v932_v26, %v1008_v27 }
 0x1a2   :  { %v1212_v28 = vmax.f32 %v1123_v25, %v1184_v24 }
 0x1a4   :  { %v1225_v29 = vadd.f32 %v8118_v63, %v1212_v28 }
 0x1a6   :  { %v1238_v30 = vmax.f32 %v1225_v29, 0.0 }
 0x1a7   :  { %v1097_v36 = vpop.f32.mrf.mxu2  ;;  %v1186_v37 = vpop.f32.mrf.mxu3 }
 0x1a8   :  { %v1124_v39 = vmax.f32 %v1035_v31, %v1097_v36  ;;  %1268 = vrot.lane.b32.xlu0 %v1238_v30, %s7572_s25  ;;  %v935_v40 = vpop.f32.mrf.mxu0  ;;  %v1011_v41 = vpop.f32.mrf.mxu1  ;;  %v2518_v36 = vld [vmem:[#allocation2 + $0x68] sm:$0x3] }
 0x1a9   :  { %v1036_v45 = vmax.f32 %v935_v40, %v1011_v41 }
 0x1aa   :  { %v1213_v43 = vmax.f32 %v1124_v39, %v1186_v37  ;;  %v2531_v39 = vpack.c.bf16 %v2518_v36, %v2518_v36 }
 0x1ab   :  { %6431 = vmatmul.msk.bf16.gmra.mxu0 %vm502_vm4, %v8010_v33  ;;  %6462 = vmatmul.msk.bf16.gmra.mxu1 %vm502_vm4, %v8010_v33 }
 0x1ac   :  { %v1226_v44 = vadd.f32 %v8118_v63, %v1213_v43  ;;  %6493 = vmatmul.msk.bf16.gmra.mxu2 %vm502_vm4, %v8010_v33  ;;  %6524 = vmatmul.msk.bf16.gmra.mxu3 %vm502_vm4, %v8010_v33 }
 0x1ae   :  { %v1239_v46 = vmax.f32 %v1226_v44, 0.0  ;;  %v7573_v44 = vmov 0  }
 0x1af   :  { %v1100_v47 = vpop.f32.mrf.mxu2  ;;  %v1189_v48 = vpop.f32.mrf.mxu3  ;;  %100 = vst [vmem:[#allocation5 + $0x90] sm:$0x11] %v7573_v44 }
 0x1b0   :  { %v1125_v52 = vmax.f32 %v1036_v45, %v1100_v47  ;;  %1270 = vrot.lane.b32.xlu0 %v1239_v46, %s7572_s25  ;;  %v937_v53 = vpop.f32.mrf.mxu0  ;;  %v1013_v54 = vpop.f32.mrf.mxu1  ;;  %102 = vst.msk [vmem:[#allocation5 + $0x98] sm:$0x1] %vm101_vm13, %v7573_v44  ;;  %vm1748_vm13 = vcmask 140384  }
 0x1b1   :  { %v1037_v58 = vmax.f32 %v937_v53, %v1013_v54  ;;  %v2609_v46 = vpop.permute.xlu1 %2608  ;;  %2544 = vst.msk [vmem:[#allocation5 + $0x94] sm:$0x1] %vm2225_vm14, %v2531_v39 }
 0x1b2   :  { %v1214_v55 = vmax.f32 %v1125_v52, %v1189_v48  ;;  %2635 = vst.msk [vmem:[#allocation5 + $0x94] sm:$0x1] %vm2318_vm15, %v2609_v46  ;;  %v8355_v48 = vpop.permute.xlu2 %2788  ;;  %v8357_v52 = vpop.permute.xlu0 %2697 }
 0x1b3   :  { %75 = vst [vmem:[#allocation5] sm:$0xff] %v7573_v44 }
 0x1b4   :  { %v1227_v56 = vadd.f32 %v8118_v63, %v1214_v55  ;;  %78 = vst [vmem:[#allocation5 + $0xc] sm:$0xff] %v7573_v44  ;;  %v2830_v55 = vld [vmem:[#allocation2 + $0x70] sm:$0x3] }
 0x1b5   :  { %80 = vst [vmem:[#allocation5 + $0x18] sm:$0xff] %v7573_v44 }
 0x1b6   :  { %v1240_v57 = vmax.f32 %v1227_v56, 0.0  ;;  %82 = vst [vmem:[#allocation5 + $0x24] sm:$0xff] %v7573_v44 }
 0x1b7   :  { %v1102_v59 = vpop.f32.mrf.mxu2  ;;  %v1191_v60 = vpop.f32.mrf.mxu3  ;;  %84 = vst [vmem:[#allocation5 + $0x30] sm:$0xff] %v7573_v44 }
 0x1b8   :  { %v1126_v62 = vmax.f32 %v1037_v58, %v1102_v59  ;;  %1272 = vrot.lane.b32.xlu0 %v1240_v57, %s7572_s25  ;;  %v940_v0 = vpop.f32.mrf.mxu0  ;;  %v1016_v1 = vpop.f32.mrf.mxu1  ;;  %v2843_v58 = vpack.c.bf16 %v2830_v55, %v2830_v55  ;;  %86 = vst [vmem:[#allocation5 + $0x3c] sm:$0xff] %v7573_v44 }
 0x1b9   :  { %v1038_v4 = vmax.f32 %v940_v0, %v1016_v1  ;;  %88 = vst [vmem:[#allocation5 + $0x48] sm:$0xff] %v7573_v44 }
 0x1ba   :  { %v1215_v2 = vmax.f32 %v1126_v62, %v1191_v60  ;;  %2856 = vst.msk [vmem:[#allocation5 + $0x98] sm:$0x1] %vm2225_vm14, %v2843_v58 }
 0x1bb   :  { %6432 = vmatmul.msk.bf16.gmra.mxu0 %vm502_vm4, %v8026_v42  ;;  %6463 = vmatmul.msk.bf16.gmra.mxu1 %vm502_vm4, %v8026_v42  ;;  %90 = vst [vmem:[#allocation5 + $0x54] sm:$0xff] %v7573_v44 }
 0x1bc   :  { %v1228_v3 = vadd.f32 %v8118_v63, %v1215_v2  ;;  %6494 = vmatmul.msk.bf16.gmra.mxu2 %vm502_vm4, %v8026_v42  ;;  %6525 = vmatmul.msk.bf16.gmra.mxu3 %vm502_vm4, %v8026_v42  ;;  %92 = vst [vmem:[#allocation5 + $0x60] sm:$0xff] %v7573_v44  ;;  %v8371_v2 = vpop.permute.xlu2 %2383 }
 0x1bd   :  { %94 = vst [vmem:[#allocation5 + $0x6c] sm:$0xff] %v7573_v44 }
 0x1be   :  { %v1241_v6 = vmax.f32 %v1228_v3, 0.0  ;;  %v2700_v3 = vpop.permute.xlu0 %2699  ;;  %96 = vst [vmem:[#allocation5 + $0x78] sm:$0xff] %v7573_v44 }
 0x1bf   :  { %v1105_v8 = vpop.f32.mrf.mxu2  ;;  %v1194_v9 = vpop.f32.mrf.mxu3  ;;  %98 = vst [vmem:[#allocation5 + $0x84] sm:$0xff] %v7573_v44 }
 0x1c0   :  { %v1127_v10 = vmax.f32 %v1038_v4, %v1105_v8  ;;  %1274 = vrot.lane.b32.xlu0 %v1241_v6, %s7572_s25  ;;  %v942_v12 = vpop.f32.mrf.mxu0  ;;  %v1018_v13 = vpop.f32.mrf.mxu1  ;;  %2726 = vst.msk [vmem:[#allocation5 + $0x94] sm:$0x1] %vm2411_vm9, %v2700_v3 }
 0x1c1   :  { %v1039_v15 = vmax.f32 %v942_v12, %v1018_v13  ;;  %77 = vst.msk [vmem:[#allocation5 + $0x8] sm:$0xf] %vm76_vm12, %v7573_v44 }
 0x1c2   :  { %v1216_v5 = vmax.f32 %v1127_v10, %v1194_v9  ;;  %79 = vst.msk [vmem:[#allocation5 + $0x14] sm:$0xf] %vm76_vm12, %v7573_v44 }
 0x1c3   :  { %81 = vst.msk [vmem:[#allocation5 + $0x20] sm:$0xf] %vm76_vm12, %v7573_v44 }
 0x1c4   :  { %v1229_v11 = vadd.f32 %v8118_v63, %v1216_v5  ;;  %83 = vst.msk [vmem:[#allocation5 + $0x2c] sm:$0xf] %vm76_vm12, %v7573_v44 }
 0x1c5   :  { %85 = vst.msk [vmem:[#allocation5 + $0x38] sm:$0xf] %vm76_vm12, %v7573_v44 }
 0x1c6   :  { %v1242_v14 = vmax.f32 %v1229_v11, 0.0  ;;  %87 = vst.msk [vmem:[#allocation5 + $0x44] sm:$0xf] %vm76_vm12, %v7573_v44 }
 0x1c7   :  { %v1107_v16 = vpop.f32.mrf.mxu2  ;;  %v1196_v17 = vpop.f32.mrf.mxu3  ;;  %89 = vst.msk [vmem:[#allocation5 + $0x50] sm:$0xf] %vm76_vm12, %v7573_v44 }
 0x1c8   :  { %v1128_v19 = vmax.f32 %v1039_v15, %v1107_v16  ;;  %1276 = vrot.lane.b32.xlu0 %v1242_v14, %s7572_s25  ;;  %v945_v20 = vpop.f32.mrf.mxu0  ;;  %v1021_v21 = vpop.f32.mrf.mxu1  ;;  %91 = vst.msk [vmem:[#allocation5 + $0x5c] sm:$0xf] %vm76_vm12, %v7573_v44 }
 0x1c9   :  { %v1040_v24 = vmax.f32 %v945_v20, %v1021_v21  ;;  %v8388_v21 = vpop.permute.xlu1 %2476  ;;  %93 = vst.msk [vmem:[#allocation5 + $0x68] sm:$0xf] %vm76_vm12, %v7573_v44 }
 0x1ca   :  { %v1217_v22 = vmax.f32 %v1128_v19, %v1196_v17  ;;  %95 = vst.msk [vmem:[#allocation5 + $0x74] sm:$0xf] %vm76_vm12, %v7573_v44 }
 0x1cb   :  { %6433 = vmatmul.msk.bf16.gmra.mxu0 %vm502_vm4, %v8049_v50  ;;  %6464 = vmatmul.msk.bf16.gmra.mxu1 %vm502_vm4, %v8049_v50  ;;  %97 = vst.msk [vmem:[#allocation5 + $0x80] sm:$0xf] %vm76_vm12, %v7573_v44 }
 0x1cc   :  { %v1230_v23 = vadd.f32 %v8118_v63, %v1217_v22  ;;  %6495 = vmatmul.msk.bf16.gmra.mxu2 %vm502_vm4, %v8049_v50  ;;  %6526 = vmatmul.msk.bf16.gmra.mxu3 %vm502_vm4, %v8049_v50  ;;  %99 = vst.msk [vmem:[#allocation5 + $0x8c] sm:$0xf] %vm76_vm12, %v7573_v44  ;;  %vm2184_vm12 = vcmask 189584  }
 0x1ce   :  { %v1243_v25 = vmax.f32 %v1230_v23, 0.0 }
 0x1cf   :  { %v1110_v26 = vpop.f32.mrf.mxu2  ;;  %v1199_v27 = vpop.f32.mrf.mxu3 }
 0x1d0   :  { %v1129_v28 = vmax.f32 %v1040_v24, %v1110_v26  ;;  %1278 = vrot.lane.b32.xlu2 %v1243_v25, %s7572_s25  ;;  %v947_v29 = vpop.f32.mrf.mxu0  ;;  %v1023_v30 = vpop.f32.mrf.mxu1 }
 0x1d1   :  { %v1041_v34 = vmax.f32 %v947_v29, %v1023_v30 }
 0x1d2   :  { %v1218_v31 = vmax.f32 %v1129_v28, %v1199_v27 }
 0x1d4   :  { %v1231_v32 = vadd.f32 %v8118_v63, %v1218_v31 }
 0x1d6   :  { %v1244_v35 = vmax.f32 %v1231_v32, 0.0 }
 0x1d7   :  { %v1112_v37 = vpop.f32.mrf.mxu2  ;;  %v1201_v38 = vpop.f32.mrf.mxu3 }
 0x1d8   :  { %v1130_v40 = vmax.f32 %v1041_v34, %v1112_v37  ;;  %1280 = vrot.lane.b32.xlu0 %v1244_v35, %s7572_s25  ;;  %v950_v41 = vpop.f32.mrf.mxu0  ;;  %v1026_v43 = vpop.f32.mrf.mxu1 }
 0x1d9   :  { %v1042_v53 = vmax.f32 %v950_v41, %v1026_v43 }
 0x1da   :  { %v1219_v45 = vmax.f32 %v1130_v40, %v1201_v38 }
 0x1db   :  { %6551 = vmatmul.msk.bf16.vlgmr.msrb.gmra.mxu0 %vm502_vm4, %v7906_v49  ;;  %6582 = vmatmul.msk.bf16.vlgmr.msrb.gmra.mxu1 %vm502_vm4, %v7906_v49 }
 0x1dc   :  { %v1232_v47 = vadd.f32 %v8118_v63, %v1219_v45  ;;  %6613 = vmatmul.msk.bf16.vlgmr.msrb.gmra.mxu2 %vm502_vm4, %v7906_v49  ;;  %6644 = vmatmul.msk.bf16.vlgmr.msrb.gmra.mxu3 %vm502_vm4, %v7906_v49 }
 0x1de   :  { %v1245_v54 = vmax.f32 %v1232_v47, 0.0 }
 0x1df   :  { %v1115_v56 = vpop.f32.mrf.mxu2  ;;  %v1204_v57 = vpop.f32.mrf.mxu3 }
 0x1e0   :  { %v1131_v59 = vmax.f32 %v1042_v53, %v1115_v56  ;;  %1282 = vrot.lane.b32.xlu2 %v1245_v54, %s7572_s25  ;;  %v952_v49 = vpop.f32.mrf.mxu0  ;;  %v1028_v60 = vpop.f32.mrf.mxu1 }
 0x1e2   :  { %v1220_v62 = vmax.f32 %v1131_v59, %v1204_v57 }
 0x1e4   :  { %v1233_v0 = vadd.f32 %v8118_v63, %v1220_v62 }
 0x1e6   :  { %v1246_v1 = vmax.f32 %v1233_v0, 0.0 }
 0x1e7   :  { %v1117_v4 = vpop.f32.mrf.mxu2  ;;  %v1206_v6 = vpop.f32.mrf.mxu3 }
 0x1e8   :  { %1284 = vrot.lane.b32.xlu0 %v1246_v1, %s7572_s25  ;;  %v1356_v8 = vpop.f32.mrf.mxu0  ;;  %v1432_v9 = vpop.f32.mrf.mxu1 }
 0x1e9   :  { %v1466_v10 = vmax.f32 %v1356_v8, %v1432_v9 }
 0x1eb   :  { %6552 = vmatmul.msk.bf16.gmra.mxu0 %vm502_vm4, %v7934_v61  ;;  %6583 = vmatmul.msk.bf16.gmra.mxu1 %vm502_vm4, %v7934_v61 }
 0x1ec   :  { %6614 = vmatmul.msk.bf16.gmra.mxu2 %vm502_vm4, %v7934_v61  ;;  %6645 = vmatmul.msk.bf16.gmra.mxu3 %vm502_vm4, %v7934_v61 }
 0x1ef   :  { %v1521_v12 = vpop.f32.mrf.mxu2  ;;  %v1610_v13 = vpop.f32.mrf.mxu3 }
 0x1f0   :  { %v1555_v5 = vmax.f32 %v1466_v10, %v1521_v12  ;;  %v1358_v11 = vpop.f32.mrf.mxu0  ;;  %v1434_v14 = vpop.f32.mrf.mxu1 }
 0x1f1   :  { %v1467_v20 = vmax.f32 %v1358_v11, %v1434_v14 }
 0x1f2   :  { %v1644_v15 = vmax.f32 %v1555_v5, %v1610_v13  ;;  %v1265_v16 = vpop.permute.xlu2 %1264 }
 0x1f3   :  { %1302 = vst.msk [vmem:[#allocation2 + $0x10] sm:$0xff] %vm1299_vm10, %v1265_v16 }
 0x1f4   :  { %v1657_v17 = vadd.f32 %v8118_v63, %v1644_v15 }
 0x1f6   :  { %v1670_v19 = vmax.f32 %v1657_v17, 0.0 }
 0x1f7   :  { %v1523_v22 = vpop.f32.mrf.mxu2  ;;  %v1612_v23 = vpop.f32.mrf.mxu3 }
 0x1f8   :  { %v1556_v61 = vmax.f32 %v1467_v20, %v1523_v22  ;;  %1696 = vrot.lane.b32.xlu0 %v1670_v19, %s7574_s1  ;;  %v1361_v24 = vpop.f32.mrf.mxu0  ;;  %v1437_v25 = vpop.f32.mrf.mxu1 }
 0x1f9   :  { %v1468_v29 = vmax.f32 %v1361_v24, %v1437_v25 }
 0x1fa   :  { %v1645_v26 = vmax.f32 %v1556_v61, %v1612_v23  ;;  %v1261_v27 = vpop.permute.xlu0 %1260 }
 0x1fb   :  { %1300 = vst.msk [vmem:[#allocation2] sm:$0xff] %vm1299_vm10, %v1261_v27  ;;  %6553 = vmatmul.msk.bf16.gmra.mxu0 %vm502_vm4, %v7950_v7  ;;  %6584 = vmatmul.msk.bf16.gmra.mxu1 %vm502_vm4, %v7950_v7 }
 0x1fc   :  { %v1658_v28 = vadd.f32 %v8118_v63, %v1645_v26  ;;  %6615 = vmatmul.msk.bf16.gmra.mxu2 %vm502_vm4, %v7950_v7  ;;  %6646 = vmatmul.msk.bf16.gmra.mxu3 %vm502_vm4, %v7950_v7 }
 0x1fe   :  { %v1671_v30 = vmax.f32 %v1658_v28, 0.0 }
 0x1ff   :  { %v1526_v31 = vpop.f32.mrf.mxu2  ;;  %v1615_v32 = vpop.f32.mrf.mxu3 }
 0x200   :  { %v1557_v34 = vmax.f32 %v1468_v29, %v1526_v31  ;;  %1698 = vrot.lane.b32.xlu1 %v1671_v30, %s7574_s1  ;;  %v1363_v35 = vpop.f32.mrf.mxu0  ;;  %v1439_v36 = vpop.f32.mrf.mxu1 }
 0x201   :  { %v1469_v41 = vmax.f32 %v1363_v35, %v1439_v36 }
 0x202   :  { %v1646_v37 = vmax.f32 %v1557_v34, %v1615_v32  ;;  %v1263_v38 = vpop.permute.xlu1 %1262 }
 0x203   :  { %1301 = vst.msk [vmem:[#allocation2 + $0x8] sm:$0xff] %vm1299_vm10, %v1263_v38 }
 0x204   :  { %v1659_v39 = vadd.f32 %v8118_v63, %v1646_v37 }
 0x206   :  { %v1672_v40 = vmax.f32 %v1659_v39, 0.0 }
 0x207   :  { %v1528_v43 = vpop.f32.mrf.mxu2  ;;  %v1617_v45 = vpop.f32.mrf.mxu3 }
 0x208   :  { %v1558_v7 = vmax.f32 %v1469_v41, %v1528_v43  ;;  %1700 = vrot.lane.b32.xlu2 %v1672_v40, %s7574_s1  ;;  %v1366_v46 = vpop.f32.mrf.mxu0  ;;  %v1442_v47 = vpop.f32.mrf.mxu1 }
 0x209   :  { %v1470_v55 = vmax.f32 %v1366_v46, %v1442_v47 }
 0x20a   :  { %v1647_v53 = vmax.f32 %v1558_v7, %v1617_v45 }
 0x20b   :  { %6554 = vmatmul.msk.bf16.gmra.mxu0 %vm502_vm4, %v7978_v18  ;;  %6585 = vmatmul.msk.bf16.gmra.mxu1 %vm502_vm4, %v7978_v18 }
 0x20c   :  { %v1660_v54 = vadd.f32 %v8118_v63, %v1647_v53  ;;  %6616 = vmatmul.msk.bf16.gmra.mxu2 %vm502_vm4, %v7978_v18  ;;  %6647 = vmatmul.msk.bf16.gmra.mxu3 %vm502_vm4, %v7978_v18 }
 0x20e   :  { %v1673_v56 = vmax.f32 %v1660_v54, 0.0 }
 0x20f   :  { %v1531_v57 = vpop.f32.mrf.mxu2  ;;  %v1620_v58 = vpop.f32.mrf.mxu3 }
 0x210   :  { %v1559_v59 = vmax.f32 %v1470_v55, %v1531_v57  ;;  %1702 = vrot.lane.b32.xlu1 %v1673_v56, %s7574_s1  ;;  %v1368_v49 = vpop.f32.mrf.mxu0  ;;  %v1444_v60 = vpop.f32.mrf.mxu1 }
 0x211   :  { %v1471_v4 = vmax.f32 %v1368_v49, %v1444_v60 }
 0x212   :  { %v1648_v62 = vmax.f32 %v1559_v59, %v1620_v58  ;;  %v1267_v0 = vpop.permute.xlu0 %1266 }
 0x213   :  { %1303 = vst.msk [vmem:[#allocation2 + $0x18] sm:$0xff] %vm1299_vm10, %v1267_v0 }
 0x214   :  { %v1661_v1 = vadd.f32 %v8118_v63, %v1648_v62 }
 0x216   :  { %v1674_v3 = vmax.f32 %v1661_v1, 0.0 }
 0x217   :  { %v1533_v6 = vpop.f32.mrf.mxu2  ;;  %v1622_v8 = vpop.f32.mrf.mxu3 }
 0x218   :  { %v1560_v18 = vmax.f32 %v1471_v4, %v1533_v6  ;;  %1704 = vrot.lane.b32.xlu1 %v1674_v3, %s7574_s1  ;;  %v1371_v9 = vpop.f32.mrf.mxu0  ;;  %v1447_v10 = vpop.f32.mrf.mxu1 }
 0x219   :  { %v1472_v11 = vmax.f32 %v1371_v9, %v1447_v10 }
 0x21a   :  { %v1649_v12 = vmax.f32 %v1560_v18, %v1622_v8  ;;  %v1269_v13 = vpop.permute.xlu0 %1268 }
 0x21b   :  { %1304 = vst.msk [vmem:[#allocation2 + $0x20] sm:$0xff] %vm1299_vm10, %v1269_v13  ;;  %6555 = vmatmul.msk.bf16.gmra.mxu0 %vm502_vm4, %v8010_v33  ;;  %6586 = vmatmul.msk.bf16.gmra.mxu1 %vm502_vm4, %v8010_v33 }
 0x21c   :  { %v1662_v5 = vadd.f32 %v8118_v63, %v1649_v12  ;;  %6617 = vmatmul.msk.bf16.gmra.mxu2 %vm502_vm4, %v8010_v33  ;;  %6648 = vmatmul.msk.bf16.gmra.mxu3 %vm502_vm4, %v8010_v33  ;;  %v8433_v63 = vld [vmem:[%s10271_s2] ss:$0 sm:$0xff]  ;;  %s7575_s2 = smov 18  }
 0x21e   :  { %v1675_v14 = vmax.f32 %v1662_v5, 0.0 }
 0x21f   :  { %v1536_v15 = vpop.f32.mrf.mxu2  ;;  %v1625_v16 = vpop.f32.mrf.mxu3 }
 0x220   :  { %v1561_v17 = vmax.f32 %v1472_v11, %v1536_v15  ;;  %1706 = vrot.lane.b32.xlu1 %v1675_v14, %s7574_s1  ;;  %v1373_v19 = vpop.f32.mrf.mxu0  ;;  %v1449_v20 = vpop.f32.mrf.mxu1 }
 0x221   :  { %v1473_v24 = vmax.f32 %v1373_v19, %v1449_v20 }
 0x222   :  { %v1650_v22 = vmax.f32 %v1561_v17, %v1625_v16  ;;  %v1271_v23 = vpop.permute.xlu0 %1270 }
 0x223   :  { %1305 = vst.msk [vmem:[#allocation2 + $0x28] sm:$0xff] %vm1299_vm10, %v1271_v23 }
 0x224   :  { %v1663_v33 = vadd.f32 %v8433_v63, %v1650_v22 }
 0x226   :  { %v1676_v61 = vmax.f32 %v1663_v33, 0.0 }
 0x227   :  { %v1538_v25 = vpop.f32.mrf.mxu2  ;;  %v1627_v26 = vpop.f32.mrf.mxu3 }
 0x228   :  { %v1562_v27 = vmax.f32 %v1473_v24, %v1538_v25  ;;  %1708 = vrot.lane.b32.xlu1 %v1676_v61, %s7574_s1  ;;  %v1376_v28 = vpop.f32.mrf.mxu0  ;;  %v1452_v29 = vpop.f32.mrf.mxu1 }
 0x229   :  { %v1474_v35 = vmax.f32 %v1376_v28, %v1452_v29 }
 0x22a   :  { %v1651_v30 = vmax.f32 %v1562_v27, %v1627_v26  ;;  %v1273_v31 = vpop.permute.xlu0 %1272  ;;  %v1279_v32 = vpop.permute.xlu2 %1278 }
 0x22b   :  { %1306 = vst.msk [vmem:[#allocation2 + $0x30] sm:$0xff] %vm1299_vm10, %v1273_v31  ;;  %6556 = vmatmul.msk.bf16.gmra.mxu0 %vm502_vm4, %v8026_v42  ;;  %6587 = vmatmul.msk.bf16.gmra.mxu1 %vm502_vm4, %v8026_v42 }
 0x22c   :  { %v1664_v34 = vadd.f32 %v8433_v63, %v1651_v30  ;;  %1309 = vst.msk [vmem:[#allocation2 + $0x48] sm:$0xff] %vm1299_vm10, %v1279_v32  ;;  %6618 = vmatmul.msk.bf16.gmra.mxu2 %vm502_vm4, %v8026_v42  ;;  %6649 = vmatmul.msk.bf16.gmra.mxu3 %vm502_vm4, %v8026_v42 }
 0x22e   :  { %v1677_v36 = vmax.f32 %v1664_v34, 0.0 }
 0x22f   :  { %v1541_v37 = vpop.f32.mrf.mxu2  ;;  %v1630_v38 = vpop.f32.mrf.mxu3 }
 0x230   :  { %v1563_v39 = vmax.f32 %v1474_v35, %v1541_v37  ;;  %1710 = vrot.lane.b32.xlu1 %v1677_v36, %s7574_s1  ;;  %v1378_v40 = vpop.f32.mrf.mxu0  ;;  %v1454_v41 = vpop.f32.mrf.mxu1 }
 0x231   :  { %v1475_v47 = vmax.f32 %v1378_v40, %v1454_v41 }
 0x232   :  { %v1652_v43 = vmax.f32 %v1563_v39, %v1630_v38  ;;  %v1275_v45 = vpop.permute.xlu0 %1274 }
 0x233   :  { %1307 = vst.msk [vmem:[#allocation2 + $0x38] sm:$0xff] %vm1299_vm10, %v1275_v45 }
 0x234   :  { %v1665_v7 = vadd.f32 %v8433_v63, %v1652_v43 }
 0x236   :  { %v1678_v46 = vmax.f32 %v1665_v7, 0.0 }
 0x237   :  { %v1543_v53 = vpop.f32.mrf.mxu2  ;;  %v1632_v54 = vpop.f32.mrf.mxu3 }
 0x238   :  { %v1564_v42 = vmax.f32 %v1475_v47, %v1543_v53  ;;  %1712 = vrot.lane.b32.xlu1 %v1678_v46, %s7574_s1  ;;  %v1381_v55 = vpop.f32.mrf.mxu0  ;;  %v1457_v56 = vpop.f32.mrf.mxu1 }
 0x239   :  { %v1476_v60 = vmax.f32 %v1381_v55, %v1457_v56 }
 0x23a   :  { %v1653_v57 = vmax.f32 %v1564_v42, %v1632_v54  ;;  %v1277_v58 = vpop.permute.xlu0 %1276  ;;  %v1283_v59 = vpop.permute.xlu2 %1282 }
 0x23b   :  { %1308 = vst.msk [vmem:[#allocation2 + $0x40] sm:$0xff] %vm1299_vm10, %v1277_v58  ;;  %6557 = vmatmul.msk.bf16.gmra.mxu0 %vm502_vm4, %v8049_v50  ;;  %6588 = vmatmul.msk.bf16.gmra.mxu1 %vm502_vm4, %v8049_v50 }
 0x23c   :  { %v1666_v49 = vadd.f32 %v8433_v63, %v1653_v57  ;;  %1311 = vst.msk [vmem:[#allocation2 + $0x58] sm:$0xff] %vm1299_vm10, %v1283_v59  ;;  %6619 = vmatmul.msk.bf16.gmra.mxu2 %vm502_vm4, %v8049_v50  ;;  %6650 = vmatmul.msk.bf16.gmra.mxu3 %vm502_vm4, %v8049_v50  ;;  %vm1312_vm4 = vcmask 91184  }
 0x23e   :  { %v1679_v62 = vmax.f32 %v1666_v49, 0.0 }
 0x23f   :  { %v1546_v0 = vpop.f32.mrf.mxu2  ;;  %v1635_v1 = vpop.f32.mrf.mxu3 }
 0x240   :  { %v1565_v3 = vmax.f32 %v1476_v60, %v1546_v0  ;;  %1714 = vrot.lane.b32.xlu2 %v1679_v62, %s7574_s1  ;;  %v1383_v4 = vpop.f32.mrf.mxu0  ;;  %v1459_v6 = vpop.f32.mrf.mxu1 }
 0x241   :  { %v1477_v10 = vmax.f32 %v1383_v4, %v1459_v6 }
 0x242   :  { %v1654_v8 = vmax.f32 %v1565_v3, %v1635_v1 }
 0x244   :  { %v1667_v18 = vadd.f32 %v8433_v63, %v1654_v8 }
 0x246   :  { %v1680_v9 = vmax.f32 %v1667_v18, 0.0 }
 0x247   :  { %v1548_v12 = vpop.f32.mrf.mxu2  ;;  %v1637_v13 = vpop.f32.mrf.mxu3 }
 0x248   :  { %v1566_v5 = vmax.f32 %v1477_v10, %v1548_v12  ;;  %1716 = vrot.lane.b32.xlu1 %v1680_v9, %s7574_s1  ;;  %v1386_v50 = vpop.f32.mrf.mxu0  ;;  %v1462_v11 = vpop.f32.mrf.mxu1 }
 0x249   :  { %v1478_v17 = vmax.f32 %v1386_v50, %v1462_v11 }
 0x24a   :  { %v1655_v14 = vmax.f32 %v1566_v5, %v1637_v13  ;;  %v1281_v15 = vpop.permute.xlu0 %1280 }
 0x24b   :  { %1310 = vst.msk [vmem:[#allocation2 + $0x50] sm:$0xff] %vm1299_vm10, %v1281_v15  ;;  %vm2171_vm10 = vcmask 195728  }
 0x24c   :  { %v1668_v16 = vadd.f32 %v8433_v63, %v1655_v14 }
 0x24e   :  { %v1681_v19 = vmax.f32 %v1668_v16, 0.0 }
 0x24f   :  { %v1551_v20 = vpop.f32.mrf.mxu2  ;;  %v1640_v22 = vpop.f32.mrf.mxu3 }
 0x250   :  { %v1567_v23 = vmax.f32 %v1478_v17, %v1551_v20  ;;  %1718 = vrot.lane.b32.xlu2 %v1681_v19, %s7574_s1  ;;  %v1388_v33 = vpop.f32.mrf.mxu0  ;;  %v1464_v61 = vpop.f32.mrf.mxu1 }
 0x252   :  { %v1656_v24 = vmax.f32 %v1567_v23, %v1640_v22 }
 0x254   :  { %v1669_v25 = vadd.f32 %v8433_v63, %v1656_v24 }
 0x256   :  { %v1682_v26 = vmax.f32 %v1669_v25, 0.0 }
 0x257   :  { %v1553_v27 = vpop.f32.mrf.mxu2  ;;  %v1642_v28 = vpop.f32.mrf.mxu3 }
 0x258   :  { %1720 = vrot.lane.b32.xlu1 %v1682_v26, %s7574_s1  ;;  %v1792_v29 = vpop.f32.mrf.mxu0  ;;  %v1868_v30 = vpop.f32.mrf.mxu1  ;;  %s6130_s1 = sshll.u32 %s10280_s11, 4  ;;  %s6131_s1 = int_to_ptr.hbm [resolvable:$true] %s6130_s1 }
 0x259   :  { %v1902_v32 = vmax.f32 %v1792_v29, %v1868_v30 }
 0x25a   :  { %v1285_v31 = vpop.permute.xlu0 %1284 }
 0x25b   :  { %1313 = vst.msk [vmem:[#allocation2 + $0x60] sm:$0x3] %vm1312_vm4, %v1285_v31  ;;  %vm2212_vm4 = vcmask 191488  }
 0x25f   :  { %v1957_v34 = vpop.f32.mrf.mxu2  ;;  %v2046_v35 = vpop.f32.mrf.mxu3 }
 0x260   :  { %v1991_v36 = vmax.f32 %v1902_v32, %v1957_v34  ;;  %v1794_v37 = vpop.f32.mrf.mxu0  ;;  %v1870_v38 = vpop.f32.mrf.mxu1 }
 0x261   :  { %v1903_v45 = vmax.f32 %v1794_v37, %v1870_v38 }
 0x262   :  { %v2080_v39 = vmax.f32 %v1991_v36, %v2046_v35  ;;  %v1701_v40 = vpop.permute.xlu2 %1700 }
 0x263   :  { %1738 = vst.msk [vmem:[#allocation2 + $0x10] sm:$0xff] %vm1735_vm11, %v1701_v40 }
 0x264   :  { %v2093_v41 = vadd.f32 %v8433_v63, %v2080_v39 }
 0x266   :  { %v2106_v43 = vmax.f32 %v2093_v41, 0.0 }
 0x267   :  { %v1959_v7 = vpop.f32.mrf.mxu2  ;;  %v2048_v46 = vpop.f32.mrf.mxu3 }
 0x268   :  { %v1992_v47 = vmax.f32 %v1903_v45, %v1959_v7  ;;  %2132 = vrot.lane.b32.xlu0 %v2106_v43, %s7575_s2  ;;  %v1797_v53 = vpop.f32.mrf.mxu0  ;;  %v1873_v54 = vpop.f32.mrf.mxu1 }
 0x269   :  { %v1904_v57 = vmax.f32 %v1797_v53, %v1873_v54 }
 0x26a   :  { %v2081_v42 = vmax.f32 %v1992_v47, %v2048_v46  ;;  %v1697_v55 = vpop.permute.xlu0 %1696 }
 0x26b   :  { %1736 = vst.msk [vmem:[#allocation2] sm:$0xff] %vm1735_vm11, %v1697_v55 }
 0x26c   :  { %v2094_v56 = vadd.f32 %v8433_v63, %v2081_v42 }
 0x26e   :  { %v2107_v58 = vmax.f32 %v2094_v56, 0.0 }
 0x26f   :  { %v1962_v59 = vpop.f32.mrf.mxu2  ;;  %v2051_v49 = vpop.f32.mrf.mxu3 }
 0x270   :  { %v1993_v60 = vmax.f32 %v1904_v57, %v1962_v59  ;;  %2134 = vrot.lane.b32.xlu1 %v2107_v58, %s7575_s2  ;;  %v1799_v62 = vpop.f32.mrf.mxu0  ;;  %v1875_v0 = vpop.f32.mrf.mxu1 }
 0x271   :  { %v1905_v8 = vmax.f32 %v1799_v62, %v1875_v0 }
 0x272   :  { %v2082_v1 = vmax.f32 %v1993_v60, %v2051_v49  ;;  %v1699_v3 = vpop.permute.xlu1 %1698 }
 0x273   :  { %1737 = vst.msk [vmem:[#allocation2 + $0x8] sm:$0xff] %vm1735_vm11, %v1699_v3 }
 0x274   :  { %v2095_v4 = vadd.f32 %v8433_v63, %v2082_v1 }
 0x276   :  { %v2108_v6 = vmax.f32 %v2095_v4, 0.0 }
 0x277   :  { %v1964_v18 = vpop.f32.mrf.mxu2  ;;  %v2053_v9 = vpop.f32.mrf.mxu3 }
 0x278   :  { %v1994_v10 = vmax.f32 %v1905_v8, %v1964_v18  ;;  %2136 = vrot.lane.b32.xlu2 %v2108_v6, %s7575_s2  ;;  %v1802_v12 = vpop.f32.mrf.mxu0  ;;  %v1878_v13 = vpop.f32.mrf.mxu1 }
 0x279   :  { %v1906_v11 = vmax.f32 %v1802_v12, %v1878_v13 }
 0x27a   :  { %v2083_v5 = vmax.f32 %v1994_v10, %v2053_v9 }
 0x27c   :  { %v2096_v50 = vadd.f32 %v8433_v63, %v2083_v5 }
 0x27e   :  { %v2109_v14 = vmax.f32 %v2096_v50, 0.0 }
 0x27f   :  { %v1967_v15 = vpop.f32.mrf.mxu2  ;;  %v2056_v16 = vpop.f32.mrf.mxu3 }
 0x280   :  { %v1995_v17 = vmax.f32 %v1906_v11, %v1967_v15  ;;  %2138 = vrot.lane.b32.xlu2 %v2109_v14, %s7575_s2  ;;  %v1804_v19 = vpop.f32.mrf.mxu0  ;;  %v1880_v20 = vpop.f32.mrf.mxu1 }
 0x281   :  { %v1907_v24 = vmax.f32 %v1804_v19, %v1880_v20 }
 0x282   :  { %v2084_v22 = vmax.f32 %v1995_v17, %v2056_v16  ;;  %v1703_v23 = vpop.permute.xlu1 %1702 }
 0x283   :  { %1739 = vst.msk [vmem:[#allocation2 + $0x18] sm:$0xff] %vm1735_vm11, %v1703_v23 }
 0x284   :  { %v2097_v33 = vadd.f32 %v8433_v63, %v2084_v22 }
 0x286   :  { %v2110_v61 = vmax.f32 %v2097_v33, 0.0 }
 0x287   :  { %v1969_v25 = vpop.f32.mrf.mxu2  ;;  %v2058_v26 = vpop.f32.mrf.mxu3 }
 0x288   :  { %v1996_v27 = vmax.f32 %v1907_v24, %v1969_v25  ;;  %2140 = vrot.lane.b32.xlu2 %v2110_v61, %s7575_s2  ;;  %v1807_v28 = vpop.f32.mrf.mxu0  ;;  %v1883_v29 = vpop.f32.mrf.mxu1 }
 0x289   :  { %v1908_v34 = vmax.f32 %v1807_v28, %v1883_v29 }
 0x28a   :  { %v2085_v30 = vmax.f32 %v1996_v27, %v2058_v26  ;;  %v1705_v31 = vpop.permute.xlu1 %1704 }
 0x28b   :  { %1740 = vst.msk [vmem:[#allocation2 + $0x20] sm:$0xff] %vm1735_vm11, %v1705_v31 }
 0x28c   :  { %v2098_v32 = vadd.f32 %v8433_v63, %v2085_v30 }
 0x28e   :  { %v2111_v35 = vmax.f32 %v2098_v32, 0.0 }
 0x28f   :  { %v1972_v36 = vpop.f32.mrf.mxu2  ;;  %v2061_v37 = vpop.f32.mrf.mxu3 }
 0x290   :  { %v1997_v38 = vmax.f32 %v1908_v34, %v1972_v36  ;;  %2142 = vrot.lane.b32.xlu2 %v2111_v35, %s7575_s2  ;;  %v1809_v39 = vpop.f32.mrf.mxu0  ;;  %v1885_v40 = vpop.f32.mrf.mxu1 }
 0x291   :  { %v1909_v46 = vmax.f32 %v1809_v39, %v1885_v40 }
 0x292   :  { %v2086_v41 = vmax.f32 %v1997_v38, %v2061_v37  ;;  %v1707_v43 = vpop.permute.xlu1 %1706 }
 0x293   :  { %1741 = vst.msk [vmem:[#allocation2 + $0x28] sm:$0xff] %vm1735_vm11, %v1707_v43 }
 0x294   :  { %v2099_v45 = vadd.f32 %v8433_v63, %v2086_v41 }
 0x296   :  { %v2112_v7 = vmax.f32 %v2099_v45, 0.0 }
 0x297   :  { %v1974_v47 = vpop.f32.mrf.mxu2  ;;  %v2063_v53 = vpop.f32.mrf.mxu3 }
 0x298   :  { %v1998_v54 = vmax.f32 %v1909_v46, %v1974_v47  ;;  %2144 = vrot.lane.b32.xlu2 %v2112_v7, %s7575_s2  ;;  %v1812_v42 = vpop.f32.mrf.mxu0  ;;  %v1888_v55 = vpop.f32.mrf.mxu1 }
 0x299   :  { %v1910_v49 = vmax.f32 %v1812_v42, %v1888_v55  ;;  %v7426_v42 = vld [vmem:[%s10272_s3 + $0x88] sm:$0xff] }
 0x29a   :  { %v2087_v56 = vmax.f32 %v1998_v54, %v2063_v53  ;;  %v1709_v57 = vpop.permute.xlu1 %1708  ;;  %v1715_v58 = vpop.permute.xlu2 %1714  ;;  %3242 = vmatpush.bf16.msra.mxu2 %v7426_v42 }
 0x29b   :  { %1742 = vst.msk [vmem:[#allocation2 + $0x30] sm:$0xff] %vm1735_vm11, %v1709_v57 }
 0x29c   :  { %v2100_v59 = vadd.f32 %v8433_v63, %v2087_v56  ;;  %1745 = vst.msk [vmem:[#allocation2 + $0x48] sm:$0xff] %vm1735_vm11, %v1715_v58  ;;  %v7425_v56 = vld [vmem:[%s10272_s3 + $0x80] sm:$0xff] }
 0x29e   :  { %v2113_v60 = vmax.f32 %v2100_v59, 0.0  ;;  %3243 = vmatpush.bf16.msra.mxu2 %v7425_v56 }
 0x29f   :  { %v1977_v62 = vpop.f32.mrf.mxu2  ;;  %v2066_v0 = vpop.f32.mrf.mxu3 }
 0x2a0   :  { %v1999_v1 = vmax.f32 %v1910_v49, %v1977_v62  ;;  %2146 = vrot.lane.b32.xlu2 %v2113_v60, %s7575_s2  ;;  %v1814_v3 = vpop.f32.mrf.mxu0  ;;  %v1890_v4 = vpop.f32.mrf.mxu1 }
 0x2a1   :  { %v1911_v10 = vmax.f32 %v1814_v3, %v1890_v4 }
 0x2a2   :  { %v2088_v6 = vmax.f32 %v1999_v1, %v2066_v0  ;;  %v1711_v8 = vpop.permute.xlu1 %1710 }
 0x2a3   :  { %1743 = vst.msk [vmem:[#allocation2 + $0x38] sm:$0xff] %vm1735_vm11, %v1711_v8 }
 0x2a4   :  { %v2101_v18 = vadd.f32 %v8433_v63, %v2088_v6 }
 0x2a6   :  { %v2114_v9 = vmax.f32 %v2101_v18, 0.0 }
 0x2a7   :  { %v1979_v12 = vpop.f32.mrf.mxu2  ;;  %v2068_v13 = vpop.f32.mrf.mxu3 }
 0x2a8   :  { %v2000_v5 = vmax.f32 %v1911_v10, %v1979_v12  ;;  %2148 = vrot.lane.b32.xlu2 %v2114_v9, %s7575_s2  ;;  %v1817_v50 = vpop.f32.mrf.mxu0  ;;  %v1893_v11 = vpop.f32.mrf.mxu1 }
 0x2a9   :  { %v1912_v19 = vmax.f32 %v1817_v50, %v1893_v11 }
 0x2aa   :  { %v2089_v14 = vmax.f32 %v2000_v5, %v2068_v13  ;;  %v1713_v15 = vpop.permute.xlu1 %1712  ;;  %v1719_v16 = vpop.permute.xlu2 %1718 }
 0x2ab   :  { %1744 = vst.msk [vmem:[#allocation2 + $0x40] sm:$0xff] %vm1735_vm11, %v1713_v15 }
 0x2ac   :  { %v2102_v17 = vadd.f32 %v8433_v63, %v2089_v14  ;;  %1747 = vst.msk [vmem:[#allocation2 + $0x58] sm:$0xff] %vm1735_vm11, %v1719_v16 }
 0x2ae   :  { %v2115_v20 = vmax.f32 %v2102_v17, 0.0 }
 0x2af   :  { %v1982_v22 = vpop.f32.mrf.mxu2  ;;  %v2071_v23 = vpop.f32.mrf.mxu3 }
 0x2b0   :  { %v2001_v33 = vmax.f32 %v1912_v19, %v1982_v22  ;;  %2150 = vrot.lane.b32.xlu2 %v2115_v20, %s7575_s2  ;;  %v1819_v61 = vpop.f32.mrf.mxu0  ;;  %v1895_v24 = vpop.f32.mrf.mxu1 }
 0x2b1   :  { %v1913_v28 = vmax.f32 %v1819_v61, %v1895_v24 }
 0x2b2   :  { %v2090_v25 = vmax.f32 %v2001_v33, %v2071_v23 }
 0x2b4   :  { %v2103_v26 = vadd.f32 %v8433_v63, %v2090_v25 }
 0x2b6   :  { %v2116_v27 = vmax.f32 %v2103_v26, 0.0 }
 0x2b7   :  { %v1984_v29 = vpop.f32.mrf.mxu2  ;;  %v2073_v30 = vpop.f32.mrf.mxu3 }
 0x2b8   :  { %v2002_v31 = vmax.f32 %v1913_v28, %v1984_v29  ;;  %2152 = vrot.lane.b32.xlu2 %v2116_v27, %s7575_s2  ;;  %v1822_v32 = vpop.f32.mrf.mxu0  ;;  %v1898_v34 = vpop.f32.mrf.mxu1 }
 0x2b9   :  { %v1914_v38 = vmax.f32 %v1822_v32, %v1898_v34 }
 0x2ba   :  { %v2091_v35 = vmax.f32 %v2002_v31, %v2073_v30  ;;  %v1717_v36 = vpop.permute.xlu1 %1716 }
 0x2bb   :  { %1746 = vst.msk [vmem:[#allocation2 + $0x50] sm:$0xff] %vm1735_vm11, %v1717_v36  ;;  %vm3128_vm11 = vcmask 261120  }
 0x2bc   :  { %v2104_v37 = vadd.f32 %v8433_v63, %v2091_v35 }
 0x2be   :  { %v2117_v39 = vmax.f32 %v2104_v37, 0.0 }
 0x2bf   :  { %v1987_v40 = vpop.f32.mrf.mxu2  ;;  %v2076_v41 = vpop.f32.mrf.mxu3 }
 0x2c0   :  { %v2003_v43 = vmax.f32 %v1914_v38, %v1987_v40  ;;  %2154 = vrot.lane.b32.xlu2 %v2117_v39, %s7575_s2  ;;  %v1824_v45 = vpop.f32.mrf.mxu0  ;;  %v1900_v7 = vpop.f32.mrf.mxu1 }
 0x2c2   :  { %v2092_v46 = vmax.f32 %v2003_v43, %v2076_v41 }
 0x2c4   :  { %v2105_v47 = vadd.f32 %v8433_v63, %v2092_v46 }
 0x2c6   :  { %v2118_v53 = vmax.f32 %v2105_v47, 0.0 }
 0x2c7   :  { %v1989_v44 = vpop.f32.mrf.mxu2  ;;  %v2078_v54 = vpop.f32.mrf.mxu3 }
 0x2c8   :  { %2156 = vrot.lane.b32.xlu2 %v2118_v53, %s7575_s2 }
 0x2ca   :  { %v1721_v55 = vpop.permute.xlu1 %1720 }
 0x2cb   :  { %1749 = vst.msk [vmem:[#allocation2 + $0x60] sm:$0x3] %vm1748_vm13, %v1721_v55  ;;  %vm2398_vm13 = vcmask 716288  }
 0x2d2   :  { %v2137_v63 = vpop.permute.xlu2 %2136 }
 0x2d3   :  { %2174 = vst.msk [vmem:[#allocation2 + $0x10] sm:$0xff] %vm2171_vm10, %v2137_v63 }
 0x2da   :  { %v2818_v57 = vld [vmem:[#allocation2 + $0x10] sm:$0xff]  ;;  %v2133_v58 = vpop.permute.xlu0 %2132  ;;  %v2139_v59 = vpop.permute.xlu2 %2138 }
 0x2db   :  { %v2831_v49 = vpack.c.bf16 %v2818_v57, %v2818_v57  ;;  %2172 = vst.msk [vmem:[#allocation2] sm:$0xff] %vm2171_vm10, %v2133_v58 }
 0x2dc   :  { %2175 = vst.msk [vmem:[#allocation2 + $0x18] sm:$0xff] %vm2171_vm10, %v2139_v59 }
 0x2dd   :  { %2844 = vst.msk [vmem:[#allocation5 + $0x8] sm:$0xf] %vm2212_vm4, %v2831_v49 }
 0x2de   :  { %2533 = vst.msk [vmem:[#allocation5 + $0x10] sm:$0xf] %vm2212_vm4, %v2831_v49 }
 0x2df   :  { %2215 = vst.msk [vmem:[#allocation5 + $0x18] sm:$0xf] %vm2212_vm4, %v2831_v49 }
 0x2e2   :  { %v2135_v60 = vpop.permute.xlu1 %2134  ;;  %v2141_v62 = vpop.permute.xlu2 %2140  ;;  %v2186_v0 = vld [vmem:[#allocation2] sm:$0xff] }
 0x2e3   :  { %v2819_v1 = vld [vmem:[#allocation2 + $0x18] sm:$0xff]  ;;  %2173 = vst.msk [vmem:[#allocation2 + $0x8] sm:$0xff] %vm2171_vm10, %v2135_v60  ;;  %v2199_v3 = vpack.c.bf16 %v2186_v0, %v2186_v0 }
 0x2e4   :  { %v2832_v4 = vpack.c.bf16 %v2819_v1, %v2819_v1  ;;  %2176 = vst.msk [vmem:[#allocation2 + $0x20] sm:$0xff] %vm2171_vm10, %v2141_v62  ;;  %v6661_v11 = vld [vmem:[#allocation5 + $0x8] sm:$0xf] }
 0x2e5   :  { %2213 = vst.msk [vmem:[#allocation5] sm:$0xf] %vm2212_vm4, %v2199_v3  ;;  %v2728_v20 = vld [vmem:[#allocation2 + $0x17] sm:$0xff] }
 0x2e6   :  { %2845 = vst.msk [vmem:[#allocation5 + $0x14] sm:$0xf] %vm2212_vm4, %v2832_v4  ;;  %v8567_v26 = vpack.c.bf16 %v2728_v20, %v2728_v20  ;;  %v2546_v57 = vld [vmem:[#allocation2 + $0x11] sm:$0xff] }
 0x2e7   :  { %2216 = vst.msk [vmem:[#allocation5 + $0x24] sm:$0xf] %vm2212_vm4, %v2832_v4  ;;  %v2637_v58 = vld [vmem:[#allocation2 + $0x16] sm:$0xff]  ;;  %v2559_v0 = vpack.c.bf16 %v2546_v57, %v2546_v57 }
 0x2e8   :  { %2534 = vst.msk [vmem:[#allocation5 + $0x1c] sm:$0xf] %vm2212_vm4, %v2832_v4  ;;  %v2650_v3 = vpack.c.bf16 %v2637_v58, %v2637_v58 }
 0x2ea   :  { %v2143_v6 = vpop.permute.xlu2 %2142  ;;  %v2636_v8 = vld [vmem:[#allocation2 + $0xe] sm:$0xff]  ;;  %v2227_v9 = vld [vmem:[#allocation2 + $0x1] sm:$0xff] }
 0x2eb   :  { %v2228_v18 = vld [vmem:[#allocation2 + $0x9] sm:$0xff]  ;;  %v2820_v10 = vld [vmem:[#allocation2 + $0x20] sm:$0xff]  ;;  %2177 = vst.msk [vmem:[#allocation2 + $0x28] sm:$0xff] %vm2171_vm10, %v2143_v6  ;;  %v2649_v12 = vpack.c.bf16 %v2636_v8, %v2636_v8  ;;  %v2240_v5 = vpack.c.bf16 %v2227_v9, %v2227_v9 }
 0x2ec   :  { %v8552_v13 = vpack.c.bf16 %v2228_v18, %v2228_v18  ;;  %v2833_v50 = vpack.c.bf16 %v2820_v10, %v2820_v10  ;;  %v2187_v16 = vld [vmem:[#allocation2 + $0x8] sm:$0xff]  ;;  %v2190_v17 = vld [vmem:[#allocation2 + $0x20] sm:$0xff] }
 0x2ed   :  { %2675 = vrot.lane.b32.xlu2 %v2649_v12, %s7570_s28  ;;  %v7393_v14 = vld [vmem:[#allocation5 + $0x10] sm:$0xf0]  ;;  %2266 = vrot.lane.b32.xlu0 %v2240_v5, %s7567_s24  ;;  %v2200_v19 = vpack.c.bf16 %v2187_v16, %v2187_v16  ;;  %v2321_v22 = vld [vmem:[#allocation2 + $0xa] sm:$0xff]  ;;  %v2203_v23 = vpack.c.bf16 %v2190_v17, %v2190_v17 }
 0x2ee   :  { %2268 = vrot.lane.b32.xlu1 %v8552_v13, %s7567_s24  ;;  %2846 = vst.msk [vmem:[#allocation5 + $0x20] sm:$0xf] %vm2212_vm4, %v2833_v50  ;;  %v8559_v15 = vor.u32 %v7393_v14, %v6661_v11  ;;  %v2320_v33 = vld [vmem:[#allocation2 + $0x2] sm:$0xff]  ;;  %v2334_v27 = vpack.c.bf16 %v2321_v22, %v2321_v22  ;;  %v2414_v32 = vld [vmem:[#allocation2 + $0xf] sm:$0xff]  ;;  %v2323_v22 = vld [vmem:[#allocation2 + $0x1a] sm:$0xff] }
 0x2ef   :  { %2535 = vst.msk [vmem:[#allocation5 + $0x28] sm:$0xf] %vm2212_vm4, %v2833_v50  ;;  %v2333_v29 = vpack.c.bf16 %v2320_v33, %v2320_v33  ;;  %v2638_v31 = vld [vmem:[#allocation2 + $0x1e] sm:$0xff]  ;;  %v2413_v34 = vld [vmem:[#allocation2 + $0x7] sm:$0xff]  ;;  %v2427_v39 = vpack.c.bf16 %v2414_v32, %v2414_v32 }
 0x2f0   :  { %6795 = vmatmul.msk.bf16.vlgmr.msra.gmra.mxu2 %vm3128_vm11, %v8559_v15  ;;  %2214 = vst.msk [vmem:[#allocation5 + $0xc] sm:$0xf] %vm2212_vm4, %v2200_v19  ;;  %v2651_v38 = vpack.c.bf16 %v2638_v31, %v2638_v31  ;;  %v2426_v41 = vpack.c.bf16 %v2413_v34, %v2413_v34  ;;  %v2829_v9 = vld [vmem:[#allocation2 + $0x68] sm:$0xff] }
 0x2f1   :  { %2532 = vst.msk [vmem:[#allocation5 + $0x4] sm:$0xf] %vm2212_vm4, %v2200_v19  ;;  %v2842_v10 = vpack.c.bf16 %v2829_v9, %v2829_v9 }
 0x2f2   :  { %v2821_v61 = vld [vmem:[#allocation2 + $0x28] sm:$0xff]  ;;  %v2145_v24 = vpop.permute.xlu2 %2144  ;;  %2217 = vst.msk [vmem:[#allocation5 + $0x30] sm:$0xf] %vm2212_vm4, %v2203_v23  ;;  %v2322_v23 = vld [vmem:[#allocation2 + $0x12] sm:$0xff] }
 0x2f3   :  { %v2834_v25 = vpack.c.bf16 %v2821_v61, %v2821_v61  ;;  %2178 = vst.msk [vmem:[#allocation2 + $0x30] sm:$0xff] %vm2171_vm10, %v2145_v24  ;;  %v2191_v28 = vld [vmem:[#allocation2 + $0x28] sm:$0xff] }
 0x2f4   :  { %v2204_v30 = vpack.c.bf16 %v2191_v28, %v2191_v28  ;;  %v2730_v47 = vld [vmem:[#allocation2 + $0x27] sm:$0xff]  ;;  %2855 = vst.msk [vmem:[#allocation5 + $0x8c] sm:$0xf] %vm2212_vm4, %v2842_v10 }
 0x2f5   :  { %2847 = vst.msk [vmem:[#allocation5 + $0x2c] sm:$0xf] %vm2212_vm4, %v2834_v25  ;;  %2768 = vrot.lane.b32.xlu2 %v8567_v26, %s7571_s0  ;;  %2359 = vrot.lane.b32.xlu0 %v2333_v29, %s7570_s28  ;;  %v6673_v43 = vld [vmem:[#allocation5 + $0x20] sm:$0xf]  ;;  %v8589_v42 = vpack.c.bf16 %v2730_v47, %v2730_v47  ;;  %v2324_v63 = vld [vmem:[#allocation2 + $0x22] sm:$0xff]  ;;  %v2335_v29 = vpack.c.bf16 %v2322_v23, %v2322_v23 }
 0x2f6   :  { %2361 = vrot.lane.b32.xlu1 %v2334_v27, %s7570_s28  ;;  %2218 = vst.msk [vmem:[#allocation5 + $0x3c] sm:$0xf] %vm2212_vm4, %v2204_v30  ;;  %v2337_v62 = vpack.c.bf16 %v2324_v63, %v2324_v63  ;;  %v2336_v27 = vpack.c.bf16 %v2323_v22, %v2323_v22 }
 0x2f7   :  { %2536 = vst.msk [vmem:[#allocation5 + $0x34] sm:$0xf] %vm2212_vm4, %v2204_v30 }
 0x2fa   :  { %v2822_v35 = vld [vmem:[#allocation2 + $0x30] sm:$0xff]  ;;  %v2147_v36 = vpop.permute.xlu2 %2146 }
 0x2fb   :  { %v2835_v37 = vpack.c.bf16 %v2822_v35, %v2822_v35  ;;  %2179 = vst.msk [vmem:[#allocation2 + $0x38] sm:$0xff] %vm2171_vm10, %v2147_v36  ;;  %v2511_v40 = vld [vmem:[#allocation2 + $0x30] sm:$0xff]  ;;  %v2416_v36 = vld [vmem:[#allocation2 + $0x1f] sm:$0xff] }
 0x2fc   :  { %v7396_v45 = vld [vmem:[#allocation5 + $0x28] sm:$0xf0]  ;;  %v2524_v7 = vpack.c.bf16 %v2511_v40, %v2511_v40  ;;  %v2418_v12 = vld [vmem:[#allocation2 + $0x2f] sm:$0xff] }
 0x2fd   :  { %2848 = vst.msk [vmem:[#allocation5 + $0x38] sm:$0xf] %vm2212_vm4, %v2835_v37  ;;  %2679 = vrot.lane.b32.xlu2 %v2651_v38, %s7570_s28  ;;  %v8581_v46 = vor.u32 %v7396_v45, %v6673_v43  ;;  %2452 = vrot.lane.b32.xlu0 %v2426_v41, %s7571_s0  ;;  %v8612_v14 = vpack.c.bf16 %v2418_v12, %v2418_v12  ;;  %v2640_v20 = vld [vmem:[#allocation2 + $0x2e] sm:$0xff]  ;;  %v7408_v12 = vld [vmem:[#allocation5 + $0x88] sm:$0xf0] }
 0x2fe   :  { %2454 = vrot.lane.b32.xlu1 %v2427_v39, %s7571_s0  ;;  %2537 = vst.msk [vmem:[#allocation5 + $0x40] sm:$0xf] %vm2212_vm4, %v2524_v7  ;;  %v2653_v25 = vpack.c.bf16 %v2640_v20, %v2640_v20  ;;  %v2429_v41 = vpack.c.bf16 %v2416_v36, %v2416_v36  ;;  %v7432_v20 = vld [vmem:[%s10272_s3 + $0xb8] sm:$0xff] }
 0x2ff   :  { %2219 = vst.msk [vmem:[#allocation5 + $0x48] sm:$0xf] %vm2212_vm4, %v2524_v7 }
 0x300   :  { %6796 = vmatmul.msk.bf16.gmra.mxu2 %vm3128_vm11, %v8581_v46 }
 0x302   :  { %v2823_v53 = vld [vmem:[#allocation2 + $0x38] sm:$0xff]  ;;  %v2149_v44 = vpop.permute.xlu2 %2148 }
 0x303   :  { %v2836_v54 = vpack.c.bf16 %v2823_v53, %v2823_v53  ;;  %2180 = vst.msk [vmem:[#allocation2 + $0x40] sm:$0xff] %vm2171_vm10, %v2149_v44  ;;  %v2193_v55 = vld [vmem:[#allocation2 + $0x38] sm:$0xff] }
 0x304   :  { %v2206_v56 = vpack.c.bf16 %v2193_v55, %v2193_v55  ;;  %v6685_v4 = vld [vmem:[#allocation5 + $0x38] sm:$0xf]  ;;  %v2732_v35 = vld [vmem:[#allocation2 + $0x37] sm:$0xff] }
 0x305   :  { %2849 = vst.msk [vmem:[#allocation5 + $0x44] sm:$0xf] %vm2212_vm4, %v2836_v54  ;;  %2772 = vrot.lane.b32.xlu2 %v8589_v42, %s7571_s0  ;;  %2584 = vrot.lane.b32.xlu0 %v8552_v13, %s7567_s24  ;;  %v2230_v13 = vld [vmem:[#allocation2 + $0x19] sm:$0xff]  ;;  %v8632_v40 = vpack.c.bf16 %v2732_v35, %v2732_v35 }
 0x306   :  { %2766 = vrot.lane.b32.xlu1 %v2427_v39, %s7571_s0  ;;  %2220 = vst.msk [vmem:[#allocation5 + $0x54] sm:$0xf] %vm2212_vm4, %v2206_v56  ;;  %v2243_v16 = vpack.c.bf16 %v2230_v13, %v2230_v13  ;;  %v2326_v7 = vld [vmem:[#allocation2 + $0x32] sm:$0xff] }
 0x307   :  { %2538 = vst.msk [vmem:[#allocation5 + $0x4c] sm:$0xf] %vm2212_vm4, %v2206_v56  ;;  %v2339_v44 = vpack.c.bf16 %v2326_v7, %v2326_v7  ;;  %v7424_v35 = vld [vmem:[%s10272_s3 + $0x78] sm:$0xff] }
 0x308   :  { %3193 = vmatpush.bf16.msra.mxu1 %v7424_v35  ;;  %v2550_v7 = vld [vmem:[#allocation2 + $0x31] sm:$0xff] }
 0x30a   :  { %v2824_v59 = vld [vmem:[#allocation2 + $0x40] sm:$0xff]  ;;  %v2151_v49 = vpop.permute.xlu2 %2150 }
 0x30b   :  { %v2837_v60 = vpack.c.bf16 %v2824_v59, %v2824_v59  ;;  %2181 = vst.msk [vmem:[#allocation2 + $0x48] sm:$0xff] %vm2171_vm10, %v2151_v49  ;;  %v2513_v1 = vld [vmem:[#allocation2 + $0x40] sm:$0xff] }
 0x30c   :  { %v7399_v6 = vld [vmem:[#allocation5 + $0x40] sm:$0xf0]  ;;  %v2526_v8 = vpack.c.bf16 %v2513_v1, %v2513_v1  ;;  %v2420_v59 = vld [vmem:[#allocation2 + $0x3f] sm:$0xff] }
 0x30d   :  { %2850 = vst.msk [vmem:[#allocation5 + $0x50] sm:$0xf] %vm2212_vm4, %v2837_v60  ;;  %2367 = vrot.lane.b32.xlu2 %v2337_v62, %s7570_s28  ;;  %v8603_v18 = vor.u32 %v7399_v6, %v6685_v4  ;;  %2677 = vrot.lane.b32.xlu0 %v2650_v3, %s7570_s28  ;;  %v2548_v49 = vld [vmem:[#allocation2 + $0x21] sm:$0xff]  ;;  %v8652_v62 = vpack.c.bf16 %v2420_v59, %v2420_v59  ;;  %v7416_v3 = vld [vmem:[%s10272_s3 + $0x38] sm:$0xff] }
 0x30e   :  { %2586 = vrot.lane.b32.xlu1 %v2559_v0, %s7567_s24  ;;  %2539 = vst.msk [vmem:[#allocation5 + $0x58] sm:$0xf] %vm2212_vm4, %v2526_v8  ;;  %v2639_v60 = vld [vmem:[#allocation2 + $0x26] sm:$0xff]  ;;  %v7452_v6 = vld [vmem:[%s10272_s3 + $0x158] sm:$0xff]  ;;  %3150 = vmatpush.bf16.msra.mxu0 %v7416_v3 }
 0x30f   :  { %2221 = vst.msk [vmem:[#allocation5 + $0x60] sm:$0xf] %vm2212_vm4, %v2526_v8  ;;  %v2652_v1 = vpack.c.bf16 %v2639_v60, %v2639_v60  ;;  %v7434_v4 = vld [vmem:[%s10272_s3 + $0xc8] sm:$0xff]  ;;  %v2642_v8 = vld [vmem:[#allocation2 + $0x3e] sm:$0xff]  ;;  %3711 = vmatpush.bf16.msrb.mxu2 %v7452_v6 }
 0x310   :  { %6797 = vmatmul.msk.bf16.gmra.mxu2 %vm3128_vm11, %v8603_v18  ;;  %3424 = vmatpush.bf16.msra.mxu3 %v7434_v4  ;;  %v2655_v9 = vpack.c.bf16 %v2642_v8, %v2642_v8  ;;  %v7409_v59 = vld [vmem:[%s10272_s3] sm:$0xff]  ;;  %v7420_v4 = vld [vmem:[%s10272_s3 + $0x58] sm:$0xff] }
 0x311   :  { %v7445_v60 = vld [vmem:[%s10272_s3 + $0x120] sm:$0xff] }
 0x312   :  { %v2825_v5 = vld [vmem:[#allocation2 + $0x48] sm:$0xff]  ;;  %v2153_v50 = vpop.permute.xlu2 %2152  ;;  %v7421_v3 = vld [vmem:[%s10272_s3 + $0x60] sm:$0xff] }
 0x313   :  { %v2838_v11 = vpack.c.bf16 %v2825_v5, %v2825_v5  ;;  %2182 = vst.msk [vmem:[#allocation2 + $0x50] sm:$0xff] %vm2171_vm10, %v2153_v50  ;;  %v2195_v17 = vld [vmem:[#allocation2 + $0x48] sm:$0xff]  ;;  %v7415_v5 = vld [vmem:[%s10272_s3 + $0x30] sm:$0xff]  ;;  %v7433_v50 = vld [vmem:[%s10272_s3 + $0xc0] sm:$0xff] }
 0x314   :  { %v2208_v19 = vpack.c.bf16 %v2195_v17, %v2195_v17  ;;  %v6697_v30 = vld [vmem:[#allocation5 + $0x50] sm:$0xf]  ;;  %3151 = vmatpush.bf16.msra.mxu0 %v7415_v5  ;;  %v2325_v17 = vld [vmem:[#allocation2 + $0x2a] sm:$0xff]  ;;  %3425 = vmatpush.bf16.msra.mxu3 %v7433_v50 }
 0x315   :  { %2851 = vst.msk [vmem:[#allocation5 + $0x5c] sm:$0xf] %vm2212_vm4, %v2838_v11  ;;  %2462 = vrot.lane.b32.xlu2 %v8612_v14, %s7571_s0  ;;  %2270 = vrot.lane.b32.xlu0 %v2559_v0, %s7567_s24  ;;  %v2561_v0 = vpack.c.bf16 %v2548_v49, %v2548_v49  ;;  %v7451_v11 = vld [vmem:[%s10272_s3 + $0x150] sm:$0xff]  ;;  %v2327_v5 = vld [vmem:[#allocation2 + $0x3a] sm:$0xff] }
 0x316   :  { %2272 = vrot.lane.b32.xlu1 %v2243_v16, %s7567_s24  ;;  %2222 = vst.msk [vmem:[#allocation5 + $0x6c] sm:$0xf] %vm2212_vm4, %v2208_v19  ;;  %3712 = vmatpush.bf16.msrb.mxu2 %v7451_v11  ;;  %v7427_v49 = vld [vmem:[%s10272_s3 + $0x90] sm:$0xff] }
 0x317   :  { %2540 = vst.msk [vmem:[#allocation5 + $0x64] sm:$0xf] %vm2212_vm4, %v2208_v19  ;;  %v7414_v19 = vld [vmem:[%s10272_s3 + $0x28] sm:$0xff] }
 0x318   :  { %3152 = vmatpush.bf16.msra.mxu0 %v7414_v19  ;;  %3426 = vmatpush.bf16.msra.mxu3 %v7432_v20 }
 0x31a   :  { %v2826_v33 = vld [vmem:[#allocation2 + $0x50] sm:$0xff]  ;;  %v2155_v61 = vpop.permute.xlu2 %2154 }
 0x31b   :  { %v2839_v24 = vpack.c.bf16 %v2826_v33, %v2826_v33  ;;  %2183 = vst.msk [vmem:[#allocation2 + $0x58] sm:$0xff] %vm2171_vm10, %v2155_v61  ;;  %v2515_v28 = vld [vmem:[#allocation2 + $0x50] sm:$0xff]  ;;  %v7450_v33 = vld [vmem:[%s10272_s3 + $0x148] sm:$0xff]  ;;  %v2338_v61 = vpack.c.bf16 %v2325_v17, %v2325_v17  ;;  %vm2491_vm10 = vcmask 978688  }
 0x31c   :  { %v7402_v31 = vld [vmem:[#allocation5 + $0x58] sm:$0xf0]  ;;  %v2528_v32 = vpack.c.bf16 %v2515_v28, %v2515_v28  ;;  %3713 = vmatpush.bf16.msrb.mxu2 %v7450_v33  ;;  %v7417_v33 = vld [vmem:[%s10272_s3 + $0x40] sm:$0xff] }
 0x31d   :  { %2852 = vst.msk [vmem:[#allocation5 + $0x68] sm:$0xf] %vm2212_vm4, %v2839_v24  ;;  %2683 = vrot.lane.b32.xlu2 %v2653_v25, %s7570_s28  ;;  %v8625_v34 = vor.u32 %v7402_v31, %v6697_v30  ;;  %2363 = vrot.lane.b32.xlu0 %v2335_v29, %s7570_s28  ;;  %v7413_v24 = vld [vmem:[%s10272_s3 + $0x20] sm:$0xff]  ;;  %v7431_v25 = vld [vmem:[%s10272_s3 + $0xb0] sm:$0xff] }
 0x31e   :  { %2365 = vrot.lane.b32.xlu1 %v2336_v27, %s7570_s28  ;;  %2541 = vst.msk [vmem:[#allocation5 + $0x70] sm:$0xf] %vm2212_vm4, %v2528_v32  ;;  %v7449_v27 = vld [vmem:[%s10272_s3 + $0x140] sm:$0xff]  ;;  %3153 = vmatpush.bf16.msra.mxu0 %v7413_v24  ;;  %v7412_v30 = vld [vmem:[%s10272_s3 + $0x18] sm:$0xff] }
 0x31f   :  { %2223 = vst.msk [vmem:[#allocation5 + $0x78] sm:$0xf] %vm2212_vm4, %v2528_v32  ;;  %v2328_v28 = vld [vmem:[#allocation2 + $0x42] sm:$0xff]  ;;  %3427 = vmatpush.bf16.msra.mxu3 %v7431_v25 }
 0x320   :  { %6798 = vmatmul.msk.bf16.gmra.mxu2 %vm3128_vm11, %v8625_v34  ;;  %v2882_v29 = vld [vmem:[#allocation5 + $0x98] sm:$0x1]  ;;  %v7430_v32 = vld [vmem:[%s10272_s3 + $0xa8] sm:$0xff]  ;;  %v2341_v36 = vpack.c.bf16 %v2328_v28, %v2328_v28 }
 0x321   :  { %v2984_v31 = vunpack.c.l.b16 %v2882_v29  ;;  %3714 = vmatpush.bf16.msrb.mxu2 %v7449_v27  ;;  %v2552_v28 = vld [vmem:[#allocation2 + $0x41] sm:$0xff] }
 0x322   :  { %v2827_v37 = vld [vmem:[#allocation2 + $0x58] sm:$0xff]  ;;  %v2157_v38 = vpop.permute.xlu2 %2156  ;;  %3154 = vmatpush.bf16.msra.mxu0 %v7412_v30  ;;  %v2643_v29 = vld [vmem:[#allocation2 + $0x46] sm:$0xff] }
 0x323   :  { %v2840_v39 = vpack.c.bf16 %v2827_v37, %v2827_v37  ;;  %2185 = vst.msk [vmem:[#allocation2 + $0x60] sm:$0x3] %vm2184_vm12, %v2157_v38  ;;  %v2197_v43 = vld [vmem:[#allocation2 + $0x58] sm:$0xff]  ;;  %v8720_v38 = vpack.c.b16 %v2984_v31, %v2984_v31  ;;  %3428 = vmatpush.bf16.msra.mxu3 %v7430_v32  ;;  %v2565_v32 = vpack.c.bf16 %v2552_v28, %v2552_v28  ;;  %vm2504_vm12 = vcmask 975616  }
 0x324   :  { %v2210_v45 = vpack.c.bf16 %v2197_v43, %v2197_v43  ;;  %v6709_v54 = vld [vmem:[#allocation5 + $0x68] sm:$0xf]  ;;  %v7448_v37 = vld [vmem:[%s10272_s3 + $0x138] sm:$0xff] }
 0x325   :  { %2853 = vst.msk [vmem:[#allocation5 + $0x74] sm:$0xf] %vm2212_vm4, %v2840_v39  ;;  %2776 = vrot.lane.b32.xlu2 %v8632_v40, %s7571_s0  ;;  %2456 = vrot.lane.b32.xlu0 %v8567_v26, %s7571_s0  ;;  %v7411_v39 = vld [vmem:[%s10272_s3 + $0x10] sm:$0xff] }
 0x326   :  { %2458 = vrot.lane.b32.xlu1 %v2429_v41, %s7571_s0  ;;  %2224 = vst.msk [vmem:[#allocation5 + $0x84] sm:$0xf] %vm2212_vm4, %v2210_v45  ;;  %3715 = vmatpush.bf16.msrb.mxu2 %v7448_v37  ;;  %v7447_v43 = vld [vmem:[%s10272_s3 + $0x130] sm:$0xff] }
 0x327   :  { %2542 = vst.msk [vmem:[#allocation5 + $0x7c] sm:$0xf] %vm2212_vm4, %v2210_v45  ;;  %v2422_v45 = vld [vmem:[#allocation2 + $0x4f] sm:$0xff]  ;;  %3155 = vmatpush.bf16.msra.mxu0 %v7411_v39 }
 0x328   :  { %v2330_v20 = vld [vmem:[#allocation2 + $0x52] sm:$0xff] }
 0x32a   :  { %v2828_v47 = vld [vmem:[#allocation2 + $0x60] sm:$0xff]  ;;  %3716 = vmatpush.bf16.msrb.mxu2 %v7447_v43 }
 0x32b   :  { %v2841_v53 = vpack.c.bf16 %v2828_v47, %v2828_v47  ;;  %v2517_v56 = vld [vmem:[#allocation2 + $0x60] sm:$0xff]  ;;  %v7423_v47 = vld [vmem:[%s10272_s3 + $0x70] sm:$0xff] }
 0x32c   :  { %v7405_v55 = vld [vmem:[#allocation5 + $0x70] sm:$0xf0]  ;;  %v2530_v26 = vpack.c.bf16 %v2517_v56, %v2517_v56  ;;  %3194 = vmatpush.bf16.msra.mxu1 %v7423_v47  ;;  %v7446_v56 = vld [vmem:[%s10272_s3 + $0x128] sm:$0xff] }
 0x32d   :  { %2854 = vst.msk [vmem:[#allocation5 + $0x80] sm:$0xf] %vm2212_vm4, %v2841_v53  ;;  %2371 = vrot.lane.b32.xlu2 %v2339_v44, %s7570_s28  ;;  %v8645_v63 = vor.u32 %v7405_v55, %v6709_v54  ;;  %v2198_v57 = vld [vmem:[#allocation2 + $0x60] sm:$0x3]  ;;  %2588 = vrot.lane.b32.xlu0 %v2243_v16, %s7567_s24  ;;  %v2232_v16 = vld [vmem:[#allocation2 + $0x29] sm:$0xff]  ;;  %v8740_v53 = vpack.c.bf16 %v2422_v45, %v2422_v45  ;;  %v7428_v55 = vld [vmem:[%s10272_s3 + $0x98] sm:$0xff] }
 0x32e   :  { %2770 = vrot.lane.b32.xlu1 %v2429_v41, %s7571_s0  ;;  %v2211_v58 = vpack.c.bf16 %v2198_v57, %v2198_v57  ;;  %2543 = vst.msk [vmem:[#allocation5 + $0x88] sm:$0xf] %vm2212_vm4, %v2530_v26  ;;  %v2245_v23 = vpack.c.bf16 %v2232_v16, %v2232_v16  ;;  %v7429_v41 = vld [vmem:[%s10272_s3 + $0xa0] sm:$0xff]  ;;  %v2563_v44 = vpack.c.bf16 %v2550_v7, %v2550_v7  ;;  %v7410_v54 = vld [vmem:[%s10272_s3 + $0x8] sm:$0xff]  ;;  %vm57_vm4 = vcmask 130048  }
 0x32f   :  { %3429 = vmatpush.bf16.msra.mxu3 %v7429_v41  ;;  %v7422_v57 = vld [vmem:[%s10272_s3 + $0x68] sm:$0xff]  ;;  %3156 = vmatpush.bf16.msra.mxu0 %v7410_v54  ;;  %v2424_v27 = vld [vmem:[#allocation2 + $0x5f] sm:$0xff]  ;;  %70 = vst.msk [vmem:[#allocation3 + $0x60] sm:$0xff] %vm57_vm4, %v10281_v51 }
 0x330   :  { %6799 = vmatmul.msk.bf16.gmra.mxu2 %vm3128_vm11, %v8645_v63  ;;  %2226 = vst.msk [vmem:[#allocation5 + $0x90] sm:$0x1] %vm2225_vm14, %v2211_v58  ;;  %3195 = vmatpush.bf16.msra.mxu1 %v7422_v57  ;;  %vm2305_vm14 = vcmask 453888   ;;  %v7418_v16 = vld [vmem:[%s10272_s3 + $0x48] sm:$0xff]  ;;  %v8810_v31 = vpack.c.bf16 %v2424_v27, %v2424_v27  ;;  %v2646_v43 = vld [vmem:[#allocation2 + $0x5e] sm:$0xff] }
 0x331   :  { %3717 = vmatpush.bf16.msrb.mxu2 %v7446_v56  ;;  %v2329_v56 = vld [vmem:[#allocation2 + $0x4a] sm:$0xff]  ;;  %71 = vst.msk [vmem:[#allocation3 + $0x68] sm:$0xff] %vm57_vm4, %v10281_v51 }
 0x332   :  { %58 = vst.msk [vmem:[#allocation3] sm:$0xff] %vm57_vm4, %v10281_v51 }
 0x333   :  { %3430 = vmatpush.bf16.msra.mxu3 %v7428_v55  ;;  %3157 = vmatpush.bf16.msra.mxu0 %v7409_v59  ;;  %v2236_v55 = vld [vmem:[#allocation2 + $0x49] sm:$0xff]  ;;  %59 = vst.msk [vmem:[#allocation3 + $0x8] sm:$0xff] %vm57_vm4, %v10281_v51 }
 0x334   :  { %v6721_v10 = vld [vmem:[#allocation5 + $0x80] sm:$0xf]  ;;  %3196 = vmatpush.bf16.msra.mxu1 %v7421_v3  ;;  %v2249_v57 = vpack.c.bf16 %v2236_v55, %v2236_v55  ;;  %60 = vst.msk [vmem:[#allocation3 + $0x10] sm:$0xff] %vm57_vm4, %v10281_v51 }
 0x335   :  { %2466 = vrot.lane.b32.xlu2 %v8652_v62, %s7571_s0  ;;  %2681 = vrot.lane.b32.xlu0 %v2652_v1, %s7570_s28  ;;  %v8671_v13 = vor.u32 %v7408_v12, %v6721_v10  ;;  %v2736_v10 = vld [vmem:[#allocation2 + $0x57] sm:$0xff]  ;;  %61 = vst.msk [vmem:[#allocation3 + $0x18] sm:$0xff] %vm57_vm4, %v10281_v51 }
 0x336   :  { %2590 = vrot.lane.b32.xlu1 %v2561_v0, %s7567_s24  ;;  %3718 = vmatpush.bf16.msrb.mxu2 %v7445_v60  ;;  %v2234_v12 = vld [vmem:[#allocation2 + $0x39] sm:$0xff]  ;;  %v8786_v50 = vpack.c.bf16 %v2736_v10, %v2736_v10  ;;  %62 = vst.msk [vmem:[#allocation3 + $0x20] sm:$0xff] %vm57_vm4, %v10281_v51 }
 0x337   :  { %3431 = vmatpush.bf16.msra.mxu3 %v7427_v49  ;;  %v2247_v11 = vpack.c.bf16 %v2234_v12, %v2234_v12  ;;  %63 = vst.msk [vmem:[#allocation3 + $0x28] sm:$0xff] %vm57_vm4, %v10281_v51 }
 0x338   :  { %3197 = vmatpush.bf16.msra.mxu1 %v7420_v4  ;;  %64 = vst.msk [vmem:[#allocation3 + $0x30] sm:$0xff] %vm57_vm4, %v10281_v51 }
 0x339   :  { %65 = vst.msk [vmem:[#allocation3 + $0x38] sm:$0xff] %vm57_vm4, %v10281_v51 }
 0x33a   :  { %66 = vst.msk [vmem:[#allocation3 + $0x40] sm:$0xff] %vm57_vm4, %v10281_v51 }
 0x33b   :  { %67 = vst.msk [vmem:[#allocation3 + $0x48] sm:$0xff] %vm57_vm4, %v10281_v51 }
 0x33c   :  { %68 = vst.msk [vmem:[#allocation3 + $0x50] sm:$0xff] %vm57_vm4, %v10281_v51 }
 0x33d   :  { %2687 = vrot.lane.b32.xlu2 %v2655_v9, %s7570_s28  ;;  %2274 = vrot.lane.b32.xlu0 %v2561_v0, %s7567_s24  ;;  %v2644_v0 = vld [vmem:[#allocation2 + $0x4e] sm:$0xff]  ;;  %69 = vst.msk [vmem:[#allocation3 + $0x58] sm:$0xff] %vm57_vm4, %v10281_v51 }
 0x33e   :  { %2460 = vrot.lane.b32.xlu1 %v8589_v42, %s7571_s0  ;;  %v2734_v42 = vld [vmem:[#allocation2 + $0x47] sm:$0xff]  ;;  %v2657_v1 = vpack.c.bf16 %v2644_v0, %v2644_v0  ;;  %72 = vst.msk [vmem:[#allocation3 + $0x70] sm:$0xff] %vm57_vm4, %v10281_v51 }
 0x33f   :  { %v8690_v22 = vpack.c.bf16 %v2734_v42, %v2734_v42  ;;  %v2340_v42 = vpack.c.bf16 %v2327_v5, %v2327_v5 }
 0x340   :  { %6800 = vmatmul.msk.bf16.gmra.mxu2 %vm3128_vm11, %v8671_v13 }
 0x345   :  { %2780 = vrot.lane.b32.xlu2 %v8690_v22, %s7571_s0  ;;  %2369 = vrot.lane.b32.xlu0 %v2338_v61, %s7570_s28  ;;  %v2343_v61 = vpack.c.bf16 %v2330_v20, %v2330_v20 }
 0x346   :  { %2276 = vrot.lane.b32.xlu1 %v2245_v23, %s7567_s24 }
 0x347   :  { %v8757_v58 = vpop.permute.xlu2 %2675 }
 0x34d   :  { %2375 = vrot.lane.b32.xlu2 %v2341_v36, %s7570_s28  ;;  %2592 = vrot.lane.b32.xlu0 %v2245_v23, %s7567_s24 }
 0x34e   :  { %2774 = vrot.lane.b32.xlu1 %v8612_v14, %s7571_s0  ;;  %v2641_v14 = vld [vmem:[#allocation2 + $0x36] sm:$0xff] }
 0x34f   :  { %v2654_v26 = vpack.c.bf16 %v2641_v14, %v2641_v14  ;;  %v8779_v8 = vpop.permute.xlu2 %2768  ;;  %v2659_v14 = vpack.c.bf16 %v2646_v43, %v2646_v43 }
 0x350   :  { %6801 = vmatmul.msk.bf16.gmra.mxu2 %vm3128_vm11, %v8720_v38 }
 0x355   :  { %2470 = vrot.lane.b32.xlu2 %v8740_v53, %s7571_s0  ;;  %2685 = vrot.lane.b32.xlu0 %v2654_v26, %s7570_s28 }
 0x356   :  { %2594 = vrot.lane.b32.xlu1 %v2563_v44, %s7567_s24 }
 0x357   :  { %v8797_v23 = vpop.permute.xlu2 %2679 }
 0x35d   :  { %2691 = vrot.lane.b32.xlu2 %v2657_v1, %s7570_s28  ;;  %2278 = vrot.lane.b32.xlu0 %v2563_v44, %s7567_s24 }
 0x35e   :  { %2464 = vrot.lane.b32.xlu1 %v8632_v40, %s7571_s0  ;;  %v7419_v40 = vld [vmem:[%s10272_s3 + $0x50] sm:$0xff] }
 0x35f   :  { %v2267_v9 = vpop.permute.xlu0 %2266  ;;  %3198 = vmatpush.bf16.msra.mxu1 %v7419_v40  ;;  %v8812_v35 = vpop.permute.xlu2 %2772 }
 0x360   :  { %v2269_v6 = vpop.permute.xlu1 %2268  ;;  %2306 = vst.msk [vmem:[#allocation5] sm:$0xf] %vm2305_vm14, %v2267_v9  ;;  %v2645_v9 = vld [vmem:[#allocation2 + $0x56] sm:$0xff] }
 0x361   :  { %2307 = vst.msk [vmem:[#allocation5 + $0xc] sm:$0xf] %vm2305_vm14, %v2269_v6 }
 0x363   :  { %3199 = vmatpush.bf16.msra.mxu1 %v7418_v16 }
 0x365   :  { %2784 = vrot.lane.b32.xlu2 %v8786_v50, %s7571_s0  ;;  %2373 = vrot.lane.b32.xlu0 %v2340_v42, %s7570_s28 }
 0x366   :  { %2280 = vrot.lane.b32.xlu1 %v2247_v11, %s7567_s24 }
 0x367   :  { %v2360_v19 = vpop.permute.xlu0 %2359  ;;  %3200 = vmatpush.bf16.msra.mxu1 %v7417_v33  ;;  %v8832_v47 = vpop.permute.xlu2 %2367 }
 0x368   :  { %v2362_v17 = vpop.permute.xlu1 %2361  ;;  %2399 = vst.msk [vmem:[#allocation5] sm:$0xf] %vm2398_vm13, %v2360_v19 }
 0x369   :  { %2400 = vst.msk [vmem:[#allocation5 + $0xc] sm:$0xf] %vm2398_vm13, %v2362_v17 }
 0x36d   :  { %2379 = vrot.lane.b32.xlu2 %v2343_v61, %s7570_s28  ;;  %2596 = vrot.lane.b32.xlu0 %v2247_v11, %s7567_s24  ;;  %v2238_v61 = vld [vmem:[#allocation2 + $0x59] sm:$0xff] }
 0x36e   :  { %2778 = vrot.lane.b32.xlu1 %v8652_v62, %s7571_s0  ;;  %v2656_v62 = vpack.c.bf16 %v2643_v29, %v2643_v29  ;;  %v2251_v27 = vpack.c.bf16 %v2238_v61, %v2238_v61 }
 0x36f   :  { %v2453_v25 = vpop.permute.xlu0 %2452  ;;  %v8843_v59 = vpop.permute.xlu2 %2462 }
 0x370   :  { %v2455_v24 = vpop.permute.xlu1 %2454  ;;  %2492 = vst.msk [vmem:[#allocation5] sm:$0xf] %vm2491_vm10, %v2453_v25 }
 0x371   :  { %2493 = vst.msk [vmem:[#allocation5 + $0xc] sm:$0xf] %vm2491_vm10, %v2455_v24  ;;  %v2331_v24 = vld [vmem:[#allocation2 + $0x5a] sm:$0xff] }
 0x372   :  { %v2344_v28 = vpack.c.bf16 %v2331_v24, %v2331_v24 }
 0x373   :  { %v8808_v30 = vpop.f32.mrf.mxu2 }
 0x375   :  { %2474 = vrot.lane.b32.xlu2 %v8810_v31, %s7571_s0  ;;  %2689 = vrot.lane.b32.xlu0 %v2656_v62, %s7570_s28  ;;  %v2556_v62 = vld [vmem:[#allocation2 + $0x61] sm:$0xff] }
 0x376   :  { %2598 = vrot.lane.b32.xlu1 %v2565_v32, %s7567_s24 }
 0x377   :  { %v2585_v39 = vpop.permute.xlu0 %2584  ;;  %v6653_v41 = vld [vmem:[#allocation5] sm:$0xf]  ;;  %v8857_v10 = vpop.permute.xlu2 %2683 }
 0x378   :  { %v2767_v36 = vpop.permute.xlu1 %2766  ;;  %v7392_v37 = vld [vmem:[#allocation5 + $0x8] sm:$0xf0]  ;;  %2623 = vst.msk [vmem:[#allocation5 + $0x4] sm:$0xf] %vm2305_vm14, %v2585_v39 }
 0x379   :  { %v8819_v45 = vor.u32 %v7392_v37, %v6653_v41  ;;  %2714 = vst.msk [vmem:[#allocation5 + $0x4] sm:$0xf] %vm2398_vm13, %v8757_v58  ;;  %v2342_v58 = vpack.c.bf16 %v2329_v56, %v2329_v56  ;;  %v2569_v37 = vpack.c.bf16 %v2556_v62, %v2556_v62  ;;  %v4916_v41 = vld [vmem:[#allocation3 + $0x67] sm:$0xff] }
 0x37a   :  { %2805 = vst.msk [vmem:[#allocation5 + $0x4] sm:$0xf] %vm2491_vm10, %v2767_v36  ;;  %v4929_v55 = vpack.c.bf16 %v4916_v41, %v4916_v41  ;;  %v7441_v62 = vld [vmem:[%s10272_s3 + $0x100] sm:$0xff] }
 0x37b   :  { %3158 = vmatmul.bf16.vlgmr.msra.gmra.mxu0 %v8819_v45  ;;  %v8825_v7 = vpop.f32.mrf.mxu2  ;;  %3432 = vmatmul.bf16.vlgmr.msra.gmra.mxu3 %v8819_v45 }
 0x37c   :  { %3719 = vmatmul.bf16.vlgmr.msrb.gmra.mxu2 %v8819_v45 }
 0x37d   :  { %2695 = vrot.lane.b32.xlu2 %v2659_v14, %s7570_s28  ;;  %2282 = vrot.lane.b32.xlu0 %v2565_v32, %s7567_s24 }
 0x37e   :  { %2468 = vrot.lane.b32.xlu1 %v8690_v22, %s7571_s0 }
 0x37f   :  { %v2678_v54 = vpop.permute.xlu0 %2677  ;;  %v8883_v16 = vpop.permute.xlu2 %2776 }
 0x380   :  { %v2587_v44 = vpop.permute.xlu1 %2586 }
 0x381   :  { %2624 = vst.msk [vmem:[#allocation5 + $0x10] sm:$0xf] %vm2305_vm14, %v2587_v44  ;;  %v7391_v60 = vld [vmem:[#allocation5 + $0x4] sm:$0xf] }
 0x382   :  { %2715 = vst.msk [vmem:[#allocation5 + $0x10] sm:$0xf] %vm2398_vm13, %v2678_v54 }
 0x383   :  { %2806 = vst.msk [vmem:[#allocation5 + $0x10] sm:$0xf] %vm2491_vm10, %v8779_v8  ;;  %v8839_v26 = vpop.f32.mrf.mxu2  ;;  %v2554_v8 = vld [vmem:[#allocation2 + $0x51] sm:$0xff] }
 0x384   :  { %v2567_v5 = vpack.c.bf16 %v2554_v8, %v2554_v8 }
 0x385   :  { %2377 = vrot.lane.b32.xlu0 %v2342_v58, %s7570_s28 }
 0x386   :  { %2284 = vrot.lane.b32.xlu1 %v2249_v57, %s7567_s24 }
 0x387   :  { %v2271_v49 = vpop.permute.xlu0 %2270 }
 0x388   :  { %v2273_v22 = vpop.permute.xlu1 %2272  ;;  %2308 = vst.msk [vmem:[#allocation5 + $0x18] sm:$0xf] %vm2305_vm14, %v2271_v49  ;;  %v2239_v49 = vld [vmem:[#allocation2 + $0x61] sm:$0x3] }
 0x389   :  { %2309 = vst.msk [vmem:[#allocation5 + $0x24] sm:$0xf] %vm2305_vm14, %v2273_v22 }
 0x38a   :  { %v6655_v0 = vld [vmem:[#allocation5 + $0xc] sm:$0xf0] }
 0x38b   :  { %v8847_v1 = vor.u32 %v7391_v60, %v6655_v0  ;;  %v8849_v3 = vpop.f32.mrf.mxu2 }
 0x38d   :  { %3201 = vmatmul.bf16.vlgmr.msra.gmra.mxu1 %v8847_v1  ;;  %2600 = vrot.lane.b32.xlu0 %v2249_v57, %s7567_s24  ;;  %v2739_v57 = vld [vmem:[#allocation2 + $0x6f] sm:$0x3] }
 0x38e   :  { %2782 = vrot.lane.b32.xlu1 %v8740_v53, %s7571_s0  ;;  %v2658_v53 = vpack.c.bf16 %v2645_v9, %v2645_v9  ;;  %v2752_v58 = vpack.c.bf16 %v2739_v57, %v2739_v57 }
 0x38f   :  { %v2364_v6 = vpop.permute.xlu0 %2363 }
 0x390   :  { %v2366_v4 = vpop.permute.xlu1 %2365  ;;  %2401 = vst.msk [vmem:[#allocation5 + $0x18] sm:$0xf] %vm2398_vm13, %v2364_v6  ;;  %2790 = vrot.lane.b32.xlu2 %v2752_v58, %s7571_s0 }
 0x391   :  { %2402 = vst.msk [vmem:[#allocation5 + $0x24] sm:$0xf] %vm2398_vm13, %v2366_v4  ;;  %v2252_v4 = vpack.c.bf16 %v2239_v49, %v2239_v49 }
 0x393   :  { %v8861_v12 = vpop.f32.mrf.mxu2 }
 0x395   :  { %2693 = vrot.lane.b32.xlu0 %v2658_v53, %s7570_s28 }
 0x396   :  { %2602 = vrot.lane.b32.xlu1 %v2567_v5, %s7567_s24 }
 0x397   :  { %v2457_v11 = vpop.permute.xlu0 %2456 }
 0x398   :  { %v2459_v40 = vpop.permute.xlu1 %2458  ;;  %2494 = vst.msk [vmem:[#allocation5 + $0x18] sm:$0xf] %vm2491_vm10, %v2457_v11  ;;  %v7444_v11 = vld [vmem:[%s10272_s3 + $0x118] sm:$0xff] }
 0x399   :  { %2495 = vst.msk [vmem:[#allocation5 + $0x24] sm:$0xf] %vm2491_vm10, %v2459_v40  ;;  %v7442_v40 = vld [vmem:[%s10272_s3 + $0x108] sm:$0xff]  ;;  %3516 = vmatpush.bf16.msrb.mxu1 %v7444_v11  ;;  %v7456_v11 = vld [vmem:[%s10272_s3 + $0x178] sm:$0xff] }
 0x39a   :  { %3467 = vmatpush.bf16.msrb.mxu0 %v7442_v40 }
 0x39b   :  { %v8879_v42 = vpop.f32.mrf.mxu2 }
 0x39c   :  { %10285 = vst [vmem:[#allocation10_spill] sm:$0xff] %v8879_v42 }
 0x39d   :  { %2286 = vrot.lane.b32.xlu0 %v2567_v5, %s7567_s24 }
 0x39e   :  { %2472 = vrot.lane.b32.xlu1 %v8786_v50, %s7571_s0  ;;  %3468 = vmatpush.bf16.msrb.mxu0 %v7441_v62 }
 0x39f   :  { %v2589_v20 = vpop.permute.xlu0 %2588  ;;  %v6665_v33 = vld [vmem:[#allocation5 + $0x18] sm:$0xf] }
 0x3a0   :  { %v2771_v17 = vpop.permute.xlu1 %2770  ;;  %v7395_v19 = vld [vmem:[#allocation5 + $0x20] sm:$0xf0]  ;;  %2625 = vst.msk [vmem:[#allocation5 + $0x1c] sm:$0xf] %vm2305_vm14, %v2589_v20 }
 0x3a1   :  { %v8899_v50 = vor.u32 %v7395_v19, %v6665_v33  ;;  %2716 = vst.msk [vmem:[#allocation5 + $0x1c] sm:$0xf] %vm2398_vm13, %v8797_v23  ;;  %v8914_v23 = vpop.permute.xlu2 %2371  ;;  %v7459_v20 = vld [vmem:[%s10272_s3 + $0x190] sm:$0xff] }
 0x3a2   :  { %2807 = vst.msk [vmem:[#allocation5 + $0x1c] sm:$0xf] %vm2491_vm10, %v2771_v17 }
 0x3a3   :  { %3163 = vmatmul.bf16.gmra.mxu0 %v8899_v50  ;;  %v8905_v25 = vpop.f32.mrf.mxu2  ;;  %3437 = vmatmul.bf16.gmra.mxu3 %v8899_v50 }
 0x3a4   :  { %3724 = vmatmul.bf16.gmra.mxu2 %v8899_v50 }
 0x3a5   :  { %2381 = vrot.lane.b32.xlu0 %v2344_v28, %s7570_s28 }
 0x3a6   :  { %2288 = vrot.lane.b32.xlu1 %v2251_v27, %s7567_s24 }
 0x3a7   :  { %v2682_v32 = vpop.permute.xlu0 %2681 }
 0x3a8   :  { %v2591_v29 = vpop.permute.xlu1 %2590 }
 0x3a9   :  { %2626 = vst.msk [vmem:[#allocation5 + $0x28] sm:$0xf] %vm2305_vm14, %v2591_v29  ;;  %v8925_v43 = vpop.permute.xlu2 %2466  ;;  %v7394_v44 = vld [vmem:[#allocation5 + $0x1c] sm:$0xf] }
 0x3aa   :  { %2717 = vst.msk [vmem:[#allocation5 + $0x28] sm:$0xf] %vm2398_vm13, %v2682_v32 }
 0x3ab   :  { %2808 = vst.msk [vmem:[#allocation5 + $0x28] sm:$0xf] %vm2491_vm10, %v8812_v35  ;;  %v8921_v36 = vpop.f32.mrf.mxu2 }
 0x3ac   :  { %10286 = vst [vmem:[#allocation11_spill] sm:$0xff] %v8921_v36 }
 0x3ad   :  { %2604 = vrot.lane.b32.xlu0 %v2251_v27, %s7567_s24 }
 0x3ae   :  { %2606 = vrot.lane.b32.xlu1 %v2569_v37, %s7567_s24 }
 0x3af   :  { %v2275_v14 = vpop.permute.xlu0 %2274 }
 0x3b0   :  { %v2461_v39 = vpop.permute.xlu1 %2460  ;;  %2310 = vst.msk [vmem:[#allocation5 + $0x30] sm:$0xf] %vm2305_vm14, %v2275_v14 }
 0x3b1   :  { %2403 = vst.msk [vmem:[#allocation5 + $0x30] sm:$0xf] %vm2398_vm13, %v8832_v47  ;;  %v2688_v60 = vpop.permute.xlu2 %2687 }
 0x3b2   :  { %v6667_v54 = vld [vmem:[#allocation5 + $0x24] sm:$0xf0]  ;;  %2496 = vst.msk [vmem:[#allocation5 + $0x30] sm:$0xf] %vm2491_vm10, %v2461_v39 }
 0x3b3   :  { %v8930_v35 = vor.u32 %v7394_v44, %v6667_v54  ;;  %v8933_v56 = vpop.f32.mrf.mxu2  ;;  %v7440_v54 = vld [vmem:[%s10272_s3 + $0xf8] sm:$0xff] }
 0x3b4   :  { %3469 = vmatpush.bf16.msrb.mxu0 %v7440_v54 }
 0x3b5   :  { %3206 = vmatmul.bf16.gmra.mxu1 %v8930_v35  ;;  %4966 = vrot.lane.b32.xlu0 %v4929_v55, %s7566_s23 }
 0x3b6   :  { %2786 = vrot.lane.b32.xlu1 %v8810_v31, %s7571_s0  ;;  %v7460_v31 = vld [vmem:[%s10272_s3 + $0x198] sm:$0xff] }
 0x3b7   :  { %v2370_v47 = vpop.permute.xlu0 %2369  ;;  %3754 = vmatpush.bf16.msrb.mxu3 %v7460_v31 }
 0x3b8   :  { %v2277_v22 = vpop.permute.xlu1 %2276 }
 0x3b9   :  { %2311 = vst.msk [vmem:[#allocation5 + $0x3c] sm:$0xf] %vm2305_vm14, %v2277_v22  ;;  %v6677_v9 = vld [vmem:[#allocation5 + $0x30] sm:$0xf]  ;;  %v2781_v17 = vpop.permute.xlu2 %2780 }
 0x3ba   :  { %2404 = vst.msk [vmem:[#allocation5 + $0x3c] sm:$0xf] %vm2398_vm13, %v2370_v47 }
 0x3bb   :  { %2497 = vst.msk [vmem:[#allocation5 + $0x3c] sm:$0xf] %vm2491_vm10, %v8843_v59  ;;  %v8947_v0 = vpop.f32.mrf.mxu2  ;;  %3755 = vmatpush.bf16.msrb.mxu3 %v7459_v20  ;;  %v7438_v20 = vld [vmem:[%s10272_s3 + $0xe8] sm:$0xff] }
 0x3bc   :  { %10287 = vst [vmem:[#allocation12_spill] sm:$0xff] %v8947_v0 }
 0x3bd   :  { %2290 = vrot.lane.b32.xlu0 %v2252_v4, %s7567_s24  ;;  %v7439_v4 = vld [vmem:[%s10272_s3 + $0xf0] sm:$0xff] }
 0x3be   :  { %3470 = vmatpush.bf16.msrb.mxu0 %v7439_v4 }
 0x3bf   :  { %v2593_v8 = vpop.permute.xlu0 %2592 }
 0x3c0   :  { %v2775_v6 = vpop.permute.xlu1 %2774  ;;  %2627 = vst.msk [vmem:[#allocation5 + $0x34] sm:$0xf] %vm2305_vm14, %v2593_v8 }
 0x3c1   :  { %2718 = vst.msk [vmem:[#allocation5 + $0x34] sm:$0xf] %vm2398_vm13, %v8857_v10  ;;  %v2376_v61 = vpop.permute.xlu2 %2375 }
 0x3c2   :  { %v7398_v5 = vld [vmem:[#allocation5 + $0x38] sm:$0xf0]  ;;  %2809 = vst.msk [vmem:[#allocation5 + $0x34] sm:$0xf] %vm2491_vm10, %v2775_v6  ;;  %3471 = vmatpush.bf16.msrb.mxu0 %v7438_v20  ;;  %v7475_v20 = vld [vmem:[%s10272_s3 + $0x210] sm:$0xff] }
 0x3c3   :  { %v8953_v59 = vor.u32 %v7398_v5, %v6677_v9  ;;  %v8956_v53 = vpop.f32.mrf.mxu2 }
 0x3c5   :  { %3168 = vmatmul.bf16.gmra.mxu0 %v8953_v59  ;;  %3442 = vmatmul.bf16.gmra.mxu3 %v8953_v59 }
 0x3c6   :  { %3729 = vmatmul.bf16.gmra.mxu2 %v8953_v59 }
 0x3c7   :  { %v2686_v19 = vpop.permute.xlu0 %2685 }
 0x3c8   :  { %v2595_v10 = vpop.permute.xlu1 %2594 }
 0x3c9   :  { %2628 = vst.msk [vmem:[#allocation5 + $0x40] sm:$0xf] %vm2305_vm14, %v2595_v10  ;;  %v7397_v28 = vld [vmem:[#allocation5 + $0x34] sm:$0xf]  ;;  %v2471_v39 = vpop.permute.xlu2 %2470 }
 0x3ca   :  { %2719 = vst.msk [vmem:[#allocation5 + $0x40] sm:$0xf] %vm2398_vm13, %v2686_v19 }
 0x3cb   :  { %2810 = vst.msk [vmem:[#allocation5 + $0x40] sm:$0xf] %vm2491_vm10, %v8883_v16  ;;  %v8974_v33 = vpop.f32.mrf.mxu2 }
 0x3cc   :  { %10288 = vst [vmem:[#allocation13_spill] sm:$0xff] %v8974_v33 }
 0x3cf   :  { %v2279_v27 = vpop.permute.xlu0 %2278 }
 0x3d0   :  { %v2465_v24 = vpop.permute.xlu1 %2464  ;;  %2312 = vst.msk [vmem:[#allocation5 + $0x48] sm:$0xf] %vm2305_vm14, %v2279_v27 }
 0x3d1   :  { %2405 = vst.msk [vmem:[#allocation5 + $0x48] sm:$0xf] %vm2398_vm13, %v8914_v23  ;;  %v7458_v23 = vld [vmem:[%s10272_s3 + $0x188] sm:$0xff]  ;;  %v2692_v22 = vpop.permute.xlu2 %2691 }
 0x3d2   :  { %v6679_v29 = vld [vmem:[#allocation5 + $0x3c] sm:$0xf0]  ;;  %2498 = vst.msk [vmem:[#allocation5 + $0x48] sm:$0xf] %vm2491_vm10, %v2465_v24  ;;  %3756 = vmatpush.bf16.msrb.mxu3 %v7458_v23 }
 0x3d3   :  { %v8979_v32 = vor.u32 %v7397_v28, %v6679_v29  ;;  %v8982_v16 = vpop.f32.mrf.mxu2 }
 0x3d5   :  { %3211 = vmatmul.bf16.gmra.mxu1 %v8979_v32 }
 0x3d7   :  { %v2374_v41 = vpop.permute.xlu0 %2373 }
 0x3d8   :  { %v2281_v37 = vpop.permute.xlu1 %2280 }
 0x3d9   :  { %2313 = vst.msk [vmem:[#allocation5 + $0x54] sm:$0xf] %vm2305_vm14, %v2281_v37  ;;  %v6689_v57 = vld [vmem:[#allocation5 + $0x48] sm:$0xf]  ;;  %v2785_v31 = vpop.permute.xlu2 %2784 }
 0x3da   :  { %2406 = vst.msk [vmem:[#allocation5 + $0x54] sm:$0xf] %vm2398_vm13, %v2374_v41 }
 0x3db   :  { %2499 = vst.msk [vmem:[#allocation5 + $0x54] sm:$0xf] %vm2491_vm10, %v8925_v43  ;;  %v3277_v14 = vpop.f32.mrf.mxu2 }
 0x3dc   :  { %v4877_v14 = vld [vmem:[#allocation3 + $0x66] sm:$0xff] }
 0x3df   :  { %v2597_v55 = vpop.permute.xlu0 %2596 }
 0x3e0   :  { %v2779_v44 = vpop.permute.xlu1 %2778  ;;  %2629 = vst.msk [vmem:[#allocation5 + $0x4c] sm:$0xf] %vm2305_vm14, %v2597_v55  ;;  %v9046_v55 = vpack.c.bf16 %v4877_v14, %v4877_v14  ;;  %v7472_v14 = vld [vmem:[%s10272_s3 + $0x1f8] sm:$0xff] }
 0x3e1   :  { %2720 = vst.msk [vmem:[#allocation5 + $0x4c] sm:$0xf] %vm2398_vm13, %v2688_v60  ;;  %v7457_v60 = vld [vmem:[%s10272_s3 + $0x180] sm:$0xff] }
 0x3e2   :  { %v7401_v58 = vld [vmem:[#allocation5 + $0x50] sm:$0xf0]  ;;  %2811 = vst.msk [vmem:[#allocation5 + $0x4c] sm:$0xf] %vm2491_vm10, %v2779_v44  ;;  %3757 = vmatpush.bf16.msrb.mxu3 %v7457_v60 }
 0x3e3   :  { %v9000_v43 = vor.u32 %v7401_v58, %v6689_v57  ;;  %v7437_v57 = vld [vmem:[%s10272_s3 + $0xe0] sm:$0xff]  ;;  %4903 = vst.msk [vmem:[#allocation6 + $0x5c] sm:$0xf] %vm129_vm0, %v9046_v55 }
 0x3e4   :  { %3472 = vmatpush.bf16.msrb.mxu0 %v7437_v57  ;;  %v7471_v57 = vld [vmem:[%s10272_s3 + $0x1f0] sm:$0xff] }
 0x3e5   :  { %3173 = vmatmul.bf16.gmra.mxu0 %v9000_v43  ;;  %3447 = vmatmul.bf16.gmra.mxu3 %v9000_v43 }
 0x3e6   :  { %3734 = vmatmul.bf16.gmra.mxu2 %v9000_v43  ;;  %3758 = vmatpush.bf16.msrb.mxu3 %v7456_v11  ;;  %v7436_v11 = vld [vmem:[%s10272_s3 + $0xd8] sm:$0xff] }
 0x3e7   :  { %v2690_v49 = vpop.permute.xlu0 %2689 }
 0x3e8   :  { %v2599_v47 = vpop.permute.xlu1 %2598  ;;  %3473 = vmatpush.bf16.msrb.mxu0 %v7436_v11  ;;  %v7470_v11 = vld [vmem:[%s10272_s3 + $0x1e8] sm:$0xff] }
 0x3e9   :  { %2630 = vst.msk [vmem:[#allocation5 + $0x58] sm:$0xf] %vm2305_vm14, %v2599_v47  ;;  %v7400_v9 = vld [vmem:[#allocation5 + $0x4c] sm:$0xf] }
 0x3ea   :  { %2721 = vst.msk [vmem:[#allocation5 + $0x58] sm:$0xf] %vm2398_vm13, %v2690_v49  ;;  %v7478_v49 = vld [vmem:[%s10272_s3 + $0x228] sm:$0xff] }
 0x3eb   :  { %2812 = vst.msk [vmem:[#allocation5 + $0x58] sm:$0xf] %vm2491_vm10, %v2781_v17  ;;  %v2380_v17 = vpop.permute.xlu2 %2379  ;;  %4041 = vmatpush.bf16.msra.mxu2 %v7478_v49 }
 0x3ef   :  { %v2283_v8 = vpop.permute.xlu0 %2282 }
 0x3f0   :  { %v2469_v6 = vpop.permute.xlu1 %2468  ;;  %2314 = vst.msk [vmem:[#allocation5 + $0x60] sm:$0xf] %vm2305_vm14, %v2283_v8 }
 0x3f1   :  { %2407 = vst.msk [vmem:[#allocation5 + $0x60] sm:$0xf] %vm2398_vm13, %v2376_v61  ;;  %v7443_v61 = vld [vmem:[%s10272_s3 + $0x110] sm:$0xff] }
 0x3f2   :  { %v6691_v5 = vld [vmem:[#allocation5 + $0x54] sm:$0xf0]  ;;  %2500 = vst.msk [vmem:[#allocation5 + $0x60] sm:$0xf] %vm2491_vm10, %v2469_v6  ;;  %3517 = vmatpush.bf16.msrb.mxu1 %v7443_v61 }
 0x3f3   :  { %v9017_v40 = vor.u32 %v7400_v9, %v6691_v5  ;;  %v2475_v27 = vpop.permute.xlu2 %2474  ;;  %v7454_v9 = vld [vmem:[%s10272_s3 + $0x168] sm:$0xff]  ;;  %v7477_v5 = vld [vmem:[%s10272_s3 + $0x220] sm:$0xff] }
 0x3f4   :  { %4042 = vmatpush.bf16.msra.mxu2 %v7477_v5  ;;  %v7462_v5 = vld [vmem:[%s10272_s3 + $0x1a8] sm:$0xff] }
 0x3f5   :  { %3216 = vmatmul.bf16.gmra.mxu1 %v9017_v40 }
 0x3f6   :  { %3998 = vmatpush.bf16.msra.mxu1 %v7470_v11 }
 0x3f7   :  { %v2378_v19 = vpop.permute.xlu0 %2377 }
 0x3f8   :  { %v2285_v10 = vpop.permute.xlu1 %2284  ;;  %v3159_v44 = vpop.f32.mrf.mxu0 }
 0x3f9   :  { %2315 = vst.msk [vmem:[#allocation5 + $0x6c] sm:$0xf] %vm2305_vm14, %v2285_v10  ;;  %v6701_v29 = vld [vmem:[#allocation5 + $0x60] sm:$0xf] }
 0x3fa   :  { %2408 = vst.msk [vmem:[#allocation5 + $0x6c] sm:$0xf] %vm2398_vm13, %v2378_v19 }
 0x3fb   :  { %2501 = vst.msk [vmem:[#allocation5 + $0x6c] sm:$0xf] %vm2491_vm10, %v2471_v39  ;;  %v7455_v39 = vld [vmem:[%s10272_s3 + $0x170] sm:$0xff]  ;;  %v2696_v58 = vpop.permute.xlu2 %2695 }
 0x3fc   :  { %3759 = vmatpush.bf16.msrb.mxu3 %v7455_v39 }
 0x3ff   :  { %v2601_v28 = vpop.permute.xlu0 %2600 }
 0x400   :  { %v2783_v24 = vpop.permute.xlu1 %2782  ;;  %2631 = vst.msk [vmem:[#allocation5 + $0x64] sm:$0xf] %vm2305_vm14, %v2601_v28  ;;  %3760 = vmatpush.bf16.msrb.mxu3 %v7454_v9  ;;  %v7474_v28 = vld [vmem:[%s10272_s3 + $0x208] sm:$0xff] }
 0x401   :  { %2722 = vst.msk [vmem:[#allocation5 + $0x64] sm:$0xf] %vm2398_vm13, %v2692_v22 }
 0x402   :  { %v7404_v62 = vld [vmem:[#allocation5 + $0x68] sm:$0xf0]  ;;  %2813 = vst.msk [vmem:[#allocation5 + $0x64] sm:$0xf] %vm2491_vm10, %v2783_v24 }
 0x403   :  { %v9035_v37 = vor.u32 %v7404_v62, %v6701_v29  ;;  %v2791_v8 = vpop.permute.xlu2 %2790  ;;  %v7453_v29 = vld [vmem:[%s10272_s3 + $0x160] sm:$0xff] }
 0x404   :  { %2817 = vst.msk [vmem:[#allocation5 + $0x94] sm:$0x1] %vm2504_vm12, %v2791_v8  ;;  %3761 = vmatpush.bf16.msrb.mxu3 %v7453_v29 }
 0x405   :  { %3178 = vmatmul.bf16.gmra.mxu0 %v9035_v37  ;;  %3452 = vmatmul.bf16.gmra.mxu3 %v9035_v37 }
 0x406   :  { %3739 = vmatmul.bf16.gmra.mxu2 %v9035_v37 }
 0x407   :  { %v2694_v23 = vpop.permute.xlu0 %2693 }
 0x408   :  { %v2603_v41 = vpop.permute.xlu1 %2602 }
 0x409   :  { %2632 = vst.msk [vmem:[#allocation5 + $0x70] sm:$0xf] %vm2305_vm14, %v2603_v41  ;;  %v7403_v4 = vld [vmem:[#allocation5 + $0x64] sm:$0xf]  ;;  %v7473_v41 = vld [vmem:[%s10272_s3 + $0x200] sm:$0xff] }
 0x40a   :  { %2723 = vst.msk [vmem:[#allocation5 + $0x70] sm:$0xf] %vm2398_vm13, %v2694_v23  ;;  %v3202_v54 = vpop.f32.mrf.mxu1  ;;  %v7435_v23 = vld [vmem:[%s10272_s3 + $0xd0] sm:$0xff] }
 0x40b   :  { %2814 = vst.msk [vmem:[#allocation5 + $0x70] sm:$0xf] %vm2491_vm10, %v2785_v31  ;;  %v9052_v22 = vadd.f32 %v3202_v54, %v3159_v44  ;;  %3474 = vmatpush.bf16.msrb.mxu0 %v7435_v23  ;;  %v9112_v44 = vpop.f32.mrf.mxu0  ;;  %v9166_v23 = vpop.f32.mrf.mxu2 }
 0x40f   :  { %v2287_v60 = vpop.permute.xlu0 %2286  ;;  %3803 = vmatpush.bf16.msra.mxu0 %v7462_v5 }
 0x410   :  { %v2473_v47 = vpop.permute.xlu1 %2472  ;;  %2316 = vst.msk [vmem:[#allocation5 + $0x78] sm:$0xf] %vm2305_vm14, %v2287_v60 }
 0x411   :  { %2409 = vst.msk [vmem:[#allocation5 + $0x78] sm:$0xf] %vm2398_vm13, %v2380_v17  ;;  %v7476_v17 = vld [vmem:[%s10272_s3 + $0x218] sm:$0xff] }
 0x412   :  { %v6703_v6 = vld [vmem:[#allocation5 + $0x6c] sm:$0xf0]  ;;  %2502 = vst.msk [vmem:[#allocation5 + $0x78] sm:$0xf] %vm2491_vm10, %v2473_v47  ;;  %4043 = vmatpush.bf16.msra.mxu2 %v7476_v17  ;;  %v9114_v54 = vpop.f32.mrf.mxu1 }
 0x413   :  { %v9061_v31 = vor.u32 %v7403_v4, %v6703_v6  ;;  %v7480_v4 = vld [vmem:[%s10272_s3 + $0x238] sm:$0xff] }
 0x414   :  { %4090 = vmatpush.bf16.msra.mxu3 %v7480_v4  ;;  %v7466_v4 = vld [vmem:[%s10272_s3 + $0x1c8] sm:$0xff] }
 0x415   :  { %3221 = vmatmul.bf16.gmra.mxu1 %v9061_v31 }
 0x416   :  { %4044 = vmatpush.bf16.msra.mxu2 %v7475_v20  ;;  %v7469_v20 = vld [vmem:[%s10272_s3 + $0x1e0] sm:$0xff] }
 0x417   :  { %v2382_v19 = vpop.permute.xlu0 %2381  ;;  %3999 = vmatpush.bf16.msra.mxu1 %v7469_v20 }
 0x418   :  { %v2289_v10 = vpop.permute.xlu1 %2288 }
 0x419   :  { %2317 = vst.msk [vmem:[#allocation5 + $0x84] sm:$0xf] %vm2305_vm14, %v2289_v10 }
 0x41a   :  { %2410 = vst.msk [vmem:[#allocation5 + $0x84] sm:$0xf] %vm2398_vm13, %v2382_v19  ;;  %4045 = vmatpush.bf16.msra.mxu2 %v7474_v28  ;;  %v7468_v28 = vld [vmem:[%s10272_s3 + $0x1d8] sm:$0xff] }
 0x41b   :  { %2503 = vst.msk [vmem:[#allocation5 + $0x84] sm:$0xf] %vm2491_vm10, %v2475_v27  ;;  %v6713_v27 = vld [vmem:[#allocation5 + $0x78] sm:$0xf]  ;;  %4000 = vmatpush.bf16.msra.mxu1 %v7468_v28 }
 0x41e   :  { %4046 = vmatpush.bf16.msra.mxu2 %v7473_v41  ;;  %v9164_v41 = vpop.f32.mrf.mxu3 }
 0x41f   :  { %v2605_v24 = vpop.permute.xlu0 %2604 }
 0x420   :  { %v2607_v61 = vpop.permute.xlu1 %2606  ;;  %2633 = vst.msk [vmem:[#allocation5 + $0x7c] sm:$0xf] %vm2305_vm14, %v2605_v24  ;;  %v3164_v6 = vpop.f32.mrf.mxu0 }
 0x421   :  { %2634 = vst.msk [vmem:[#allocation5 + $0x88] sm:$0xf] %vm2305_vm14, %v2607_v61  ;;  %vm4758_vm14 = vcmask 913152  }
 0x422   :  { %2725 = vst.msk [vmem:[#allocation5 + $0x88] sm:$0xf] %vm2398_vm13, %v8357_v52  ;;  %v7407_v62 = vld [vmem:[#allocation5 + $0x80] sm:$0xf0]  ;;  %4047 = vmatpush.bf16.msra.mxu2 %v7472_v14 }
 0x423   :  { %2816 = vst.msk [vmem:[#allocation5 + $0x88] sm:$0xf] %vm2491_vm10, %v8355_v48  ;;  %v9095_v39 = vor.u32 %v7407_v62, %v6713_v27  ;;  %v7479_v14 = vld [vmem:[%s10272_s3 + $0x230] sm:$0xff] }
 0x424   :  { %2724 = vst.msk [vmem:[#allocation5 + $0x7c] sm:$0xf] %vm2398_vm13, %v2696_v58  ;;  %4091 = vmatpush.bf16.msra.mxu3 %v7479_v14  ;;  %vm4851_vm13 = vcmask 1044352  }
 0x425   :  { %3183 = vmatmul.bf16.gmra.mxu0 %v9095_v39  ;;  %3457 = vmatmul.bf16.gmra.mxu3 %v9095_v39 }
 0x426   :  { %3744 = vmatmul.bf16.gmra.mxu2 %v9095_v39 }
 0x427   :  { %v4967_v52 = vpop.permute.xlu0 %4966  ;;  %4048 = vmatpush.bf16.msra.mxu2 %v7471_v57 }
 0x428   :  { %v2787_v48 = vpop.permute.xlu1 %2786  ;;  %4994 = vst.msk [vmem:[#allocation6 + $0x5c] sm:$0xf] %vm222_vm1, %v4967_v52  ;;  %v9150_v61 = vpop.f32.mrf.mxu0 }
 0x429   :  { %2815 = vst.msk [vmem:[#allocation5 + $0x7c] sm:$0xf] %vm2491_vm10, %v2787_v48  ;;  %v7467_v48 = vld [vmem:[%s10272_s3 + $0x1d0] sm:$0xff]  ;;  %v9175_v52 = vpop.f32.mrf.mxu2  ;;  %vm6083_vm10 = vcmask 1041408  }
 0x42a   :  { %v6715_v47 = vld [vmem:[#allocation5 + $0x84] sm:$0xf0]  ;;  %4001 = vmatpush.bf16.msra.mxu1 %v7467_v48 }
 0x42e   :  { %4002 = vmatpush.bf16.msra.mxu1 %v7466_v4 }
 0x42f   :  { %v2291_v49 = vpop.permute.xlu0 %2290 }
 0x430   :  { %v7406_v58 = vld [vmem:[#allocation5 + $0x7c] sm:$0xf]  ;;  %2319 = vst.msk [vmem:[#allocation5 + $0x90] sm:$0x1] %vm2318_vm15, %v2291_v49  ;;  %vm73_vm15 = vcmask 123904  }
 0x431   :  { %v9120_v60 = vor.u32 %v7406_v58, %v6715_v47  ;;  %2412 = vst.msk [vmem:[#allocation5 + $0x90] sm:$0x1] %vm2411_vm9, %v8371_v2  ;;  %v9185_v58 = vpop.f32.mrf.mxu2  ;;  %vm4572_vm9 = vcmask 650752  }
 0x432   :  { %v3207_v8 = vpop.f32.mrf.mxu1  ;;  %2505 = vst.msk [vmem:[#allocation5 + $0x90] sm:$0x1] %vm2504_vm12, %v8388_v21  ;;  %vm4864_vm12 = vcmask 1041280  }
 0x433   :  { %v9128_v9 = vadd.f32 %v3207_v8, %v3164_v6  ;;  %3226 = vmatmul.bf16.gmra.mxu1 %v9120_v60 }
 0x439   :  { %v2881_v17 = vld [vmem:[#allocation5 + $0x90] sm:$0x11] }
 0x43a   :  { %v2982_v2 = vunpack.c.l.b16 %v2881_v17  ;;  %v2983_v10 = vunpack.c.h.b16 %v2881_v17  ;;  %v9152_v24 = vpop.f32.mrf.mxu1  ;;  %v9206_v17 = vpop.f32.mrf.mxu2 }
 0x43c   :  { %v9139_v19 = vpack.c.b16 %v2982_v2, %v2982_v2  ;;  %v9144_v21 = vpack.c.b16 %v2983_v10, %v2983_v10  ;;  %v7465_v2 = vld [vmem:[%s10272_s3 + $0x1c0] sm:$0xff] }
 0x43d   :  { %4003 = vmatpush.bf16.msra.mxu1 %v7465_v2 }
 0x43e   :  { %3188 = vmatmul.bf16.gmra.mxu0 %v9139_v19  ;;  %3462 = vmatmul.bf16.gmra.mxu3 %v9139_v19 }
 0x43f   :  { %3749 = vmatmul.bf16.gmra.mxu2 %v9139_v19 }
 0x442   :  { %v3169_v29 = vpop.f32.mrf.mxu0 }
 0x443   :  { %3231 = vmatmul.bf16.gmra.mxu1 %v9144_v21 }
 0x449   :  { %v9213_v20 = vpop.f32.mrf.mxu2 }
 0x44a   :  { %v9187_v47 = vpop.f32.mrf.mxu0 }
 0x44e   :  { %3475 = vmatmul.bf16.vlgmr.msrb.gmra.mxu0 %v8847_v1  ;;  %3762 = vmatmul.bf16.vlgmr.msrb.gmra.mxu3 %v8847_v1 }
 0x44f   :  { %4049 = vmatmul.bf16.vlgmr.msra.gmra.mxu2 %v8847_v1  ;;  %v9173_v1 = vpop.f32.mrf.mxu3 }
 0x452   :  { %v3212_v27 = vpop.f32.mrf.mxu1 }
 0x453   :  { %v9160_v62 = vadd.f32 %v3212_v27, %v3169_v29  ;;  %6910 = vmatmul.msk.bf16.vlgmr.msrb.gmra.mxu1 %vm3128_vm11, %v8559_v15  ;;  %v9225_v29 = vpop.f32.mrf.mxu2 }
 0x457   :  { %v9183_v57 = vpop.f32.mrf.mxu3 }
 0x45a   :  { %v9189_v49 = vpop.f32.mrf.mxu1 }
 0x45e   :  { %3480 = vmatmul.bf16.gmra.mxu0 %v8930_v35  ;;  %3767 = vmatmul.bf16.gmra.mxu3 %v8930_v35 }
 0x45f   :  { %4054 = vmatmul.bf16.gmra.mxu2 %v8930_v35  ;;  %v7461_v35 = vld [vmem:[%s10272_s3 + $0x1a0] sm:$0xff]  ;;  %v9200_v5 = vpop.f32.mrf.mxu3 }
 0x460   :  { %3804 = vmatpush.bf16.msra.mxu0 %v7461_v35 }
 0x462   :  { %v3174_v6 = vpop.f32.mrf.mxu0 }
 0x463   :  { %6911 = vmatmul.msk.bf16.gmra.mxu1 %vm3128_vm11, %v8581_v46 }
 0x467   :  { %v9211_v10 = vpop.f32.mrf.mxu3 }
 0x469   :  { %v9233_v35 = vpop.f32.mrf.mxu2 }
 0x46a   :  { %v9227_v27 = vpop.f32.mrf.mxu0  ;;  %10291 = vst [vmem:[#allocation16_spill] sm:$0xff] %v9233_v35 }
 0x46b   :  { %10289 = vst [vmem:[#allocation14_spill] sm:$0xff] %v9227_v27 }
 0x46e   :  { %3485 = vmatmul.bf16.gmra.mxu0 %v8979_v32  ;;  %3772 = vmatmul.bf16.gmra.mxu3 %v8979_v32 }
 0x46f   :  { %4059 = vmatmul.bf16.gmra.mxu2 %v8979_v32  ;;  %v7464_v32 = vld [vmem:[%s10272_s3 + $0x1b8] sm:$0xff]  ;;  %v9223_v28 = vpop.f32.mrf.mxu3 }
 0x470   :  { %4004 = vmatpush.bf16.msra.mxu1 %v7464_v32 }
 0x471   :  { %v9247_v32 = vpop.f32.mrf.mxu2 }
 0x472   :  { %v3217_v8 = vpop.f32.mrf.mxu1  ;;  %10293 = vst [vmem:[#allocation18_spill] sm:$0xff] %v9247_v32 }
 0x473   :  { %v9202_v11 = vadd.f32 %v3217_v8, %v3174_v6  ;;  %6912 = vmatmul.msk.bf16.gmra.mxu1 %vm3128_vm11, %v8603_v18  ;;  %v7463_v8 = vld [vmem:[%s10272_s3 + $0x1b0] sm:$0xff]  ;;  %s7576_s3 = smov 112  }
 0x474   :  { %4005 = vmatpush.bf16.msra.mxu1 %v7463_v8 }
 0x477   :  { %v9231_v14 = vpop.f32.mrf.mxu3 }
 0x47a   :  { %v9229_v48 = vpop.f32.mrf.mxu1 }
 0x47b   :  { %10290 = vst [vmem:[#allocation15_spill] sm:$0xff] %v9229_v48 }
 0x47e   :  { %3490 = vmatmul.bf16.gmra.mxu0 %v9017_v40  ;;  %3777 = vmatmul.bf16.gmra.mxu3 %v9017_v40 }
 0x47f   :  { %4064 = vmatmul.bf16.gmra.mxu2 %v9017_v40  ;;  %v9245_v2 = vpop.f32.mrf.mxu3 }
 0x480   :  { %10292 = vst [vmem:[#allocation17_spill] sm:$0xff] %v9245_v2 }
 0x482   :  { %v3179_v40 = vpop.f32.mrf.mxu0 }
 0x483   :  { %6913 = vmatmul.msk.bf16.gmra.mxu1 %vm3128_vm11, %v8625_v34 }
 0x488   :  { %v9249_v51 = vpop.f32.mrf.mxu3 }
 0x489   :  { %v9251_v33 = vpop.f32.mrf.mxu2 }
 0x48a   :  { %10294 = vst [vmem:[#allocation19_spill] sm:$0xff] %v9251_v33 }
 0x48e   :  { %3495 = vmatmul.bf16.gmra.mxu0 %v9061_v31  ;;  %3782 = vmatmul.bf16.gmra.mxu3 %v9061_v31 }
 0x48f   :  { %4069 = vmatmul.bf16.gmra.mxu2 %v9061_v31  ;;  %v9256_v31 = vpop.f32.mrf.mxu0 }
 0x490   :  { %10295 = vst [vmem:[#allocation20_spill] sm:$0xff] %v9256_v31 }
 0x491   :  { %v9264_v8 = vpop.f32.mrf.mxu2 }
 0x492   :  { %v3222_v4 = vpop.f32.mrf.mxu1  ;;  %10298 = vst [vmem:[#allocation23_spill] sm:$0xff] %v9264_v8 }
 0x493   :  { %v9238_v6 = vadd.f32 %v3222_v4, %v3179_v40  ;;  %6914 = vmatmul.msk.bf16.gmra.mxu1 %vm3128_vm11, %v8645_v63  ;;  %v9262_v4 = vpop.f32.mrf.mxu3 }
 0x494   :  { %10297 = vst [vmem:[#allocation22_spill] sm:$0xff] %v9262_v4 }
 0x49a   :  { %v9260_v40 = vpop.f32.mrf.mxu1 }
 0x49b   :  { %10296 = vst [vmem:[#allocation21_spill] sm:$0xff] %v9260_v40 }
 0x49e   :  { %3500 = vmatmul.bf16.gmra.mxu0 %v9120_v60  ;;  %3787 = vmatmul.bf16.gmra.mxu3 %v9120_v60 }
 0x49f   :  { %4074 = vmatmul.bf16.gmra.mxu2 %v9120_v60 }
 0x4a2   :  { %v3184_v0 = vpop.f32.mrf.mxu0 }
 0x4a3   :  { %6915 = vmatmul.msk.bf16.gmra.mxu1 %vm3128_vm11, %v8671_v13 }
 0x4a8   :  { %v9268_v36 = vpop.f32.mrf.mxu3 }
 0x4a9   :  { %v9273_v31 = vpop.f32.mrf.mxu2 }
 0x4aa   :  { %10299 = vst [vmem:[#allocation24_spill] sm:$0xff] %v9273_v31  ;;  %v3186_v4 = vpop.f32.mrf.mxu0 }
 0x4ae   :  { %3505 = vmatmul.bf16.gmra.mxu0 %v9144_v21  ;;  %3792 = vmatmul.bf16.gmra.mxu3 %v9144_v21 }
 0x4af   :  { %4079 = vmatmul.bf16.gmra.mxu2 %v9144_v21 }
 0x4b0   :  { %v3227_v33 = vpop.f32.mrf.mxu1  ;;  %v9279_v32 = vpop.f32.mrf.mxu3 }
 0x4b1   :  { %v9271_v60 = vadd.f32 %v3227_v33, %v3184_v0  ;;  %10301 = vst [vmem:[#allocation26_spill] sm:$0xff] %v9279_v32  ;;  %v9281_v2 = vpop.f32.mrf.mxu2 }
 0x4b2   :  { %10302 = vst [vmem:[#allocation27_spill] sm:$0xff] %v9281_v2 }
 0x4b3   :  { %6916 = vmatmul.msk.bf16.gmra.mxu1 %vm3128_vm11, %v8720_v38 }
 0x4b8   :  { %v3229_v40 = vpop.f32.mrf.mxu1 }
 0x4b9   :  { %v9277_v8 = vadd.f32 %v3229_v40, %v3186_v4 }
 0x4bb   :  { %10300 = vst [vmem:[#allocation25_spill] sm:$0xff] %v9277_v8  ;;  %v3189_v48 = vpop.f32.mrf.mxu0 }
 0x4be   :  { %7025 = vmatmul.msk.bf16.vlgmr.msra.gmra.mxu0 %vm3128_vm11, %v8559_v15  ;;  %7140 = vmatmul.msk.bf16.vlgmr.msra.gmra.mxu3 %vm3128_vm11, %v8559_v15 }
 0x4c0   :  { %v3232_v0 = vpop.f32.mrf.mxu1 }
 0x4c1   :  { %v9287_v33 = vadd.f32 %v3232_v0, %v3189_v48  ;;  %v9289_v21 = vpop.f32.mrf.mxu3  ;;  %v9301_v48 = vadd.f32 %v8808_v30, %v9052_v22 }
 0x4c2   :  { %v9292_v40 = vpop.f32.mrf.mxu2 }
 0x4c3   :  { %4006 = vmatmul.bf16.vlgmr.msra.gmra.mxu1 %v8819_v45  ;;  %10303 = vst [vmem:[#allocation28_spill] sm:$0xff] %v9292_v40  ;;  %v3191_v4 = vpop.f32.mrf.mxu0 }
 0x4c8   :  { %v3234_v8 = vpop.f32.mrf.mxu1 }
 0x4c9   :  { %v3465_v32 = vpop.f32.mrf.mxu3 }
 0x4ca   :  { %v3752_v2 = vpop.f32.mrf.mxu2 }
 0x4cb   :  { %v3476_v31 = vpop.f32.mrf.mxu0 }
 0x4cc   :  { %v3477_v27 = vadd.f32 %v3476_v31, %v9164_v41 }
 0x4ce   :  { %7026 = vmatmul.msk.bf16.gmra.mxu0 %vm3128_vm11, %v8581_v46  ;;  %7141 = vmatmul.msk.bf16.gmra.mxu3 %vm3128_vm11, %v8581_v46 }
 0x4d0   :  { %v3519_v15 = vpop.f32.mrf.mxu1 }
 0x4d1   :  { %v9303_v45 = vadd.f32 %v3519_v15, %v3477_v27  ;;  %v9307_v2 = vpop.f32.mrf.mxu3 }
 0x4d2   :  { %v9310_v41 = vpop.f32.mrf.mxu2 }
 0x4d3   :  { %4011 = vmatmul.bf16.gmra.mxu1 %v8899_v50  ;;  %v3478_v31 = vpop.f32.mrf.mxu0 }
 0x4d4   :  { %v3479_v8 = vadd.f32 %v3478_v31, %v9173_v1  ;;  %v9326_v1 = vadd.f32 %v8839_v26, %v9128_v9 }
 0x4d8   :  { %v3521_v46 = vpop.f32.mrf.mxu1 }
 0x4d9   :  { %v9313_v0 = vadd.f32 %v3521_v46, %v3479_v8  ;;  %v9315_v4 = vpop.f32.mrf.mxu3 }
 0x4da   :  { %v9317_v30 = vpop.f32.mrf.mxu2 }
 0x4db   :  { %v3481_v22 = vpop.f32.mrf.mxu0 }
 0x4dc   :  { %v3482_v27 = vadd.f32 %v3481_v22, %v9183_v57 }
 0x4de   :  { %7027 = vmatmul.msk.bf16.gmra.mxu0 %vm3128_vm11, %v8603_v18  ;;  %7142 = vmatmul.msk.bf16.gmra.mxu3 %vm3128_vm11, %v8603_v18 }
 0x4e0   :  { %v3524_v50 = vpop.f32.mrf.mxu1 }
 0x4e1   :  { %v9328_v15 = vadd.f32 %v3524_v50, %v3482_v27  ;;  %v9332_v8 = vpop.f32.mrf.mxu3 }
 0x4e2   :  { %v9335_v57 = vpop.f32.mrf.mxu2 }
 0x4e3   :  { %4016 = vmatmul.bf16.gmra.mxu1 %v8953_v59  ;;  %v3483_v46 = vpop.f32.mrf.mxu0 }
 0x4e4   :  { %v3484_v22 = vadd.f32 %v3483_v46, %v9200_v5  ;;  %v9351_v5 = vadd.f32 %v8861_v12, %v9160_v62  ;;  %v5188_v46 = vld [vmem:[#allocation3 + $0x65] sm:$0xff] }
 0x4e8   :  { %v3526_v18 = vpop.f32.mrf.mxu1 }
 0x4e9   :  { %v9338_v32 = vadd.f32 %v3526_v18, %v3484_v22  ;;  %v9340_v40 = vpop.f32.mrf.mxu3 }
 0x4ea   :  { %v9342_v26 = vpop.f32.mrf.mxu2 }
 0x4eb   :  { %v3486_v9 = vpop.f32.mrf.mxu0 }
 0x4ec   :  { %v3487_v27 = vadd.f32 %v3486_v9, %v9211_v10 }
 0x4ee   :  { %7028 = vmatmul.msk.bf16.gmra.mxu0 %vm3128_vm11, %v8625_v34  ;;  %7143 = vmatmul.msk.bf16.gmra.mxu3 %vm3128_vm11, %v8625_v34 }
 0x4f0   :  { %v3529_v59 = vpop.f32.mrf.mxu1 }
 0x4f1   :  { %v9353_v50 = vadd.f32 %v3529_v59, %v3487_v27  ;;  %v9357_v22 = vpop.f32.mrf.mxu3  ;;  %v9377_v27 = vadd.f32 %v8905_v25, %v9202_v11 }
 0x4f2   :  { %v9360_v10 = vpop.f32.mrf.mxu2 }
 0x4f3   :  { %4021 = vmatmul.bf16.gmra.mxu1 %v9000_v43  ;;  %v9362_v18 = vpop.f32.mrf.mxu0 }
 0x4f8   :  { %v9364_v9 = vpop.f32.mrf.mxu1 }
 0x4f9   :  { %v9366_v34 = vpop.f32.mrf.mxu3 }
 0x4fa   :  { %v9368_v31 = vpop.f32.mrf.mxu2 }
 0x4fb   :  { %10304 = vst [vmem:[#allocation29_spill] sm:$0xff] %v9368_v31  ;;  %v3491_v12 = vpop.f32.mrf.mxu0 }
 0x4fc   :  { %v3492_v62 = vadd.f32 %v3491_v12, %v9231_v14 }
 0x4fe   :  { %7029 = vmatmul.msk.bf16.gmra.mxu0 %vm3128_vm11, %v8645_v63  ;;  %7144 = vmatmul.msk.bf16.gmra.mxu3 %vm3128_vm11, %v8645_v63 }
 0x500   :  { %v3534_v43 = vpop.f32.mrf.mxu1 }
 0x501   :  { %v9379_v59 = vadd.f32 %v3534_v43, %v3492_v62  ;;  %v9383_v35 = vpop.f32.mrf.mxu3  ;;  %v9403_v62 = vadd.f32 %v8933_v56, %v9238_v6 }
 0x502   :  { %v9386_v14 = vpop.f32.mrf.mxu2 }
 0x503   :  { %4026 = vmatmul.bf16.gmra.mxu1 %v9035_v37  ;;  %v9388_v12 = vpop.f32.mrf.mxu0 }
 0x508   :  { %v9390_v31 = vpop.f32.mrf.mxu1 }
 0x509   :  { %10305 = vst [vmem:[#allocation30_spill] sm:$0xff] %v9390_v31  ;;  %v9392_v63 = vpop.f32.mrf.mxu3 }
 0x50a   :  { %10306 = vst [vmem:[#allocation31_spill] sm:$0xff] %v9392_v63  ;;  %v9394_v42 = vpop.f32.mrf.mxu2  ;;  %v5098_v63 = vld [vmem:[#allocation3 + $0x69] sm:$0xff] }
 0x50b   :  { %10307 = vst [vmem:[#allocation32_spill] sm:$0xff] %v9394_v42  ;;  %v3496_v25 = vpop.f32.mrf.mxu0 }
 0x50c   :  { %v3497_v11 = vadd.f32 %v3496_v25, %v9249_v51 }
 0x50e   :  { %7030 = vmatmul.msk.bf16.gmra.mxu0 %vm3128_vm11, %v8671_v13  ;;  %7145 = vmatmul.msk.bf16.gmra.mxu3 %vm3128_vm11, %v8671_v13  ;;  %v5111_v13 = vpack.c.bf16 %v5098_v63, %v5098_v63  ;;  %v5007_v63 = vld [vmem:[#allocation3 + $0x68] sm:$0xff] }
 0x510   :  { %v3539_v37 = vpop.f32.mrf.mxu1  ;;  %5148 = vrot.lane.b32.xlu2 %v5111_v13, %s7568_s29 }
 0x511   :  { %v9405_v43 = vadd.f32 %v3539_v37, %v3497_v11  ;;  %v9409_v42 = vpop.f32.mrf.mxu3 }
 0x512   :  { %v9412_v51 = vpop.f32.mrf.mxu2 }
 0x513   :  { %4031 = vmatmul.bf16.gmra.mxu1 %v9095_v39  ;;  %v9414_v25 = vpop.f32.mrf.mxu0 }
 0x514   :  { %10308 = vst [vmem:[#allocation33_spill] sm:$0xff] %v9414_v25 }
 0x518   :  { %v9416_v31 = vpop.f32.mrf.mxu1 }
 0x519   :  { %10309 = vst [vmem:[#allocation34_spill] sm:$0xff] %v9416_v31  ;;  %v9419_v56 = vpop.f32.mrf.mxu3  ;;  %v9430_v31 = vadd.f32 %v8956_v53, %v9271_v60  ;;  %v5189_v60 = vld [vmem:[#allocation3 + $0x6d] sm:$0xff] }
 0x51a   :  { %10310 = vst [vmem:[#allocation35_spill] sm:$0xff] %v9419_v56  ;;  %v9421_v6 = vpop.f32.mrf.mxu2  ;;  %v5201_v56 = vpack.c.bf16 %v5188_v46, %v5188_v46  ;;  %v5202_v46 = vpack.c.bf16 %v5189_v60, %v5189_v60 }
 0x51b   :  { %10311 = vst [vmem:[#allocation36_spill] sm:$0xff] %v9421_v6  ;;  %v3501_v11 = vpop.f32.mrf.mxu0  ;;  %v5020_v6 = vpack.c.bf16 %v5007_v63, %v5007_v63 }
 0x51c   :  { %v3502_v37 = vadd.f32 %v3501_v11, %v9268_v36  ;;  %5237 = vrot.lane.b32.xlu2 %v5201_v56, %s7570_s28  ;;  %5239 = vrot.lane.b32.xlu0 %v5202_v46, %s7570_s28 }
 0x51d   :  { %5057 = vrot.lane.b32.xlu1 %v5020_v6, %s7567_s24 }
 0x51e   :  { %7031 = vmatmul.msk.bf16.gmra.mxu0 %vm3128_vm11, %v8720_v38  ;;  %7146 = vmatmul.msk.bf16.gmra.mxu3 %vm3128_vm11, %v8720_v38  ;;  %vm4665_vm11 = vcmask 781952  }
 0x520   :  { %v3544_v39 = vpop.f32.mrf.mxu1 }
 0x521   :  { %v9432_v13 = vadd.f32 %v3544_v39, %v3502_v37  ;;  %v9436_v11 = vpop.f32.mrf.mxu3  ;;  %v4784_v37 = vld [vmem:[#allocation3 + $0x62] sm:$0xff]  ;;  %v5280_v39 = vld [vmem:[#allocation3 + $0x6e] sm:$0xff] }
 0x522   :  { %v9440_v38 = vpop.f32.mrf.mxu2  ;;  %v4797_v63 = vpack.c.bf16 %v4784_v37, %v4784_v37  ;;  %v5293_v36 = vpack.c.bf16 %v5280_v39, %v5280_v39  ;;  %v9457_v37 = vadd.f32 %v8982_v16, %v9287_v33 }
 0x523   :  { %10312 = vst [vmem:[#allocation37_spill] sm:$0xff] %v9432_v13  ;;  %4036 = vmatmul.bf16.gmra.mxu1 %v9139_v19  ;;  %v9443_v25 = vpop.f32.mrf.mxu0 }
 0x524   :  { %10313 = vst [vmem:[#allocation38_spill] sm:$0xff] %v9443_v25  ;;  %4834 = vrot.lane.b32.xlu2 %v4797_v63, %s7576_s3  ;;  %5328 = vrot.lane.b32.xlu0 %v9046_v55, %s7577_s16  ;;  %v5371_v63 = vld [vmem:[#allocation3 + $0x6f] sm:$0xff] }
 0x525   :  { %5330 = vrot.lane.b32.xlu1 %v5293_v36, %s7577_s16  ;;  %10317 = vst [vmem:[#allocation42_spill] sm:$0xff] %v9457_v37 }
 0x528   :  { %v9445_v53 = vpop.f32.mrf.mxu1 }
 0x529   :  { %10314 = vst [vmem:[#allocation39_spill] sm:$0xff] %v9445_v53  ;;  %v9447_v13 = vpop.f32.mrf.mxu3 }
 0x52a   :  { %10315 = vst [vmem:[#allocation40_spill] sm:$0xff] %v9447_v13  ;;  %v9450_v19 = vpop.f32.mrf.mxu2  ;;  %v5370_v13 = vld [vmem:[#allocation3 + $0x67] sm:$0xff] }
 0x52b   :  { %10316 = vst [vmem:[#allocation41_spill] sm:$0xff] %v9450_v19  ;;  %v3506_v56 = vpop.f32.mrf.mxu0  ;;  %v5383_v46 = vpack.c.bf16 %v5370_v13, %v5370_v13 }
 0x52c   :  { %v3507_v53 = vadd.f32 %v3506_v56, %v9289_v21  ;;  %v5462_v21 = vld [vmem:[#allocation3 + $0x70] sm:$0xff] }
 0x52d   :  { %5419 = vrot.lane.b32.xlu2 %v5383_v46, %s7571_s0  ;;  %5510 = vrot.lane.b32.xlu1 %v5020_v6, %s7576_s3  ;;  %v5475_v13 = vpack.c.bf16 %v5462_v21, %v5462_v21  ;;  %v3205_v46 = vadd.f32 %v9114_v54, %v9112_v44 }
 0x530   :  { %v3549_v60 = vpop.f32.mrf.mxu1 }
 0x531   :  { %v9459_v39 = vadd.f32 %v3549_v60, %v3507_v53  ;;  %v9463_v25 = vpop.f32.mrf.mxu3  ;;  %v4917_v53 = vld [vmem:[#allocation3 + $0x6f] sm:$0x3]  ;;  %v5384_v60 = vpack.c.bf16 %v5371_v63, %v5371_v63 }
 0x532   :  { %v9467_v36 = vpop.f32.mrf.mxu2  ;;  %v4930_v56 = vpack.c.bf16 %v4917_v53, %v4917_v53 }
 0x533   :  { %10318 = vst [vmem:[#allocation43_spill] sm:$0xff] %v9459_v39  ;;  %v3508_v16 = vpop.f32.mrf.mxu0  ;;  %v3764_v39 = vadd.f32 %v9307_v2, %v9166_v23  ;;  %5421 = vrot.lane.b32.xlu0 %v5384_v60, %s7571_s0  ;;  %v3248_v2 = vadd.f32 %v8825_v7, %v3205_v46 }
 0x534   :  { %v10319_v16 = vmax.f32 %v9301_v48, %v9303_v45 }
 0x535   :  { %5512 = vrot.lane.b32.xlu2 %v5475_v13, %s7576_s3  ;;  %4968 = vrot.lane.b32.xlu1 %v4930_v56, %s7566_s23  ;;  %v3554_v54 = vmax.f32 %v3248_v2, %v9313_v0  ;;  %v3210_v0 = vadd.f32 %v9152_v24, %v9150_v61 }
 0x537   :  { %v3253_v2 = vadd.f32 %v8849_v3, %v3210_v0 }
 0x538   :  { %v3551_v33 = vpop.f32.mrf.mxu1 }
 0x539   :  { %v3795_v19 = vpop.f32.mrf.mxu3 }
 0x53a   :  { %v4082_v37 = vpop.f32.mrf.mxu2 }
 0x53b   :  { %v3806_v55 = vpop.f32.mrf.mxu0  ;;  %v3766_v37 = vadd.f32 %v9315_v4, %v9175_v52  ;;  %v3769_v52 = vadd.f32 %v9332_v8, %v9185_v58 }
 0x53c   :  { %v3807_v6 = vadd.f32 %v3806_v55, %v3764_v39  ;;  %v9488_v39 = vld [vmem:[%s10273_s4] ss:$0 sm:$0xff] }
 0x53e   :  { %v3840_v33 = vmax.f32 %v10319_v16, %v3807_v6 }
 0x540   :  { %v4007_v19 = vpop.f32.mrf.mxu1 }
 0x541   :  { %v4051_v21 = vadd.f32 %v9310_v41, %v4007_v19  ;;  %v4093_v23 = vpop.f32.mrf.mxu3 }
 0x543   :  { %v4094_v53 = vadd.f32 %v4093_v23, %v4051_v21  ;;  %v3808_v44 = vpop.f32.mrf.mxu0 }
 0x544   :  { %v3809_v45 = vadd.f32 %v3808_v44, %v3766_v37  ;;  %v3771_v37 = vadd.f32 %v9340_v40, %v9206_v17  ;;  %v3556_v44 = vmax.f32 %v3253_v2, %v9338_v32  ;;  %v3774_v17 = vadd.f32 %v9357_v22, %v9213_v20 }
 0x545   :  { %v4127_v48 = vmax.f32 %v3840_v33, %v4094_v53  ;;  %v10320_v33 = vmax.f32 %v9326_v1, %v9328_v15 }
 0x546   :  { %v3841_v41 = vmax.f32 %v3554_v54, %v3809_v45 }
 0x547   :  { %v4143_v63 = vadd.f32 %v9488_v39, %v4127_v48 }
 0x548   :  { %v4009_v13 = vpop.f32.mrf.mxu1 }
 0x549   :  { %v4053_v7 = vadd.f32 %v9317_v30, %v4009_v13  ;;  %v4156_v56 = vmax.f32 %v4143_v63, 0.0  ;;  %v4095_v60 = vpop.f32.mrf.mxu3 }
 0x54b   :  { %4169 = vst.msk [vmem:[#allocation3] sm:$0xff] %vm57_vm4, %v4156_v56  ;;  %v4096_v4 = vadd.f32 %v4095_v60, %v4053_v7  ;;  %v3811_v55 = vpop.f32.mrf.mxu0 }
 0x54c   :  { %v3812_v46 = vadd.f32 %v3811_v55, %v3769_v52 }
 0x54d   :  { %v4128_v6 = vmax.f32 %v3841_v41, %v4096_v4 }
 0x54e   :  { %v3842_v30 = vmax.f32 %v10320_v33, %v3812_v46 }
 0x54f   :  { %v4144_v16 = vadd.f32 %v9488_v39, %v4128_v6 }
 0x550   :  { %v4012_v19 = vpop.f32.mrf.mxu1 }
 0x551   :  { %v4056_v21 = vadd.f32 %v9335_v57, %v4012_v19  ;;  %v4157_v23 = vmax.f32 %v4144_v16, 0.0  ;;  %v4098_v58 = vpop.f32.mrf.mxu3  ;;  %v3215_v19 = vadd.f32 %v9189_v49, %v9187_v47  ;;  %v3776_v47 = vadd.f32 %v9366_v34, %v9225_v29 }
 0x552   :  { %v4182_v8 = vld [vmem:[#allocation3] sm:$0xff] }
 0x553   :  { %4170 = vst.msk [vmem:[#allocation3 + $0x8] sm:$0xff] %vm57_vm4, %v4157_v23  ;;  %v4099_v61 = vadd.f32 %v4098_v58, %v4056_v21  ;;  %v4195_v24 = vpack.c.bf16 %v4182_v8, %v4182_v8  ;;  %v3813_v53 = vpop.f32.mrf.mxu0  ;;  %v3489_v21 = vadd.f32 %v9362_v18, %v9223_v28  ;;  %v10322_v28 = vld [vmem:[#allocation10_spill] sm:$0xff] }
 0x554   :  { %v3814_v15 = vadd.f32 %v3813_v53, %v3771_v37  ;;  %v3258_v18 = vadd.f32 %v10322_v28, %v3215_v19  ;;  %v10327_v19 = vld [vmem:[#allocation15_spill] sm:$0xff] }
 0x555   :  { %v4129_v1 = vmax.f32 %v3842_v30, %v4099_v61  ;;  %4208 = vst.msk [vmem:[#allocation6] sm:$0xf] %vm129_vm0, %v4195_v24  ;;  %v3532_v53 = vadd.f32 %v9364_v9, %v3489_v21 }
 0x556   :  { %v3843_v54 = vmax.f32 %v3556_v44, %v3814_v15  ;;  %v10323_v15 = vld [vmem:[#allocation29_spill] sm:$0xff] }
 0x557   :  { %v4145_v57 = vadd.f32 %v9488_v39, %v4129_v1 }
 0x558   :  { %v4014_v48 = vpop.f32.mrf.mxu1 }
 0x559   :  { %v4058_v3 = vadd.f32 %v9342_v26, %v4014_v48  ;;  %v4158_v45 = vmax.f32 %v4145_v57, 0.0  ;;  %v4100_v40 = vpop.f32.mrf.mxu3  ;;  %v10321_v26 = vmax.f32 %v9351_v5, %v9353_v50  ;;  %v3558_v57 = vmax.f32 %v3258_v18, %v3532_v53  ;;  %v10331_v53 = vld [vmem:[#allocation31_spill] sm:$0xff] }
 0x55a   :  { %v4403_v63 = vld [vmem:[#allocation3 + $0x3] sm:$0xff] }
 0x55b   :  { %v4312_v41 = vld [vmem:[#allocation3 + $0x2] sm:$0xff]  ;;  %4171 = vst.msk [vmem:[#allocation3 + $0x10] sm:$0xff] %vm57_vm4, %v4158_v45  ;;  %v4101_v32 = vadd.f32 %v4100_v40, %v4058_v3  ;;  %v4416_v7 = vpack.c.bf16 %v4403_v63, %v4403_v63  ;;  %v3816_v4 = vpop.f32.mrf.mxu0  ;;  %v10324_v3 = vld [vmem:[#allocation16_spill] sm:$0xff] }
 0x55c   :  { %v4221_v13 = vld [vmem:[#allocation3 + $0x1] sm:$0xff]  ;;  %v4325_v56 = vpack.c.bf16 %v4312_v41, %v4312_v41  ;;  %v3817_v46 = vadd.f32 %v3816_v4, %v3774_v17  ;;  %v3779_v45 = vadd.f32 %v9383_v35, %v10324_v3 }
 0x55d   :  { %v4234_v60 = vpack.c.bf16 %v4221_v13, %v4221_v13  ;;  %v4587_v52 = vld [vmem:[#allocation3 + $0x8] sm:$0xff]  ;;  %v4130_v6 = vmax.f32 %v3843_v54, %v4101_v32  ;;  %4442 = vrot.lane.b32.xlu1 %v4416_v7, %s7568_s29 }
 0x55e   :  { %v4600_v55 = vpack.c.bf16 %v4587_v52, %v4587_v52  ;;  %4351 = vrot.lane.b32.xlu2 %v4325_v56, %s7567_s24  ;;  %v3844_v22 = vmax.f32 %v10321_v26, %v3817_v46  ;;  %v4494_v33 = vld [vmem:[#allocation3 + $0x7] sm:$0xff] }
 0x55f   :  { %4260 = vrot.lane.b32.xlu0 %v4234_v60, %s7566_s23  ;;  %v4146_v20 = vadd.f32 %v9488_v39, %v4130_v6  ;;  %v4507_v5 = vpack.c.bf16 %v4494_v33, %v4494_v33  ;;  %v10325_v6 = vmax.f32 %v9377_v27, %v9379_v59 }
 0x560   :  { %4209 = vst.msk [vmem:[#allocation6 + $0x8] sm:$0xf] %vm129_vm0, %v4600_v55  ;;  %v4017_v0 = vpop.f32.mrf.mxu1 }
 0x561   :  { %v4061_v16 = vadd.f32 %v9360_v10, %v4017_v0  ;;  %v4159_v30 = vmax.f32 %v4146_v20, 0.0  ;;  %v4103_v23 = vpop.f32.mrf.mxu3 }
 0x562   :  { %v4222_v58 = vld [vmem:[#allocation3 + $0x9] sm:$0xff] }
 0x563   :  { %v4996_v8 = vld [vmem:[#allocation3 + $0x10] sm:$0xff]  ;;  %4172 = vst.msk [vmem:[#allocation3 + $0x18] sm:$0xff] %vm57_vm4, %v4159_v30  ;;  %v4104_v2 = vadd.f32 %v4103_v23, %v4061_v16  ;;  %v9528_v37 = vpack.c.bf16 %v4222_v58, %v4222_v58  ;;  %v3818_v10 = vpop.f32.mrf.mxu0  ;;  %v10326_v30 = vld [vmem:[#allocation14_spill] sm:$0xff] }
 0x564   :  { %v5009_v50 = vpack.c.bf16 %v4996_v8, %v4996_v8  ;;  %v4866_v61 = vld [vmem:[#allocation3 + $0xe] sm:$0xff]  ;;  %v3819_v9 = vadd.f32 %v3818_v10, %v3776_v47  ;;  %v3220_v21 = vadd.f32 %v10327_v19, %v10326_v30 }
 0x565   :  { %v4879_v24 = vpack.c.bf16 %v4866_v61, %v4866_v61  ;;  %v4131_v49 = vmax.f32 %v3844_v22, %v4104_v2  ;;  %4262 = vrot.lane.b32.xlu1 %v9528_v37, %s7566_s23  ;;  %v4404_v34 = vld [vmem:[#allocation3 + $0xb] sm:$0xff] }
 0x566   :  { %4533 = vrot.lane.b32.xlu2 %v4507_v5, %s7570_s28  ;;  %4210 = vst.msk [vmem:[#allocation6 + $0x10] sm:$0xf] %vm129_vm0, %v5009_v50  ;;  %v4313_v48 = vld [vmem:[#allocation3 + $0xa] sm:$0xff]  ;;  %v3845_v63 = vmax.f32 %v3558_v57, %v3819_v9  ;;  %v4417_v13 = vpack.c.bf16 %v4404_v34, %v4404_v34  ;;  %v10328_v23 = vld [vmem:[#allocation17_spill] sm:$0xff] }
 0x567   :  { %4626 = vrot.lane.b32.xlu0 %v4600_v55, %s7577_s16  ;;  %4892 = vst.msk [vmem:[#allocation6 + $0x4] sm:$0xf] %vm129_vm0, %v4879_v24  ;;  %v4147_v44 = vadd.f32 %v9488_v39, %v4131_v49  ;;  %v4326_v60 = vpack.c.bf16 %v4313_v48, %v4313_v48  ;;  %v4905_v0 = vld [vmem:[#allocation3 + $0xf] sm:$0xff]  ;;  %v3494_v58 = vadd.f32 %v9388_v12, %v10328_v23  ;;  %v10330_v24 = vld [vmem:[#allocation18_spill] sm:$0xff]  ;;  %v10332_v12 = vld [vmem:[#allocation11_spill] sm:$0xff] }
 0x568   :  { %v4019_v1 = vpop.f32.mrf.mxu1  ;;  %v4918_v5 = vpack.c.bf16 %v4905_v0, %v4905_v0  ;;  %v3781_v47 = vadd.f32 %v10331_v53, %v10330_v24  ;;  %v3263_v28 = vadd.f32 %v10332_v12, %v3220_v21  ;;  %v10338_v0 = vld [vmem:[#allocation22_spill] sm:$0xff]  ;;  %v10343_v24 = vld [vmem:[#allocation35_spill] sm:$0xff]  ;;  %v10344_v12 = vld [vmem:[#allocation12_spill] sm:$0xff] }
 0x569   :  { %v4063_v29 = vadd.f32 %v10323_v15, %v4019_v1  ;;  %v4160_v54 = vmax.f32 %v4147_v44, 0.0  ;;  %v4105_v17 = vpop.f32.mrf.mxu3  ;;  %v10333_v1 = vld [vmem:[#allocation32_spill] sm:$0xff] }
 0x56a   :  { %v4997_v40 = vld [vmem:[#allocation3 + $0x18] sm:$0xff] }
 0x56b   :  { %4173 = vst.msk [vmem:[#allocation3 + $0x20] sm:$0xff] %vm57_vm4, %v4160_v54  ;;  %v4106_v41 = vadd.f32 %v4105_v17, %v4063_v29  ;;  %v9545_v32 = vpack.c.bf16 %v4997_v40, %v4997_v40  ;;  %v5269_v7 = vld [vmem:[#allocation3 + $0x16] sm:$0xff]  ;;  %v3821_v56 = vpop.f32.mrf.mxu0  ;;  %v10334_v54 = vld [vmem:[#allocation19_spill] sm:$0xff] }
 0x56c   :  { %v9547_v52 = vpack.c.bf16 %v5269_v7, %v5269_v7  ;;  %v3822_v55 = vadd.f32 %v3821_v56, %v3779_v45  ;;  %v3784_v48 = vadd.f32 %v9409_v42, %v10334_v54  ;;  %v10335_v56 = vmax.f32 %v9403_v62, %v9405_v43 }
 0x56d   :  { %v4132_v4 = vmax.f32 %v3845_v63, %v4106_v41  ;;  %5035 = vrot.lane.b32.xlu1 %v5009_v50, %s7567_s24  ;;  %4211 = vst.msk [vmem:[#allocation6 + $0x18] sm:$0xf] %vm129_vm0, %v9545_v32 }
 0x56e   :  { %4444 = vrot.lane.b32.xlu2 %v4417_v13, %s7568_s29  ;;  %4893 = vst.msk [vmem:[#allocation6 + $0xc] sm:$0xf] %vm129_vm0, %v9547_v52  ;;  %v3846_v46 = vmax.f32 %v10325_v6, %v3822_v55  ;;  %v4906_v55 = vld [vmem:[#allocation3 + $0x17] sm:$0xff] }
 0x56f   :  { %4353 = vrot.lane.b32.xlu0 %v4326_v60, %s7567_s24  ;;  %v4148_v35 = vadd.f32 %v9488_v39, %v4132_v4  ;;  %v9609_v21 = vpack.c.bf16 %v4906_v55, %v4906_v55 }
 0x570   :  { %v4022_v20 = vpop.f32.mrf.mxu1 }
 0x571   :  { %v4066_v26 = vadd.f32 %v9386_v14, %v4022_v20  ;;  %v4161_v22 = vmax.f32 %v4148_v35, 0.0  ;;  %v4108_v16 = vpop.f32.mrf.mxu3  ;;  %v10329_v14 = vld [vmem:[#allocation30_spill] sm:$0xff]  ;;  %v5087_v35 = vld [vmem:[#allocation3 + $0x11] sm:$0xff] }
 0x572   :  { %v5270_v33 = vld [vmem:[#allocation3 + $0x1e] sm:$0xff]  ;;  %v3537_v10 = vadd.f32 %v10329_v14, %v3494_v58  ;;  %v10336_v20 = vld [vmem:[#allocation20_spill] sm:$0xff]  ;;  %v5100_v62 = vpack.c.bf16 %v5087_v35, %v5087_v35 }
 0x573   :  { %4174 = vst.msk [vmem:[#allocation3 + $0x28] sm:$0xff] %vm57_vm4, %v4161_v22  ;;  %v4109_v8 = vadd.f32 %v4108_v16, %v4066_v26  ;;  %v9566_v2 = vpack.c.bf16 %v5270_v33, %v5270_v33  ;;  %v4998_v27 = vld [vmem:[#allocation3 + $0x20] sm:$0xff]  ;;  %v3823_v59 = vpop.f32.mrf.mxu0  ;;  %v10337_v26 = vld [vmem:[#allocation21_spill] sm:$0xff] }
 0x574   :  { %v9568_v61 = vpack.c.bf16 %v4998_v27, %v4998_v27  ;;  %v3824_v44 = vadd.f32 %v3823_v59, %v3781_v47  ;;  %v3560_v29 = vmax.f32 %v3263_v28, %v3537_v10  ;;  %v3225_v22 = vadd.f32 %v10337_v26, %v10336_v20  ;;  %v10339_v16 = vld [vmem:[#allocation33_spill] sm:$0xff]  ;;  %v10342_v10 = vld [vmem:[#allocation23_spill] sm:$0xff] }
 0x575   :  { %v4133_v49 = vmax.f32 %v3846_v46, %v4109_v8  ;;  %4628 = vrot.lane.b32.xlu1 %v5009_v50, %s7577_s16  ;;  %4894 = vst.msk [vmem:[#allocation6 + $0x14] sm:$0xf] %vm129_vm0, %v9566_v2  ;;  %v5178_v46 = vld [vmem:[#allocation3 + $0x15] sm:$0xff]  ;;  %v3499_v33 = vadd.f32 %v10339_v16, %v10338_v0  ;;  %v10340_v8 = vmov 0.0   ;;  %v3786_v53 = vadd.f32 %v10343_v24, %v10342_v10 }
 0x576   :  { %4812 = vrot.lane.b32.xlu2 %v4326_v60, %s7576_s3  ;;  %4212 = vst.msk [vmem:[#allocation6 + $0x20] sm:$0xf] %vm129_vm0, %v9568_v61  ;;  %v3847_v3 = vmax.f32 %v3560_v29, %v3824_v44  ;;  %v5191_v58 = vpack.c.bf16 %v5178_v46, %v5178_v46  ;;  %v3268_v28 = vadd.f32 %v10344_v12, %v3225_v22  ;;  %v10349_v0 = vld [vmem:[#allocation26_spill] sm:$0xff]  ;;  %v10354_v24 = vld [vmem:[#allocation25_spill] sm:$0xff] }
 0x577   :  { %4944 = vrot.lane.b32.xlu0 %v4918_v5, %s7566_s23  ;;  %v4149_v18 = vadd.f32 %v9488_v39, %v4133_v49  ;;  %74 = vst.msk [vmem:[#allocation3 + $0x78] sm:$0x3] %vm73_vm15, %v10340_v8  ;;  %v5149_v49 = vpop.permute.xlu2 %5148  ;;  %v10350_v16 = vld [vmem:[#allocation38_spill] sm:$0xff]  ;;  %v10352_v8 = vld [vmem:[#allocation27_spill] sm:$0xff] }
 0x578   :  { %v4024_v9 = vpop.f32.mrf.mxu1 }
 0x579   :  { %v4068_v15 = vadd.f32 %v10333_v1, %v4024_v9  ;;  %v4162_v50 = vmax.f32 %v4149_v18, 0.0  ;;  %v4110_v34 = vpop.f32.mrf.mxu3  ;;  %v10345_v1 = vld [vmem:[#allocation36_spill] sm:$0xff] }
 0x57a   :  { %v4999_v57 = vld [vmem:[#allocation3 + $0x28] sm:$0xff] }
 0x57b   :  { %4175 = vst.msk [vmem:[#allocation3 + $0x30] sm:$0xff] %vm57_vm4, %v4162_v50  ;;  %v4111_v45 = vadd.f32 %v4110_v34, %v4068_v15  ;;  %v9586_v17 = vpack.c.bf16 %v4999_v57, %v4999_v57  ;;  %v5271_v40 = vld [vmem:[#allocation3 + $0x26] sm:$0xff]  ;;  %v3826_v63 = vpop.f32.mrf.mxu0  ;;  %v4774_v34 = vld [vmem:[#allocation3 + $0x12] sm:$0xff] }
 0x57c   :  { %v9588_v41 = vpack.c.bf16 %v5271_v40, %v5271_v40  ;;  %v3827_v7 = vadd.f32 %v3826_v63, %v3784_v48  ;;  %v10346_v48 = vld [vmem:[#allocation24_spill] sm:$0xff] }
 0x57d   :  { %v4134_v13 = vmax.f32 %v3847_v3, %v4111_v45  ;;  %4719 = vrot.lane.b32.xlu1 %v9528_v37, %s7571_s0  ;;  %4213 = vst.msk [vmem:[#allocation6 + $0x28] sm:$0xf] %vm129_vm0, %v9586_v17  ;;  %v3789_v3 = vadd.f32 %v9436_v11, %v10346_v48 }
 0x57e   :  { %5037 = vrot.lane.b32.xlu2 %v9545_v32, %s7567_s24  ;;  %4895 = vst.msk [vmem:[#allocation6 + $0x1c] sm:$0xf] %vm129_vm0, %v9588_v41  ;;  %v3848_v60 = vmax.f32 %v10335_v56, %v3827_v7 }
 0x57f   :  { %4535 = vrot.lane.b32.xlu0 %v4918_v5, %s7570_s28  ;;  %v4150_v42 = vadd.f32 %v9488_v39, %v4134_v13  ;;  %v10341_v5 = vld [vmem:[#allocation34_spill] sm:$0xff]  ;;  %v9653_v46 = vpop.permute.xlu2 %5237 }
 0x580   :  { %v4027_v4 = vpop.f32.mrf.mxu1  ;;  %v3542_v14 = vadd.f32 %v10341_v5, %v3499_v33  ;;  %v3504_v33 = vadd.f32 %v10350_v16, %v10349_v0  ;;  %v10353_v5 = vld [vmem:[#allocation40_spill] sm:$0xff] }
 0x581   :  { %v4071_v37 = vadd.f32 %v9412_v51, %v4027_v4  ;;  %v4163_v6 = vmax.f32 %v4150_v42, 0.0  ;;  %v4113_v30 = vpop.f32.mrf.mxu3  ;;  %v9636_v42 = vpack.c.bf16 %v4774_v34, %v4774_v34 }
 0x582   :  { %v5272_v43 = vld [vmem:[#allocation3 + $0x2e] sm:$0xff]  ;;  %v3562_v29 = vmax.f32 %v3268_v28, %v3542_v14 }
 0x583   :  { %4176 = vst.msk [vmem:[#allocation3 + $0x38] sm:$0xff] %vm57_vm4, %v4163_v6  ;;  %v4114_v19 = vadd.f32 %v4113_v30, %v4071_v37  ;;  %v5454_v51 = vld [vmem:[#allocation3 + $0x30] sm:$0xff]  ;;  %v3828_v23 = vpop.f32.mrf.mxu0  ;;  %v9613_v27 = vpack.c.bf16 %v5272_v43, %v5272_v43 }
 0x584   :  { %v9615_v59 = vpack.c.bf16 %v5454_v51, %v5454_v51  ;;  %v3829_v44 = vadd.f32 %v3828_v23, %v3786_v53  ;;  %v10347_v37 = vld [vmem:[#allocation37_spill] sm:$0xff]  ;;  %v10351_v23 = vld [vmem:[#allocation39_spill] sm:$0xff] }
 0x585   :  { %v4135_v47 = vmax.f32 %v3848_v60, %v4114_v19  ;;  %4946 = vrot.lane.b32.xlu1 %v9609_v21, %s7566_s23  ;;  %4896 = vst.msk [vmem:[#allocation6 + $0x24] sm:$0xf] %vm129_vm0, %v9613_v27  ;;  %v10348_v55 = vmax.f32 %v9430_v31, %v10347_v37  ;;  %v10355_v53 = vld [vmem:[#allocation13_spill] sm:$0xff] }
 0x586   :  { %5126 = vrot.lane.b32.xlu2 %v5100_v62, %s7568_s29  ;;  %4214 = vst.msk [vmem:[#allocation6 + $0x30] sm:$0xf] %vm129_vm0, %v9615_v59  ;;  %v3849_v45 = vmax.f32 %v3562_v29, %v3829_v44 }
 0x587   :  { %5217 = vrot.lane.b32.xlu0 %v5191_v58, %s7570_s28  ;;  %v4151_v18 = vadd.f32 %v9488_v39, %v4135_v47  ;;  %v3547_v58 = vadd.f32 %v10351_v23, %v3504_v33  ;;  %v3273_v47 = vadd.f32 %v10355_v53, %v10354_v24  ;;  %v9681_v29 = vpop.permute.xlu2 %4834  ;;  %v5361_v53 = vld [vmem:[#allocation3 + $0x1f] sm:$0xff] }
 0x588   :  { %v4029_v9 = vpop.f32.mrf.mxu1 }
 0x589   :  { %v4073_v15 = vadd.f32 %v10345_v1, %v4029_v9  ;;  %v4164_v50 = vmax.f32 %v4151_v18, 0.0  ;;  %v4115_v57 = vpop.f32.mrf.mxu3  ;;  %v4405_v9 = vld [vmem:[#allocation3 + $0x13] sm:$0xff]  ;;  %v3564_v1 = vmax.f32 %v3273_v47, %v3547_v58 }
 0x58a   :  { %v5001_v54 = vld [vmem:[#allocation3 + $0x38] sm:$0xff] }
 0x58b   :  { %4177 = vst.msk [vmem:[#allocation3 + $0x40] sm:$0xff] %vm57_vm4, %v4164_v50  ;;  %v4116_v40 = vadd.f32 %v4115_v57, %v4073_v15  ;;  %v9634_v63 = vpack.c.bf16 %v5001_v54, %v5001_v54  ;;  %v5273_v13 = vld [vmem:[#allocation3 + $0x36] sm:$0xff]  ;;  %v3831_v7 = vpop.f32.mrf.mxu0  ;;  %v10357_v50 = vld [vmem:[#allocation28_spill] sm:$0xff] }
 0x58c   :  { %v9638_v56 = vpack.c.bf16 %v5273_v13, %v5273_v13  ;;  %v3832_v4 = vadd.f32 %v3831_v7, %v3789_v3  ;;  %v3794_v34 = vadd.f32 %v9463_v25, %v10357_v50  ;;  %v4418_v3 = vpack.c.bf16 %v4405_v9, %v4405_v9  ;;  %v4224_v47 = vld [vmem:[#allocation3 + $0x19] sm:$0xff] }
 0x58d   :  { %v4136_v60 = vmax.f32 %v3849_v45, %v4116_v40  ;;  %5308 = vrot.lane.b32.xlu1 %v9547_v52, %s7577_s16  ;;  %4215 = vst.msk [vmem:[#allocation6 + $0x38] sm:$0xf] %vm129_vm0, %v9634_v63  ;;  %v4315_v50 = vld [vmem:[#allocation3 + $0x1a] sm:$0xff] }
 0x58e   :  { %4721 = vrot.lane.b32.xlu2 %v5100_v62, %s7571_s0  ;;  %4897 = vst.msk [vmem:[#allocation6 + $0x2c] sm:$0xf] %vm129_vm0, %v9638_v56  ;;  %v3850_v35 = vmax.f32 %v10348_v55, %v3832_v4  ;;  %v5240_v13 = vpop.permute.xlu0 %5239  ;;  %v10358_v55 = vld [vmem:[#allocation42_spill] sm:$0xff] }
 0x58f   :  { %4814 = vrot.lane.b32.xlu0 %v9636_v42, %s7576_s3  ;;  %v4152_v11 = vadd.f32 %v9488_v39, %v4136_v60  ;;  %v5058_v10 = vpop.permute.xlu1 %5057 }
 0x590   :  { %v4032_v6 = vpop.f32.mrf.mxu1  ;;  %5085 = vst.msk [vmem:[#allocation6 + $0x5c] sm:$0xf] %vm315_vm2, %v5058_v10 }
 0x591   :  { %v4076_v52 = vadd.f32 %v9440_v38, %v4032_v6  ;;  %v4165_v20 = vmax.f32 %v4152_v11, 0.0  ;;  %v4118_v26 = vpop.f32.mrf.mxu3  ;;  %v3791_v38 = vadd.f32 %v10353_v5, %v10352_v8  ;;  %5176 = vst.msk [vmem:[#allocation6 + $0x5c] sm:$0xf] %vm408_vm3, %v5149_v49 }
 0x592   :  { %v5274_v22 = vld [vmem:[#allocation3 + $0x3e] sm:$0xff]  ;;  %5267 = vst.msk [vmem:[#allocation6 + $0x5c] sm:$0xf] %vm4572_vm9, %v5240_v13 }
 0x593   :  { %4178 = vst.msk [vmem:[#allocation3 + $0x48] sm:$0xff] %vm57_vm4, %v4165_v20  ;;  %v4119_v30 = vadd.f32 %v4118_v26, %v4076_v52  ;;  %v9659_v19 = vpack.c.bf16 %v5274_v22, %v5274_v22  ;;  %v5456_v43 = vld [vmem:[#allocation3 + $0x40] sm:$0xff]  ;;  %v3833_v51 = vpop.f32.mrf.mxu0 }
 0x594   :  { %v9661_v31 = vpack.c.bf16 %v5456_v43, %v5456_v43  ;;  %v3834_v28 = vadd.f32 %v3833_v51, %v3791_v38  ;;  %v5179_v26 = vld [vmem:[#allocation3 + $0x1d] sm:$0xff]  ;;  %v4878_v38 = vld [vmem:[#allocation3 + $0x6e] sm:$0x3] }
 0x595   :  { %v4137_v14 = vmax.f32 %v3850_v35, %v4119_v30  ;;  %4264 = vrot.lane.b32.xlu1 %v5100_v62, %s7566_s23  ;;  %4898 = vst.msk [vmem:[#allocation6 + $0x34] sm:$0xf] %vm129_vm0, %v9659_v19  ;;  %v10356_v62 = vld [vmem:[#allocation41_spill] sm:$0xff]  ;;  %v10359_v35 = vld [vmem:[#allocation43_spill] sm:$0xff]  ;;  %v5192_v33 = vpack.c.bf16 %v5179_v26, %v5179_v26  ;;  %v9707_v30 = vpop.permute.xlu2 %5419  ;;  %v4891_v24 = vpack.c.bf16 %v4878_v38, %v4878_v38 }
 0x596   :  { %5490 = vrot.lane.b32.xlu2 %v9545_v32, %s7576_s3  ;;  %4216 = vst.msk [vmem:[#allocation6 + $0x40] sm:$0xf] %vm129_vm0, %v9661_v31  ;;  %v3851_v48 = vmax.f32 %v3564_v1, %v3834_v28  ;;  %v10360_v6 = vmax.f32 %v10358_v55, %v10359_v35  ;;  %v9711_v23 = vpop.permute.xlu0 %5328  ;;  %v7500_v35 = vld [vmem:[%s10274_s5 + $0x38] sm:$0xff] }
 0x597   :  { %5399 = vrot.lane.b32.xlu0 %v9609_v21, %s7571_s0  ;;  %v4153_v12 = vadd.f32 %v9488_v39, %v4137_v14  ;;  %v5331_v25 = vpop.permute.xlu1 %5330  ;;  %4904 = vst.msk [vmem:[#allocation6 + $0x64] sm:$0x1] %vm142_vm5, %v4891_v24  ;;  %5754 = vmatpush.bf16.msrb.mxu0 %v7500_v35  ;;  %v5089_v26 = vld [vmem:[#allocation3 + $0x21] sm:$0xff]  ;;  %v7494_v24 = vld [vmem:[%s10274_s5 + $0x8] sm:$0xff] }
 0x598   :  { %v4034_v18 = vpop.f32.mrf.mxu1  ;;  %5358 = vst.msk [vmem:[#allocation6 + $0x5c] sm:$0xf] %vm4665_vm11, %v5331_v25  ;;  %v4908_v25 = vld [vmem:[#allocation3 + $0x27] sm:$0xff] }
 0x599   :  { %v4078_v44 = vadd.f32 %v10356_v62, %v4034_v18  ;;  %v4166_v15 = vmax.f32 %v4153_v12, 0.0  ;;  %v4120_v57 = vpop.f32.mrf.mxu3  ;;  %v5374_v18 = vpack.c.bf16 %v5361_v53, %v5361_v53  ;;  %v4237_v62 = vpack.c.bf16 %v4224_v47, %v4224_v47  ;;  %v7493_v53 = vld [vmem:[%s10274_s5] sm:$0xff] }
 0x59a   :  { %v5003_v54 = vld [vmem:[#allocation3 + $0x48] sm:$0xff]  ;;  %v4921_v55 = vpack.c.bf16 %v4908_v25, %v4908_v25 }
 0x59b   :  { %4179 = vst.msk [vmem:[#allocation3 + $0x50] sm:$0xff] %vm57_vm4, %v4166_v15  ;;  %v4121_v49 = vadd.f32 %v4120_v57, %v4078_v44  ;;  %v5275_v45 = vld [vmem:[#allocation3 + $0x46] sm:$0xff]  ;;  %v3836_v40 = vpop.f32.mrf.mxu0  ;;  %v9686_v7 = vpack.c.bf16 %v5003_v54, %v5003_v54 }
 0x59c   :  { %v9688_v60 = vpack.c.bf16 %v5275_v45, %v5275_v45  ;;  %v3837_v11 = vadd.f32 %v3836_v40, %v3794_v34  ;;  %v4328_v34 = vpack.c.bf16 %v4315_v50, %v4315_v50  ;;  %v4406_v45 = vld [vmem:[#allocation3 + $0x1b] sm:$0xff]  ;;  %v5363_v50 = vld [vmem:[#allocation3 + $0x2f] sm:$0xff] }
 0x59d   :  { %v4138_v4 = vmax.f32 %v3851_v48, %v4121_v49  ;;  %4630 = vrot.lane.b32.xlu1 %v9545_v32, %s7577_s16  ;;  %4217 = vst.msk [vmem:[#allocation6 + $0x48] sm:$0xf] %vm129_vm0, %v9686_v7  ;;  %v4419_v40 = vpack.c.bf16 %v4406_v45, %v4406_v45  ;;  %v4408_v35 = vld [vmem:[#allocation3 + $0x2b] sm:$0xff] }
 0x59e   :  { %4446 = vrot.lane.b32.xlu2 %v4418_v3, %s7568_s29  ;;  %v3852_v52 = vmax.f32 %v10360_v6, %v3837_v11  ;;  %4899 = vst.msk [vmem:[#allocation6 + $0x3c] sm:$0xf] %vm129_vm0, %v9688_v60  ;;  %v5180_v11 = vld [vmem:[#allocation3 + $0x25] sm:$0xff] }
 0x59f   :  { %4355 = vrot.lane.b32.xlu0 %v9636_v42, %s7567_s24  ;;  %v4154_v37 = vadd.f32 %v9488_v39, %v4138_v4  ;;  %v9718_v5 = vpop.permute.xlu1 %5510 }
 0x5a0   :  { %v4037_v20 = vpop.f32.mrf.mxu1 }
 0x5a1   :  { %v4081_v32 = vadd.f32 %v9467_v36, %v4037_v20  ;;  %v4167_v22 = vmax.f32 %v4154_v37, 0.0  ;;  %v4123_v42 = vpop.f32.mrf.mxu3  ;;  %v5193_v37 = vpack.c.bf16 %v5180_v11, %v5180_v11  ;;  %v7505_v11 = vld [vmem:[%s10274_s5 + $0x60] sm:$0xff] }
 0x5a2   :  { %v5276_v0 = vld [vmem:[#allocation3 + $0x4e] sm:$0xff] }
 0x5a3   :  { %4180 = vst.msk [vmem:[#allocation3 + $0x58] sm:$0xff] %vm57_vm4, %v4167_v22  ;;  %v4124_v16 = vadd.f32 %v4123_v42, %v4081_v32  ;;  %v9709_v43 = vpack.c.bf16 %v5276_v0, %v5276_v0  ;;  %v5004_v51 = vld [vmem:[#allocation3 + $0x50] sm:$0xff]  ;;  %v3838_v58 = vpop.f32.mrf.mxu0  ;;  %v4776_v32 = vld [vmem:[#allocation3 + $0x22] sm:$0xff]  ;;  %v5102_v42 = vpack.c.bf16 %v5089_v26, %v5089_v26  ;;  %vm6061_vm4 = vcmask 687104  }
 0x5a4   :  { %v9713_v36 = vpack.c.bf16 %v5004_v51, %v5004_v51  ;;  %v4789_v22 = vpack.c.bf16 %v4776_v32, %v4776_v32  ;;  %v7498_v0 = vld [vmem:[%s10274_s5 + $0x28] sm:$0xff] }
 0x5a5   :  { %v4139_v8 = vmax.f32 %v3852_v52, %v4124_v16  ;;  %5219 = vrot.lane.b32.xlu1 %v5192_v33, %s7570_s28  ;;  %4900 = vst.msk [vmem:[#allocation6 + $0x44] sm:$0xf] %vm129_vm0, %v9709_v43  ;;  %v5422_v15 = vpop.permute.xlu0 %5421  ;;  %v7497_v16 = vld [vmem:[%s10274_s5 + $0x20] sm:$0xff] }
 0x5a6   :  { %5310 = vrot.lane.b32.xlu2 %v9566_v2, %s7577_s16  ;;  %4218 = vst.msk [vmem:[#allocation6 + $0x50] sm:$0xf] %vm129_vm0, %v9713_v36 }
 0x5a7   :  { %4537 = vrot.lane.b32.xlu0 %v9609_v21, %s7570_s28  ;;  %v4155_v14 = vadd.f32 %v9488_v39, %v4139_v8  ;;  %v5513_v39 = vpop.permute.xlu2 %5512  ;;  %v4969_v9 = vpop.permute.xlu1 %4968  ;;  %5449 = vst.msk [vmem:[#allocation6 + $0x5c] sm:$0xf] %vm4758_vm14, %v5422_v15  ;;  %v7496_v8 = vld [vmem:[%s10274_s5 + $0x18] sm:$0xff]  ;;  %v5090_v15 = vld [vmem:[#allocation3 + $0x29] sm:$0xff] }
 0x5a8   :  { %v4039_v10 = vpop.f32.mrf.mxu1  ;;  %4995 = vst.msk [vmem:[#allocation6 + $0x64] sm:$0x1] %vm235_vm6, %v4969_v9 }
 0x5a9   :  { %v4168_v12 = vmax.f32 %v4155_v14, 0.0  ;;  %v4125_v28 = vpop.f32.mrf.mxu3  ;;  %5540 = vst.msk [vmem:[#allocation6 + $0x5c] sm:$0xf] %vm4851_vm13, %v5513_v39 }
 0x5aa   :  { %v5005_v2 = vld [vmem:[#allocation3 + $0x58] sm:$0xff]  ;;  %v5181_v28 = vld [vmem:[#allocation3 + $0x2d] sm:$0xff] }
 0x5ab   :  { %4181 = vst.msk [vmem:[#allocation3 + $0x60] sm:$0x3] %vm73_vm15, %v4168_v12  ;;  %v9729_v21 = vpack.c.bf16 %v5005_v2, %v5005_v2  ;;  %v5277_v44 = vld [vmem:[#allocation3 + $0x56] sm:$0xff] }
 0x5ac   :  { %v9733_v1 = vpack.c.bf16 %v5277_v44, %v5277_v44 }
 0x5ad   :  { %5401 = vrot.lane.b32.xlu1 %v5374_v18, %s7571_s0  ;;  %4219 = vst.msk [vmem:[#allocation6 + $0x58] sm:$0xf] %vm129_vm0, %v9729_v21 }
 0x5ae   :  { %4266 = vrot.lane.b32.xlu2 %v4237_v62, %s7566_s23  ;;  %4901 = vst.msk [vmem:[#allocation6 + $0x4c] sm:$0xf] %vm129_vm0, %v9733_v1 }
 0x5af   :  { %5128 = vrot.lane.b32.xlu0 %v4237_v62, %s7568_s29 }
 0x5b2   :  { %v5278_v57 = vld [vmem:[#allocation3 + $0x5e] sm:$0xff] }
 0x5b3   :  { %v9743_v54 = vpack.c.bf16 %v5278_v57, %v5278_v57  ;;  %v4194_v48 = vld [vmem:[#allocation3 + $0x60] sm:$0x3]  ;;  %v9821_v57 = vpack.c.bf16 %v5090_v15, %v5090_v15 }
 0x5b4   :  { %v4207_v49 = vpack.c.bf16 %v4194_v48, %v4194_v48  ;;  %v5376_v48 = vpack.c.bf16 %v5363_v50, %v5363_v50 }
 0x5b5   :  { %4357 = vrot.lane.b32.xlu1 %v4328_v34, %s7567_s24  ;;  %4902 = vst.msk [vmem:[#allocation6 + $0x54] sm:$0xf] %vm129_vm0, %v9743_v54  ;;  %vm5946_vm0 = vcmask 1043456  }
 0x5b6   :  { %5039 = vrot.lane.b32.xlu2 %v9568_v61, %s7567_s24  ;;  %4220 = vst.msk [vmem:[#allocation6 + $0x60] sm:$0x1] %vm142_vm5, %v4207_v49  ;;  %v7507_v49 = vld [vmem:[%s10274_s5 + $0x70] sm:$0xff]  ;;  %vm5924_vm5 = vcmask 982016  }
 0x5b7   :  { %5492 = vrot.lane.b32.xlu0 %v9568_v61, %s7576_s3 }
 0x5b8   :  { %v4352_v3 = vpop.permute.xlu2 %4351 }
 0x5bd   :  { %4948 = vrot.lane.b32.xlu1 %v5374_v18, %s7566_s23 }
 0x5be   :  { %4632 = vrot.lane.b32.xlu2 %v9568_v61, %s7577_s16  ;;  %v7499_v61 = vld [vmem:[%s10274_s5 + $0x30] sm:$0xff] }
 0x5bf   :  { %4448 = vrot.lane.b32.xlu0 %v4419_v40, %s7568_s29  ;;  %5755 = vmatpush.bf16.msrb.mxu0 %v7499_v61  ;;  %v4421_v61 = vpack.c.bf16 %v4408_v35, %v4408_v35  ;;  %v5365_v35 = vld [vmem:[#allocation3 + $0x3f] sm:$0xff] }
 0x5c0   :  { %v4534_v13 = vpop.permute.xlu2 %4533 }
 0x5c3   :  { %5756 = vmatpush.bf16.msrb.mxu0 %v7498_v0 }
 0x5c5   :  { %4539 = vrot.lane.b32.xlu1 %v5374_v18, %s7570_s28  ;;  %v4407_v18 = vld [vmem:[#allocation3 + $0x23] sm:$0xff] }
 0x5c6   :  { %4723 = vrot.lane.b32.xlu2 %v4237_v62, %s7571_s0  ;;  %v5194_v62 = vpack.c.bf16 %v5181_v28, %v5181_v28  ;;  %v4420_v44 = vpack.c.bf16 %v4407_v18, %v4407_v18 }
 0x5c7   :  { %4816 = vrot.lane.b32.xlu0 %v4328_v34, %s7576_s3  ;;  %5757 = vmatpush.bf16.msrb.mxu0 %v7497_v16  ;;  %v7508_v34 = vld [vmem:[%s10274_s5 + $0x78] sm:$0xff]  ;;  %v7502_v16 = vld [vmem:[%s10274_s5 + $0x48] sm:$0xff] }
 0x5c8   :  { %v4445_v4 = vpop.permute.xlu2 %4444  ;;  %5797 = vmatpush.bf16.msrb.mxu1 %v7508_v34  ;;  %v4409_v34 = vld [vmem:[#allocation3 + $0x33] sm:$0xff] }
 0x5cb   :  { %5758 = vmatpush.bf16.msrb.mxu0 %v7496_v8 }
 0x5cc   :  { %5798 = vmatpush.bf16.msrb.mxu1 %v7507_v49 }
 0x5cd   :  { %5221 = vrot.lane.b32.xlu1 %v5193_v37, %s7570_s28 }
 0x5ce   :  { %4950 = vrot.lane.b32.xlu2 %v4921_v55, %s7566_s23 }
 0x5cf   :  { %5041 = vrot.lane.b32.xlu0 %v9586_v17, %s7567_s24  ;;  %v4443_v6 = vpop.permute.xlu1 %4442 }
 0x5d0   :  { %v4813_v52 = vpop.permute.xlu2 %4812 }
 0x5d1   :  { %v4261_v20 = vpop.permute.xlu0 %4260 }
 0x5d2   :  { %4299 = vst.msk [vmem:[#allocation6] sm:$0xf] %vm222_vm1, %v4261_v20 }
 0x5d3   :  { %4390 = vst.msk [vmem:[#allocation6] sm:$0xf] %vm315_vm2, %v4352_v3 }
 0x5d4   :  { %4481 = vst.msk [vmem:[#allocation6] sm:$0xf] %vm408_vm3, %v4443_v6  ;;  %v7504_v6 = vld [vmem:[%s10274_s5 + $0x58] sm:$0xff] }
 0x5d5   :  { %4573 = vst.msk [vmem:[#allocation6] sm:$0xf] %vm4572_vm9, %v4534_v13  ;;  %4818 = vrot.lane.b32.xlu1 %v4789_v22, %s7576_s3  ;;  %v4317_v13 = vld [vmem:[#allocation3 + $0x2a] sm:$0xff] }
 0x5d6   :  { %5312 = vrot.lane.b32.xlu2 %v9588_v41, %s7577_s16  ;;  %v7495_v41 = vld [vmem:[%s10274_s5 + $0x10] sm:$0xff] }
 0x5d7   :  { %5130 = vrot.lane.b32.xlu0 %v5102_v42, %s7568_s29  ;;  %v4263_v33 = vpop.permute.xlu1 %4262  ;;  %5759 = vmatpush.bf16.msrb.mxu0 %v7495_v41  ;;  %v5182_v41 = vld [vmem:[#allocation3 + $0x35] sm:$0xff] }
 0x5d8   :  { %v5038_v51 = vpop.permute.xlu2 %5037  ;;  %4300 = vst.msk [vmem:[#allocation6 + $0x8] sm:$0xf] %vm222_vm1, %v4263_v33  ;;  %v7501_v33 = vld [vmem:[%s10274_s5 + $0x40] sm:$0xff] }
 0x5d9   :  { %v4627_v58 = vpop.permute.xlu0 %4626 }
 0x5da   :  { %4666 = vst.msk [vmem:[#allocation6] sm:$0xf] %vm4665_vm11, %v4627_v58 }
 0x5db   :  { %5760 = vmatpush.bf16.msrb.mxu0 %v7494_v24  ;;  %v5091_v24 = vld [vmem:[#allocation3 + $0x31] sm:$0xff] }
 0x5dd   :  { %5403 = vrot.lane.b32.xlu1 %v4921_v55, %s7571_s0 }
 0x5de   :  { %4268 = vrot.lane.b32.xlu2 %v5102_v42, %s7566_s23 }
 0x5df   :  { %4725 = vrot.lane.b32.xlu0 %v5102_v42, %s7571_s0  ;;  %v5036_v38 = vpop.permute.xlu1 %5035  ;;  %5761 = vmatpush.bf16.msrb.mxu0 %v7493_v53  ;;  %v4778_v53 = vld [vmem:[#allocation3 + $0x32] sm:$0xff] }
 0x5e0   :  { %v5127_v14 = vpop.permute.xlu2 %5126 }
 0x5e1   :  { %v4354_v10 = vpop.permute.xlu0 %4353 }
 0x5e2   :  { %4391 = vst.msk [vmem:[#allocation6 + $0x8] sm:$0xf] %vm315_vm2, %v4354_v10 }
 0x5e3   :  { %4482 = vst.msk [vmem:[#allocation6 + $0x8] sm:$0xf] %vm408_vm3, %v4445_v4  ;;  %v7506_v4 = vld [vmem:[%s10274_s5 + $0x68] sm:$0xff] }
 0x5e4   :  { %5799 = vmatpush.bf16.msrb.mxu1 %v7506_v4  ;;  %v5092_v4 = vld [vmem:[#allocation3 + $0x39] sm:$0xff] }
 0x5e5   :  { %4359 = vrot.lane.b32.xlu1 %v4789_v22, %s7567_s24 }
 0x5e6   :  { %4634 = vrot.lane.b32.xlu2 %v9586_v17, %s7577_s16 }
 0x5e7   :  { %5494 = vrot.lane.b32.xlu0 %v9586_v17, %s7576_s3  ;;  %v4629_v47 = vpop.permute.xlu1 %4628 }
 0x5e8   :  { %v4722_v12 = vpop.permute.xlu2 %4721  ;;  %5800 = vmatpush.bf16.msrb.mxu1 %v7505_v11  ;;  %v5105_v11 = vpack.c.bf16 %v5092_v4, %v5092_v4 }
 0x5e9   :  { %v4945_v2 = vpop.permute.xlu0 %4944 }
 0x5ea   :  { %4983 = vst.msk [vmem:[#allocation6 + $0x4] sm:$0xf] %vm222_vm1, %v4945_v2  ;;  %v4791_v2 = vpack.c.bf16 %v4778_v53, %v4778_v53  ;;  %v5184_v53 = vld [vmem:[#allocation3 + $0x45] sm:$0xff] }
 0x5eb   :  { %5074 = vst.msk [vmem:[#allocation6 + $0x4] sm:$0xf] %vm315_vm2, %v5036_v38  ;;  %v5195_v38 = vpack.c.bf16 %v5182_v41, %v5182_v41 }
 0x5ec   :  { %5165 = vst.msk [vmem:[#allocation6 + $0x4] sm:$0xf] %vm408_vm3, %v5127_v14  ;;  %5801 = vmatpush.bf16.msrb.mxu1 %v7504_v6 }
 0x5ed   :  { %4541 = vrot.lane.b32.xlu1 %v4921_v55, %s7570_s28 }
 0x5ee   :  { %5223 = vrot.lane.b32.xlu2 %v5194_v62, %s7570_s28 }
 0x5ef   :  { %4450 = vrot.lane.b32.xlu0 %v4420_v44, %s7568_s29  ;;  %v4720_v17 = vpop.permute.xlu1 %4719 }
 0x5f0   :  { %v5491_v39 = vpop.permute.xlu2 %5490  ;;  %4759 = vst.msk [vmem:[#allocation6] sm:$0xf] %vm4758_vm14, %v4720_v17 }
 0x5f1   :  { %v4536_v9 = vpop.permute.xlu0 %4535  ;;  %4852 = vst.msk [vmem:[#allocation6] sm:$0xf] %vm4851_vm13, %v4813_v52  ;;  %v7503_v52 = vld [vmem:[%s10274_s5 + $0x50] sm:$0xff] }
 0x5f2   :  { %4574 = vst.msk [vmem:[#allocation6 + $0x8] sm:$0xf] %vm4572_vm9, %v4536_v9  ;;  %5802 = vmatpush.bf16.msrb.mxu1 %v7503_v52 }
 0x5f3   :  { %4667 = vst.msk [vmem:[#allocation6 + $0x8] sm:$0xf] %vm4665_vm11, %v4629_v47  ;;  %v4910_v47 = vld [vmem:[#allocation3 + $0x37] sm:$0xff] }
 0x5f4   :  { %4760 = vst.msk [vmem:[#allocation6 + $0x8] sm:$0xf] %vm4758_vm14, %v4722_v12  ;;  %v5104_v12 = vpack.c.bf16 %v5091_v24, %v5091_v24  ;;  %v4923_v28 = vpack.c.bf16 %v4910_v47, %v4910_v47  ;;  %v5093_v24 = vld [vmem:[#allocation3 + $0x41] sm:$0xff] }
 0x5f5   :  { %5132 = vrot.lane.b32.xlu1 %v9821_v57, %s7568_s29 }
 0x5f6   :  { %5405 = vrot.lane.b32.xlu2 %v5376_v48, %s7571_s0  ;;  %5803 = vmatpush.bf16.msrb.mxu1 %v7502_v16 }
 0x5f7   :  { %5314 = vrot.lane.b32.xlu0 %v9613_v27, %s7577_s16  ;;  %v4947_v3 = vpop.permute.xlu1 %4946  ;;  %v4330_v27 = vpack.c.bf16 %v4317_v13, %v4317_v13 }
 0x5f8   :  { %v4447_v45 = vpop.permute.xlu2 %4446  ;;  %4984 = vst.msk [vmem:[#allocation6 + $0xc] sm:$0xf] %vm222_vm1, %v4947_v3  ;;  %v7149_v22 = vld [vmem:[#allocation6] sm:$0xf]  ;;  %v4422_v3 = vpack.c.bf16 %v4409_v34, %v4409_v34 }
 0x5f9   :  { %v5218_v40 = vpop.permute.xlu0 %5217  ;;  %5075 = vst.msk [vmem:[#allocation6 + $0xc] sm:$0xf] %vm315_vm2, %v5038_v51 }
 0x5fa   :  { %5256 = vst.msk [vmem:[#allocation6 + $0x4] sm:$0xf] %vm4572_vm9, %v5218_v40  ;;  %5804 = vmatpush.bf16.msrb.mxu1 %v7501_v33 }
 0x5fd   :  { %5496 = vrot.lane.b32.xlu1 %v9615_v59, %s7576_s3 }
 0x5fe   :  { %4361 = vrot.lane.b32.xlu2 %v4330_v27, %s7567_s24 }
 0x5ff   :  { %4270 = vrot.lane.b32.xlu0 %v9821_v57, %s7566_s23  ;;  %v5309_v25 = vpop.permute.xlu1 %5308 }
 0x600   :  { %v5311_v37 = vpop.permute.xlu2 %5310  ;;  %5347 = vst.msk [vmem:[#allocation6 + $0x4] sm:$0xf] %vm4665_vm11, %v5309_v25 }
 0x601   :  { %v4815_v55 = vpop.permute.xlu0 %4814 }
 0x602   :  { %4853 = vst.msk [vmem:[#allocation6 + $0x8] sm:$0xf] %vm4851_vm13, %v4815_v55 }
 0x605   :  { %4452 = vrot.lane.b32.xlu1 %v4421_v61, %s7568_s29  ;;  %v5378_v61 = vpack.c.bf16 %v5365_v35, %v5365_v35 }
 0x606   :  { %4952 = vrot.lane.b32.xlu2 %v5376_v48, %s7566_s23 }
 0x607   :  { %5043 = vrot.lane.b32.xlu0 %v9615_v59, %s7567_s24  ;;  %v4265_v20 = vpop.permute.xlu1 %4264 }
 0x608   :  { %v4267_v32 = vpop.permute.xlu2 %4266  ;;  %4301 = vst.msk [vmem:[#allocation6 + $0x10] sm:$0xf] %vm222_vm1, %v4265_v20  ;;  %v4410_v20 = vld [vmem:[#allocation3 + $0x3b] sm:$0xff] }
 0x609   :  { %v5400_v26 = vpop.permute.xlu0 %5399  ;;  %v7482_v42 = vld [vmem:[#allocation6 + $0x4] sm:$0xf0]  ;;  %4302 = vst.msk [vmem:[#allocation6 + $0x18] sm:$0xf] %vm222_vm1, %v4267_v32 }
 0x60a   :  { %v7150_v0 = vor.u32 %v7482_v42, %v7149_v22  ;;  %5438 = vst.msk [vmem:[#allocation6 + $0x4] sm:$0xf] %vm4758_vm14, %v5400_v26  ;;  %v4319_v32 = vld [vmem:[#allocation3 + $0x3a] sm:$0xff]  ;;  %v4423_v26 = vpack.c.bf16 %v4410_v20, %v4410_v20 }
 0x60b   :  { %5529 = vst.msk [vmem:[#allocation6 + $0x4] sm:$0xf] %vm4851_vm13, %v5491_v39  ;;  %v4332_v22 = vpack.c.bf16 %v4319_v32, %v4319_v32 }
 0x60c   :  { %5762 = vmatmul.bf16.vlgmr.msrb.gmra.mxu0 %v7150_v0 }
 0x60d   :  { %4820 = vrot.lane.b32.xlu1 %v4330_v27, %s7576_s3  ;;  %v5183_v27 = vld [vmem:[#allocation3 + $0x3d] sm:$0xff] }
 0x60e   :  { %4543 = vrot.lane.b32.xlu2 %v5376_v48, %s7570_s28  ;;  %v5196_v25 = vpack.c.bf16 %v5183_v27, %v5183_v27 }
 0x60f   :  { %4636 = vrot.lane.b32.xlu0 %v9615_v59, %s7577_s16  ;;  %v4631_v51 = vpop.permute.xlu1 %4630 }
 0x610   :  { %v5040_v58 = vpop.permute.xlu2 %5039 }
 0x611   :  { %v4356_v8 = vpop.permute.xlu0 %4355 }
 0x612   :  { %4392 = vst.msk [vmem:[#allocation6 + $0x10] sm:$0xf] %vm315_vm2, %v4356_v8 }
 0x613   :  { %4483 = vst.msk [vmem:[#allocation6 + $0x10] sm:$0xf] %vm408_vm3, %v4447_v45 }
 0x615   :  { %5045 = vrot.lane.b32.xlu1 %v9634_v63, %s7567_s24 }
 0x616   :  { %5225 = vrot.lane.b32.xlu2 %v5195_v38, %s7570_s28 }
 0x617   :  { %4727 = vrot.lane.b32.xlu0 %v9821_v57, %s7571_s0  ;;  %v5220_v59 = vpop.permute.xlu1 %5219  ;;  %v7481_v57 = vld [vmem:[#allocation6 + $0x4] sm:$0xf] }
 0x618   :  { %v4633_v14 = vpop.permute.xlu2 %4632 }
 0x619   :  { %v4538_v10 = vpop.permute.xlu0 %4537 }
 0x61a   :  { %4575 = vst.msk [vmem:[#allocation6 + $0x10] sm:$0xf] %vm4572_vm9, %v4538_v10  ;;  %v4912_v10 = vld [vmem:[#allocation3 + $0x47] sm:$0xff] }
 0x61b   :  { %4668 = vst.msk [vmem:[#allocation6 + $0x10] sm:$0xf] %vm4665_vm11, %v4631_v51  ;;  %v4925_v47 = vpack.c.bf16 %v4912_v10, %v4912_v10 }
 0x61d   :  { %5134 = vrot.lane.b32.xlu1 %v5104_v12, %s7568_s29 }
 0x61e   :  { %4822 = vrot.lane.b32.xlu2 %v4791_v2, %s7576_s3 }
 0x61f   :  { %4954 = vrot.lane.b32.xlu0 %v4923_v28, %s7566_s23  ;;  %v5402_v18 = vpop.permute.xlu1 %5401 }
 0x620   :  { %v4724_v62 = vpop.permute.xlu2 %4723 }
 0x621   :  { %4761 = vst.msk [vmem:[#allocation6 + $0x10] sm:$0xf] %vm4758_vm14, %v4724_v62  ;;  %v5129_v44 = vpop.permute.xlu0 %5128 }
 0x622   :  { %5166 = vst.msk [vmem:[#allocation6 + $0xc] sm:$0xf] %vm408_vm3, %v5129_v44  ;;  %v4780_v44 = vld [vmem:[#allocation3 + $0x42] sm:$0xff] }
 0x623   :  { %5257 = vst.msk [vmem:[#allocation6 + $0xc] sm:$0xf] %vm4572_vm9, %v5220_v59 }
 0x624   :  { %5348 = vst.msk [vmem:[#allocation6 + $0xc] sm:$0xf] %vm4665_vm11, %v5311_v37 }
 0x625   :  { %5439 = vst.msk [vmem:[#allocation6 + $0xc] sm:$0xf] %vm4758_vm14, %v5402_v18  ;;  %4729 = vrot.lane.b32.xlu1 %v5104_v12, %s7571_s0 }
 0x626   :  { %5407 = vrot.lane.b32.xlu2 %v4923_v28, %s7571_s0 }
 0x627   :  { %5316 = vrot.lane.b32.xlu0 %v9638_v56, %s7577_s16  ;;  %v4358_v17 = vpop.permute.xlu1 %4357 }
 0x628   :  { %v4951_v39 = vpop.permute.xlu2 %4950  ;;  %4393 = vst.msk [vmem:[#allocation6 + $0x18] sm:$0xf] %vm315_vm2, %v4358_v17  ;;  %v4793_v17 = vpack.c.bf16 %v4780_v44, %v4780_v44  ;;  %v4914_v44 = vld [vmem:[#allocation3 + $0x57] sm:$0xff] }
 0x629   :  { %v5493_v9 = vpop.permute.xlu0 %5492  ;;  %4986 = vst.msk [vmem:[#allocation6 + $0x1c] sm:$0xf] %vm222_vm1, %v4951_v39 }
 0x62a   :  { %5530 = vst.msk [vmem:[#allocation6 + $0xc] sm:$0xf] %vm4851_vm13, %v5493_v9 }
 0x62d   :  { %5498 = vrot.lane.b32.xlu1 %v9634_v63, %s7576_s3 }
 0x62e   :  { %4363 = vrot.lane.b32.xlu2 %v4791_v2, %s7567_s24  ;;  %v5197_v2 = vpack.c.bf16 %v5184_v53, %v5184_v53 }
 0x62f   :  { %4272 = vrot.lane.b32.xlu0 %v5104_v12, %s7566_s23  ;;  %v4949_v15 = vpop.permute.xlu1 %4948  ;;  %v5106_v12 = vpack.c.bf16 %v5093_v24, %v5093_v24 }
 0x630   :  { %v5313_v50 = vpop.permute.xlu2 %5312  ;;  %4985 = vst.msk [vmem:[#allocation6 + $0x14] sm:$0xf] %vm222_vm1, %v4949_v15 }
 0x631   :  { %v4449_v56 = vpop.permute.xlu0 %4448  ;;  %5076 = vst.msk [vmem:[#allocation6 + $0x14] sm:$0xf] %vm315_vm2, %v5040_v58  ;;  %v7151_v48 = vld [vmem:[#allocation6 + $0x8] sm:$0xf0] }
 0x632   :  { %4484 = vst.msk [vmem:[#allocation6 + $0x18] sm:$0xf] %vm408_vm3, %v4449_v56  ;;  %v7154_v49 = vor.u32 %v7481_v57, %v7151_v48 }
 0x634   :  { %5805 = vmatmul.bf16.vlgmr.msrb.gmra.mxu1 %v7154_v49  ;;  %v4411_v49 = vld [vmem:[#allocation3 + $0x43] sm:$0xff] }
 0x635   :  { %4454 = vrot.lane.b32.xlu1 %v4422_v3, %s7568_s29  ;;  %v4424_v3 = vpack.c.bf16 %v4411_v49, %v4411_v49 }
 0x636   :  { %4545 = vrot.lane.b32.xlu2 %v4923_v28, %s7570_s28 }
 0x637   :  { %4638 = vrot.lane.b32.xlu0 %v9634_v63, %s7577_s16  ;;  %v4540_v45 = vpop.permute.xlu1 %4539 }
 0x638   :  { %v4269_v40 = vpop.permute.xlu2 %4268  ;;  %4576 = vst.msk [vmem:[#allocation6 + $0x18] sm:$0xf] %vm4572_vm9, %v4540_v45  ;;  %v5874_v45 = vld [vmem:[%s10276_s7 + $0x38] sm:$0xf] }
 0x639   :  { %v4817_v13 = vpop.permute.xlu0 %4816  ;;  %4669 = vst.msk [vmem:[#allocation6 + $0x18] sm:$0xf] %vm4665_vm11, %v4633_v14  ;;  %v5908_v4 = vunpack.c.l.b16 %v5874_v45 }
 0x63a   :  { %4303 = vst.msk [vmem:[#allocation6 + $0x20] sm:$0xf] %vm222_vm1, %v4269_v40 }
 0x63b   :  { %4854 = vst.msk [vmem:[#allocation6 + $0x10] sm:$0xf] %vm4851_vm13, %v4817_v13 }
 0x63d   :  { %5318 = vrot.lane.b32.xlu1 %v9659_v19, %s7577_s16 }
 0x63e   :  { %5136 = vrot.lane.b32.xlu2 %v5105_v11, %s7568_s29 }
 0x63f   :  { %5227 = vrot.lane.b32.xlu0 %v5196_v25, %s7570_s28  ;;  %v5222_v63 = vpop.permute.xlu1 %5221  ;;  %v5916_v25 = vpack.c.b16 %v5908_v4, %v5908_v4 }
 0x640   :  { %v4635_v37 = vpop.permute.xlu2 %4634 }
 0x641   :  { %v5042_v55 = vpop.permute.xlu0 %5041 }
 0x642   :  { %5077 = vst.msk [vmem:[#allocation6 + $0x1c] sm:$0xf] %vm315_vm2, %v5042_v55  ;;  %v7157_v8 = vld [vmem:[#allocation6 + $0x10] sm:$0xf] }
 0x645   :  { %4274 = vrot.lane.b32.xlu1 %v5105_v11, %s7566_s23 }
 0x646   :  { %5500 = vrot.lane.b32.xlu2 %v9661_v31, %s7576_s3 }
 0x647   :  { %5409 = vrot.lane.b32.xlu0 %v5378_v61, %s7571_s0  ;;  %v4819_v6 = vpop.permute.xlu1 %4818 }
 0x648   :  { %v5224_v19 = vpop.permute.xlu2 %5223 }
 0x649   :  { %v5131_v52 = vpop.permute.xlu0 %5130 }
 0x64a   :  { %5167 = vst.msk [vmem:[#allocation6 + $0x14] sm:$0xf] %vm408_vm3, %v5131_v52  ;;  %v7514_v52 = vld [vmem:[%s10276_s7 + $0x28] sm:$0xff] }
 0x64b   :  { %5258 = vst.msk [vmem:[#allocation6 + $0x14] sm:$0xf] %vm4572_vm9, %v5222_v63 }
 0x64c   :  { %5349 = vst.msk [vmem:[#allocation6 + $0x14] sm:$0xf] %vm4665_vm11, %v5313_v50 }
 0x64d   :  { %5047 = vrot.lane.b32.xlu1 %v9661_v31, %s7567_s24 }
 0x64e   :  { %4456 = vrot.lane.b32.xlu2 %v4423_v26, %s7568_s29 }
 0x64f   :  { %4365 = vrot.lane.b32.xlu0 %v4332_v22, %s7567_s24  ;;  %v5404_v42 = vpop.permute.xlu1 %5403 }
 0x650   :  { %v5406_v0 = vpop.permute.xlu2 %5405  ;;  %5440 = vst.msk [vmem:[#allocation6 + $0x14] sm:$0xf] %vm4758_vm14, %v5404_v42 }
 0x651   :  { %v4726_v16 = vpop.permute.xlu0 %4725 }
 0x652   :  { %4762 = vst.msk [vmem:[#allocation6 + $0x18] sm:$0xf] %vm4758_vm14, %v4726_v16  ;;  %v7512_v16 = vld [vmem:[%s10276_s7 + $0x18] sm:$0xff] }
 0x653   :  { %4855 = vst.msk [vmem:[#allocation6 + $0x18] sm:$0xf] %vm4851_vm13, %v4819_v6  ;;  %v5367_v6 = vld [vmem:[#allocation3 + $0x4f] sm:$0xff] }
 0x654   :  { %v5380_v20 = vpack.c.bf16 %v5367_v6, %v5367_v6 }
 0x655   :  { %4640 = vrot.lane.b32.xlu1 %v9661_v31, %s7577_s16 }
 0x656   :  { %4824 = vrot.lane.b32.xlu2 %v4332_v22, %s7576_s3 }
 0x657   :  { %4956 = vrot.lane.b32.xlu0 %v5378_v61, %s7566_s23  ;;  %v4360_v33 = vpop.permute.xlu1 %4359 }
 0x658   :  { %v4362_v51 = vpop.permute.xlu2 %4361  ;;  %4394 = vst.msk [vmem:[#allocation6 + $0x20] sm:$0xf] %vm315_vm2, %v4360_v33 }
 0x659   :  { %v5495_v58 = vpop.permute.xlu0 %5494 }
 0x65a   :  { %5531 = vst.msk [vmem:[#allocation6 + $0x14] sm:$0xf] %vm4851_vm13, %v5495_v58  ;;  %v7484_v41 = vld [vmem:[#allocation6 + $0x14] sm:$0xf0] }
 0x65b   :  { %v7158_v38 = vor.u32 %v7484_v41, %v7157_v8 }
 0x65d   :  { %5767 = vmatmul.bf16.gmra.mxu0 %v7158_v38  ;;  %4731 = vrot.lane.b32.xlu1 %v5105_v11, %s7571_s0  ;;  %v5185_v11 = vld [vmem:[#allocation3 + $0x4d] sm:$0xff] }
 0x65e   :  { %5049 = vrot.lane.b32.xlu2 %v9686_v7, %s7567_s24  ;;  %v5198_v63 = vpack.c.bf16 %v5185_v11, %v5185_v11  ;;  %v7510_v38 = vld [vmem:[%s10276_s7 + $0x8] sm:$0xff] }
 0x65f   :  { %4547 = vrot.lane.b32.xlu0 %v5378_v61, %s7570_s28  ;;  %v4542_v31 = vpop.permute.xlu1 %4541 }
 0x660   :  { %v4953_v59 = vpop.permute.xlu2 %4952 }
 0x661   :  { %4987 = vst.msk [vmem:[#allocation6 + $0x24] sm:$0xf] %vm222_vm1, %v4953_v59  ;;  %v4451_v14 = vpop.permute.xlu0 %4450  ;;  %v7483_v56 = vld [vmem:[#allocation6 + $0x14] sm:$0xf] }
 0x662   :  { %4485 = vst.msk [vmem:[#allocation6 + $0x20] sm:$0xf] %vm408_vm3, %v4451_v14  ;;  %v7509_v14 = vld [vmem:[%s10276_s7] sm:$0xff] }
 0x663   :  { %4577 = vst.msk [vmem:[#allocation6 + $0x20] sm:$0xf] %vm4572_vm9, %v4542_v31  ;;  %v4412_v31 = vld [vmem:[#allocation3 + $0x4b] sm:$0xff] }
 0x664   :  { %4670 = vst.msk [vmem:[#allocation6 + $0x20] sm:$0xf] %vm4665_vm11, %v4635_v37  ;;  %v5948_v37 = vsel %vm5946_vm0, %v5916_v25, 0  ;;  %v4425_v59 = vpack.c.bf16 %v4412_v31, %v4412_v31 }
 0x665   :  { %4958 = vrot.lane.b32.xlu1 %v4925_v47, %s7566_s23  ;;  %5950 = vmatpush.bf16.msrb.mxu2 %v5948_v37 }
 0x666   :  { %5138 = vrot.lane.b32.xlu2 %v5106_v12, %s7568_s29 }
 0x667   :  { %5229 = vrot.lane.b32.xlu0 %v5197_v2, %s7570_s28  ;;  %v5133_v28 = vpop.permute.xlu1 %5132 }
 0x668   :  { %v4544_v18 = vpop.permute.xlu2 %4543  ;;  %5168 = vst.msk [vmem:[#allocation6 + $0x1c] sm:$0xf] %vm408_vm3, %v5133_v28 }
 0x669   :  { %v5315_v62 = vpop.permute.xlu0 %5314  ;;  %5259 = vst.msk [vmem:[#allocation6 + $0x1c] sm:$0xf] %vm4572_vm9, %v5224_v19  ;;  %v4230_v19 = vld [vmem:[#allocation3 + $0x49] sm:$0xff] }
 0x66a   :  { %5350 = vst.msk [vmem:[#allocation6 + $0x1c] sm:$0xf] %vm4665_vm11, %v5315_v62  ;;  %v4243_v32 = vpack.c.bf16 %v4230_v19, %v4230_v19  ;;  %v5186_v62 = vld [vmem:[#allocation3 + $0x55] sm:$0xff] }
 0x66b   :  { %5441 = vst.msk [vmem:[#allocation6 + $0x1c] sm:$0xf] %vm4758_vm14, %v5406_v0  ;;  %v4321_v0 = vld [vmem:[#allocation3 + $0x4a] sm:$0xff] }
 0x66c   :  { %v4334_v33 = vpack.c.bf16 %v4321_v0, %v4321_v0 }
 0x66d   :  { %5320 = vrot.lane.b32.xlu1 %v9688_v60, %s7577_s16 }
 0x66e   :  { %4733 = vrot.lane.b32.xlu2 %v5106_v12, %s7571_s0 }
 0x66f   :  { %4826 = vrot.lane.b32.xlu0 %v4793_v17, %s7576_s3  ;;  %v5497_v39 = vpop.permute.xlu1 %5496 }
 0x670   :  { %v5226_v9 = vpop.permute.xlu2 %5225  ;;  %5532 = vst.msk [vmem:[#allocation6 + $0x1c] sm:$0xf] %vm4851_vm13, %v5497_v39  ;;  %v5199_v39 = vpack.c.bf16 %v5186_v62, %v5186_v62 }
 0x671   :  { %v4271_v15 = vpop.permute.xlu0 %4270 }
 0x672   :  { %4304 = vst.msk [vmem:[#allocation6 + $0x28] sm:$0xf] %vm222_vm1, %v4271_v15 }
 0x673   :  { %4395 = vst.msk [vmem:[#allocation6 + $0x28] sm:$0xf] %vm315_vm2, %v4362_v51  ;;  %v7511_v51 = vld [vmem:[%s10276_s7 + $0x10] sm:$0xff] }
 0x675   :  { %4276 = vrot.lane.b32.xlu1 %v5106_v12, %s7566_s23 }
 0x676   :  { %5502 = vrot.lane.b32.xlu2 %v9686_v7, %s7576_s3 }
 0x677   :  { %5411 = vrot.lane.b32.xlu0 %v4925_v47, %s7571_s0  ;;  %v4453_v60 = vpop.permute.xlu1 %4452  ;;  %v7159_v34 = vld [vmem:[#allocation6 + $0x18] sm:$0xf0] }
 0x678   :  { %v9962_v50 = vpop.permute.xlu2 %4822  ;;  %4486 = vst.msk [vmem:[#allocation6 + $0x28] sm:$0xf] %vm408_vm3, %v4453_v60  ;;  %v7162_v48 = vor.u32 %v7483_v56, %v7159_v34  ;;  %v4782_v56 = vld [vmem:[#allocation3 + $0x52] sm:$0xff] }
 0x679   :  { %v5044_v57 = vpop.permute.xlu0 %5043  ;;  %4578 = vst.msk [vmem:[#allocation6 + $0x28] sm:$0xf] %vm4572_vm9, %v4544_v18  ;;  %v4795_v49 = vpack.c.bf16 %v4782_v56, %v4782_v56 }
 0x67a   :  { %5078 = vst.msk [vmem:[#allocation6 + $0x24] sm:$0xf] %vm315_vm2, %v5044_v57  ;;  %5810 = vmatmul.bf16.gmra.mxu1 %v7162_v48  ;;  %v5095_v57 = vld [vmem:[#allocation3 + $0x51] sm:$0xff]  ;;  %v10043_v48 = vld [vmem:[%s10275_s6] ss:$0 sm:$0xff] }
 0x67d   :  { %4642 = vrot.lane.b32.xlu1 %v9686_v7, %s7577_s16  ;;  %v7515_v7 = vld [vmem:[%s10276_s7 + $0x30] sm:$0xff] }
 0x67e   :  { %4458 = vrot.lane.b32.xlu2 %v4424_v3, %s7568_s29  ;;  %5951 = vmatpush.bf16.msrb.mxu2 %v7515_v7  ;;  %v5108_v3 = vpack.c.bf16 %v5095_v57, %v5095_v57 }
 0x67f   :  { %4367 = vrot.lane.b32.xlu0 %v4793_v17, %s7567_s24  ;;  %v4821_v40 = vpop.permute.xlu1 %4820 }
 0x680   :  { %v5408_v13 = vpop.permute.xlu2 %5407 }
 0x681   :  { %v4637_v27 = vpop.permute.xlu0 %4636 }
 0x682   :  { %4671 = vst.msk [vmem:[#allocation6 + $0x28] sm:$0xf] %vm4665_vm11, %v4637_v27  ;;  %5952 = vmatpush.bf16.msrb.mxu2 %v7514_v52 }
 0x685   :  { %5231 = vrot.lane.b32.xlu1 %v5198_v63, %s7570_s28 }
 0x686   :  { %5322 = vrot.lane.b32.xlu2 %v9709_v43, %s7577_s16  ;;  %v7513_v43 = vld [vmem:[%s10276_s7 + $0x20] sm:$0xff] }
 0x687   :  { %4549 = vrot.lane.b32.xlu0 %v4925_v47, %s7570_s28  ;;  %v5046_v55 = vpop.permute.xlu1 %5045  ;;  %5953 = vmatpush.bf16.msrb.mxu2 %v7513_v43 }
 0x688   :  { %v4364_v35 = vpop.permute.xlu2 %4363 }
 0x689   :  { %v4728_v61 = vpop.permute.xlu0 %4727  ;;  %v5763_v17 = vpop.f32.mrf.mxu0 }
 0x68a   :  { %4763 = vst.msk [vmem:[#allocation6 + $0x20] sm:$0xf] %vm4758_vm14, %v4728_v61 }
 0x68b   :  { %4856 = vst.msk [vmem:[#allocation6 + $0x20] sm:$0xf] %vm4851_vm13, %v4821_v40  ;;  %5954 = vmatpush.bf16.msrb.mxu2 %v7512_v16  ;;  %v5764_v40 = vadd.f32 %v10043_v48, %v5763_v17 }
 0x68d   :  { %5413 = vrot.lane.b32.xlu1 %v5380_v20, %s7571_s0 }
 0x68e   :  { %4278 = vrot.lane.b32.xlu2 %v4243_v32, %s7566_s23 }
 0x68f   :  { %5140 = vrot.lane.b32.xlu0 %v4243_v32, %s7568_s29  ;;  %v5135_v26 = vpop.permute.xlu1 %5134  ;;  %5955 = vmatpush.bf16.msrb.mxu2 %v7511_v51 }
 0x690   :  { %v4546_v22 = vpop.permute.xlu2 %4545  ;;  %5169 = vst.msk [vmem:[#allocation6 + $0x24] sm:$0xf] %vm408_vm3, %v5135_v26 }
 0x691   :  { %v4955_v42 = vpop.permute.xlu0 %4954  ;;  %5260 = vst.msk [vmem:[#allocation6 + $0x24] sm:$0xf] %vm4572_vm9, %v5226_v9  ;;  %v4927_v9 = vpack.c.bf16 %v4914_v44, %v4914_v44  ;;  %v5765_v45 = vpop.f32.mrf.mxu0 }
 0x692   :  { %4988 = vst.msk [vmem:[#allocation6 + $0x2c] sm:$0xf] %vm222_vm1, %v4955_v42  ;;  %v7165_v47 = vld [vmem:[#allocation6 + $0x20] sm:$0xf]  ;;  %v5766_v27 = vadd.f32 %v10043_v48, %v5765_v45 }
 0x693   :  { %5079 = vst.msk [vmem:[#allocation6 + $0x2c] sm:$0xf] %vm315_vm2, %v5046_v55  ;;  %5956 = vmatpush.bf16.msrb.mxu2 %v7510_v38  ;;  %v4413_v42 = vld [vmem:[#allocation3 + $0x53] sm:$0xff] }
 0x694   :  { %v4426_v16 = vpack.c.bf16 %v4413_v42, %v4413_v42 }
 0x695   :  { %4369 = vrot.lane.b32.xlu1 %v4334_v33, %s7567_s24 }
 0x696   :  { %5051 = vrot.lane.b32.xlu2 %v9713_v36, %s7567_s24 }
 0x697   :  { %5504 = vrot.lane.b32.xlu0 %v9713_v36, %s7576_s3  ;;  %v4730_v58 = vpop.permute.xlu1 %4729  ;;  %5957 = vmatpush.bf16.msrb.mxu2 %v7509_v14 }
 0x698   :  { %v5137_v8 = vpop.permute.xlu2 %5136  ;;  %4764 = vst.msk [vmem:[#allocation6 + $0x28] sm:$0xf] %vm4758_vm14, %v4730_v58  ;;  %v5096_v58 = vld [vmem:[#allocation3 + $0x59] sm:$0xff] }
 0x699   :  { %v5317_v41 = vpop.permute.xlu0 %5316  ;;  %4857 = vst.msk [vmem:[#allocation6 + $0x28] sm:$0xf] %vm4851_vm13, %v9962_v50 }
 0x69a   :  { %5170 = vst.msk [vmem:[#allocation6 + $0x2c] sm:$0xf] %vm408_vm3, %v5137_v8  ;;  %v5369_v8 = vld [vmem:[#allocation3 + $0x5f] sm:$0xff] }
 0x69b   :  { %5351 = vst.msk [vmem:[#allocation6 + $0x24] sm:$0xf] %vm4665_vm11, %v5317_v41  ;;  %v10079_v41 = vpack.c.bf16 %v5096_v58, %v5096_v58  ;;  %v5382_v38 = vpack.c.bf16 %v5369_v8, %v5369_v8 }
 0x69c   :  { %5442 = vst.msk [vmem:[#allocation6 + $0x24] sm:$0xf] %vm4758_vm14, %v5408_v13 }
 0x69d   :  { %4960 = vrot.lane.b32.xlu1 %v5380_v20, %s7566_s23 }
 0x69e   :  { %4644 = vrot.lane.b32.xlu2 %v9713_v36, %s7577_s16 }
 0x69f   :  { %4460 = vrot.lane.b32.xlu0 %v4425_v59, %s7568_s29  ;;  %v5499_v10 = vpop.permute.xlu1 %5498 }
 0x6a0   :  { %v5501_v24 = vpop.permute.xlu2 %5500  ;;  %5533 = vst.msk [vmem:[#allocation6 + $0x24] sm:$0xf] %vm4851_vm13, %v5499_v10  ;;  %v7486_v12 = vld [vmem:[#allocation6 + $0x24] sm:$0xf0]  ;;  %v5460_v10 = vld [vmem:[#allocation3 + $0x60] sm:$0xff] }
 0x6a1   :  { %v4273_v53 = vpop.permute.xlu0 %4272  ;;  %v7166_v2 = vor.u32 %v7486_v12, %v7165_v47 }
 0x6a2   :  { %4305 = vst.msk [vmem:[#allocation6 + $0x30] sm:$0xf] %vm222_vm1, %v4273_v53  ;;  %v5473_v53 = vpack.c.bf16 %v5460_v10, %v5460_v10 }
 0x6a3   :  { %4396 = vst.msk [vmem:[#allocation6 + $0x30] sm:$0xf] %vm315_vm2, %v4364_v35  ;;  %5772 = vmatmul.bf16.gmra.mxu0 %v7166_v2  ;;  %v5008_v2 = vld [vmem:[#allocation3 + $0x70] sm:$0x3] }
 0x6a5   :  { %4551 = vrot.lane.b32.xlu1 %v5380_v20, %s7570_s28 }
 0x6a6   :  { %4735 = vrot.lane.b32.xlu2 %v4243_v32, %s7571_s0 }
 0x6a7   :  { %4828 = vrot.lane.b32.xlu0 %v4334_v33, %s7576_s3  ;;  %v4455_v36 = vpop.permute.xlu1 %4454  ;;  %v7485_v19 = vld [vmem:[#allocation6 + $0x24] sm:$0xf] }
 0x6a8   :  { %v4457_v28 = vpop.permute.xlu2 %4456  ;;  %4487 = vst.msk [vmem:[#allocation6 + $0x30] sm:$0xf] %vm408_vm3, %v4455_v36 }
 0x6a9   :  { %v4639_v18 = vpop.permute.xlu0 %4638  ;;  %4579 = vst.msk [vmem:[#allocation6 + $0x30] sm:$0xf] %vm4572_vm9, %v4546_v22  ;;  %v5187_v22 = vld [vmem:[#allocation3 + $0x5d] sm:$0xff] }
 0x6aa   :  { %4672 = vst.msk [vmem:[#allocation6 + $0x30] sm:$0xf] %vm4665_vm11, %v4639_v18  ;;  %v5200_v0 = vpack.c.bf16 %v5187_v22, %v5187_v22  ;;  %v5021_v18 = vpack.c.bf16 %v5008_v2, %v5008_v2 }
 0x6ad   :  { %5233 = vrot.lane.b32.xlu1 %v5199_v39, %s7570_s28  ;;  %v5097_v39 = vld [vmem:[#allocation3 + $0x61] sm:$0xff] }
 0x6ae   :  { %4962 = vrot.lane.b32.xlu2 %v4927_v9, %s7566_s23  ;;  %v5110_v56 = vpack.c.bf16 %v5097_v39, %v5097_v39  ;;  %v4785_v39 = vld [vmem:[#allocation3 + $0x6a] sm:$0x3] }
 0x6af   :  { %5053 = vrot.lane.b32.xlu0 %v9729_v21, %s7567_s24  ;;  %v5319_v15 = vpop.permute.xlu1 %5318 }
 0x6b0   :  { %v10037_v60 = vpop.permute.xlu2 %4824 }
 0x6b1   :  { %v5228_v50 = vpop.permute.xlu0 %5227  ;;  %v5806_v34 = vpop.f32.mrf.mxu1 }
 0x6b2   :  { %5261 = vst.msk [vmem:[#allocation6 + $0x2c] sm:$0xf] %vm4572_vm9, %v5228_v50  ;;  %v5807_v11 = vadd.f32 %v5806_v34, %v5764_v40 }
 0x6b3   :  { %5352 = vst.msk [vmem:[#allocation6 + $0x2c] sm:$0xf] %vm4665_vm11, %v5319_v15 }
 0x6b5   :  { %4830 = vrot.lane.b32.xlu1 %v4795_v49, %s7576_s3 }
 0x6b6   :  { %5324 = vrot.lane.b32.xlu2 %v9733_v1, %s7577_s16  ;;  %v5840_v1 = vmax.f32 %v5807_v11, 0.0 }
 0x6b7   :  { %5142 = vrot.lane.b32.xlu0 %v5108_v3, %s7568_s29  ;;  %v4275_v13 = vpop.permute.xlu1 %4274 }
 0x6b8   :  { %v10051_v4 = vpop.permute.xlu2 %5049  ;;  %4306 = vst.msk [vmem:[#allocation6 + $0x38] sm:$0xf] %vm222_vm1, %v4275_v13 }
 0x6b9   :  { %v5410_v25 = vpop.permute.xlu0 %5409  ;;  %v5808_v63 = vpop.f32.mrf.mxu1 }
 0x6ba   :  { %5443 = vst.msk [vmem:[#allocation6 + $0x2c] sm:$0xf] %vm4758_vm14, %v5410_v25  ;;  %v5809_v37 = vadd.f32 %v5808_v63, %v5766_v27  ;;  %v4324_v27 = vld [vmem:[#allocation3 + $0x62] sm:$0x3] }
 0x6bb   :  { %5534 = vst.msk [vmem:[#allocation6 + $0x2c] sm:$0xf] %vm4851_vm13, %v5501_v24  ;;  %v4323_v24 = vld [vmem:[#allocation3 + $0x5a] sm:$0xff]  ;;  %v4337_v25 = vpack.c.bf16 %v4324_v27, %v4324_v27 }
 0x6bc   :  { %v5841_v7 = vmax.f32 %v5809_v37, 0.0  ;;  %v4336_v47 = vpack.c.bf16 %v4323_v24, %v4323_v24  ;;  %v4415_v37 = vld [vmem:[#allocation3 + $0x63] sm:$0x3] }
 0x6bd   :  { %5415 = vrot.lane.b32.xlu1 %v4927_v9, %s7571_s0 }
 0x6be   :  { %4280 = vrot.lane.b32.xlu2 %v5108_v3, %s7566_s23  ;;  %v5853_v55 = vpack.c.bf16 %v5841_v7, %v5840_v1 }
 0x6bf   :  { %4737 = vrot.lane.b32.xlu0 %v5108_v3, %s7571_s0  ;;  %v5048_v35 = vpop.permute.xlu1 %5047 }
 0x6c0   :  { %v5139_v61 = vpop.permute.xlu2 %5138  ;;  %7287 = vmatmul.msk.bf16.vlgmr.msrb.gmra.mxu2 %vm5924_vm5, %v5853_v55 }
 0x6c1   :  { %v4366_v6 = vpop.permute.xlu0 %4365 }
 0x6c2   :  { %4397 = vst.msk [vmem:[#allocation6 + $0x38] sm:$0xf] %vm315_vm2, %v4366_v6  ;;  %v7167_v52 = vld [vmem:[#allocation6 + $0x28] sm:$0xf0] }
 0x6c3   :  { %4488 = vst.msk [vmem:[#allocation6 + $0x38] sm:$0xf] %vm408_vm3, %v4457_v28  ;;  %v7170_v20 = vor.u32 %v7485_v19, %v7167_v52  ;;  %v4414_v28 = vld [vmem:[#allocation3 + $0x5b] sm:$0xff] }
 0x6c4   :  { %v4427_v62 = vpack.c.bf16 %v4414_v28, %v4414_v28 }
 0x6c5   :  { %5815 = vmatmul.bf16.gmra.mxu1 %v7170_v20  ;;  %4371 = vrot.lane.b32.xlu1 %v4795_v49, %s7567_s24  ;;  %v4428_v20 = vpack.c.bf16 %v4415_v37, %v4415_v37 }
 0x6c6   :  { %4646 = vrot.lane.b32.xlu2 %v9729_v21, %s7577_s16 }
 0x6c7   :  { %5506 = vrot.lane.b32.xlu0 %v9729_v21, %s7576_s3  ;;  %v4641_v32 = vpop.permute.xlu1 %4640 }
 0x6c8   :  { %v4734_v43 = vpop.permute.xlu2 %4733 }
 0x6c9   :  { %v4957_v26 = vpop.permute.xlu0 %4956 }
 0x6ca   :  { %4989 = vst.msk [vmem:[#allocation6 + $0x34] sm:$0xf] %vm222_vm1, %v4957_v26 }
 0x6cb   :  { %5080 = vst.msk [vmem:[#allocation6 + $0x34] sm:$0xf] %vm315_vm2, %v5048_v35 }
 0x6cc   :  { %5171 = vst.msk [vmem:[#allocation6 + $0x34] sm:$0xf] %vm408_vm3, %v5139_v61  ;;  %v4506_v61 = vld [vmem:[#allocation3 + $0x67] sm:$0x3] }
 0x6cd   :  { %4553 = vrot.lane.b32.xlu1 %v4927_v9, %s7570_s28 }
 0x6ce   :  { %5235 = vrot.lane.b32.xlu2 %v5200_v0, %s7570_s28 }
 0x6cf   :  { %4462 = vrot.lane.b32.xlu0 %v4426_v16, %s7568_s29  ;;  %v4732_v21 = vpop.permute.xlu1 %4731  ;;  %v5190_v16 = vld [vmem:[#allocation3 + $0x75] sm:$0x3] }
 0x6d0   :  { %v5503_v33 = vpop.permute.xlu2 %5502  ;;  %4765 = vst.msk [vmem:[#allocation6 + $0x30] sm:$0xf] %vm4758_vm14, %v4732_v21  ;;  %v5203_v8 = vpack.c.bf16 %v5190_v16, %v5190_v16 }
 0x6d1   :  { %v4548_v51 = vpop.permute.xlu0 %4547  ;;  %4858 = vst.msk [vmem:[#allocation6 + $0x30] sm:$0xf] %vm4851_vm13, %v10037_v60 }
 0x6d2   :  { %4580 = vst.msk [vmem:[#allocation6 + $0x38] sm:$0xf] %vm4572_vm9, %v4548_v51  ;;  %v5281_v51 = vld [vmem:[#allocation3 + $0x76] sm:$0x3] }
 0x6d3   :  { %4673 = vst.msk [vmem:[#allocation6 + $0x38] sm:$0xf] %vm4665_vm11, %v4641_v32  ;;  %v5099_v32 = vld [vmem:[#allocation3 + $0x71] sm:$0x3] }
 0x6d4   :  { %4766 = vst.msk [vmem:[#allocation6 + $0x38] sm:$0xf] %vm4758_vm14, %v4734_v43  ;;  %v4519_v43 = vpack.c.bf16 %v4506_v61, %v4506_v61  ;;  %v5112_v26 = vpack.c.bf16 %v5099_v32, %v5099_v32 }
 0x6d5   :  { %5144 = vrot.lane.b32.xlu1 %v10079_v41, %s7568_s29 }
 0x6d6   :  { %5417 = vrot.lane.b32.xlu2 %v5382_v38, %s7571_s0 }
 0x6d7   :  { %5326 = vrot.lane.b32.xlu0 %v9743_v54, %s7577_s16  ;;  %v4959_v31 = vpop.permute.xlu1 %4958 }
 0x6d8   :  { %v4459_v59 = vpop.permute.xlu2 %4458  ;;  %4990 = vst.msk [vmem:[#allocation6 + $0x3c] sm:$0xf] %vm222_vm1, %v4959_v31  ;;  %v7173_v15 = vld [vmem:[#allocation6 + $0x30] sm:$0xf] }
 0x6d9   :  { %v5230_v14 = vpop.permute.xlu0 %5229  ;;  %5081 = vst.msk [vmem:[#allocation6 + $0x3c] sm:$0xf] %vm315_vm2, %v10051_v4 }
 0x6da   :  { %5262 = vst.msk [vmem:[#allocation6 + $0x34] sm:$0xf] %vm4572_vm9, %v5230_v14  ;;  %v5768_v3 = vpop.f32.mrf.mxu0 }
 0x6db   :  { %v5769_v63 = vadd.f32 %v10043_v48, %v5768_v3 }
 0x6dd   :  { %5508 = vrot.lane.b32.xlu1 %v5473_v53, %s7576_s3 }
 0x6de   :  { %4373 = vrot.lane.b32.xlu2 %v4336_v47, %s7567_s24 }
 0x6df   :  { %4282 = vrot.lane.b32.xlu0 %v10079_v41, %s7566_s23  ;;  %v5321_v54 = vpop.permute.xlu1 %5320 }
 0x6e0   :  { %v10095_v12 = vpop.permute.xlu2 %5322  ;;  %5353 = vst.msk [vmem:[#allocation6 + $0x34] sm:$0xf] %vm4665_vm11, %v5321_v54 }
 0x6e1   :  { %v4827_v36 = vpop.permute.xlu0 %4826 }
 0x6e2   :  { %4859 = vst.msk [vmem:[#allocation6 + $0x38] sm:$0xf] %vm4851_vm13, %v4827_v36  ;;  %v5770_v11 = vpop.f32.mrf.mxu0  ;;  %v5372_v36 = vld [vmem:[#allocation3 + $0x77] sm:$0x3] }
 0x6e3   :  { %v5771_v1 = vadd.f32 %v10043_v48, %v5770_v11  ;;  %v5385_v28 = vpack.c.bf16 %v5372_v36, %v5372_v36  ;;  %v7518_v11 = vld [vmem:[%s10278_s9 + $0x10] sm:$0xff] }
 0x6e5   :  { %4464 = vrot.lane.b32.xlu1 %v4427_v62, %s7568_s29  ;;  %v5463_v62 = vld [vmem:[#allocation3 + $0x78] sm:$0x3] }
 0x6e6   :  { %4964 = vrot.lane.b32.xlu2 %v5382_v38, %s7566_s23 }
 0x6e7   :  { %5059 = vrot.lane.b32.xlu0 %v5021_v18, %s7567_s24  ;;  %v4277_v44 = vpop.permute.xlu1 %4276 }
 0x6e8   :  { %v4279_v17 = vpop.permute.xlu2 %4278  ;;  %4307 = vst.msk [vmem:[#allocation6 + $0x40] sm:$0xf] %vm222_vm1, %v4277_v44 }
 0x6e9   :  { %v5412_v9 = vpop.permute.xlu0 %5411  ;;  %v7488_v60 = vld [vmem:[#allocation6 + $0x34] sm:$0xf0]  ;;  %4308 = vst.msk [vmem:[#allocation6 + $0x48] sm:$0xf] %vm222_vm1, %v4279_v17 }
 0x6ea   :  { %v7174_v50 = vor.u32 %v7488_v60, %v7173_v15  ;;  %5444 = vst.msk [vmem:[#allocation6 + $0x34] sm:$0xf] %vm4758_vm14, %v5412_v9  ;;  %v5476_v15 = vpack.c.bf16 %v5463_v62, %v5463_v62  ;;  %v6023_v60 = vld [vmem:[%s10278_s9 + $0x28] sm:$0x3] }
 0x6eb   :  { %5535 = vst.msk [vmem:[#allocation6 + $0x34] sm:$0xf] %vm4851_vm13, %v5503_v33 }
 0x6ec   :  { %5777 = vmatmul.bf16.gmra.mxu0 %v7174_v50  ;;  %v4798_v50 = vpack.c.bf16 %v4785_v39, %v4785_v39 }
 0x6ed   :  { %5146 = vrot.lane.b32.xlu1 %v5110_v56, %s7568_s29 }
 0x6ee   :  { %4555 = vrot.lane.b32.xlu2 %v5382_v38, %s7570_s28  ;;  %v4599_v38 = vld [vmem:[#allocation3 + $0x68] sm:$0x3] }
 0x6ef   :  { %5055 = vrot.lane.b32.xlu0 %v5473_v53, %s7567_s24  ;;  %v4643_v34 = vpop.permute.xlu1 %4642  ;;  %v4612_v31 = vpack.c.bf16 %v4599_v38, %v4599_v38 }
 0x6f0   :  { %v10109_v57 = vpop.permute.xlu2 %5051 }
 0x6f1   :  { %v4368_v49 = vpop.permute.xlu0 %4367 }
 0x6f2   :  { %4398 = vst.msk [vmem:[#allocation6 + $0x40] sm:$0xf] %vm315_vm2, %v4368_v49 }
 0x6f3   :  { %4489 = vst.msk [vmem:[#allocation6 + $0x40] sm:$0xf] %vm408_vm3, %v4459_v59  ;;  %v4692_v59 = vld [vmem:[#allocation3 + $0x69] sm:$0x3] }
 0x6f5   :  { %4741 = vrot.lane.b32.xlu1 %v5110_v56, %s7571_s0  ;;  %v6049_v56 = vunpack.c.l.b16 %v6023_v60 }
 0x6f6   :  { %4375 = vrot.lane.b32.xlu2 %v4337_v25, %s7567_s24 }
 0x6f7   :  { %4648 = vrot.lane.b32.xlu0 %v5473_v53, %s7577_s16  ;;  %v5232_v45 = vpop.permute.xlu1 %5231  ;;  %v5811_v13 = vpop.f32.mrf.mxu1  ;;  %v4233_v53 = vld [vmem:[#allocation3 + $0x61] sm:$0x3] }
 0x6f8   :  { %v10115_v40 = vpop.permute.xlu2 %4644  ;;  %v5812_v7 = vadd.f32 %v5811_v13, %v5769_v63  ;;  %v4246_v18 = vpack.c.bf16 %v4233_v53, %v4233_v53  ;;  %v7519_v13 = vld [vmem:[%s10278_s9 + $0x18] sm:$0xff]  ;;  %v7517_v63 = vld [vmem:[%s10278_s9 + $0x8] sm:$0xff] }
 0x6f9   :  { %v4550_v4 = vpop.permute.xlu0 %4549 }
 0x6fa   :  { %4581 = vst.msk [vmem:[#allocation6 + $0x40] sm:$0xf] %vm4572_vm9, %v4550_v4  ;;  %v5842_v22 = vmax.f32 %v5812_v7, 0.0 }
 0x6fb   :  { %4674 = vst.msk [vmem:[#allocation6 + $0x40] sm:$0xf] %vm4665_vm11, %v4643_v34  ;;  %v6055_v34 = vpack.c.b16 %v6049_v56, %v6049_v56 }
 0x6fd   :  { %4832 = vrot.lane.b32.xlu1 %v4336_v47, %s7576_s3  ;;  %v7487_v47 = vld [vmem:[#allocation6 + $0x34] sm:$0xf] }
 0x6fe   :  { %5150 = vrot.lane.b32.xlu2 %v5112_v26, %s7568_s29 }
 0x6ff   :  { %4739 = vrot.lane.b32.xlu0 %v10079_v41, %s7571_s0  ;;  %v5414_v55 = vpop.permute.xlu1 %5413  ;;  %v5813_v6 = vpop.f32.mrf.mxu1  ;;  %v5294_v41 = vpack.c.bf16 %v5281_v51, %v5281_v51 }
 0x700   :  { %v4736_v35 = vpop.permute.xlu2 %4735  ;;  %v5814_v52 = vadd.f32 %v5813_v6, %v5771_v1 }
 0x701   :  { %4767 = vst.msk [vmem:[#allocation6 + $0x40] sm:$0xf] %vm4758_vm14, %v4736_v35  ;;  %v5141_v19 = vpop.permute.xlu0 %5140 }
 0x702   :  { %5172 = vst.msk [vmem:[#allocation6 + $0x3c] sm:$0xf] %vm408_vm3, %v5141_v19  ;;  %v5843_v42 = vmax.f32 %v5814_v52, 0.0 }
 0x703   :  { %5263 = vst.msk [vmem:[#allocation6 + $0x3c] sm:$0xf] %vm4572_vm9, %v5232_v45  ;;  %v7520_v45 = vld [vmem:[%s10278_s9 + $0x20] sm:$0xff] }
 0x704   :  { %5354 = vst.msk [vmem:[#allocation6 + $0x3c] sm:$0xf] %vm4665_vm11, %v10095_v12  ;;  %v5854_v0 = vpack.c.bf16 %v5843_v42, %v5842_v22  ;;  %v4705_v12 = vpack.c.bf16 %v4692_v59, %v4692_v59 }
 0x705   :  { %5445 = vst.msk [vmem:[#allocation6 + $0x3c] sm:$0xf] %vm4758_vm14, %v5414_v55  ;;  %4466 = vrot.lane.b32.xlu1 %v4428_v20, %s7568_s29  ;;  %v7516_v55 = vld [vmem:[%s10278_s9] sm:$0xff] }
 0x706   :  { %7288 = vmatmul.msk.bf16.gmra.mxu2 %vm5924_vm5, %v5854_v0  ;;  %4650 = vrot.lane.b32.xlu2 %v4612_v31, %s7577_s16 }
 0x707   :  { %4557 = vrot.lane.b32.xlu0 %v4519_v43, %s7570_s28  ;;  %v4370_v21 = vpop.permute.xlu1 %4369 }
 0x708   :  { %v4963_v33 = vpop.permute.xlu2 %4962  ;;  %4399 = vst.msk [vmem:[#allocation6 + $0x48] sm:$0xf] %vm315_vm2, %v4370_v21 }
 0x709   :  { %v5505_v58 = vpop.permute.xlu0 %5504  ;;  %4992 = vst.msk [vmem:[#allocation6 + $0x4c] sm:$0xf] %vm222_vm1, %v4963_v33  ;;  %v10190_v33 = vld [vmem:[%s10277_s8] ss:$0 sm:$0xff] }
 0x70a   :  { %5536 = vst.msk [vmem:[#allocation6 + $0x3c] sm:$0xf] %vm4851_vm13, %v5505_v58 }
 0x70d   :  { %5241 = vrot.lane.b32.xlu1 %v5203_v8, %s7570_s28 }
 0x70e   :  { %5423 = vrot.lane.b32.xlu2 %v5385_v28, %s7571_s0 }
 0x70f   :  { %5332 = vrot.lane.b32.xlu0 %v5294_v41, %s7577_s16  ;;  %v4961_v14 = vpop.permute.xlu1 %4960 }
 0x710   :  { %v5325_v10 = vpop.permute.xlu2 %5324  ;;  %4991 = vst.msk [vmem:[#allocation6 + $0x44] sm:$0xf] %vm222_vm1, %v4961_v14 }
 0x711   :  { %v4461_v24 = vpop.permute.xlu0 %4460  ;;  %5082 = vst.msk [vmem:[#allocation6 + $0x44] sm:$0xf] %vm315_vm2, %v10109_v57  ;;  %v7175_v54 = vld [vmem:[#allocation6 + $0x38] sm:$0xf0]  ;;  %v6085_v57 = vsel %vm6083_vm10, %v6055_v34, 0 }
 0x712   :  { %4490 = vst.msk [vmem:[#allocation6 + $0x48] sm:$0xf] %vm408_vm3, %v4461_v24  ;;  %v7178_v2 = vor.u32 %v7487_v47, %v7175_v54  ;;  %6089 = vmatpush.bf16.msrb.mxu3 %v6085_v57 }
 0x714   :  { %5820 = vmatmul.bf16.gmra.mxu1 %v7178_v2 }
 0x715   :  { %4743 = vrot.lane.b32.xlu1 %v4705_v12, %s7571_s0 }
 0x716   :  { %6090 = vmatpush.bf16.msrb.mxu3 %v7520_v45 }
 0x717   :  { %4284 = vrot.lane.b32.xlu0 %v4246_v18, %s7566_s23  ;;  %v4552_v44 = vpop.permute.xlu1 %4551 }
 0x718   :  { %v4281_v17 = vpop.permute.xlu2 %4280  ;;  %4582 = vst.msk [vmem:[#allocation6 + $0x48] sm:$0xf] %vm4572_vm9, %v4552_v44 }
 0x719   :  { %v4829_v9 = vpop.permute.xlu0 %4828  ;;  %4675 = vst.msk [vmem:[#allocation6 + $0x48] sm:$0xf] %vm4665_vm11, %v10115_v40 }
 0x71a   :  { %4309 = vst.msk [vmem:[#allocation6 + $0x50] sm:$0xf] %vm222_vm1, %v4281_v17  ;;  %6091 = vmatpush.bf16.msrb.mxu3 %v7519_v13 }
 0x71b   :  { %4860 = vst.msk [vmem:[#allocation6 + $0x40] sm:$0xf] %vm4851_vm13, %v4829_v9 }
 0x71d   :  { %5514 = vrot.lane.b32.xlu1 %v5476_v15, %s7576_s3 }
 0x71e   :  { %6092 = vmatpush.bf16.msrb.mxu3 %v7518_v11 }
 0x71f   :  { %4836 = vrot.lane.b32.xlu0 %v4798_v50, %s7576_s3  ;;  %v5234_v49 = vpop.permute.xlu1 %5233 }
 0x720   :  { %v4647_v3 = vpop.permute.xlu2 %4646  ;;  %v5773_v32 = vpop.f32.mrf.mxu0 }
 0x721   :  { %v5054_v40 = vpop.permute.xlu0 %5053  ;;  %v5774_v21 = vadd.f32 %v10043_v48, %v5773_v32 }
 0x722   :  { %5083 = vst.msk [vmem:[#allocation6 + $0x4c] sm:$0xf] %vm315_vm2, %v5054_v40  ;;  %6093 = vmatpush.bf16.msrb.mxu3 %v7517_v63  ;;  %v7181_v19 = vld [vmem:[#allocation6 + $0x40] sm:$0xf] }
 0x726   :  { %6094 = vmatpush.bf16.msrb.mxu3 %v7516_v55 }
 0x727   :  { %v4831_v4 = vpop.permute.xlu1 %4830 }
 0x728   :  { %v5236_v27 = vpop.permute.xlu2 %5235  ;;  %v5775_v16 = vpop.f32.mrf.mxu0 }
 0x729   :  { %v5143_v25 = vpop.permute.xlu0 %5142  ;;  %v5776_v58 = vadd.f32 %v10043_v48, %v5775_v16 }
 0x72a   :  { %5173 = vst.msk [vmem:[#allocation6 + $0x44] sm:$0xf] %vm408_vm3, %v5143_v25 }
 0x72b   :  { %5264 = vst.msk [vmem:[#allocation6 + $0x44] sm:$0xf] %vm4572_vm9, %v5234_v49 }
 0x72c   :  { %5355 = vst.msk [vmem:[#allocation6 + $0x44] sm:$0xf] %vm4665_vm11, %v5325_v10 }
 0x72f   :  { %v5416_v37 = vpop.permute.xlu1 %5415 }
 0x730   :  { %v5418_v1 = vpop.permute.xlu2 %5417  ;;  %5446 = vst.msk [vmem:[#allocation6 + $0x44] sm:$0xf] %vm4758_vm14, %v5416_v37 }
 0x731   :  { %v4738_v7 = vpop.permute.xlu0 %4737 }
 0x732   :  { %4768 = vst.msk [vmem:[#allocation6 + $0x48] sm:$0xf] %vm4758_vm14, %v4738_v7 }
 0x733   :  { %4861 = vst.msk [vmem:[#allocation6 + $0x48] sm:$0xf] %vm4851_vm13, %v4831_v4 }
 0x737   :  { %v4372_v35 = vpop.permute.xlu1 %4371 }
 0x738   :  { %v4374_v61 = vpop.permute.xlu2 %4373  ;;  %4400 = vst.msk [vmem:[#allocation6 + $0x50] sm:$0xf] %vm315_vm2, %v4372_v35 }
 0x739   :  { %v5507_v6 = vpop.permute.xlu0 %5506 }
 0x73a   :  { %5537 = vst.msk [vmem:[#allocation6 + $0x44] sm:$0xf] %vm4851_vm13, %v5507_v6  ;;  %v7490_v52 = vld [vmem:[#allocation6 + $0x44] sm:$0xf0] }
 0x73b   :  { %v7182_v20 = vor.u32 %v7490_v52, %v7181_v19 }
 0x73d   :  { %5782 = vmatmul.bf16.gmra.mxu0 %v7182_v20 }
 0x73f   :  { %v4554_v43 = vpop.permute.xlu1 %4553 }
 0x740   :  { %v4965_v26 = vpop.permute.xlu2 %4964 }
 0x741   :  { %4993 = vst.msk [vmem:[#allocation6 + $0x54] sm:$0xf] %vm222_vm1, %v4965_v26  ;;  %v4463_v22 = vpop.permute.xlu0 %4462  ;;  %v7489_v44 = vld [vmem:[#allocation6 + $0x44] sm:$0xf] }
 0x742   :  { %4491 = vst.msk [vmem:[#allocation6 + $0x50] sm:$0xf] %vm408_vm3, %v4463_v22  ;;  %v5816_v42 = vpop.f32.mrf.mxu1 }
 0x743   :  { %4583 = vst.msk [vmem:[#allocation6 + $0x50] sm:$0xf] %vm4572_vm9, %v4554_v43  ;;  %v5959_v0 = vpop.f32.mrf.mxu2  ;;  %v5817_v8 = vadd.f32 %v5816_v42, %v5774_v21 }
 0x744   :  { %4676 = vst.msk [vmem:[#allocation6 + $0x50] sm:$0xf] %vm4665_vm11, %v4647_v3  ;;  %v5960_v31 = vadd.f32 %v10190_v33, %v5959_v0 }
 0x745   :  { %v5844_v10 = vmax.f32 %v5817_v8, 0.0 }
 0x746   :  { %v5993_v47 = vmax.f32 %v5960_v31, 0.0 }
 0x747   :  { %v5145_v51 = vpop.permute.xlu1 %5144 }
 0x748   :  { %5174 = vst.msk [vmem:[#allocation6 + $0x4c] sm:$0xf] %vm408_vm3, %v5145_v51  ;;  %v4556_v18 = vpop.permute.xlu2 %4555 }
 0x749   :  { %v5327_v41 = vpop.permute.xlu0 %5326  ;;  %5265 = vst.msk [vmem:[#allocation6 + $0x4c] sm:$0xf] %vm4572_vm9, %v5236_v27 }
 0x74a   :  { %v5818_v38 = vpop.f32.mrf.mxu1  ;;  %5356 = vst.msk [vmem:[#allocation6 + $0x4c] sm:$0xf] %vm4665_vm11, %v5327_v41 }
 0x74b   :  { %v5819_v59 = vadd.f32 %v5818_v38, %v5776_v58  ;;  %5447 = vst.msk [vmem:[#allocation6 + $0x4c] sm:$0xf] %vm4758_vm14, %v5418_v1  ;;  %v5961_v14 = vpop.f32.mrf.mxu2 }
 0x74c   :  { %v5962_v53 = vadd.f32 %v10190_v33, %v5961_v14 }
 0x74d   :  { %v5845_v24 = vmax.f32 %v5819_v59, 0.0 }
 0x74e   :  { %v5994_v12 = vmax.f32 %v5962_v53, 0.0 }
 0x74f   :  { %v5855_v54 = vpack.c.bf16 %v5845_v24, %v5844_v10  ;;  %v5509_v2 = vpop.permute.xlu1 %5508  ;;  %v10240_v24 = vld [vmem:[%s10279_s10] ss:$0 sm:$0xff] }
 0x750   :  { %v6006_v36 = vpack.c.bf16 %v5994_v12, %v5993_v47  ;;  %5538 = vst.msk [vmem:[#allocation6 + $0x4c] sm:$0xf] %vm4851_vm13, %v5509_v2  ;;  %v4376_v15 = vpop.permute.xlu2 %4375 }
 0x751   :  { %v4283_v28 = vpop.permute.xlu0 %4282  ;;  %7289 = vmatmul.msk.bf16.gmra.mxu2 %vm5924_vm5, %v5855_v54 }
 0x752   :  { %4310 = vst.msk [vmem:[#allocation6 + $0x58] sm:$0xf] %vm222_vm1, %v4283_v28  ;;  %7314 = vmatmul.msk.bf16.vlgmr.msrb.gmra.mxu3 %vm6061_vm4, %v6006_v36  ;;  %vm4585_vm1 = vcmask 647680  }
 0x753   :  { %4401 = vst.msk [vmem:[#allocation6 + $0x58] sm:$0xf] %vm315_vm2, %v4374_v61 }
 0x757   :  { %v4465_v62 = vpop.permute.xlu1 %4464  ;;  %v7183_v17 = vld [vmem:[#allocation6 + $0x48] sm:$0xf0] }
 0x758   :  { %4492 = vst.msk [vmem:[#allocation6 + $0x58] sm:$0xf] %vm408_vm3, %v4465_v62  ;;  %v7186_v9 = vor.u32 %v7489_v44, %v7183_v17  ;;  %v5151_v56 = vpop.permute.xlu2 %5150 }
 0x759   :  { %v5060_v39 = vpop.permute.xlu0 %5059  ;;  %4584 = vst.msk [vmem:[#allocation6 + $0x58] sm:$0xf] %vm4572_vm9, %v4556_v18 }
 0x75a   :  { %5086 = vst.msk [vmem:[#allocation6 + $0x64] sm:$0x1] %vm328_vm7, %v5060_v39  ;;  %5825 = vmatmul.bf16.gmra.mxu1 %v7186_v9 }
 0x75b   :  { %5177 = vst.msk [vmem:[#allocation6 + $0x64] sm:$0x1] %vm421_vm8, %v5151_v56 }
 0x75f   :  { %v5147_v60 = vpop.permute.xlu1 %5146 }
 0x761   :  { %v5056_v50 = vpop.permute.xlu0 %5055 }
 0x762   :  { %5084 = vst.msk [vmem:[#allocation6 + $0x54] sm:$0xf] %vm315_vm2, %v5056_v50  ;;  %vm4678_vm2 = vcmask 778880  }
 0x763   :  { %5175 = vst.msk [vmem:[#allocation6 + $0x54] sm:$0xf] %vm408_vm3, %v5147_v60  ;;  %vm4771_vm3 = vcmask 910080  }
 0x764   :  { %5266 = vst.msk [vmem:[#allocation6 + $0x54] sm:$0xf] %vm4572_vm9, %v9653_v46 }
 0x765   :  { %5357 = vst.msk [vmem:[#allocation6 + $0x54] sm:$0xf] %vm4665_vm11, %v9711_v23  ;;  %v7191_v23 = vld [vmem:[#allocation6 + $0x58] sm:$0xf0] }
 0x766   :  { %5448 = vst.msk [vmem:[#allocation6 + $0x54] sm:$0xf] %vm4758_vm14, %v9707_v30 }
 0x767   :  { %5539 = vst.msk [vmem:[#allocation6 + $0x54] sm:$0xf] %vm4851_vm13, %v9718_v5  ;;  %v4742_v34 = vpop.permute.xlu1 %4741  ;;  %v4651_v5 = vpop.permute.xlu2 %4650 }
 0x769   :  { %v4649_v57 = vpop.permute.xlu0 %4648  ;;  %v5778_v7 = vpop.f32.mrf.mxu0 }
 0x76a   :  { %4677 = vst.msk [vmem:[#allocation6 + $0x58] sm:$0xf] %vm4665_vm11, %v4649_v57  ;;  %v5779_v26 = vadd.f32 %v10043_v48, %v5778_v7 }
 0x76b   :  { %4770 = vst.msk [vmem:[#allocation6 + $0x58] sm:$0xf] %vm4758_vm14, %v4742_v34 }
 0x76c   :  { %4863 = vst.msk [vmem:[#allocation6 + $0x58] sm:$0xf] %vm4851_vm13, %v9681_v29 }
 0x76e   :  { %v7491_v46 = vld [vmem:[#allocation6 + $0x54] sm:$0xf] }
 0x76f   :  { %v7194_v49 = vor.u32 %v7491_v46, %v7191_v23  ;;  %v4833_v3 = vpop.permute.xlu1 %4832  ;;  %v5424_v11 = vpop.permute.xlu2 %5423 }
 0x771   :  { %5830 = vmatmul.bf16.gmra.mxu1 %v7194_v49  ;;  %v4740_v30 = vpop.permute.xlu0 %4739  ;;  %v5780_v20 = vpop.f32.mrf.mxu0 }
 0x772   :  { %4769 = vst.msk [vmem:[#allocation6 + $0x50] sm:$0xf] %vm4758_vm14, %v4740_v30  ;;  %v5781_v42 = vadd.f32 %v10043_v48, %v5780_v20 }
 0x773   :  { %4862 = vst.msk [vmem:[#allocation6 + $0x50] sm:$0xf] %vm4851_vm13, %v4833_v3  ;;  %v7492_v4 = vld [vmem:[#allocation6 + $0x54] sm:$0xf0] }
 0x777   :  { %v4467_v45 = vpop.permute.xlu1 %4466 }
 0x779   :  { %v4558_v40 = vpop.permute.xlu0 %4557 }
 0x77a   :  { %v7189_v13 = vld [vmem:[#allocation6 + $0x50] sm:$0xf] }
 0x77b   :  { %v7190_v27 = vor.u32 %v7492_v4, %v7189_v13 }
 0x77d   :  { %5787 = vmatmul.bf16.gmra.mxu0 %v7190_v27 }
 0x77f   :  { %v5242_v29 = vpop.permute.xlu1 %5241 }
 0x780   :  { %5268 = vst.msk [vmem:[#allocation6 + $0x64] sm:$0x1] %vm4585_vm1, %v5242_v29 }
 0x781   :  { %v5333_v25 = vpop.permute.xlu0 %5332 }
 0x782   :  { %5359 = vst.msk [vmem:[#allocation6 + $0x64] sm:$0x1] %vm4678_vm2, %v5333_v25 }
 0x783   :  { %5450 = vst.msk [vmem:[#allocation6 + $0x64] sm:$0x1] %vm4771_vm3, %v5424_v11 }
 0x787   :  { %v4744_v63 = vpop.permute.xlu1 %4743 }
 0x789   :  { %v4285_v37 = vpop.permute.xlu0 %4284  ;;  %v5964_v1 = vpop.f32.mrf.mxu2 }
 0x78a   :  { %4311 = vst.msk [vmem:[#allocation6 + $0x60] sm:$0x1] %vm235_vm6, %v4285_v37  ;;  %v5965_v61 = vadd.f32 %v10190_v33, %v5964_v1  ;;  %vm6119_vm6 = vcmask 73728  }
 0x78b   :  { %4402 = vst.msk [vmem:[#allocation6 + $0x60] sm:$0x1] %vm328_vm7, %v4376_v15  ;;  %vm6121_vm7 = vcmask 74753  }
 0x78c   :  { %4493 = vst.msk [vmem:[#allocation6 + $0x60] sm:$0x1] %vm421_vm8, %v4467_v45  ;;  %v5995_v32 = vmax.f32 %v5965_v61, 0.0 }
 0x78d   :  { %4586 = vst.msk [vmem:[#allocation6 + $0x60] sm:$0x1] %vm4585_vm1, %v4558_v40 }
 0x78e   :  { %4679 = vst.msk [vmem:[#allocation6 + $0x60] sm:$0x1] %vm4678_vm2, %v4651_v5 }
 0x78f   :  { %4772 = vst.msk [vmem:[#allocation6 + $0x60] sm:$0x1] %vm4771_vm3, %v4744_v63  ;;  %v5515_v55 = vpop.permute.xlu1 %5514 }
 0x790   :  { %5541 = vst.msk [vmem:[#allocation6 + $0x64] sm:$0x1] %vm4864_vm12, %v5515_v55 }
 0x791   :  { %v4837_v35 = vpop.permute.xlu0 %4836  ;;  %v5821_v6 = vpop.f32.mrf.mxu1 }
 0x792   :  { %4865 = vst.msk [vmem:[#allocation6 + $0x60] sm:$0x1] %vm4864_vm12, %v4837_v35  ;;  %v5966_v19 = vpop.f32.mrf.mxu2  ;;  %v5822_v0 = vadd.f32 %v5821_v6, %v5779_v26 }
 0x793   :  { %v5967_v52 = vadd.f32 %v10190_v33, %v5966_v19 }
 0x794   :  { %v5846_v31 = vmax.f32 %v5822_v0, 0.0 }
 0x795   :  { %v5996_v43 = vmax.f32 %v5967_v52, 0.0 }
 0x797   :  { %v6007_v22 = vpack.c.bf16 %v5996_v43, %v5995_v32 }
 0x799   :  { %v5554_v16 = vld [vmem:[#allocation6 + $0x60] sm:$0x11]  ;;  %v5823_v21 = vpop.f32.mrf.mxu1  ;;  %7315 = vmatmul.msk.bf16.gmra.mxu3 %vm6061_vm4, %v6007_v22 }
 0x79a   :  { %v5628_v51 = vunpack.c.l.b16 %v5554_v16  ;;  %v5629_v58 = vunpack.c.h.b16 %v5554_v16  ;;  %v5824_v8 = vadd.f32 %v5823_v21, %v5781_v42 }
 0x79c   :  { %v5642_v41 = vpack.c.b16 %v5628_v51, %v5628_v51  ;;  %v5643_v38 = vpack.c.b16 %v5629_v58, %v5629_v58  ;;  %v5847_v59 = vmax.f32 %v5824_v8, 0.0 }
 0x79e   :  { %5792 = vmatmul.bf16.gmra.mxu0 %v5642_v41  ;;  %5835 = vmatmul.bf16.gmra.mxu1 %v5643_v38  ;;  %v5856_v14 = vpack.c.bf16 %v5847_v59, %v5846_v31 }
 0x7a0   :  { %7290 = vmatmul.msk.bf16.gmra.mxu2 %vm5924_vm5, %v5856_v14 }
 0x7ba   :  { %v5783_v10 = vpop.f32.mrf.mxu0 }
 0x7bb   :  { %v5784_v18 = vadd.f32 %v10043_v48, %v5783_v10 }
 0x7c2   :  { %v5785_v36 = vpop.f32.mrf.mxu0 }
 0x7c3   :  { %v5786_v17 = vadd.f32 %v10043_v48, %v5785_v36 }
 0x7d4   :  { %v5969_v53 = vpop.f32.mrf.mxu2 }
 0x7d5   :  { %v6096_v47 = vpop.f32.mrf.mxu3  ;;  %v5970_v2 = vadd.f32 %v10190_v33, %v5969_v53 }
 0x7d6   :  { %v6097_v54 = vadd.f32 %v10240_v24, %v6096_v47 }
 0x7d7   :  { %v5826_v12 = vpop.f32.mrf.mxu1  ;;  %v5997_v39 = vmax.f32 %v5970_v2, 0.0 }
 0x7d8   :  { %6120 = vst.msk [vmem:[#allocation7] sm:$0x1] %vm6119_vm6, %v6097_v54  ;;  %v5827_v9 = vadd.f32 %v5826_v12, %v5784_v18 }
 0x7da   :  { %v5848_v34 = vmax.f32 %v5827_v9, 0.0 }
 0x7dc   :  { %v5971_v28 = vpop.f32.mrf.mxu2 }
 0x7dd   :  { %v5972_v62 = vadd.f32 %v10190_v33, %v5971_v28  ;;  %v6098_v44 = vpop.f32.mrf.mxu3 }
 0x7df   :  { %v5998_v15 = vmax.f32 %v5972_v62, 0.0  ;;  %v5828_v60 = vpop.f32.mrf.mxu1 }
 0x7e0   :  { %v5829_v56 = vadd.f32 %v5828_v60, %v5786_v17 }
 0x7e1   :  { %v6008_v50 = vpack.c.bf16 %v5998_v15, %v5997_v39 }
 0x7e2   :  { %v5849_v57 = vmax.f32 %v5829_v56, 0.0 }
 0x7e3   :  { %7316 = vmatmul.msk.bf16.gmra.mxu3 %vm6061_vm4, %v6008_v50 }
 0x7e4   :  { %v5857_v46 = vpack.c.bf16 %v5849_v57, %v5848_v34 }
 0x7e6   :  { %7291 = vmatmul.msk.bf16.gmra.mxu2 %vm5924_vm5, %v5857_v46 }
 0x7ee   :  { %v5831_v23 = vpop.f32.mrf.mxu1 }
 0x7f6   :  { %v5833_v40 = vpop.f32.mrf.mxu1 }
 0x7fa   :  { %v5788_v49 = vpop.f32.mrf.mxu0 }
 0x7fb   :  { %v5789_v3 = vadd.f32 %v10043_v48, %v5788_v49 }
 0x7fd   :  { %v5832_v5 = vadd.f32 %v5831_v23, %v5789_v3 }
 0x7ff   :  { %v5850_v4 = vmax.f32 %v5832_v5, 0.0 }
 0x802   :  { %v5790_v30 = vpop.f32.mrf.mxu0 }
 0x803   :  { %v5791_v45 = vadd.f32 %v10043_v48, %v5790_v30 }
 0x805   :  { %v5834_v13 = vadd.f32 %v5833_v40, %v5791_v45 }
 0x807   :  { %v5851_v27 = vmax.f32 %v5834_v13, 0.0 }
 0x809   :  { %v5858_v29 = vpack.c.bf16 %v5851_v27, %v5850_v4 }
 0x80b   :  { %7292 = vmatmul.msk.bf16.gmra.mxu2 %vm5924_vm5, %v5858_v29 }
 0x81b   :  { %v5793_v11 = vpop.f32.mrf.mxu0  ;;  %v5836_v25 = vpop.f32.mrf.mxu1 }
 0x81c   :  { %v5794_v63 = vadd.f32 %v10043_v48, %v5793_v11  ;;  %v6100_v37 = vpop.f32.mrf.mxu3 }
 0x81e   :  { %v5837_v1 = vadd.f32 %v5836_v25, %v5794_v63 }
 0x820   :  { %v5852_v7 = vmax.f32 %v5837_v1, 0.0 }
 0x822   :  { %v5859_v55 = vpack.c.bf16 %v5852_v7, %v5852_v7 }
 0x823   :  { %v5795_v35 = vpop.f32.mrf.mxu0  ;;  %v5838_v61 = vpop.f32.mrf.mxu1 }
 0x824   :  { %v5974_v6 = vpop.f32.mrf.mxu2  ;;  %7293 = vmatmul.msk.bf16.gmra.mxu2 %vm5924_vm5, %v5859_v55  ;;  %v6101_v19 = vpop.f32.mrf.mxu3 }
 0x825   :  { %v5975_v52 = vadd.f32 %v10190_v33, %v5974_v6 }
 0x827   :  { %v5999_v43 = vmax.f32 %v5975_v52, 0.0 }
 0x82c   :  { %v5976_v20 = vpop.f32.mrf.mxu2 }
 0x82d   :  { %v5977_v32 = vadd.f32 %v10190_v33, %v5976_v20 }
 0x82f   :  { %v6000_v26 = vmax.f32 %v5977_v32, 0.0 }
 0x831   :  { %v6009_v22 = vpack.c.bf16 %v6000_v26, %v5999_v43 }
 0x833   :  { %7317 = vmatmul.msk.bf16.gmra.mxu3 %vm6061_vm4, %v6009_v22 }
 0x866   :  { %v6103_v48 = vpop.f32.mrf.mxu3 }
 0x869   :  { %v5979_v42 = vpop.f32.mrf.mxu2 }
 0x86a   :  { %v5980_v16 = vadd.f32 %v10190_v33, %v5979_v42 }
 0x86c   :  { %v6001_v58 = vmax.f32 %v5980_v16, 0.0 }
 0x86e   :  { %v6104_v0 = vpop.f32.mrf.mxu3 }
 0x871   :  { %v5981_v21 = vpop.f32.mrf.mxu2 }
 0x872   :  { %v5982_v51 = vadd.f32 %v10190_v33, %v5981_v21 }
 0x874   :  { %v6002_v8 = vmax.f32 %v5982_v51, 0.0 }
 0x876   :  { %v6010_v41 = vpack.c.bf16 %v6002_v8, %v6001_v58 }
 0x878   :  { %7318 = vmatmul.msk.bf16.gmra.mxu3 %vm6061_vm4, %v6010_v41 }
 0x88e   :  { %v5984_v38 = vpop.f32.mrf.mxu2 }
 0x88f   :  { %v5985_v31 = vadd.f32 %v10190_v33, %v5984_v38 }
 0x891   :  { %v6003_v10 = vmax.f32 %v5985_v31, 0.0 }
 0x896   :  { %v5986_v59 = vpop.f32.mrf.mxu2 }
 0x897   :  { %v5987_v14 = vadd.f32 %v10190_v33, %v5986_v59 }
 0x899   :  { %v6004_v53 = vmax.f32 %v5987_v14, 0.0 }
 0x89b   :  { %v6011_v47 = vpack.c.bf16 %v6004_v53, %v6003_v10 }
 0x89d   :  { %7319 = vmatmul.msk.bf16.gmra.mxu3 %vm6061_vm4, %v6011_v47 }
 0x8a7   :  { %v5989_v54 = vpop.f32.mrf.mxu2 }
 0x8a8   :  { %v5990_v12 = vadd.f32 %v10190_v33, %v5989_v54 }
 0x8aa   :  { %v6005_v2 = vmax.f32 %v5990_v12, 0.0 }
 0x8ac   :  { %v6012_v36 = vpack.c.bf16 %v6005_v2, %v6005_v2 }
 0x8ae   :  { %7320 = vmatmul.msk.bf16.gmra.mxu3 %vm6061_vm4, %v6012_v36 }
 0x8af   :  { %v5991_v28 = vpop.f32.mrf.mxu2 }
 0x8b6   :  { %v6106_v18 = vpop.f32.mrf.mxu3 }
 0x8b7   :  { %v6107_v62 = vadd.f32 %v10240_v24, %v6106_v18 }
 0x8b9   :  { %6122 = vst.msk [vmem:[#allocation7] sm:$0x2] %vm6121_vm7, %v6107_v62 }
 0x8ba   :  { %6133 = dma.vmem_to_hbm [thread:$0]  %s6129_s22, 32, %s6131_s1, [#allocation8]  }
 0x8be   :  { %v6108_v33 = vpop.f32.mrf.mxu3 }
 0x8fb   :  { %v6110_v44 = vpop.f32.mrf.mxu3 }
 0x903   :  { %v6111_v17 = vpop.f32.mrf.mxu3 }
 0x920   :  { %v6113_v39 = vpop.f32.mrf.mxu3 }
 0x928   :  { %v6114_v9 = vpop.f32.mrf.mxu3 }
 0x931   :  { %v6116_v15 = vpop.f32.mrf.mxu3 }
 0x939   :  { %v6117_v60 = vpop.f32.mrf.mxu3 }
 0x93a   :  { %7564 = dma.done.wait [#allocation8], 32  }
 0x93b   :  { %7565 = vsyncadd [#allocation8], 4294967264 }
 0x93c   :  { %6138 = vsyncpa [#allocation8], 1 }

</bundles_post_ra>
